<compile_context>
chip_gen: v6e
topology: v6e:2x2x1
jax: 0.10.0
libtpu: 0.0.40
codegen_flags: <defaults>
</compile_context>

<pallas_src>
import jax
import jax.numpy as jnp
import numpy as np
from jax.experimental import pallas as pl
from jax.experimental.pallas import tpu as pltpu

EPS = 1e-5
LANE = 128
VMEM_LIMIT = 48 * 1024 * 1024   # > every default scoped limit, < v7x 64 MiB physical


def _round_up(x, m):
    return (x + m - 1) // m * m


def _conv3x3_taps(window, w_ref, H, W, Ci):
    """3x3 'SAME' conv as 9 unrolled accumulating MXU matmuls.

    window(ky, kx) -> (H, W, Ci) bf16 shifted view of the zero-padded input.
    w_ref: (9, Ci, Co) bf16.  Returns (H*W, Co) f32.

    Tap accumulation avoids the 9x-replicated im2col patch buffer and the
    lane-axis concatenate entirely (review item).  For a tiny-Cin stem this
    under-fills the MXU contraction depth, but the stem is negligible.
    """
    acc = None
    t = 0
    for ky in range(3):
        for kx in range(3):
            p = jnp.dot(window(ky, kx).reshape(H * W, Ci), w_ref[t],
                        preferred_element_type=jnp.float32)
            acc = p if acc is None else acc + p
            t += 1
    return acc


def _partial_stats(y):
    """Per-channel one-pass stats [sum ; sum of squares] -> (2, C)."""
    # TODO(synk): switch to shifted/Welford accumulation if |mean| >> std at
    # large N*H*W (one-pass E[x^2]-E[x]^2 can cancel catastrophically).
    return jnp.concatenate(
        [jnp.sum(y, axis=0, keepdims=True),
         jnp.sum(y * y, axis=0, keepdims=True)], axis=0)


def _conv1_kernel(xpad_ref, w_ref, y_ref, st_ref):
    # xpad_ref: (1, H+2, W+2, Cin) bf16   w_ref: (9, Cin, Cp) bf16
    # y_ref:    (1, H, W, Cp) bf16        st_ref: (1, 2, Cp) f32
    _, Hp, Wp, Ci = xpad_ref.shape
    H, W = Hp - 2, Wp - 2
    Co = y_ref.shape[-1]
    y = _conv3x3_taps(
        lambda ky, kx: xpad_ref[0, ky:ky + H, kx:kx + W, :], w_ref, H, W, Ci)
    y_ref[0] = y.reshape(H, W, Co).astype(y_ref.dtype)
    st_ref[0] = _partial_stats(y)


def _conv2_kernel(y1_ref, w_ref, aff_ref, y2_ref, st_ref, a1pad_ref):
    # y1_ref: (1, H, W, Cp) bf16   aff_ref: (2, Cp) f32 (BN1 scale/shift)
    # y2_ref: (1, H, W, Cp) bf16   st_ref: (1, 2, Cp) f32
    # a1pad_ref: (H+2, W+2, Cp) bf16 VMEM scratch, persistent across grid steps
    _, H, W, Ci = y1_ref.shape
    Co = y2_ref.shape[-1]

    # Zero the 1-pixel halo border ONCE.  The scratch persists across grid
    # iterations and only its interior is rewritten each step.  (The grid axis
    # is marked "arbitrary" -> sequential on one core, so step 0 runs first.)
    @pl.when(pl.program_id(0) == 0)
    def _():
        a1pad_ref[0:1, :, :] = jnp.zeros((1, W + 2, Ci), a1pad_ref.dtype)
        a1pad_ref[H + 1:H + 2, :, :] = jnp.zeros((1, W + 2, Ci), a1pad_ref.dtype)
        a1pad_ref[:, 0:1, :] = jnp.zeros((H + 2, 1, Ci), a1pad_ref.dtype)
        a1pad_ref[:, W + 1:W + 2, :] = jnp.zeros((H + 2, 1, Ci), a1pad_ref.dtype)

    # fused BN1 affine (from global batch stats) + ReLU, stored once as bf16
    scale = aff_ref[0:1, :].reshape(1, 1, Ci)
    shift = aff_ref[1:2, :].reshape(1, 1, Ci)
    a1 = jnp.maximum(y1_ref[0].astype(jnp.float32) * scale + shift, 0.0)
    a1pad_ref[1:H + 1, 1:W + 1, :] = a1.astype(a1pad_ref.dtype)

    y2 = _conv3x3_taps(
        lambda ky, kx: a1pad_ref[ky:ky + H, kx:kx + W, :], w_ref, H, W, Ci)
    y2_ref[0] = y2.reshape(H, W, Co).astype(y2_ref.dtype)
    st_ref[0] = _partial_stats(y2)


def _bn_relu_nchw_kernel(y_ref, aff_ref, o_ref):
    # y_ref: (1, tile_h, W, Cp) bf16   aff_ref: (2, Cp) f32
    # o_ref: (1, Cout, tile_h*W) f32  -- NCHW-flattened, lane-dense minor axis
    _, th, W, Cp = y_ref.shape
    Cout = o_ref.shape[1]
    scale = aff_ref[0:1, :].reshape(1, 1, Cp)
    shift = aff_ref[1:2, :].reshape(1, 1, Cp)
    a = jnp.maximum(y_ref[0].astype(jnp.float32) * scale + shift, 0.0)
    at = a.reshape(th * W, Cp).T          # (Cp, tile_h*W), XLU transpose
    o_ref[0] = at[:Cout, :]               # drop zero-padded channels


def _bn_affine(partials, gamma, beta, count):
    """Fold global batch statistics into per-channel (scale, shift)."""
    s = jnp.sum(partials, axis=0)                  # reduce over batch tiles
    mean = s[0] / count
    var = s[1] / count - mean * mean               # biased variance
    scale = gamma * jax.lax.rsqrt(var + EPS)
    shift = beta - mean * scale
    return jnp.stack([scale, shift], axis=0).astype(jnp.float32)   # (2, Cp)


def _pick_tile_h(H, W, Cp, budget=2 << 20):
    """Largest row tile (divisor of H) with a lane-dense flattened output."""
    for d in range(H, 0, -1):
        if H % d:
            continue
        if d != H and (d * W) % LANE:
            continue
        if d * W * Cp * 2 <= budget:
            return d
    return H


@jax.jit
def double_conv(x_nchw, w1, b1, g1, bt1, w2, b2, g2, bt2):
    """x_nchw: (N, Cin, H, W).  w*: (3,3,Ci,Co) HWIO.  Returns (N, Cout, H, W) f32.

    b1/b2 accepted for parity with nn.Conv2d but unused: a constant per-channel
    bias before a training-mode BatchNorm cancels exactly in (y - mean).
    """
    del b1, b2
    N, Cin, H, W = x_nchw.shape
    Cout = w1.shape[-1]
    Cp = _round_up(Cout, LANE)                 # lane-dense channel padding
    pc = Cp - Cout
    cnt = float(N * H * W)

    # NHWC bf16 padded input: halves kernel-1 input HBM traffic vs f32.
    x = jnp.transpose(x_nchw, (0, 2, 3, 1)).astype(jnp.bfloat16)
    x_pad = jnp.pad(x, ((0, 0), (1, 1), (1, 1), (0, 0)))

    # Weights in (9, Ci, Cp) tap-major layout; padded channels are zero so they
    # contribute nothing and (with zero-padded gamma/beta) stay exactly zero.
    w1r = jnp.pad(w1.astype(jnp.bfloat16),
                  ((0, 0), (0, 0), (0, 0), (0, pc))).reshape(9, Cin, Cp)
    w2r = jnp.pad(w2.astype(jnp.bfloat16),
                  ((0, 0), (0, 0), (0, pc), (0, pc))).reshape(9, Cp, Cp)
    g1p = jnp.pad(g1.astype(jnp.float32), (0, pc))
    bt1p = jnp.pad(bt1.astype(jnp.float32), (0, pc))
    g2p = jnp.pad(g2.astype(jnp.float32), (0, pc))
    bt2p = jnp.pad(bt2.astype(jnp.float32), (0, pc))

    cp_par = pltpu.CompilerParams(dimension_semantics=("parallel",),
                                  vmem_limit_bytes=VMEM_LIMIT)
    cp_seq = pltpu.CompilerParams(dimension_semantics=("arbitrary",),
                                  vmem_limit_bytes=VMEM_LIMIT)

    # TODO(synk): for large U-Net feature maps, tile conv1/conv2 spatially
    # (grid=(N, H//tile_h) with a manual tile_h+2-row halo DMA) instead of
    # whole-image blocks; whole images are fine at these sizes.

    # ---- conv1 + BN1 partial stats (grid over batch) ---------------------
    y1, st1 = pl.pallas_call(
        _conv1_kernel,
        grid=(N,),
        in_specs=[
            pl.BlockSpec((1, H + 2, W + 2, Cin), lambda n: (n, 0, 0, 0)),
            pl.BlockSpec((9, Cin, Cp), lambda n: (0, 0, 0)),
        ],
        out_specs=(
            pl.BlockSpec((1, H, W, Cp), lambda n: (n, 0, 0, 0)),
            pl.BlockSpec((1, 2, Cp), lambda n: (n, 0, 0)),
        ),
        out_shape=(
            jax.ShapeDtypeStruct((N, H, W, Cp), jnp.bfloat16),
            jax.ShapeDtypeStruct((N, 2, Cp), jnp.float32),
        ),
        compiler_params=cp_par,
    )(x_pad, w1r)

    aff1 = _bn_affine(st1, g1p, bt1p, cnt)

    # ---- BN1 + ReLU + conv2 + BN2 partial stats (grid over batch) --------
    # Sequential grid ("arbitrary") so the persistent halo scratch can be
    # border-zeroed only on the first step.
    y2, st2 = pl.pallas_call(
        _conv2_kernel,
        grid=(N,),
        in_specs=[
            pl.BlockSpec((1, H, W, Cp), lambda n: (n, 0, 0, 0)),
            pl.BlockSpec((9, Cp, Cp), lambda n: (0, 0, 0)),
            pl.BlockSpec((2, Cp), lambda n: (0, 0)),
        ],
        out_specs=(
            pl.BlockSpec((1, H, W, Cp), lambda n: (n, 0, 0, 0)),
            pl.BlockSpec((1, 2, Cp), lambda n: (n, 0, 0)),
        ),
        out_shape=(
            jax.ShapeDtypeStruct((N, H, W, Cp), jnp.bfloat16),
            jax.ShapeDtypeStruct((N, 2, Cp), jnp.float32),
        ),
        scratch_shapes=[pltpu.VMEM((H + 2, W + 2, Cp), jnp.bfloat16)],
        compiler_params=cp_seq,
    )(y1, w2r, aff1)

    aff2 = _bn_affine(st2, g2p, bt2p, cnt)

    # ---- BN2 + ReLU epilogue, emits NCHW directly (lane-dense HW minor) --
    tile_h = _pick_tile_h(H, W, Cp)
    out_flat = pl.pallas_call(
        _bn_relu_nchw_kernel,
        grid=(N, H // tile_h),
        in_specs=[
            pl.BlockSpec((1, tile_h, W, Cp), lambda n, h: (n, h, 0, 0)),
            pl.BlockSpec((2, Cp), lambda n, h: (0, 0)),
        ],
        out_specs=pl.BlockSpec((1, Cout, tile_h * W), lambda n, h: (n, 0, h)),
        out_shape=jax.ShapeDtypeStruct((N, Cout, H * W), jnp.float32),
        compiler_params=pltpu.CompilerParams(
            dimension_semantics=("parallel", "parallel"),
            vmem_limit_bytes=VMEM_LIMIT),
    )(y2, aff2)

    return out_flat.reshape(N, Cout, H, W)


def _reference(x_nchw, w1, b1, g1, bt1, w2, b2, g2, bt2):
    """Pure-JAX f32 reference (same math as PyTorch training-mode forward)."""
    x = jnp.transpose(x_nchw, (0, 2, 3, 1)).astype(jnp.float32)

    def conv_bn_relu(x, w, b, g, bt):
        y = jax.lax.conv_general_dilated(
            x, w.astype(jnp.float32), (1, 1), 'SAME',
            dimension_numbers=('NHWC', 'HWIO', 'NHWC')) + b
        mean = jnp.mean(y, axis=(0, 1, 2), keepdims=True)
        var = jnp.mean((y - mean) ** 2, axis=(0, 1, 2), keepdims=True)
        return jnp.maximum((y - mean) / jnp.sqrt(var + EPS) * g + bt, 0.0)

    y = conv_bn_relu(x, w1, b1, g1, bt1)
    y = conv_bn_relu(y, w2, b2, g2, bt2)
    return jnp.transpose(y, (0, 3, 1, 2))


if __name__ == "__main__":
    N, Cin, Cout, H, W = 2, 4, 8, 16, 16

    key = jax.random.PRNGKey(0)
    ks = jax.random.split(key, 9)
    x = jax.random.normal(ks[0], (N, Cin, H, W), jnp.float32)

    # Deterministic synthetic parameters (shapes match nn.Conv2d / nn.BatchNorm2d).
    w1 = jax.random.normal(ks[1], (3, 3, Cin, Cout), jnp.float32) * 0.2   # HWIO
    b1 = jax.random.normal(ks[2], (Cout,), jnp.float32) * 0.1
    g1 = 1.0 + 0.1 * jax.random.normal(ks[3], (Cout,), jnp.float32)
    bt1 = 0.1 * jax.random.normal(ks[4], (Cout,), jnp.float32)
    w2 = jax.random.normal(ks[5], (3, 3, Cout, Cout), jnp.float32) * 0.2
    b2 = jax.random.normal(ks[6], (Cout,), jnp.float32) * 0.1
    g2 = 1.0 + 0.1 * jax.random.normal(ks[7], (Cout,), jnp.float32)
    bt2 = 0.1 * jax.random.normal(ks[8], (Cout,), jnp.float32)

    out = jax.block_until_ready(double_conv(x, w1, b1, g1, bt1, w2, b2, g2, bt2))
    ref = jax.block_until_ready(_reference(x, w1, b1, g1, bt1, w2, b2, g2, bt2))

    # bf16 activations / matmul operands (f32 accumulation) -> loose tolerance.
    np.testing.assert_allclose(np.asarray(out), np.asarray(ref),
                               rtol=5e-2, atol=5e-2)
    print("KERNEL_OK")
</pallas_src>

<mosaic_0001>
module attributes {stable_mosaic.version = 11 : i64} {
  func.func @_conv1_kernel(%arg0: i32, %arg1: memref<1x18x18x4xbf16, #tpu.memory_space<vmem>>, %arg2: memref<9x4x128xbf16, #tpu.memory_space<vmem>>, %arg3: memref<1x16x16x128xbf16, #tpu.memory_space<vmem>>, %arg4: memref<1x2x128xf32, #tpu.memory_space<vmem>>) attributes {dimension_semantics = [#tpu.dimension_semantics<parallel>], iteration_bounds = array<i64: 2>, scalar_prefetch = 0 : i64, scratch_operands = 0 : i64, tpu.core_type = #tpu.core_type<tc>, window_params = [{transform_indices = @transform_0, window_bounds = array<i64: 1, 18, 18, 4>}, {pipeline_mode = #tpu.pipeline_mode<synchronous>, transform_indices = @transform_1, window_bounds = array<i64: 9, 4, 128>}, {transform_indices = @transform_2, window_bounds = array<i64: 1, 16, 16, 128>}, {transform_indices = @transform_3, window_bounds = array<i64: 1, 2, 128>}]} {
    %c0 = arith.constant 0 : index
    %c0_0 = arith.constant 0 : index
    %c0_1 = arith.constant 0 : index
    %c0_2 = arith.constant 0 : index
    %0 = vector.load %arg1[%c0, %c0_0, %c0_1, %c0_2] : memref<1x18x18x4xbf16, #tpu.memory_space<vmem>>, vector<1x16x16x4xbf16>
    %1 = vector.shape_cast %0 : vector<1x16x16x4xbf16> to vector<16x16x4xbf16>
    %2 = vector.shape_cast %1 : vector<16x16x4xbf16> to vector<256x4xbf16>
    %c0_3 = arith.constant 0 : index
    %c0_4 = arith.constant 0 : index
    %c0_5 = arith.constant 0 : index
    %3 = vector.load %arg2[%c0_3, %c0_4, %c0_5] : memref<9x4x128xbf16, #tpu.memory_space<vmem>>, vector<1x4x128xbf16>
    %4 = vector.shape_cast %3 : vector<1x4x128xbf16> to vector<4x128xbf16>
    %cst = arith.constant dense<0.000000e+00> : vector<256x128xf32>
    %5 = tpu.matmul %2, %4, %cst {dimension_numbers = #tpu.dot_dimension_numbers<[1], [0], [0], [1], [0, 0, 1, 1], [], []>} : vector<256x4xbf16>, vector<4x128xbf16>, vector<256x128xf32> -> vector<256x128xf32>
    %c0_6 = arith.constant 0 : index
    %c0_7 = arith.constant 0 : index
    %c1 = arith.constant 1 : index
    %c0_8 = arith.constant 0 : index
    %6 = vector.load %arg1[%c0_6, %c0_7, %c1, %c0_8] : memref<1x18x18x4xbf16, #tpu.memory_space<vmem>>, vector<1x16x16x4xbf16>
    %7 = vector.shape_cast %6 : vector<1x16x16x4xbf16> to vector<16x16x4xbf16>
    %8 = vector.shape_cast %7 : vector<16x16x4xbf16> to vector<256x4xbf16>
    %c1_9 = arith.constant 1 : index
    %c0_10 = arith.constant 0 : index
    %c0_11 = arith.constant 0 : index
    %9 = vector.load %arg2[%c1_9, %c0_10, %c0_11] : memref<9x4x128xbf16, #tpu.memory_space<vmem>>, vector<1x4x128xbf16>
    %10 = vector.shape_cast %9 : vector<1x4x128xbf16> to vector<4x128xbf16>
    %cst_12 = arith.constant dense<0.000000e+00> : vector<256x128xf32>
    %11 = tpu.matmul %8, %10, %cst_12 {dimension_numbers = #tpu.dot_dimension_numbers<[1], [0], [0], [1], [0, 0, 1, 1], [], []>} : vector<256x4xbf16>, vector<4x128xbf16>, vector<256x128xf32> -> vector<256x128xf32>
    %12 = arith.addf %5, %11 : vector<256x128xf32>
    %c0_13 = arith.constant 0 : index
    %c0_14 = arith.constant 0 : index
    %c2 = arith.constant 2 : index
    %c0_15 = arith.constant 0 : index
    %13 = vector.load %arg1[%c0_13, %c0_14, %c2, %c0_15] : memref<1x18x18x4xbf16, #tpu.memory_space<vmem>>, vector<1x16x16x4xbf16>
    %14 = vector.shape_cast %13 : vector<1x16x16x4xbf16> to vector<16x16x4xbf16>
    %15 = vector.shape_cast %14 : vector<16x16x4xbf16> to vector<256x4xbf16>
    %c2_16 = arith.constant 2 : index
    %c0_17 = arith.constant 0 : index
    %c0_18 = arith.constant 0 : index
    %16 = vector.load %arg2[%c2_16, %c0_17, %c0_18] : memref<9x4x128xbf16, #tpu.memory_space<vmem>>, vector<1x4x128xbf16>
    %17 = vector.shape_cast %16 : vector<1x4x128xbf16> to vector<4x128xbf16>
    %cst_19 = arith.constant dense<0.000000e+00> : vector<256x128xf32>
    %18 = tpu.matmul %15, %17, %cst_19 {dimension_numbers = #tpu.dot_dimension_numbers<[1], [0], [0], [1], [0, 0, 1, 1], [], []>} : vector<256x4xbf16>, vector<4x128xbf16>, vector<256x128xf32> -> vector<256x128xf32>
    %19 = arith.addf %12, %18 : vector<256x128xf32>
    %c0_20 = arith.constant 0 : index
    %c1_21 = arith.constant 1 : index
    %c0_22 = arith.constant 0 : index
    %c0_23 = arith.constant 0 : index
    %20 = vector.load %arg1[%c0_20, %c1_21, %c0_22, %c0_23] : memref<1x18x18x4xbf16, #tpu.memory_space<vmem>>, vector<1x16x16x4xbf16>
    %21 = vector.shape_cast %20 : vector<1x16x16x4xbf16> to vector<16x16x4xbf16>
    %22 = vector.shape_cast %21 : vector<16x16x4xbf16> to vector<256x4xbf16>
    %c3 = arith.constant 3 : index
    %c0_24 = arith.constant 0 : index
    %c0_25 = arith.constant 0 : index
    %23 = vector.load %arg2[%c3, %c0_24, %c0_25] : memref<9x4x128xbf16, #tpu.memory_space<vmem>>, vector<1x4x128xbf16>
    %24 = vector.shape_cast %23 : vector<1x4x128xbf16> to vector<4x128xbf16>
    %cst_26 = arith.constant dense<0.000000e+00> : vector<256x128xf32>
    %25 = tpu.matmul %22, %24, %cst_26 {dimension_numbers = #tpu.dot_dimension_numbers<[1], [0], [0], [1], [0, 0, 1, 1], [], []>} : vector<256x4xbf16>, vector<4x128xbf16>, vector<256x128xf32> -> vector<256x128xf32>
    %26 = arith.addf %19, %25 : vector<256x128xf32>
    %c0_27 = arith.constant 0 : index
    %c1_28 = arith.constant 1 : index
    %c1_29 = arith.constant 1 : index
    %c0_30 = arith.constant 0 : index
    %27 = vector.load %arg1[%c0_27, %c1_28, %c1_29, %c0_30] : memref<1x18x18x4xbf16, #tpu.memory_space<vmem>>, vector<1x16x16x4xbf16>
    %28 = vector.shape_cast %27 : vector<1x16x16x4xbf16> to vector<16x16x4xbf16>
    %29 = vector.shape_cast %28 : vector<16x16x4xbf16> to vector<256x4xbf16>
    %c4 = arith.constant 4 : index
    %c0_31 = arith.constant 0 : index
    %c0_32 = arith.constant 0 : index
    %30 = vector.load %arg2[%c4, %c0_31, %c0_32] : memref<9x4x128xbf16, #tpu.memory_space<vmem>>, vector<1x4x128xbf16>
    %31 = vector.shape_cast %30 : vector<1x4x128xbf16> to vector<4x128xbf16>
    %cst_33 = arith.constant dense<0.000000e+00> : vector<256x128xf32>
    %32 = tpu.matmul %29, %31, %cst_33 {dimension_numbers = #tpu.dot_dimension_numbers<[1], [0], [0], [1], [0, 0, 1, 1], [], []>} : vector<256x4xbf16>, vector<4x128xbf16>, vector<256x128xf32> -> vector<256x128xf32>
    %33 = arith.addf %26, %32 : vector<256x128xf32>
    %c0_34 = arith.constant 0 : index
    %c1_35 = arith.constant 1 : index
    %c2_36 = arith.constant 2 : index
    %c0_37 = arith.constant 0 : index
    %34 = vector.load %arg1[%c0_34, %c1_35, %c2_36, %c0_37] : memref<1x18x18x4xbf16, #tpu.memory_space<vmem>>, vector<1x16x16x4xbf16>
    %35 = vector.shape_cast %34 : vector<1x16x16x4xbf16> to vector<16x16x4xbf16>
    %36 = vector.shape_cast %35 : vector<16x16x4xbf16> to vector<256x4xbf16>
    %c5 = arith.constant 5 : index
    %c0_38 = arith.constant 0 : index
    %c0_39 = arith.constant 0 : index
    %37 = vector.load %arg2[%c5, %c0_38, %c0_39] : memref<9x4x128xbf16, #tpu.memory_space<vmem>>, vector<1x4x128xbf16>
    %38 = vector.shape_cast %37 : vector<1x4x128xbf16> to vector<4x128xbf16>
    %cst_40 = arith.constant dense<0.000000e+00> : vector<256x128xf32>
    %39 = tpu.matmul %36, %38, %cst_40 {dimension_numbers = #tpu.dot_dimension_numbers<[1], [0], [0], [1], [0, 0, 1, 1], [], []>} : vector<256x4xbf16>, vector<4x128xbf16>, vector<256x128xf32> -> vector<256x128xf32>
    %40 = arith.addf %33, %39 : vector<256x128xf32>
    %c0_41 = arith.constant 0 : index
    %c2_42 = arith.constant 2 : index
    %c0_43 = arith.constant 0 : index
    %c0_44 = arith.constant 0 : index
    %41 = vector.load %arg1[%c0_41, %c2_42, %c0_43, %c0_44] : memref<1x18x18x4xbf16, #tpu.memory_space<vmem>>, vector<1x16x16x4xbf16>
    %42 = vector.shape_cast %41 : vector<1x16x16x4xbf16> to vector<16x16x4xbf16>
    %43 = vector.shape_cast %42 : vector<16x16x4xbf16> to vector<256x4xbf16>
    %c6 = arith.constant 6 : index
    %c0_45 = arith.constant 0 : index
    %c0_46 = arith.constant 0 : index
    %44 = vector.load %arg2[%c6, %c0_45, %c0_46] : memref<9x4x128xbf16, #tpu.memory_space<vmem>>, vector<1x4x128xbf16>
    %45 = vector.shape_cast %44 : vector<1x4x128xbf16> to vector<4x128xbf16>
    %cst_47 = arith.constant dense<0.000000e+00> : vector<256x128xf32>
    %46 = tpu.matmul %43, %45, %cst_47 {dimension_numbers = #tpu.dot_dimension_numbers<[1], [0], [0], [1], [0, 0, 1, 1], [], []>} : vector<256x4xbf16>, vector<4x128xbf16>, vector<256x128xf32> -> vector<256x128xf32>
    %47 = arith.addf %40, %46 : vector<256x128xf32>
    %c0_48 = arith.constant 0 : index
    %c2_49 = arith.constant 2 : index
    %c1_50 = arith.constant 1 : index
    %c0_51 = arith.constant 0 : index
    %48 = vector.load %arg1[%c0_48, %c2_49, %c1_50, %c0_51] : memref<1x18x18x4xbf16, #tpu.memory_space<vmem>>, vector<1x16x16x4xbf16>
    %49 = vector.shape_cast %48 : vector<1x16x16x4xbf16> to vector<16x16x4xbf16>
    %50 = vector.shape_cast %49 : vector<16x16x4xbf16> to vector<256x4xbf16>
    %c7 = arith.constant 7 : index
    %c0_52 = arith.constant 0 : index
    %c0_53 = arith.constant 0 : index
    %51 = vector.load %arg2[%c7, %c0_52, %c0_53] : memref<9x4x128xbf16, #tpu.memory_space<vmem>>, vector<1x4x128xbf16>
    %52 = vector.shape_cast %51 : vector<1x4x128xbf16> to vector<4x128xbf16>
    %cst_54 = arith.constant dense<0.000000e+00> : vector<256x128xf32>
    %53 = tpu.matmul %50, %52, %cst_54 {dimension_numbers = #tpu.dot_dimension_numbers<[1], [0], [0], [1], [0, 0, 1, 1], [], []>} : vector<256x4xbf16>, vector<4x128xbf16>, vector<256x128xf32> -> vector<256x128xf32>
    %54 = arith.addf %47, %53 : vector<256x128xf32>
    %c0_55 = arith.constant 0 : index
    %c2_56 = arith.constant 2 : index
    %c2_57 = arith.constant 2 : index
    %c0_58 = arith.constant 0 : index
    %55 = vector.load %arg1[%c0_55, %c2_56, %c2_57, %c0_58] : memref<1x18x18x4xbf16, #tpu.memory_space<vmem>>, vector<1x16x16x4xbf16>
    %56 = vector.shape_cast %55 : vector<1x16x16x4xbf16> to vector<16x16x4xbf16>
    %57 = vector.shape_cast %56 : vector<16x16x4xbf16> to vector<256x4xbf16>
    %c8 = arith.constant 8 : index
    %c0_59 = arith.constant 0 : index
    %c0_60 = arith.constant 0 : index
    %58 = vector.load %arg2[%c8, %c0_59, %c0_60] : memref<9x4x128xbf16, #tpu.memory_space<vmem>>, vector<1x4x128xbf16>
    %59 = vector.shape_cast %58 : vector<1x4x128xbf16> to vector<4x128xbf16>
    %cst_61 = arith.constant dense<0.000000e+00> : vector<256x128xf32>
    %60 = tpu.matmul %57, %59, %cst_61 {dimension_numbers = #tpu.dot_dimension_numbers<[1], [0], [0], [1], [0, 0, 1, 1], [], []>} : vector<256x4xbf16>, vector<4x128xbf16>, vector<256x128xf32> -> vector<256x128xf32>
    %61 = arith.addf %54, %60 : vector<256x128xf32>
    %62 = vector.shape_cast %61 : vector<256x128xf32> to vector<16x16x128xf32>
    %63 = arith.truncf %62 : vector<16x16x128xf32> to vector<16x16x128xbf16>
    %c0_62 = arith.constant 0 : index
    %c0_63 = arith.constant 0 : index
    %c0_64 = arith.constant 0 : index
    %c0_65 = arith.constant 0 : index
    %64 = vector.load %arg3[%c0_62, %c0_63, %c0_64, %c0_65] : memref<1x16x16x128xbf16, #tpu.memory_space<vmem>>, vector<1x16x16x128xbf16>
    %65 = vector.shape_cast %64 : vector<1x16x16x128xbf16> to vector<16x16x128xbf16>
    %66 = vector.shape_cast %63 : vector<16x16x128xbf16> to vector<1x16x16x128xbf16>
    tpu.vector_store %arg3[%c0_62, %c0_63, %c0_64, %c0_65], %66 {strides = array<i32>} : memref<1x16x16x128xbf16, #tpu.memory_space<vmem>>, vector<1x16x16x128xbf16>,
    %cst_66 = arith.constant dense<0.000000e+00> : vector<128xf32>
    %67 = vector.multi_reduction <add>, %61, %cst_66 [0] : vector<256x128xf32> to vector<128xf32>
    %68 = vector.shape_cast %67 : vector<128xf32> to vector<1x128xf32>
    %69 = arith.mulf %61, %61 : vector<256x128xf32>
    %cst_67 = arith.constant dense<0.000000e+00> : vector<128xf32>
    %70 = vector.multi_reduction <add>, %69, %cst_67 [0] : vector<256x128xf32> to vector<128xf32>
    %71 = vector.shape_cast %70 : vector<128xf32> to vector<1x128xf32>
    %72 = tpu.concatenate %68, %71 in 0 : vector<1x128xf32>, vector<1x128xf32> -> vector<2x128xf32>
    %c0_68 = arith.constant 0 : index
    %c0_69 = arith.constant 0 : index
    %c0_70 = arith.constant 0 : index
    %73 = vector.load %arg4[%c0_68, %c0_69, %c0_70] : memref<1x2x128xf32, #tpu.memory_space<vmem>>, vector<1x2x128xf32>
    %74 = vector.shape_cast %73 : vector<1x2x128xf32> to vector<2x128xf32>
    %75 = vector.shape_cast %72 : vector<2x128xf32> to vector<1x2x128xf32>
    tpu.vector_store %arg4[%c0_68, %c0_69, %c0_70], %75 {strides = array<i32>} : memref<1x2x128xf32, #tpu.memory_space<vmem>>, vector<1x2x128xf32>,
    return
  }
  func.func @transform_0(%arg0: i32) -> (i32, i32, i32, i32) {
    %c0_i32 = arith.constant 0 : i32
    %c0_i32_0 = arith.constant 0 : i32
    %c0_i32_1 = arith.constant 0 : i32
    %c0_i32_2 = arith.constant 0 : i32
    return %arg0, %c0_i32, %c0_i32_0, %c0_i32_1 : i32, i32, i32, i32
  }
  func.func @transform_1(%arg0: i32) -> (i32, i32, i32) {
    %c0_i32 = arith.constant 0 : i32
    %c0_i32_0 = arith.constant 0 : i32
    %c0_i32_1 = arith.constant 0 : i32
    %c0_i32_2 = arith.constant 0 : i32
    return %c0_i32, %c0_i32_0, %c0_i32_1 : i32, i32, i32
  }
  func.func @transform_2(%arg0: i32) -> (i32, i32, i32, i32) {
    %c0_i32 = arith.constant 0 : i32
    %c0_i32_0 = arith.constant 0 : i32
    %c0_i32_1 = arith.constant 0 : i32
    %c0_i32_2 = arith.constant 0 : i32
    return %arg0, %c0_i32, %c0_i32_0, %c0_i32_1 : i32, i32, i32, i32
  }
  func.func @transform_3(%arg0: i32) -> (i32, i32, i32) {
    %c0_i32 = arith.constant 0 : i32
    %c0_i32_0 = arith.constant 0 : i32
    %c0_i32_1 = arith.constant 0 : i32
    return %arg0, %c0_i32, %c0_i32_0 : i32, i32, i32
  }
}

module attributes {stable_mosaic.version = 11 : i64} {
  func.func @_conv2_kernel(%arg0: i32, %arg1: memref<1x16x16x128xbf16, #tpu.memory_space<vmem>>, %arg2: memref<9x128x128xbf16, #tpu.memory_space<vmem>>, %arg3: memref<2x128xf32, #tpu.memory_space<vmem>>, %arg4: memref<1x16x16x128xbf16, #tpu.memory_space<vmem>>, %arg5: memref<1x2x128xf32, #tpu.memory_space<vmem>>, %arg6: memref<18x18x128xbf16, #tpu.memory_space<vmem>>) attributes {dimension_semantics = [#tpu.dimension_semantics<arbitrary>], iteration_bounds = array<i64: 2>, scalar_prefetch = 0 : i64, scratch_operands = 1 : i64, tpu.core_type = #tpu.core_type<tc>, window_params = [{transform_indices = @transform_0, window_bounds = array<i64: 1, 16, 16, 128>}, {pipeline_mode = #tpu.pipeline_mode<synchronous>, transform_indices = @transform_1, window_bounds = array<i64: 9, 128, 128>}, {pipeline_mode = #tpu.pipeline_mode<synchronous>, transform_indices = @transform_2, window_bounds = array<i64: 2, 128>}, {transform_indices = @transform_3, window_bounds = array<i64: 1, 16, 16, 128>}, {transform_indices = @transform_4, window_bounds = array<i64: 1, 2, 128>}]} {
    %c0_i32 = arith.constant 0 : i32
    %0 = arith.cmpi eq, %arg0, %c0_i32 : i32
    %1 = arith.extui %0 : i1 to i32
    %c0_i32_0 = arith.constant 0 : i32
    %2 = arith.cmpi ne, %1, %c0_i32_0 : i32
    scf.if %2 {
      %cst_75 = arith.constant 0.000000e+00 : bf16
      %85 = vector.broadcast %cst_75 : bf16 to vector<1x18x128xbf16>
      %c0_76 = arith.constant 0 : index
      %c0_77 = arith.constant 0 : index
      %c0_78 = arith.constant 0 : index
      %86 = vector.load %arg6[%c0_76, %c0_77, %c0_78] : memref<18x18x128xbf16, #tpu.memory_space<vmem>>, vector<1x18x128xbf16>
      tpu.vector_store %arg6[%c0_76, %c0_77, %c0_78], %85 {strides = array<i32>} : memref<18x18x128xbf16, #tpu.memory_space<vmem>>, vector<1x18x128xbf16>,
      %cst_79 = arith.constant 0.000000e+00 : bf16
      %87 = vector.broadcast %cst_79 : bf16 to vector<1x18x128xbf16>
      %c17 = arith.constant 17 : index
      %c0_80 = arith.constant 0 : index
      %c0_81 = arith.constant 0 : index
      %88 = vector.load %arg6[%c17, %c0_80, %c0_81] : memref<18x18x128xbf16, #tpu.memory_space<vmem>>, vector<1x18x128xbf16>
      tpu.vector_store %arg6[%c17, %c0_80, %c0_81], %87 {strides = array<i32>} : memref<18x18x128xbf16, #tpu.memory_space<vmem>>, vector<1x18x128xbf16>,
      %cst_82 = arith.constant 0.000000e+00 : bf16
      %89 = vector.broadcast %cst_82 : bf16 to vector<18x1x128xbf16>
      %c0_83 = arith.constant 0 : index
      %c0_84 = arith.constant 0 : index
      %c0_85 = arith.constant 0 : index
      %90 = vector.load %arg6[%c0_83, %c0_84, %c0_85] : memref<18x18x128xbf16, #tpu.memory_space<vmem>>, vector<18x1x128xbf16>
      tpu.vector_store %arg6[%c0_83, %c0_84, %c0_85], %89 {strides = array<i32>} : memref<18x18x128xbf16, #tpu.memory_space<vmem>>, vector<18x1x128xbf16>,
      %cst_86 = arith.constant 0.000000e+00 : bf16
      %91 = vector.broadcast %cst_86 : bf16 to vector<18x1x128xbf16>
      %c0_87 = arith.constant 0 : index
      %c17_88 = arith.constant 17 : index
      %c0_89 = arith.constant 0 : index
      %92 = vector.load %arg6[%c0_87, %c17_88, %c0_89] : memref<18x18x128xbf16, #tpu.memory_space<vmem>>, vector<18x1x128xbf16>
      tpu.vector_store %arg6[%c0_87, %c17_88, %c0_89], %91 {strides = array<i32>} : memref<18x18x128xbf16, #tpu.memory_space<vmem>>, vector<18x1x128xbf16>,
    } else {
    }
    %c0 = arith.constant 0 : index
    %c0_1 = arith.constant 0 : index
    %3 = vector.load %arg3[%c0, %c0_1] : memref<2x128xf32, #tpu.memory_space<vmem>>, vector<1x128xf32>
    %4 = vector.shape_cast %3 : vector<1x128xf32> to vector<1x1x128xf32>
    %c1 = arith.constant 1 : index
    %c0_2 = arith.constant 0 : index
    %5 = vector.load %arg3[%c1, %c0_2] : memref<2x128xf32, #tpu.memory_space<vmem>>, vector<1x128xf32>
    %6 = vector.shape_cast %5 : vector<1x128xf32> to vector<1x1x128xf32>
    %c0_3 = arith.constant 0 : index
    %c0_4 = arith.constant 0 : index
    %c0_5 = arith.constant 0 : index
    %c0_6 = arith.constant 0 : index
    %7 = vector.load %arg1[%c0_3, %c0_4, %c0_5, %c0_6] : memref<1x16x16x128xbf16, #tpu.memory_space<vmem>>, vector<1x16x16x128xbf16>
    %8 = vector.shape_cast %7 : vector<1x16x16x128xbf16> to vector<16x16x128xbf16>
    %9 = arith.extf %8 : vector<16x16x128xbf16> to vector<16x16x128xf32>
    %10 = vector.broadcast %4 : vector<1x1x128xf32> to vector<16x16x128xf32>
    %11 = arith.mulf %9, %10 : vector<16x16x128xf32>
    %12 = vector.broadcast %6 : vector<1x1x128xf32> to vector<16x16x128xf32>
    %13 = arith.addf %11, %12 : vector<16x16x128xf32>
    %cst = arith.constant 0.000000e+00 : f32
    %14 = vector.broadcast %cst : f32 to vector<16x16x128xf32>
    %15 = arith.maximumf %13, %14 : vector<16x16x128xf32>
    %16 = arith.truncf %15 : vector<16x16x128xf32> to vector<16x16x128xbf16>
    %c1_7 = arith.constant 1 : index
    %c1_8 = arith.constant 1 : index
    %c0_9 = arith.constant 0 : index
    %17 = vector.load %arg6[%c1_7, %c1_8, %c0_9] : memref<18x18x128xbf16, #tpu.memory_space<vmem>>, vector<16x16x128xbf16>
    tpu.vector_store %arg6[%c1_7, %c1_8, %c0_9], %16 {strides = array<i32>} : memref<18x18x128xbf16, #tpu.memory_space<vmem>>, vector<16x16x128xbf16>,
    %c0_10 = arith.constant 0 : index
    %c0_11 = arith.constant 0 : index
    %c0_12 = arith.constant 0 : index
    %18 = vector.load %arg6[%c0_10, %c0_11, %c0_12] : memref<18x18x128xbf16, #tpu.memory_space<vmem>>, vector<16x16x128xbf16>
    %19 = vector.shape_cast %18 : vector<16x16x128xbf16> to vector<256x128xbf16>
    %c0_13 = arith.constant 0 : index
    %c0_14 = arith.constant 0 : index
    %c0_15 = arith.constant 0 : index
    %20 = vector.load %arg2[%c0_13, %c0_14, %c0_15] : memref<9x128x128xbf16, #tpu.memory_space<vmem>>, vector<1x128x128xbf16>
    %21 = vector.shape_cast %20 : vector<1x128x128xbf16> to vector<128x128xbf16>
    %cst_16 = arith.constant dense<0.000000e+00> : vector<256x128xf32>
    %22 = tpu.matmul %19, %21, %cst_16 {dimension_numbers = #tpu.dot_dimension_numbers<[1], [0], [0], [1], [0, 0, 1, 1], [], []>} : vector<256x128xbf16>, vector<128x128xbf16>, vector<256x128xf32> -> vector<256x128xf32>
    %c0_17 = arith.constant 0 : index
    %c1_18 = arith.constant 1 : index
    %c0_19 = arith.constant 0 : index
    %23 = vector.load %arg6[%c0_17, %c1_18, %c0_19] : memref<18x18x128xbf16, #tpu.memory_space<vmem>>, vector<16x16x128xbf16>
    %24 = vector.shape_cast %23 : vector<16x16x128xbf16> to vector<256x128xbf16>
    %c1_20 = arith.constant 1 : index
    %c0_21 = arith.constant 0 : index
    %c0_22 = arith.constant 0 : index
    %25 = vector.load %arg2[%c1_20, %c0_21, %c0_22] : memref<9x128x128xbf16, #tpu.memory_space<vmem>>, vector<1x128x128xbf16>
    %26 = vector.shape_cast %25 : vector<1x128x128xbf16> to vector<128x128xbf16>
    %cst_23 = arith.constant dense<0.000000e+00> : vector<256x128xf32>
    %27 = tpu.matmul %24, %26, %cst_23 {dimension_numbers = #tpu.dot_dimension_numbers<[1], [0], [0], [1], [0, 0, 1, 1], [], []>} : vector<256x128xbf16>, vector<128x128xbf16>, vector<256x128xf32> -> vector<256x128xf32>
    %28 = arith.addf %22, %27 : vector<256x128xf32>
    %c0_24 = arith.constant 0 : index
    %c2 = arith.constant 2 : index
    %c0_25 = arith.constant 0 : index
    %29 = vector.load %arg6[%c0_24, %c2, %c0_25] : memref<18x18x128xbf16, #tpu.memory_space<vmem>>, vector<16x16x128xbf16>
    %30 = vector.shape_cast %29 : vector<16x16x128xbf16> to vector<256x128xbf16>
    %c2_26 = arith.constant 2 : index
    %c0_27 = arith.constant 0 : index
    %c0_28 = arith.constant 0 : index
    %31 = vector.load %arg2[%c2_26, %c0_27, %c0_28] : memref<9x128x128xbf16, #tpu.memory_space<vmem>>, vector<1x128x128xbf16>
    %32 = vector.shape_cast %31 : vector<1x128x128xbf16> to vector<128x128xbf16>
    %cst_29 = arith.constant dense<0.000000e+00> : vector<256x128xf32>
    %33 = tpu.matmul %30, %32, %cst_29 {dimension_numbers = #tpu.dot_dimension_numbers<[1], [0], [0], [1], [0, 0, 1, 1], [], []>} : vector<256x128xbf16>, vector<128x128xbf16>, vector<256x128xf32> -> vector<256x128xf32>
    %34 = arith.addf %28, %33 : vector<256x128xf32>
    %c1_30 = arith.constant 1 : index
    %c0_31 = arith.constant 0 : index
    %c0_32 = arith.constant 0 : index
    %35 = vector.load %arg6[%c1_30, %c0_31, %c0_32] : memref<18x18x128xbf16, #tpu.memory_space<vmem>>, vector<16x16x128xbf16>
    %36 = vector.shape_cast %35 : vector<16x16x128xbf16> to vector<256x128xbf16>
    %c3 = arith.constant 3 : index
    %c0_33 = arith.constant 0 : index
    %c0_34 = arith.constant 0 : index
    %37 = vector.load %arg2[%c3, %c0_33, %c0_34] : memref<9x128x128xbf16, #tpu.memory_space<vmem>>, vector<1x128x128xbf16>
    %38 = vector.shape_cast %37 : vector<1x128x128xbf16> to vector<128x128xbf16>
    %cst_35 = arith.constant dense<0.000000e+00> : vector<256x128xf32>
    %39 = tpu.matmul %36, %38, %cst_35 {dimension_numbers = #tpu.dot_dimension_numbers<[1], [0], [0], [1], [0, 0, 1, 1], [], []>} : vector<256x128xbf16>, vector<128x128xbf16>, vector<256x128xf32> -> vector<256x128xf32>
    %40 = arith.addf %34, %39 : vector<256x128xf32>
    %c1_36 = arith.constant 1 : index
    %c1_37 = arith.constant 1 : index
    %c0_38 = arith.constant 0 : index
    %41 = vector.load %arg6[%c1_36, %c1_37, %c0_38] : memref<18x18x128xbf16, #tpu.memory_space<vmem>>, vector<16x16x128xbf16>
    %42 = vector.shape_cast %41 : vector<16x16x128xbf16> to vector<256x128xbf16>
    %c4 = arith.constant 4 : index
    %c0_39 = arith.constant 0 : index
    %c0_40 = arith.constant 0 : index
    %43 = vector.load %arg2[%c4, %c0_39, %c0_40] : memref<9x128x128xbf16, #tpu.memory_space<vmem>>, vector<1x128x128xbf16>
    %44 = vector.shape_cast %43 : vector<1x128x128xbf16> to vector<128x128xbf16>
    %cst_41 = arith.constant dense<0.000000e+00> : vector<256x128xf32>
    %45 = tpu.matmul %42, %44, %cst_41 {dimension_numbers = #tpu.dot_dimension_numbers<[1], [0], [0], [1], [0, 0, 1, 1], [], []>} : vector<256x128xbf16>, vector<128x128xbf16>, vector<256x128xf32> -> vector<256x128xf32>
    %46 = arith.addf %40, %45 : vector<256x128xf32>
    %c1_42 = arith.constant 1 : index
    %c2_43 = arith.constant 2 : index
    %c0_44 = arith.constant 0 : index
    %47 = vector.load %arg6[%c1_42, %c2_43, %c0_44] : memref<18x18x128xbf16, #tpu.memory_space<vmem>>, vector<16x16x128xbf16>
    %48 = vector.shape_cast %47 : vector<16x16x128xbf16> to vector<256x128xbf16>
    %c5 = arith.constant 5 : index
    %c0_45 = arith.constant 0 : index
    %c0_46 = arith.constant 0 : index
    %49 = vector.load %arg2[%c5, %c0_45, %c0_46] : memref<9x128x128xbf16, #tpu.memory_space<vmem>>, vector<1x128x128xbf16>
    %50 = vector.shape_cast %49 : vector<1x128x128xbf16> to vector<128x128xbf16>
    %cst_47 = arith.constant dense<0.000000e+00> : vector<256x128xf32>
    %51 = tpu.matmul %48, %50, %cst_47 {dimension_numbers = #tpu.dot_dimension_numbers<[1], [0], [0], [1], [0, 0, 1, 1], [], []>} : vector<256x128xbf16>, vector<128x128xbf16>, vector<256x128xf32> -> vector<256x128xf32>
    %52 = arith.addf %46, %51 : vector<256x128xf32>
    %c2_48 = arith.constant 2 : index
    %c0_49 = arith.constant 0 : index
    %c0_50 = arith.constant 0 : index
    %53 = vector.load %arg6[%c2_48, %c0_49, %c0_50] : memref<18x18x128xbf16, #tpu.memory_space<vmem>>, vector<16x16x128xbf16>
    %54 = vector.shape_cast %53 : vector<16x16x128xbf16> to vector<256x128xbf16>
    %c6 = arith.constant 6 : index
    %c0_51 = arith.constant 0 : index
    %c0_52 = arith.constant 0 : index
    %55 = vector.load %arg2[%c6, %c0_51, %c0_52] : memref<9x128x128xbf16, #tpu.memory_space<vmem>>, vector<1x128x128xbf16>
    %56 = vector.shape_cast %55 : vector<1x128x128xbf16> to vector<128x128xbf16>
    %cst_53 = arith.constant dense<0.000000e+00> : vector<256x128xf32>
    %57 = tpu.matmul %54, %56, %cst_53 {dimension_numbers = #tpu.dot_dimension_numbers<[1], [0], [0], [1], [0, 0, 1, 1], [], []>} : vector<256x128xbf16>, vector<128x128xbf16>, vector<256x128xf32> -> vector<256x128xf32>
    %58 = arith.addf %52, %57 : vector<256x128xf32>
    %c2_54 = arith.constant 2 : index
    %c1_55 = arith.constant 1 : index
    %c0_56 = arith.constant 0 : index
    %59 = vector.load %arg6[%c2_54, %c1_55, %c0_56] : memref<18x18x128xbf16, #tpu.memory_space<vmem>>, vector<16x16x128xbf16>
    %60 = vector.shape_cast %59 : vector<16x16x128xbf16> to vector<256x128xbf16>
    %c7 = arith.constant 7 : index
    %c0_57 = arith.constant 0 : index
    %c0_58 = arith.constant 0 : index
    %61 = vector.load %arg2[%c7, %c0_57, %c0_58] : memref<9x128x128xbf16, #tpu.memory_space<vmem>>, vector<1x128x128xbf16>
    %62 = vector.shape_cast %61 : vector<1x128x128xbf16> to vector<128x128xbf16>
    %cst_59 = arith.constant dense<0.000000e+00> : vector<256x128xf32>
    %63 = tpu.matmul %60, %62, %cst_59 {dimension_numbers = #tpu.dot_dimension_numbers<[1], [0], [0], [1], [0, 0, 1, 1], [], []>} : vector<256x128xbf16>, vector<128x128xbf16>, vector<256x128xf32> -> vector<256x128xf32>
    %64 = arith.addf %58, %63 : vector<256x128xf32>
    %c2_60 = arith.constant 2 : index
    %c2_61 = arith.constant 2 : index
    %c0_62 = arith.constant 0 : index
    %65 = vector.load %arg6[%c2_60, %c2_61, %c0_62] : memref<18x18x128xbf16, #tpu.memory_space<vmem>>, vector<16x16x128xbf16>
    %66 = vector.shape_cast %65 : vector<16x16x128xbf16> to vector<256x128xbf16>
    %c8 = arith.constant 8 : index
    %c0_63 = arith.constant 0 : index
    %c0_64 = arith.constant 0 : index
    %67 = vector.load %arg2[%c8, %c0_63, %c0_64] : memref<9x128x128xbf16, #tpu.memory_space<vmem>>, vector<1x128x128xbf16>
    %68 = vector.shape_cast %67 : vector<1x128x128xbf16> to vector<128x128xbf16>
    %cst_65 = arith.constant dense<0.000000e+00> : vector<256x128xf32>
    %69 = tpu.matmul %66, %68, %cst_65 {dimension_numbers = #tpu.dot_dimension_numbers<[1], [0], [0], [1], [0, 0, 1, 1], [], []>} : vector<256x128xbf16>, vector<128x128xbf16>, vector<256x128xf32> -> vector<256x128xf32>
    %70 = arith.addf %64, %69 : vector<256x128xf32>
    %71 = vector.shape_cast %70 : vector<256x128xf32> to vector<16x16x128xf32>
    %72 = arith.truncf %71 : vector<16x16x128xf32> to vector<16x16x128xbf16>
    %c0_66 = arith.constant 0 : index
    %c0_67 = arith.constant 0 : index
    %c0_68 = arith.constant 0 : index
    %c0_69 = arith.constant 0 : index
    %73 = vector.load %arg4[%c0_66, %c0_67, %c0_68, %c0_69] : memref<1x16x16x128xbf16, #tpu.memory_space<vmem>>, vector<1x16x16x128xbf16>
    %74 = vector.shape_cast %73 : vector<1x16x16x128xbf16> to vector<16x16x128xbf16>
    %75 = vector.shape_cast %72 : vector<16x16x128xbf16> to vector<1x16x16x128xbf16>
    tpu.vector_store %arg4[%c0_66, %c0_67, %c0_68, %c0_69], %75 {strides = array<i32>} : memref<1x16x16x128xbf16, #tpu.memory_space<vmem>>, vector<1x16x16x128xbf16>,
    %cst_70 = arith.constant dense<0.000000e+00> : vector<128xf32>
    %76 = vector.multi_reduction <add>, %70, %cst_70 [0] : vector<256x128xf32> to vector<128xf32>
    %77 = vector.shape_cast %76 : vector<128xf32> to vector<1x128xf32>
    %78 = arith.mulf %70, %70 : vector<256x128xf32>
    %cst_71 = arith.constant dense<0.000000e+00> : vector<128xf32>
    %79 = vector.multi_reduction <add>, %78, %cst_71 [0] : vector<256x128xf32> to vector<128xf32>
    %80 = vector.shape_cast %79 : vector<128xf32> to vector<1x128xf32>
    %81 = tpu.concatenate %77, %80 in 0 : vector<1x128xf32>, vector<1x128xf32> -> vector<2x128xf32>
    %c0_72 = arith.constant 0 : index
    %c0_73 = arith.constant 0 : index
    %c0_74 = arith.constant 0 : index
    %82 = vector.load %arg5[%c0_72, %c0_73, %c0_74] : memref<1x2x128xf32, #tpu.memory_space<vmem>>, vector<1x2x128xf32>
    %83 = vector.shape_cast %82 : vector<1x2x128xf32> to vector<2x128xf32>
    %84 = vector.shape_cast %81 : vector<2x128xf32> to vector<1x2x128xf32>
    tpu.vector_store %arg5[%c0_72, %c0_73, %c0_74], %84 {strides = array<i32>} : memref<1x2x128xf32, #tpu.memory_space<vmem>>, vector<1x2x128xf32>,
    return
  }
  func.func @transform_0(%arg0: i32) -> (i32, i32, i32, i32) {
    %c0_i32 = arith.constant 0 : i32
    %c0_i32_0 = arith.constant 0 : i32
    %c0_i32_1 = arith.constant 0 : i32
    %c0_i32_2 = arith.constant 0 : i32
    return %arg0, %c0_i32, %c0_i32_0, %c0_i32_1 : i32, i32, i32, i32
  }
  func.func @transform_1(%arg0: i32) -> (i32, i32, i32) {
    %c0_i32 = arith.constant 0 : i32
    %c0_i32_0 = arith.constant 0 : i32
    %c0_i32_1 = arith.constant 0 : i32
    %c0_i32_2 = arith.constant 0 : i32
    return %c0_i32, %c0_i32_0, %c0_i32_1 : i32, i32, i32
  }
  func.func @transform_2(%arg0: i32) -> (i32, i32) {
    %c0_i32 = arith.constant 0 : i32
    %c0_i32_0 = arith.constant 0 : i32
    %c0_i32_1 = arith.constant 0 : i32
    return %c0_i32, %c0_i32_0 : i32, i32
  }
  func.func @transform_3(%arg0: i32) -> (i32, i32, i32, i32) {
    %c0_i32 = arith.constant 0 : i32
    %c0_i32_0 = arith.constant 0 : i32
    %c0_i32_1 = arith.constant 0 : i32
    %c0_i32_2 = arith.constant 0 : i32
    return %arg0, %c0_i32, %c0_i32_0, %c0_i32_1 : i32, i32, i32, i32
  }
  func.func @transform_4(%arg0: i32) -> (i32, i32, i32) {
    %c0_i32 = arith.constant 0 : i32
    %c0_i32_0 = arith.constant 0 : i32
    %c0_i32_1 = arith.constant 0 : i32
    return %arg0, %c0_i32, %c0_i32_0 : i32, i32, i32
  }
}

module attributes {stable_mosaic.version = 11 : i64} {
  func.func @_bn_relu_nchw_kernel(%arg0: i32, %arg1: i32, %arg2: memref<1x16x16x128xbf16, #tpu.memory_space<vmem>>, %arg3: memref<2x128xf32, #tpu.memory_space<vmem>>, %arg4: memref<1x8x256xf32, #tpu.memory_space<vmem>>) attributes {dimension_semantics = [#tpu.dimension_semantics<parallel>, #tpu.dimension_semantics<parallel>], iteration_bounds = array<i64: 2, 1>, scalar_prefetch = 0 : i64, scratch_operands = 0 : i64, tpu.core_type = #tpu.core_type<tc>, window_params = [{transform_indices = @transform_0, window_bounds = array<i64: 1, 16, 16, 128>}, {pipeline_mode = #tpu.pipeline_mode<synchronous>, transform_indices = @transform_1, window_bounds = array<i64: 2, 128>}, {transform_indices = @transform_2, window_bounds = array<i64: 1, 8, 256>}]} {
    %c0 = arith.constant 0 : index
    %c0_0 = arith.constant 0 : index
    %0 = vector.load %arg3[%c0, %c0_0] : memref<2x128xf32, #tpu.memory_space<vmem>>, vector<1x128xf32>
    %1 = vector.shape_cast %0 : vector<1x128xf32> to vector<1x1x128xf32>
    %c1 = arith.constant 1 : index
    %c0_1 = arith.constant 0 : index
    %2 = vector.load %arg3[%c1, %c0_1] : memref<2x128xf32, #tpu.memory_space<vmem>>, vector<1x128xf32>
    %3 = vector.shape_cast %2 : vector<1x128xf32> to vector<1x1x128xf32>
    %c0_2 = arith.constant 0 : index
    %c0_3 = arith.constant 0 : index
    %c0_4 = arith.constant 0 : index
    %c0_5 = arith.constant 0 : index
    %4 = vector.load %arg2[%c0_2, %c0_3, %c0_4, %c0_5] : memref<1x16x16x128xbf16, #tpu.memory_space<vmem>>, vector<1x16x16x128xbf16>
    %5 = vector.shape_cast %4 : vector<1x16x16x128xbf16> to vector<16x16x128xbf16>
    %6 = arith.extf %5 : vector<16x16x128xbf16> to vector<16x16x128xf32>
    %7 = vector.broadcast %1 : vector<1x1x128xf32> to vector<16x16x128xf32>
    %8 = arith.mulf %6, %7 : vector<16x16x128xf32>
    %9 = vector.broadcast %3 : vector<1x1x128xf32> to vector<16x16x128xf32>
    %10 = arith.addf %8, %9 : vector<16x16x128xf32>
    %cst = arith.constant 0.000000e+00 : f32
    %11 = vector.broadcast %cst : f32 to vector<16x16x128xf32>
    %12 = arith.maximumf %10, %11 : vector<16x16x128xf32>
    %13 = vector.shape_cast %12 : vector<16x16x128xf32> to vector<256x128xf32>
    %14 = tpu.transpose %13, [1, 0] : vector<256x128xf32> -> vector<128x256xf32>
    %15 = vector.extract_strided_slice %14 {offsets = [0, 0], sizes = [8, 256], strides = [1, 1]} : vector<128x256xf32> to vector<8x256xf32>
    %c0_6 = arith.constant 0 : index
    %c0_7 = arith.constant 0 : index
    %c0_8 = arith.constant 0 : index
    %16 = vector.load %arg4[%c0_6, %c0_7, %c0_8] : memref<1x8x256xf32, #tpu.memory_space<vmem>>, vector<1x8x256xf32>
    %17 = vector.shape_cast %16 : vector<1x8x256xf32> to vector<8x256xf32>
    %18 = vector.shape_cast %15 : vector<8x256xf32> to vector<1x8x256xf32>
    tpu.vector_store %arg4[%c0_6, %c0_7, %c0_8], %18 {strides = array<i32>} : memref<1x8x256xf32, #tpu.memory_space<vmem>>, vector<1x8x256xf32>,
    return
  }
  func.func @transform_0(%arg0: i32, %arg1: i32) -> (i32, i32, i32, i32) {
    %c0_i32 = arith.constant 0 : i32
    %c0_i32_0 = arith.constant 0 : i32
    %c0_i32_1 = arith.constant 0 : i32
    return %arg0, %arg1, %c0_i32, %c0_i32_0 : i32, i32, i32, i32
  }
  func.func @transform_1(%arg0: i32, %arg1: i32) -> (i32, i32) {
    %c0_i32 = arith.constant 0 : i32
    %c0_i32_0 = arith.constant 0 : i32
    %c0_i32_1 = arith.constant 0 : i32
    return %c0_i32, %c0_i32_0 : i32, i32
  }
  func.func @transform_2(%arg0: i32, %arg1: i32) -> (i32, i32, i32) {
    %c0_i32 = arith.constant 0 : i32
    %c0_i32_0 = arith.constant 0 : i32
    return %arg0, %c0_i32, %arg1 : i32, i32, i32
  }
}

</mosaic_0001>

<bundles_post_ra>
// kernel: double_conv.5
= control target key start
LH: loop header
LB: loop body
LE: loop exit
PB: predicated region body
PF: predicated region fallthrough
CT: control target
= control target key end

     0   :  { %s669_s9 = smov 0   ;;  %s671_s10 = smov 0   ;;  %s798_s0 = inlined_call_operand.vmem [shape: bf16[2,16,16,128], index: 0, kind: input, shape index: {}]   ;;  %s799_s1 = inlined_call_operand.vmem [shape: f32[2,128], index: 1, kind: input, shape index: {}]   ;;  %s800_s2 = inlined_call_operand.vmem [shape: f32[2,8,256], index: 2, kind: output, shape index: {}]  }
   0x1   :  { %s673_s11 = smov 0  }
   0x2 LB: > { %s24_s12 = sadd.s32 1, %s648_s10  ;;  %p516_p0 = scmp.ge.s32.totalorder %s652_s11, 1  ;;  %s652_s11 = sphi %s673_s11, %s12_s11   ;;  %s648_s10 = sphi %s671_s10, %s802_s10   ;;  %s644_s9 = sphi %s669_s9, %s801_s9  }
   0x3   : > { %p26_p1 = scmp.ge.s32.totalorder %s24_s12, 2  ;;  %p134_p2 = scmp.lt.s32.totalorder %s652_s11, 3 }
   0x5   : > { %s804_s12 = smov (%p26_p1, %s24_s12), 0  ;;  %p135_p3 = pnand %p516_p0, %p134_p2 }
   0x6   : > { %p166_p4 = scmp.lt.s32.totalorder (!%p135_p3), %s644_s9, 1 }
   0x7   : > { %138 = sbr.rel (%p135_p3) target bundleno = 151 (0x97), region = 28 }
   0xc   : > { %s806_s9 = smov (!%p166_p4, %s644_s9), 1  ;;  %v698_v0 = vld [vmem:[%s799_s1] ss:$0 sm:$0xff]  ;;  %v707_v9 = vld [vmem:[%s799_s1 + $0x1] ss:$0 sm:$0xff] }
   0xd   : > { %s525_s13 = sshll.u32 %s806_s9, 7  ;;  %s526_s21 = sshll.u32 %s806_s9, 4 }
   0xe   : > { %s693_s16 = scalar_lea.vmem %s798_s0, %s525_s13  ;;  %s184_s24 = scalar_lea.vmem %s800_s2, %s526_s21 }
   0xf   : > { %v598_v1 = vld [vmem:[%s693_s16 + $0x40] sm:$0xff]   ;;  %v599_v3 = vld [vmem:[%s693_s16 + $0x48] sm:$0xff]   ;;  %v600_v24 = vld [vmem:[%s693_s16 + $0x50] sm:$0xff]  }
  0x10   : > { %v528_v2 = vld [vmem:[%s693_s16] sm:$0xff]   ;;  %v561_v4 = vunpack.c.l.bf16 %v598_v1  ;;  %v562_v6 = vunpack.c.h.bf16 %v598_v1  ;;  %v591_v8 = vld [vmem:[%s693_s16 + $0x8] sm:$0xff]   ;;  %v565_v10 = vunpack.c.l.bf16 %v599_v3  ;;  %v566_v18 = vunpack.c.h.bf16 %v599_v3  ;;  %v592_v25 = vld [vmem:[%s693_s16 + $0x10] sm:$0xff]  }
  0x11   : > { %v529_v5 = vunpack.c.l.bf16 %v528_v2  ;;  %v530_v7 = vunpack.c.h.bf16 %v528_v2  ;;  %v533_v11 = vunpack.c.l.bf16 %v591_v8  ;;  %v534_v19 = vunpack.c.h.bf16 %v591_v8  ;;  %v601_v44 = vld [vmem:[%s693_s16 + $0x58] sm:$0xff]   ;;  %v602_v62 = vld [vmem:[%s693_s16 + $0x60] sm:$0xff]  }
  0x12   : > { %v272_v12 = vmul.f32 %v561_v4, %v698_v0  ;;  %v273_v14 = vmul.f32 %v562_v6, %v698_v0  ;;  %v274_v16 = vmul.f32 %v565_v10, %v698_v0  ;;  %v275_v30 = vmul.f32 %v566_v18, %v698_v0  ;;  %v593_v45 = vld [vmem:[%s693_s16 + $0x18] sm:$0xff]   ;;  %v594_v63 = vld [vmem:[%s693_s16 + $0x20] sm:$0xff]   ;;  %v603_v18 = vld [vmem:[%s693_s16 + $0x68] sm:$0xff]  }
  0x13   : > { %v256_v13 = vmul.f32 %v529_v5, %v698_v0  ;;  %v257_v15 = vmul.f32 %v530_v7, %v698_v0  ;;  %v258_v17 = vmul.f32 %v533_v11, %v698_v0  ;;  %v259_v31 = vmul.f32 %v534_v19, %v698_v0  ;;  %v595_v19 = vld [vmem:[%s693_s16 + $0x28] sm:$0xff]  }
  0x14   : > { %v308_v20 = vadd.f32 %v707_v9, %v272_v12  ;;  %v309_v22 = vadd.f32 %v707_v9, %v273_v14  ;;  %v310_v28 = vadd.f32 %v707_v9, %v274_v16  ;;  %v569_v34 = vunpack.c.l.bf16 %v600_v24 }
  0x15   : > { %v292_v21 = vadd.f32 %v707_v9, %v256_v13  ;;  %v293_v23 = vadd.f32 %v707_v9, %v257_v15  ;;  %v294_v29 = vadd.f32 %v707_v9, %v258_v17  ;;  %v537_v35 = vunpack.c.l.bf16 %v592_v25 }
  0x16   : > { %v340_v26 = vmax.f32 %v308_v20, 0.0  ;;  %v341_v32 = vmax.f32 %v309_v22, 0.0  ;;  %v342_v36 = vmax.f32 %v310_v28, 0.0  ;;  %v311_v37 = vadd.f32 %v707_v9, %v275_v30 }
  0x17   : > { %v324_v27 = vmax.f32 %v292_v21, 0.0  ;;  %v325_v33 = vmax.f32 %v293_v23, 0.0  ;;  %v295_v38 = vadd.f32 %v707_v9, %v259_v31  ;;  %v570_v39 = vunpack.c.h.bf16 %v600_v24 }
  0x18   : > { %388 = vxpose.xlu1.b32.start [1/16] (narrow) %v340_v26, 8  ;;  %v326_v40 = vmax.f32 %v294_v29, 0.0  ;;  %v276_v41 = vmul.f32 %v569_v34, %v698_v0  ;;  %v260_v42 = vmul.f32 %v537_v35, %v698_v0  ;;  %v538_v43 = vunpack.c.h.bf16 %v592_v25 }
  0x19   : > { %356 = vxpose.xlu0.b32.start [1/16] (narrow) %v324_v27, 8  ;;  %v343_v46 = vmax.f32 %v311_v37, 0.0  ;;  %v277_v47 = vmul.f32 %v570_v39, %v698_v0  ;;  %v573_v48 = vunpack.c.l.bf16 %v601_v44  ;;  %v541_v49 = vunpack.c.l.bf16 %v593_v45  ;;  %v596_v37 = vld [vmem:[%s693_s16 + $0x30] sm:$0xff]  }
  0x1a   : > { %v327_v50 = vmax.f32 %v295_v38, 0.0  ;;  %v312_v51 = vadd.f32 %v707_v9, %v276_v41  ;;  %v296_v52 = vadd.f32 %v707_v9, %v260_v42  ;;  %v261_v53 = vmul.f32 %v538_v43, %v698_v0 }
  0x1b   : > { %v278_v54 = vmul.f32 %v573_v48, %v698_v0  ;;  %v262_v55 = vmul.f32 %v541_v49, %v698_v0  ;;  %v574_v56 = vunpack.c.h.bf16 %v601_v44  ;;  %v542_v57 = vunpack.c.h.bf16 %v593_v45 }
  0x1c   : > { %389 = vxpose.xlu1.b32.cont [2/16] (narrow) %v341_v32, 8  ;;  %v344_v58 = vmax.f32 %v312_v51, 0.0  ;;  %v328_v59 = vmax.f32 %v296_v52, 0.0  ;;  %v313_v60 = vadd.f32 %v707_v9, %v277_v47  ;;  %v297_v61 = vadd.f32 %v707_v9, %v261_v53 }
  0x1d   : > { %357 = vxpose.xlu0.b32.cont [2/16] (narrow) %v325_v33, 8  ;;  %v314_v1 = vadd.f32 %v707_v9, %v278_v54  ;;  %v279_v2 = vmul.f32 %v574_v56, %v698_v0  ;;  %v263_v3 = vmul.f32 %v542_v57, %v698_v0  ;;  %v577_v4 = vunpack.c.l.bf16 %v602_v62  ;;  %v605_v54 = vld [vmem:[%s693_s16 + $0x78] sm:$0xff]  }
  0x1e   : > { %v345_v5 = vmax.f32 %v313_v60, 0.0  ;;  %v329_v6 = vmax.f32 %v297_v61, 0.0  ;;  %v298_v7 = vadd.f32 %v707_v9, %v262_v55  ;;  %v545_v8 = vunpack.c.l.bf16 %v594_v63  ;;  %v597_v55 = vld [vmem:[%s693_s16 + $0x38] sm:$0xff]  }
  0x1f   : > { %v346_v10 = vmax.f32 %v314_v1, 0.0  ;;  %v315_v11 = vadd.f32 %v707_v9, %v279_v2  ;;  %v299_v12 = vadd.f32 %v707_v9, %v263_v3  ;;  %v280_v13 = vmul.f32 %v577_v4, %v698_v0 }
  0x20   : > { %390 = vxpose.xlu1.b32.cont [3/16] (narrow) %v342_v36, 8  ;;  %v330_v14 = vmax.f32 %v298_v7, 0.0  ;;  %v264_v15 = vmul.f32 %v545_v8, %v698_v0  ;;  %v578_v16 = vunpack.c.h.bf16 %v602_v62  ;;  %v546_v17 = vunpack.c.h.bf16 %v594_v63  ;;  %v604_v36 = vld [vmem:[%s693_s16 + $0x70] sm:$0xff]  }
  0x21   : > { %358 = vxpose.xlu0.b32.cont [3/16] (narrow) %v326_v40, 8  ;;  %v347_v20 = vmax.f32 %v315_v11, 0.0  ;;  %v316_v21 = vadd.f32 %v707_v9, %v280_v13  ;;  %v581_v22 = vunpack.c.l.bf16 %v603_v18  ;;  %v549_v23 = vunpack.c.l.bf16 %v595_v19 }
  0x22   : > { %v331_v24 = vmax.f32 %v299_v12, 0.0  ;;  %v300_v25 = vadd.f32 %v707_v9, %v264_v15  ;;  %v281_v26 = vmul.f32 %v578_v16, %v698_v0  ;;  %v265_v27 = vmul.f32 %v546_v17, %v698_v0 }
  0x23   : > { %v282_v28 = vmul.f32 %v581_v22, %v698_v0  ;;  %v266_v29 = vmul.f32 %v549_v23, %v698_v0  ;;  %v582_v30 = vunpack.c.h.bf16 %v603_v18  ;;  %v550_v31 = vunpack.c.h.bf16 %v595_v19 }
  0x24   : > { %391 = vxpose.xlu1.b32.cont [4/16] (narrow) %v343_v46, 8  ;;  %v348_v32 = vmax.f32 %v316_v21, 0.0  ;;  %v332_v33 = vmax.f32 %v300_v25, 0.0  ;;  %v317_v34 = vadd.f32 %v707_v9, %v281_v26  ;;  %v301_v35 = vadd.f32 %v707_v9, %v265_v27 }
  0x25   : > { %359 = vxpose.xlu0.b32.cont [4/16] (narrow) %v327_v50, 8  ;;  %v318_v38 = vadd.f32 %v707_v9, %v282_v28  ;;  %v283_v39 = vmul.f32 %v582_v30, %v698_v0  ;;  %v267_v40 = vmul.f32 %v550_v31, %v698_v0  ;;  %v585_v41 = vunpack.c.l.bf16 %v604_v36 }
  0x26   : > { %v349_v42 = vmax.f32 %v317_v34, 0.0  ;;  %v333_v43 = vmax.f32 %v301_v35, 0.0  ;;  %v302_v44 = vadd.f32 %v707_v9, %v266_v29  ;;  %v553_v45 = vunpack.c.l.bf16 %v596_v37 }
  0x27   : > { %v350_v46 = vmax.f32 %v318_v38, 0.0  ;;  %v319_v47 = vadd.f32 %v707_v9, %v283_v39  ;;  %v303_v48 = vadd.f32 %v707_v9, %v267_v40  ;;  %v284_v49 = vmul.f32 %v585_v41, %v698_v0 }
  0x28   : > { %392 = vxpose.xlu1.b32.cont [5/16] (narrow) %v344_v58, 8  ;;  %v334_v50 = vmax.f32 %v302_v44, 0.0  ;;  %v268_v51 = vmul.f32 %v553_v45, %v698_v0  ;;  %v586_v52 = vunpack.c.h.bf16 %v604_v36  ;;  %v554_v53 = vunpack.c.h.bf16 %v596_v37 }
  0x29   : > { %360 = vxpose.xlu0.b32.cont [5/16] (narrow) %v328_v59, 8  ;;  %v351_v56 = vmax.f32 %v319_v47, 0.0  ;;  %v320_v57 = vadd.f32 %v707_v9, %v284_v49  ;;  %v589_v58 = vunpack.c.l.bf16 %v605_v54  ;;  %v557_v59 = vunpack.c.l.bf16 %v597_v55 }
  0x2a   : > { %v335_v60 = vmax.f32 %v303_v48, 0.0  ;;  %v304_v61 = vadd.f32 %v707_v9, %v268_v51  ;;  %v285_v62 = vmul.f32 %v586_v52, %v698_v0  ;;  %v269_v63 = vmul.f32 %v554_v53, %v698_v0 }
  0x2b   : > { %v286_v1 = vmul.f32 %v589_v58, %v698_v0  ;;  %v270_v2 = vmul.f32 %v557_v59, %v698_v0  ;;  %v590_v3 = vunpack.c.h.bf16 %v605_v54  ;;  %v558_v4 = vunpack.c.h.bf16 %v597_v55 }
  0x2c   : > { %393 = vxpose.xlu1.b32.cont [6/16] (narrow) %v345_v5, 8  ;;  %v352_v5 = vmax.f32 %v320_v57, 0.0  ;;  %v321_v7 = vadd.f32 %v707_v9, %v285_v62  ;;  %v305_v8 = vadd.f32 %v707_v9, %v269_v63 }
  0x2d   : > { %361 = vxpose.xlu0.b32.cont [6/16] (narrow) %v329_v6, 8  ;;  %v336_v6 = vmax.f32 %v304_v61, 0.0  ;;  %v271_v11 = vmul.f32 %v558_v4, %v698_v0  ;;  %v306_v15 = vadd.f32 %v707_v9, %v270_v2 }
  0x2e   : > { %v353_v12 = vmax.f32 %v321_v7, 0.0  ;;  %v337_v13 = vmax.f32 %v305_v8, 0.0 }
  0x2f   : > { %v338_v17 = vmax.f32 %v306_v15, 0.0  ;;  %v307_v19 = vadd.f32 %v707_v9, %v271_v11 }
  0x30   : > { %394 = vxpose.xlu1.b32.cont [7/16] (narrow) %v346_v10, 8  ;;  %v287_v10 = vmul.f32 %v590_v3, %v698_v0 }
  0x31   : > { %362 = vxpose.xlu0.b32.cont [7/16] (narrow) %v330_v14, 8  ;;  %v322_v14 = vadd.f32 %v707_v9, %v286_v1 }
  0x32   : > { %v323_v18 = vadd.f32 %v707_v9, %v287_v10 }
  0x33   : > { %v354_v16 = vmax.f32 %v322_v14, 0.0 }
  0x34   : > { %395 = vxpose.xlu1.b32.cont [8/16] (narrow) %v347_v20, 8  ;;  %v355_v0 = vmax.f32 %v323_v18, 0.0  ;;  %v339_v20 = vmax.f32 %v307_v19, 0.0 }
  0x35   : > { %363 = vxpose.xlu0.b32.cont [8/16] (narrow) %v331_v24, 8 }
  0x38   : > { %396 = vxpose.xlu1.b32.cont [9/16] (narrow) %v348_v32, 8 }
  0x39   : > { %364 = vxpose.xlu0.b32.cont [9/16] (narrow) %v332_v33, 8 }
  0x3c   : > { %397 = vxpose.xlu1.b32.cont [10/16] (narrow) %v349_v42, 8 }
  0x3d   : > { %365 = vxpose.xlu0.b32.cont [10/16] (narrow) %v333_v43, 8 }
  0x40   : > { %398 = vxpose.xlu1.b32.cont [11/16] (narrow) %v350_v46, 8 }
  0x41   : > { %366 = vxpose.xlu0.b32.cont [11/16] (narrow) %v334_v50, 8 }
  0x44   : > { %399 = vxpose.xlu1.b32.cont [12/16] (narrow) %v351_v56, 8 }
  0x45   : > { %367 = vxpose.xlu0.b32.cont [12/16] (narrow) %v335_v60, 8 }
  0x48   : > { %400 = vxpose.xlu1.b32.cont [13/16] (narrow) %v352_v5, 8 }
  0x49   : > { %368 = vxpose.xlu0.b32.cont [13/16] (narrow) %v336_v6, 8 }
  0x4c   : > { %401 = vxpose.xlu1.b32.cont [14/16] (narrow) %v353_v12, 8 }
  0x4d   : > { %369 = vxpose.xlu0.b32.cont [14/16] (narrow) %v337_v13, 8 }
  0x50   : > { %402 = vxpose.xlu1.b32.cont [15/16] (narrow) %v354_v16, 8 }
  0x51   : > { %370 = vxpose.xlu0.b32.cont [15/16] (narrow) %v338_v17, 8 }
  0x54   : > { %403 = vxpose.xlu1.b32.end [16/16] (narrow) %v355_v0, 8 }
  0x55   : > { %371 = vxpose.xlu0.b32.end [16/16] (narrow) %v339_v20, 8 }
  0x94   : > { %v404_v21 = vpop.trf.xlu1 }
  0x95   : > { %v372_v22 = vpop.trf.xlu0  ;;  %421 = vst [vmem:[%s184_s24 + $0x8] sm:$0xff] %v404_v21 }
  0x96   : > { %420 = vst [vmem:[%s184_s24] sm:$0xff] %v372_v22 }
  0x97 PF: > { %s12_s11 = sadd.s32 1, %s652_s11   ;;  %s801_s9 = smov %s648_s10 }
  0x98   : > { %p9_p5 = scmp.ge.s32.totalorder %s12_s11, 4   ;;  %s802_s10 = smov %s804_s12 }
  0x9a   :  { %11 = sbr.rel (!%p9_p5) target bundleno = 2 (0x2), region = 58 }

// kernel: double_conv.3
= control target key start
LH: loop header
LB: loop body
LE: loop exit
PB: predicated region body
PF: predicated region fallthrough
CT: control target
= control target key end

     0   :  { %s6362_s12 = smov 0   ;;  %s8940_s0 = inlined_call_operand.vmem [shape: bf16[2,18,18,4], index: 0, kind: input, shape index: {}]   ;;  %s8941_s1 = inlined_call_operand.vmem [shape: bf16[9,4,128], index: 1, kind: input, shape index: {}]   ;;  %s8942_s2 = inlined_call_operand.vmem [shape: bf16[2,16,16,128], index: 2, kind: output, shape index: {0}]   ;;  %s8943_s3 = inlined_call_operand.vmem [shape: f32[2,2,128], index: 3, kind: output, shape index: {1}]  }
   0x1 LB: > { %s5097_s13 = sadd.s32 4294967295, %s6340_s12   ;;  %p5101_p0 = scmp.ge.s32.totalorder %s6340_s12, 1  ;;  %s6340_s12 = sphi %s6362_s12, %s14_s12  }
   0x2   : > { %p140_p1 = scmp.lt.s32.totalorder %s6340_s12, 3 }
   0x4   : > { %p141_p2 = pnand %p5101_p0, %p140_p1 }
   0x6   : > { %144 = sbr.rel (%p141_p2) target bundleno = 574 (0x23e), region = 28 }
   0xb   : > { %v5106_v0 = vld [vmem:[%s8941_s1 + $0x2] sm:$0x3]  ;;  %vm718_vm0 = vcmask 1041408   ;;  %p168_p3 = scmp.lt.s32.totalorder %s5097_s13, 1  ;;  %v215_v2 = vld [vmem:[%s8941_s1] sm:$0x3] }
   0xc   : > { %6266 = vmatprep.subr.msk.bf16.mxu1 %vm718_vm0, %v5106_v0  ;;  %6265 = vmatprep.subr.msk.bf16.mxu0 %vm718_vm0, %v5106_v0  ;;  %v720_v1 = vsel %vm718_vm0, %v5106_v0, 0  ;;  %v5187_v3 = vld [vmem:[%s8941_s1 + $0x4] sm:$0x3]  ;;  %vm232_vm1 = vsmask.f32 3328  ;;  %v6393_v4 = vsel %vm718_vm0, %v215_v2, 0 }
   0xd   : > { %6264 = vmatpush3.bf16.msra.mxu1 %v720_v1  ;;  %5958 = vmatpush3.bf16.msra.mxu0 %v720_v1  ;;  %s9193_s13 = smov (!%p168_p3, %s5097_s13), 1  ;;  %vm233_vm2 = vsmask.f32 7440  ;;  %vm669_vm3 = vcmask 31744   ;;  %v6419_v16 = vsel %vm718_vm0, %v5187_v3, 0  ;;  %vm1223_vm5 = vcmask 1042432  }
   0xe   : > { %6267 = vmatprep.subr.msk.bf16.mxu1 %vm718_vm0, %v215_v2  ;;  %6268 = vmatprep.subr.msk.bf16.mxu0 %vm718_vm0, %v5187_v3  ;;  %s6275_s20 = smul.u32 216, %s9193_s13  ;;  %vm6434_vm4 = vmor %vm232_vm1, %vm233_vm2  ;;  %vm1224_vm6 = vcmask 1046532   ;;  %s5676_s9 = sshll.u32 %s9193_s13, 7  ;;  %vm5008_vm8 = vcmask 1040384  }
   0xf   : > { %vm6720_vm7 = vmor %vm1223_vm5, %vm1224_vm6  ;;  %s8851_s14 = scalar_lea.vmem %s8942_s2, %s5676_s9  ;;  %s5105_s15 = sshll.u32 %s9193_s13, 1 }
  0x10   : > { %s6390_s23 = scalar_lea.vmem %s8940_s0, %s6275_s20  ;;  %s181_s18 = scalar_lea.vmem %s8943_s3, %s5105_s15 }
  0x11   : > { %v6396_v5 = vld [vmem:[%s6390_s23] sm:$0xf]  ;;  %v6399_v6 = vld [vmem:[%s6390_s23 + $0x4] sm:$0xf]  ;;  %v6402_v7 = vld [vmem:[%s6390_s23 + $0x8] sm:$0x1] }
  0x12   : > { %v236_v8 = vshrl.u32 %v6396_v5, 16  ;;  %v239_v9 = vshll.u32 %v6396_v5, 16  ;;  %v245_v10 = vshll.u32 %v6399_v6, 16  ;;  %v249_v11 = vshrl.u32 %v6399_v6, 16  ;;  %v6409_v12 = vld [vmem:[%s6390_s23 + $0x60] sm:$0xf] }
  0x13   : > { %v255_v13 = vshll.u32 %v6402_v7, 16  ;;  %v6413_v14 = vld [vmem:[%s6390_s23 + $0x64] sm:$0xf]  ;;  %v6416_v15 = vld [vmem:[%s6390_s23 + $0x68] sm:$0x1]  ;;  %v428_v22 = vshrl.u32 %v6409_v12, 16 }
  0x14   : > { %v238_v17 = vrot.slane %v236_v8, 4  ;;  %v241_v18 = vrot.slane %v239_v9, 5  ;;  %v247_v19 = vrot.slane %v245_v10, 5  ;;  %v251_v20 = vrot.slane %v249_v11, 4  ;;  %v6427_v29 = vld [vmem:[%s6390_s23 + $0xc] sm:$0xf] }
  0x15   : > { %v257_v21 = vrot.slane %v255_v13, 5  ;;  %v431_v23 = vshll.u32 %v6409_v12, 16  ;;  %v437_v24 = vshll.u32 %v6413_v14, 16  ;;  %v441_v27 = vshrl.u32 %v6413_v14, 16  ;;  %v6430_v30 = vld [vmem:[%s6390_s23 + $0x10] sm:$0xf] }
  0x16   : > { %v242_v25 = vor.u32 %v241_v18, %v238_v17  ;;  %v252_v26 = vor.u32 %v251_v20, %v247_v19  ;;  %v447_v28 = vshll.u32 %v6416_v15, 16  ;;  %v430_v33 = vrot.slane %v428_v22, 4  ;;  %v6440_v41 = vld [vmem:[%s6390_s23 + $0x14] sm:$0x1]  ;;  %v6451_v53 = vld [vmem:[%s6390_s23 + $0x6c] sm:$0xf] }
  0x17   : > { %v433_v34 = vrot.slane %v431_v23, 5  ;;  %v439_v35 = vrot.slane %v437_v24, 5  ;;  %v443_v38 = vrot.slane %v441_v27, 4  ;;  %v260_v42 = vshrl.u32 %v6427_v29, 16  ;;  %v6455_v58 = vld [vmem:[%s6390_s23 + $0x70] sm:$0xf] }
  0x18   : > { %v243_v36 = vrot.slane %v242_v25, 4  ;;  %v253_v37 = vrot.slane %v252_v26, 4  ;;  %v449_v39 = vrot.slane %v447_v28, 5  ;;  %v263_v43 = vshll.u32 %v6427_v29, 16  ;;  %v6463_v63 = vld [vmem:[%s6390_s23 + $0x74] sm:$0x1] }
  0x19   : > { %v434_v40 = vor.u32 %v433_v34, %v430_v33  ;;  %v269_v44 = vshll.u32 %v6430_v30, 16  ;;  %v444_v47 = vor.u32 %v443_v38, %v439_v35  ;;  %v273_v48 = vshrl.u32 %v6430_v30, 16  ;;  %v6469_v8 = vld [vmem:[%s6390_s23 + $0x18] sm:$0xf]  ;;  %v6482_v25 = vld [vmem:[%s6390_s23 + $0x20] sm:$0x1] }
  0x1a   : > { %v248_v45 = vsel %vm6434_vm4, %v243_v36, %v247_v19  ;;  %v258_v46 = vsel %vm6434_vm4, %v253_v37, %v257_v21  ;;  %v262_v51 = vrot.slane %v260_v42, 4  ;;  %v265_v52 = vrot.slane %v263_v43, 5  ;;  %v6476_v21 = vld [vmem:[%s6390_s23 + $0x1c] sm:$0xf] }
  0x1b   : > { %v5107_v49 = vcombine.low %v248_v45, %v258_v46  ;;  %v435_v50 = vrot.slane %v434_v40, 4  ;;  %v445_v54 = vrot.slane %v444_v47, 4  ;;  %v271_v55 = vrot.slane %v269_v44, 5  ;;  %v6495_v40 = vld [vmem:[%s8941_s1 + $0x8] sm:$0x3] }
  0x1c   : > { %v275_v56 = vrot.slane %v273_v48, 4  ;;  %v279_v57 = vshll.u32 %v6440_v41, 16  ;;  %v266_v60 = vor.u32 %v265_v52, %v262_v51  ;;  %v452_v3 = vshrl.u32 %v6451_v53, 16  ;;  %v6500_v46 = vld [vmem:[%s6390_s23 + $0x7c] sm:$0xf] }
  0x1d   : > { %5959 = vmatprep.mubr.msk.bf16.mxu0 %vm669_vm3, %v5107_v49  ;;  %v440_v59 = vsel %vm6434_vm4, %v435_v50, %v439_v35  ;;  %v450_v0 = vsel %vm6434_vm4, %v445_v54, %v449_v39  ;;  %v455_v11 = vshll.u32 %v6451_v53, 16  ;;  %v461_v13 = vshll.u32 %v6455_v58, 16  ;;  %v6489_v35 = vld [vmem:[%s6390_s23 + $0x78] sm:$0xf] }
  0x1e   : > { %v276_v1 = vor.u32 %v275_v56, %v271_v55  ;;  %v281_v2 = vrot.slane %v279_v57, 5  ;;  %v5115_v9 = vcombine.low %v440_v59, %v450_v0  ;;  %v267_v10 = vrot.slane %v266_v60, 4  ;;  %v6507_v56 = vld [vmem:[%s6390_s23 + $0x80] sm:$0x1] }
  0x1f   : > { %v454_v18 = vrot.slane %v452_v3, 4  ;;  %v465_v19 = vshrl.u32 %v6455_v58, 16  ;;  %v471_v20 = vshll.u32 %v6463_v63, 16  ;;  %v457_v23 = vrot.slane %v455_v11, 5  ;;  %8979 = vst [vmem:[#allocation2_spill] sm:$0xff] %v6507_v56 }
  0x20   : > { %v277_v17 = vrot.slane %v276_v1, 4  ;;  %5975 = vmatprep.mubr.msk.bf16.mxu1 %vm669_vm3, %v5115_v9  ;;  %v272_v22 = vsel %vm6434_vm4, %v267_v10, %v271_v55  ;;  %v463_v24 = vrot.slane %v461_v13, 5  ;;  %v284_v26 = vshrl.u32 %v6469_v8, 16  ;;  %v6513_v1 = vld [vmem:[%s6390_s23 + $0x24] sm:$0xf] }
  0x21   : > { %v467_v28 = vrot.slane %v465_v19, 4  ;;  %v473_v33 = vrot.slane %v471_v20, 5  ;;  %v287_v34 = vshll.u32 %v6469_v8, 16  ;;  %v458_v37 = vor.u32 %v457_v23, %v454_v18  ;;  %v6521_v10 = vld [vmem:[%s6390_s23 + $0x28] sm:$0xf] }
  0x22   : > { %v282_v27 = vsel %vm6434_vm4, %v277_v17, %v281_v2  ;;  %v286_v38 = vrot.slane %v284_v26, 4  ;;  %v293_v39 = vshll.u32 %v6476_v21, 16  ;;  %v297_v44 = vshrl.u32 %v6476_v21, 16  ;;  %v6527_v19 = vld [vmem:[%s8941_s1 + $0x6] sm:$0x3] }
  0x23   : > { %v5108_v36 = vcombine.low %v272_v22, %v282_v27  ;;  %v468_v42 = vor.u32 %v467_v28, %v463_v24  ;;  %v289_v43 = vrot.slane %v287_v34, 5  ;;  %v303_v45 = vshll.u32 %v6482_v25, 16 }
  0x24   : > { %v459_v47 = vrot.slane %v458_v37, 4  ;;  %v295_v48 = vrot.slane %v293_v39, 5  ;;  %v476_v49 = vshrl.u32 %v6489_v35, 16  ;;  %v479_v50 = vshll.u32 %v6489_v35, 16 }
  0x25   : > { %5960 = vmatmul.mubr.msk.bf16.vlgmr.msra.gmra.mxu0 %vm669_vm3, %v5108_v36  ;;  %v469_v51 = vrot.slane %v468_v42, 4  ;;  %v290_v52 = vor.u32 %v289_v43, %v286_v38  ;;  %v299_v54 = vrot.slane %v297_v44, 4  ;;  %v305_v55 = vrot.slane %v303_v45, 5  ;;  %v6539_v36 = vld [vmem:[%s6390_s23 + $0x84] sm:$0xf] }
  0x26   : > { %6026 = vmatpush3.bf16.msra.mxu0 %v6419_v16  ;;  %v464_v57 = vsel %vm6434_vm4, %v459_v47, %v463_v24  ;;  %v478_v59 = vrot.slane %v476_v49, 4  ;;  %v481_v60 = vrot.slane %v479_v50, 5  ;;  %v485_v0 = vshll.u32 %v6500_v46, 16  ;;  %v6532_v24 = vld [vmem:[%s6390_s23 + $0x2c] sm:$0x1] }
  0x27   : > { %6270 = vmatprep.subr.msk.bf16.mxu0 %vm718_vm0, %v6495_v40  ;;  %v474_v16 = vsel %vm6434_vm4, %v469_v51, %v473_v33  ;;  %v291_v2 = vrot.slane %v290_v52, 4  ;;  %v300_v3 = vor.u32 %v299_v54, %v295_v48  ;;  %v489_v9 = vshrl.u32 %v6500_v46, 16  ;;  %v6546_v43 = vld [vmem:[%s6390_s23 + $0x88] sm:$0xf]  ;;  %v6554_v51 = vld [vmem:[%s6390_s23 + $0x8c] sm:$0x1] }
  0x28   : > { %v5116_v11 = vcombine.low %v464_v57, %v474_v16  ;;  %v482_v13 = vor.u32 %v481_v60, %v478_v59  ;;  %v487_v17 = vrot.slane %v485_v0, 5  ;;  %v495_v18 = vshll.u32 %v6507_v56, 16  ;;  %8980 = vst [vmem:[#allocation3_spill] sm:$0xff] %v6554_v51  ;;  %v6562_v60 = vld [vmem:[%s6390_s23 + $0x30] sm:$0xf] }
  0x29   : > { %v296_v20 = vsel %vm6434_vm4, %v291_v2, %v295_v48  ;;  %v301_v22 = vrot.slane %v300_v3, 4  ;;  %v491_v23 = vrot.slane %v489_v9, 4  ;;  %v308_v26 = vshrl.u32 %v6513_v1, 16  ;;  %v6567_v9 = vld [vmem:[%s6390_s23 + $0x34] sm:$0xf] }
  0x2a   : > { %5976 = vmatmul.mubr.msk.bf16.vlgmr.msra.gmra.mxu1 %vm669_vm3, %v5116_v11  ;;  %v483_v27 = vrot.slane %v482_v13, 4  ;;  %v497_v28 = vrot.slane %v495_v18, 5  ;;  %v311_v33 = vshll.u32 %v6513_v1, 16  ;;  %v317_v34 = vshll.u32 %v6521_v10, 16 }
  0x2b   : > { %5992 = vmatpush3.bf16.msra.mxu1 %v6393_v4  ;;  %v306_v37 = vsel %vm6434_vm4, %v301_v22, %v305_v55  ;;  %v492_v38 = vor.u32 %v491_v23, %v487_v17  ;;  %v310_v39 = vrot.slane %v308_v26, 4  ;;  %v321_v42 = vshrl.u32 %v6521_v10, 16 }
  0x2c   : > { %v5109_v44 = vcombine.low %v296_v20, %v306_v37  ;;  %v488_v45 = vsel %vm6434_vm4, %v483_v27, %v487_v17  ;;  %v313_v47 = vrot.slane %v311_v33, 5  ;;  %v319_v48 = vrot.slane %v317_v34, 5  ;;  %6269 = vmatprep.subr.msk.bf16.mxu1 %vm718_vm0, %v6527_v19  ;;  %v6575_v33 = vld [vmem:[%s6390_s23 + $0x38] sm:$0x1] }
  0x2d   : > { %v493_v4 = vrot.slane %v492_v38, 4  ;;  %v323_v49 = vrot.slane %v321_v42, 4  ;;  %v327_v50 = vshll.u32 %v6532_v24, 16  ;;  %v500_v52 = vshrl.u32 %v6539_v36, 16  ;;  %v6580_v38 = vld [vmem:[%s6390_s23 + $0x90] sm:$0xf] }
  0x2e   : > { %5963 = vmatprep.mubr.msk.bf16.mxu0 %vm669_vm3, %v5109_v44  ;;  %v314_v54 = vor.u32 %v313_v47, %v310_v39  ;;  %v503_v55 = vshll.u32 %v6539_v36, 16  ;;  %v509_v57 = vshll.u32 %v6546_v43, 16  ;;  %v513_v59 = vshrl.u32 %v6546_v43, 16  ;;  %8981 = vst [vmem:[#allocation4_spill] sm:$0xff] %v6580_v38  ;;  %v6585_v47 = vld [vmem:[%s6390_s23 + $0x94] sm:$0xf] }
  0x2f   : > { %v498_v0 = vsel %vm6434_vm4, %v493_v4, %v497_v28  ;;  %v324_v16 = vor.u32 %v323_v49, %v319_v48  ;;  %v329_v2 = vrot.slane %v327_v50, 5  ;;  %v502_v3 = vrot.slane %v500_v52, 4  ;;  %8982 = vst [vmem:[#allocation5_spill] sm:$0xff] %v6585_v47 }
  0x30   : > { %v5117_v11 = vcombine.low %v488_v45, %v498_v0  ;;  %v315_v13 = vrot.slane %v314_v54, 4  ;;  %v505_v17 = vrot.slane %v503_v55, 5  ;;  %v511_v18 = vrot.slane %v509_v57, 5 }
  0x31   : > { %v325_v20 = vrot.slane %v324_v16, 4  ;;  %v515_v22 = vrot.slane %v513_v59, 4  ;;  %v519_v23 = vshll.u32 %v6554_v51, 16  ;;  %v332_v26 = vshrl.u32 %v6562_v60, 16  ;;  %v6594_v16 = vld [vmem:[%s6390_s23 + $0x98] sm:$0x1] }
  0x32   : > { %5979 = vmatprep.mubr.msk.bf16.mxu1 %vm669_vm3, %v5117_v11  ;;  %v320_v27 = vsel %vm6434_vm4, %v315_v13, %v319_v48  ;;  %v506_v28 = vor.u32 %v505_v17, %v502_v3  ;;  %v335_v34 = vshll.u32 %v6562_v60, 16  ;;  %v341_v37 = vshll.u32 %v6567_v9, 16  ;;  %8983 = vst [vmem:[#allocation6_spill] sm:$0xff] %v6594_v16  ;;  %v6599_v11 = vld [vmem:[%s6390_s23 + $0x3c] sm:$0xf] }
  0x33   : > { %v330_v39 = vsel %vm6434_vm4, %v325_v20, %v329_v2  ;;  %v516_v42 = vor.u32 %v515_v22, %v511_v18  ;;  %v521_v44 = vrot.slane %v519_v23, 5  ;;  %v334_v45 = vrot.slane %v332_v26, 4  ;;  %v6604_v23 = vld [vmem:[%s6390_s23 + $0x40] sm:$0xf]  ;;  %v1176_v51 = vld [vmem:[%s6390_s23 + $0xc] sm:$0xe] }
  0x34   : > { %v5110_v48 = vcombine.low %v320_v27, %v330_v39  ;;  %v507_v4 = vrot.slane %v506_v28, 4  ;;  %v337_v49 = vrot.slane %v335_v34, 5  ;;  %v343_v50 = vrot.slane %v341_v37, 5 }
  0x35   : > { %v517_v52 = vrot.slane %v516_v42, 4  ;;  %v345_v54 = vshrl.u32 %v6567_v9, 16  ;;  %v351_v55 = vshll.u32 %v6575_v33, 16  ;;  %v524_v57 = vshrl.u32 %v6580_v38, 16 }
  0x36   : > { %5964 = vmatmul.mubr.msk.bf16.gmra.mxu0 %vm669_vm3, %v5110_v48  ;;  %v512_v59 = vsel %vm6434_vm4, %v507_v4, %v511_v18  ;;  %v338_v0 = vor.u32 %v337_v49, %v334_v45  ;;  %v527_v2 = vshll.u32 %v6580_v38, 16  ;;  %v533_v3 = vshll.u32 %v6585_v47, 16  ;;  %v6613_v48 = vld [vmem:[%s6390_s23 + $0x44] sm:$0x1] }
  0x37   : > { %v522_v13 = vsel %vm6434_vm4, %v517_v52, %v521_v44  ;;  %v347_v17 = vrot.slane %v345_v54, 4  ;;  %v353_v20 = vrot.slane %v351_v55, 5  ;;  %v526_v22 = vrot.slane %v524_v57, 4  ;;  %v6618_v52 = vld [vmem:[%s6390_s23 + $0x9c] sm:$0xf] }
  0x38   : > { %v5118_v18 = vcombine.low %v512_v59, %v522_v13  ;;  %v339_v26 = vrot.slane %v338_v0, 4  ;;  %v529_v27 = vrot.slane %v527_v2, 5  ;;  %v535_v28 = vrot.slane %v533_v3, 5  ;;  %8984 = vst [vmem:[#allocation7_spill] sm:$0xff] %v6618_v52  ;;  %v6622_v13 = vld [vmem:[%s6390_s23 + $0xa0] sm:$0xf] }
  0x39   : > { %v348_v34 = vor.u32 %v347_v17, %v343_v50  ;;  %v537_v37 = vshrl.u32 %v6585_v47, 16  ;;  %v543_v39 = vshll.u32 %v6594_v16, 16  ;;  %v356_v42 = vshrl.u32 %v6599_v11, 16  ;;  %8985 = vst [vmem:[#allocation8_spill] sm:$0xff] %v6622_v13 }
  0x3a   : > { %5980 = vmatmul.mubr.msk.bf16.gmra.mxu1 %vm669_vm3, %v5118_v18  ;;  %v344_v44 = vsel %vm6434_vm4, %v339_v26, %v343_v50  ;;  %v530_v45 = vor.u32 %v529_v27, %v526_v22  ;;  %v359_v4 = vshll.u32 %v6599_v11, 16  ;;  %v365_v49 = vshll.u32 %v6604_v23, 16  ;;  %v6628_v26 = vld [vmem:[%s6390_s23 + $0xa4] sm:$0x1] }
  0x3b   : > { %v349_v54 = vrot.slane %v348_v34, 4  ;;  %v539_v55 = vrot.slane %v537_v37, 4  ;;  %v545_v57 = vrot.slane %v543_v39, 5  ;;  %v358_v59 = vrot.slane %v356_v42, 4  ;;  %8986 = vst [vmem:[#allocation9_spill] sm:$0xff] %v6628_v26 }
  0x3c   : > { %v531_v0 = vrot.slane %v530_v45, 4  ;;  %v361_v2 = vrot.slane %v359_v4, 5  ;;  %v367_v3 = vrot.slane %v365_v49, 5  ;;  %v369_v50 = vshrl.u32 %v6604_v23, 16  ;;  %v6632_v34 = vld [vmem:[%s6390_s23 + $0x48] sm:$0xf] }
  0x3d   : > { %v354_v17 = vsel %vm6434_vm4, %v349_v54, %v353_v20  ;;  %v540_v22 = vor.u32 %v539_v55, %v535_v28  ;;  %v375_v18 = vshll.u32 %v6613_v48, 16  ;;  %v548_v27 = vshrl.u32 %v6618_v52, 16 }
  0x3e   : > { %v5111_v37 = vcombine.low %v344_v44, %v354_v17  ;;  %v536_v39 = vsel %vm6434_vm4, %v531_v0, %v535_v28  ;;  %v362_v42 = vor.u32 %v361_v2, %v358_v59  ;;  %v371_v45 = vrot.slane %v369_v50, 4  ;;  %v6641_v17 = vld [vmem:[%s6390_s23 + $0x4c] sm:$0xf]  ;;  %v6647_v2 = vld [vmem:[%s6390_s23 + $0x50] sm:$0x1] }
  0x3f   : > { %v541_v4 = vrot.slane %v540_v22, 4  ;;  %v377_v49 = vrot.slane %v375_v18, 5  ;;  %v550_v20 = vrot.slane %v548_v27, 4  ;;  %v551_v54 = vshll.u32 %v6618_v52, 16 }
  0x40   : > { %5967 = vmatprep.mubr.msk.bf16.mxu0 %vm669_vm3, %v5111_v37  ;;  %v363_v55 = vrot.slane %v362_v42, 4  ;;  %v372_v62 = vor.u32 %v371_v45, %v367_v3  ;;  %v557_v32 = vshll.u32 %v6622_v13, 16  ;;  %v561_v44 = vshrl.u32 %v6622_v13, 16  ;;  %v6653_v42 = vld [vmem:[%s6390_s23 + $0xa8] sm:$0xf] }
  0x41   : > { %v546_v28 = vsel %vm6434_vm4, %v541_v4, %v545_v57  ;;  %v553_v59 = vrot.slane %v551_v54, 5  ;;  %v567_v0 = vshll.u32 %v6628_v26, 16  ;;  %v380_v50 = vshrl.u32 %v6632_v34, 16  ;;  %8987 = vst [vmem:[#allocation10_spill] sm:$0xff] %v6653_v42 }
  0x42   : > { %v5119_v22 = vcombine.low %v536_v39, %v546_v28  ;;  %v368_v18 = vsel %vm6434_vm4, %v363_v55, %v367_v3  ;;  %v373_v27 = vrot.slane %v372_v62, 4  ;;  %v559_v37 = vrot.slane %v557_v32, 5 }
  0x43   : > { %v554_v45 = vor.u32 %v553_v59, %v550_v20  ;;  %v563_v61 = vrot.slane %v561_v44, 4  ;;  %v569_v57 = vrot.slane %v567_v0, 5  ;;  %v382_v4 = vrot.slane %v380_v50, 4  ;;  %v6663_v44 = vld [vmem:[%s6390_s23 + $0xac] sm:$0xf] }
  0x44   : > { %5983 = vmatprep.mubr.msk.bf16.mxu1 %vm669_vm3, %v5119_v22  ;;  %v378_v54 = vsel %vm6434_vm4, %v373_v27, %v377_v49  ;;  %v383_v39 = vshll.u32 %v6632_v34, 16  ;;  %v389_v28 = vshll.u32 %v6641_v17, 16  ;;  %v393_v62 = vshrl.u32 %v6641_v17, 16  ;;  %8988 = vst [vmem:[#allocation11_spill] sm:$0xff] %v6663_v44  ;;  %v6666_v22 = vld [vmem:[%s6390_s23 + $0xb0] sm:$0x1] }
  0x45   : > { %v5112_v3 = vcombine.low %v368_v18, %v378_v54  ;;  %v555_v32 = vrot.slane %v554_v45, 4  ;;  %v564_v55 = vor.u32 %v563_v61, %v559_v37  ;;  %v399_v20 = vshll.u32 %v6647_v2, 16  ;;  %8989 = vst [vmem:[#allocation12_spill] sm:$0xff] %v6666_v22 }
  0x46   : > { %v385_v59 = vrot.slane %v383_v39, 5  ;;  %v391_v0 = vrot.slane %v389_v28, 5  ;;  %v395_v50 = vrot.slane %v393_v62, 4  ;;  %v572_v49 = vshrl.u32 %v6653_v42, 16  ;;  %v6675_v62 = vld [vmem:[%s6390_s23 + $0x54] sm:$0xf] }
  0x47   : > { %5968 = vmatmul.mubr.msk.bf16.gmra.mxu0 %vm669_vm3, %v5112_v3  ;;  %v560_v18 = vsel %vm6434_vm4, %v555_v32, %v559_v37  ;;  %v565_v27 = vrot.slane %v564_v55, 4  ;;  %v401_v61 = vrot.slane %v399_v20, 5  ;;  %v575_v45 = vshll.u32 %v6653_v42, 16  ;;  %v6682_v55 = vld [vmem:[%s6390_s23 + $0x58] sm:$0xf] }
  0x48   : > { %v386_v54 = vor.u32 %v385_v59, %v382_v4  ;;  %v396_v56 = vor.u32 %v395_v50, %v391_v0  ;;  %v574_v39 = vrot.slane %v572_v49, 4  ;;  %v581_v28 = vshll.u32 %v6663_v44, 16  ;;  %v6685_v49 = vld [vmem:[%s6390_s23 + $0x5c] sm:$0x1] }
  0x49   : > { %v570_v3 = vsel %vm6434_vm4, %v565_v27, %v569_v57  ;;  %v577_v26 = vrot.slane %v575_v45, 5  ;;  %v585_v37 = vshrl.u32 %v6663_v44, 16  ;;  %v591_v32 = vshll.u32 %v6666_v22, 16  ;;  %v1175_v22 = vld [vmem:[%s6390_s23] sm:$0xe] }
  0x4a   : > { %v5120_v4 = vcombine.low %v560_v18, %v570_v3  ;;  %v387_v20 = vrot.slane %v386_v54, 4  ;;  %v397_v59 = vrot.slane %v396_v56, 4  ;;  %v583_v50 = vrot.slane %v581_v28, 5  ;;  %v6696_v54 = vld [vmem:[%s6390_s23 + $0xb4] sm:$0xf] }
  0x4b   : > { %v578_v42 = vor.u32 %v577_v26, %v574_v39  ;;  %v587_v52 = vrot.slane %v585_v37, 4  ;;  %v593_v13 = vrot.slane %v591_v32, 5  ;;  %v404_v57 = vshrl.u32 %v6675_v62, 16  ;;  %8990 = vst [vmem:[#allocation13_spill] sm:$0xff] %v6696_v54  ;;  %v6699_v37 = vld [vmem:[%s6390_s23 + $0xb8] sm:$0xf] }
  0x4c   : > { %5984 = vmatmul.mubr.msk.bf16.gmra.mxu1 %vm669_vm3, %v5120_v4  ;;  %v392_v27 = vsel %vm6434_vm4, %v387_v20, %v391_v0  ;;  %v402_v18 = vsel %vm6434_vm4, %v397_v59, %v401_v61  ;;  %v407_v56 = vshll.u32 %v6675_v62, 16  ;;  %v413_v45 = vshll.u32 %v6682_v55, 16  ;;  %v6704_v61 = vld [vmem:[%s6390_s23 + $0xbc] sm:$0x1] }
  0x4d   : > { %v5113_v26 = vcombine.low %v392_v27, %v402_v18  ;;  %v579_v39 = vrot.slane %v578_v42, 4  ;;  %v588_v28 = vor.u32 %v587_v52, %v583_v50  ;;  %v406_v3 = vrot.slane %v404_v57, 4 }
  0x4e   : > { %v409_v32 = vrot.slane %v407_v56, 5  ;;  %v415_v4 = vrot.slane %v413_v45, 5  ;;  %v417_v0 = vshrl.u32 %v6682_v55, 16  ;;  %v423_v20 = vshll.u32 %v6685_v49, 16 }
  0x4f   : > { %5971 = vmatprep.mubr.msk.bf16.mxu0 %vm669_vm3, %v5113_v26  ;;  %v584_v59 = vsel %vm6434_vm4, %v579_v39, %v583_v50  ;;  %v589_v27 = vrot.slane %v588_v28, 4  ;;  %v596_v52 = vshrl.u32 %v6696_v54, 16  ;;  %v599_v42 = vshll.u32 %v6696_v54, 16 }
  0x50   : > { %v410_v57 = vor.u32 %v409_v32, %v406_v3  ;;  %v419_v18 = vrot.slane %v417_v0, 4  ;;  %v425_v56 = vrot.slane %v423_v20, 5  ;;  %v605_v45 = vshll.u32 %v6699_v37, 16 }
  0x51   : > { %v594_v44 = vsel %vm6434_vm4, %v589_v27, %v593_v13  ;;  %v598_v16 = vrot.slane %v596_v52, 4  ;;  %v601_v26 = vrot.slane %v599_v42, 5  ;;  %v609_v38 = vshrl.u32 %v6699_v37, 16 }
  0x52   : > { %v5121_v50 = vcombine.low %v584_v59, %v594_v44  ;;  %v411_v39 = vrot.slane %v410_v57, 4  ;;  %v420_v28 = vor.u32 %v419_v18, %v415_v4  ;;  %v607_v47 = vrot.slane %v605_v45, 5  ;;  %v1177_v57 = vld [vmem:[%s6390_s23 + $0x18] sm:$0xe] }
  0x53   : > { %v602_v54 = vor.u32 %v601_v26, %v598_v16  ;;  %v611_v3 = vrot.slane %v609_v38, 4  ;;  %v615_v32 = vshll.u32 %v6704_v61, 16  ;;  %v5171_v13 = vrot.slane %v1175_v22, 9 }
  0x54   : > { %5987 = vmatprep.mubr.msk.bf16.mxu1 %vm669_vm3, %v5121_v50  ;;  %v416_v44 = vsel %vm6434_vm4, %v411_v39, %v415_v4  ;;  %v421_v20 = vrot.slane %v420_v28, 4  ;;  %v1228_v59 = vrot.slane %v6399_v6, 5  ;;  %v5140_v38 = vcombine.low %v6427_v29, %v6430_v30 }
  0x55   : > { %v603_v16 = vrot.slane %v602_v54, 4  ;;  %v612_v27 = vor.u32 %v611_v3, %v607_v47  ;;  %v617_v52 = vrot.slane %v615_v32, 5  ;;  %v5172_v42 = vrot.slane %v1176_v51, 9 }
  0x56   : > { %v426_v18 = vsel %vm6434_vm4, %v421_v20, %v425_v56  ;;  %v1229_v22 = vsel %vm6720_vm7, %v5171_v13, %v1228_v59  ;;  %v1230_v45 = vrot.slane %v1228_v59, 4  ;;  %v8993_v4 = vrot.slane %v6430_v30, 5 }
  0x57   : > { %v5114_v50 = vcombine.low %v416_v44, %v426_v18  ;;  %v608_v54 = vsel %vm6434_vm4, %v603_v16, %v607_v47  ;;  %v613_v39 = vrot.slane %v612_v27, 4  ;;  %v5139_v51 = vcombine.low %v6396_v5, %v6399_v6  ;;  %v1178_v27 = vld [vmem:[%s6390_s23 + $0x24] sm:$0xe] }
  0x58   : > { %v1237_v26 = vrot.slane %v8993_v4, 4  ;;  %v8994_v28 = vrot.slane %v6402_v7, 5  ;;  %v8995_v3 = vmov %v8993_v4  ;;  %v5141_v13 = vcombine.low %v6469_v8, %v6476_v21  ;;  %v1180_v4 = vld [vmem:[%s6390_s23 + $0x3c] sm:$0xe] }
  0x59   : > { %v1236_v32 = vsel %vm6720_vm7, %v5172_v42, %v8995_v3  ;;  %v5173_v44 = vrot.slane %v1177_v57, 9  ;;  %5972 = vmatmul.mubr.msk.bf16.gmra.mxu0 %vm669_vm3, %v5114_v50  ;;  %v618_v47 = vsel %vm6434_vm4, %v613_v39, %v617_v52  ;;  %v8996_v6 = vrot.slane %v6440_v41, 5  ;;  %v1179_v42 = vld [vmem:[%s6390_s23 + $0x30] sm:$0xe]  ;;  %v1181_v39 = vld [vmem:[%s6390_s23 + $0x48] sm:$0xe] }
  0x5a   : > { %v1232_v56 = vsel %vm6720_vm7, %v1230_v45, %v8994_v28  ;;  %v1242_v20 = vrot.slane %v6476_v21, 5  ;;  %v5122_v59 = vcombine.low %v608_v54, %v618_v47  ;;  %v1245_v16 = vrot.slane %v6482_v25, 5  ;;  %v1182_v47 = vld [vmem:[%s6390_s23 + $0x54] sm:$0xe]  ;;  %v7015_v21 = vld [vmem:[%s6390_s23 + $0x2c] sm:$0x1] }
  0x5b   : > { %v5188_v5 = vcombine.low %v1229_v22, %v1232_v56  ;;  %v1239_v7 = vsel %vm6720_vm7, %v1237_v26, %v8996_v6  ;;  %v1796_v52 = vsel %vm718_vm0, %v6527_v19, 0  ;;  %v1249_v18 = vrot.slane %v6521_v10, 5 }
  0x5c   : > { %v1243_v41 = vsel %vm6720_vm7, %v5173_v44, %v1242_v20  ;;  %v1244_v57 = vrot.slane %v1242_v20, 4  ;;  %5988 = vmatmul.mubr.msk.bf16.gmra.mxu1 %vm669_vm3, %v5122_v59  ;;  %v5189_v22 = vcombine.low %v1236_v32, %v1239_v7  ;;  %v2522_v25 = vsel %vm718_vm0, %v6495_v40, 0 }
  0x5d   : > { %6027 = vmatprep.mubr.msk.bf16.mxu0 %vm669_vm3, %v5188_v5  ;;  %v1256_v45 = vrot.slane %v6567_v9, 5  ;;  %5993 = vmatprep.mubr.msk.bf16.mxu1 %vm669_vm3, %v5139_v51  ;;  %v5174_v26 = vrot.slane %v1178_v27, 9  ;;  %v1252_v50 = vrot.slane %v6532_v24, 5  ;;  %v5175_v54 = vrot.slane %v1179_v42, 9  ;;  %v6787_v24 = vld [vmem:[%s8941_s1 + $0xc] sm:$0x3] }
  0x5e   : > { %v1246_v19 = vsel %vm6720_vm7, %v1244_v57, %v1245_v16  ;;  %v1251_v56 = vrot.slane %v1249_v18, 4  ;;  %v1259_v32 = vrot.slane %v6575_v33, 5  ;;  %v5176_v44 = vrot.slane %v1180_v4, 9 }
  0x5f   : > { %v5190_v28 = vcombine.low %v1243_v41, %v1246_v19  ;;  %v1258_v3 = vrot.slane %v1256_v45, 4  ;;  %v1263_v40 = vrot.slane %v6604_v23, 5  ;;  %v1287_v5 = vrot.slane %v6416_v15, 5 }
  0x60   : > { %v1266_v51 = vrot.slane %v6613_v48, 5  ;;  %v5177_v6 = vrot.slane %v1181_v39, 9  ;;  %v1270_v7 = vrot.slane %v6641_v17, 5  ;;  %v5142_v33 = vcombine.low %v6513_v1, %v6521_v10  ;;  %v1183_v1 = vld [vmem:[%s6390_s23 + $0x60] sm:$0xe] }
  0x61   : > { %6028 = vmatmul.mubr.msk.bf16.vlgmr.msra.gmra.mxu0 %vm669_vm3, %v5189_v22  ;;  %v1250_v20 = vsel %vm6720_vm7, %v5174_v26, %v1249_v18  ;;  %v1265_v59 = vrot.slane %v1263_v40, 4  ;;  %v1273_v16 = vrot.slane %v6647_v2, 5  ;;  %v1253_v48 = vsel %vm6720_vm7, %v1251_v56, %v1252_v50  ;;  %v6815_v22 = vld [vmem:[%s8941_s1 + $0xa] sm:$0x3]  ;;  %v6840_v50 = vld [vmem:[%s6390_s23 + $0x6c] sm:$0xe] }
  0x62   : > { %6094 = vmatpush3.bf16.msra.mxu0 %v2522_v25  ;;  %6031 = vmatprep.mubr.msk.bf16.mxu0 %vm669_vm3, %v5190_v28  ;;  %v1257_v27 = vsel %vm6720_vm7, %v5175_v54, %v1256_v45  ;;  %v1260_v42 = vsel %vm6720_vm7, %v1258_v3, %v1259_v32  ;;  %v1272_v41 = vrot.slane %v1270_v7, 4  ;;  %v6805_v10 = vsel %vm6720_vm7, %v5176_v44, %v1263_v40  ;;  %v1186_v39 = vld [vmem:[%s6390_s23 + $0x84] sm:$0xe]  ;;  %v6869_v44 = vld [vmem:[%s6390_s23 + $0x78] sm:$0xe] }
  0x63   : > { %v6809_v2 = vsel %vm6720_vm7, %v5177_v6, %v1270_v7  ;;  %v5178_v57 = vrot.slane %v1182_v47, 9  ;;  %v1277_v18 = vrot.slane %v6682_v55, 5  ;;  %6272 = vmatprep.subr.msk.bf16.mxu0 %vm718_vm0, %v6787_v24  ;;  %v6825_v25 = vsel %vm6720_vm7, %v1265_v59, %v1266_v51  ;;  %v1187_v40 = vld [vmem:[%s6390_s23 + $0x90] sm:$0xe] }
  0x64   : > { %5994 = vmatmul.mubr.msk.bf16.vlgmr.msra.gmra.mxu1 %vm669_vm3, %v5140_v38  ;;  %v6829_v45 = vsel %vm6720_vm7, %v1272_v41, %v1273_v16  ;;  %v1280_v4 = vrot.slane %v6685_v49, 5  ;;  %v1284_v19 = vrot.slane %v6413_v14, 5  ;;  %v5191_v29 = vcombine.low %v1250_v20, %v1253_v48  ;;  %v8997_v48 = vld [vmem:[#allocation3_spill] sm:$0xff] }
  0x65   : > { %6060 = vmatpush3.bf16.msra.mxu1 %v1796_v52  ;;  %5997 = vmatprep.mubr.msk.bf16.mxu1 %vm669_vm3, %v5141_v13  ;;  %v5143_v30 = vcombine.low %v6562_v60, %v6567_v9  ;;  %v1279_v38 = vrot.slane %v1277_v18, 4  ;;  %v5179_v26 = vrot.slane %v1183_v1, 9  ;;  %v5192_v49 = vcombine.low %v1257_v27, %v1260_v42  ;;  %v1188_v42 = vld [vmem:[%s6390_s23 + $0x9c] sm:$0xe] }
  0x66   : > { %v5144_v52 = vcombine.low %v6599_v11, %v6604_v23  ;;  %v5145_v8 = vcombine.low %v6632_v34, %v6641_v17  ;;  %6271 = vmatprep.subr.msk.bf16.mxu1 %vm718_vm0, %v6815_v22  ;;  %v5193_v60 = vcombine.low %v6805_v10, %v6825_v25  ;;  %v5194_v9 = vcombine.low %v6809_v2, %v6829_v45  ;;  %v8998_v10 = vld [vmem:[#allocation5_spill] sm:$0xff]  ;;  %v8999_v2 = vld [vmem:[#allocation4_spill] sm:$0xff] }
  0x67   : > { %v1286_v54 = vrot.slane %v1284_v19, 4  ;;  %v6859_v28 = vsel %vm6720_vm7, %v5178_v57, %v1277_v18  ;;  %v6863_v56 = vsel %vm6720_vm7, %v1279_v38, %v1280_v4  ;;  %v5180_v32 = vrot.slane %v6840_v50, 9  ;;  %v1189_v18 = vld [vmem:[%s6390_s23 + $0xa8] sm:$0xe]  ;;  %v9001_v38 = vld [vmem:[#allocation8_spill] sm:$0xff] }
  0x68   : > { %v6875_v47 = vsel %vm6720_vm7, %v5179_v26, %v1284_v19  ;;  %v1291_v51 = vrot.slane %v6455_v58, 5  ;;  %v1294_v6 = vrot.slane %v6463_v63, 5  ;;  %v5182_v59 = vrot.slane %v1186_v39, 9  ;;  %v9000_v19 = vld [vmem:[#allocation6_spill] sm:$0xff]  ;;  %v9002_v26 = vld [vmem:[#allocation7_spill] sm:$0xff] }
  0x69   : > { %6032 = vmatmul.mubr.msk.bf16.gmra.mxu0 %vm669_vm3, %v5191_v29  ;;  %v1305_v16 = vrot.slane %v6546_v43, 5  ;;  %v1308_v27 = vrot.slane %v8997_v48, 5  ;;  %v5195_v41 = vcombine.low %v6859_v28, %v6863_v56  ;;  %v6893_v63 = vsel %vm6720_vm7, %v1286_v54, %v1287_v5  ;;  %v9004_v48 = vld [vmem:[#allocation11_spill] sm:$0xff] }
  0x6a   : > { %6035 = vmatprep.mubr.msk.bf16.mxu0 %vm669_vm3, %v5192_v49  ;;  %v5181_v1 = vrot.slane %v6869_v44, 9  ;;  %v5183_v4 = vrot.slane %v1187_v40, 9  ;;  %v1312_v15 = vrot.slane %v8998_v10, 5  ;;  %v1293_v5 = vrot.slane %v1291_v51, 4  ;;  %v5285_v57 = vld [vmem:[%s6390_s23 + $0xc] sm:$0xf] }
  0x6b   : > { %v6902_v25 = vsel %vm6720_vm7, %v5182_v59, %v1305_v16  ;;  %v1307_v45 = vrot.slane %v1305_v16, 4  ;;  %v1315_v29 = vrot.slane %v9000_v19, 5  ;;  %v5184_v49 = vrot.slane %v1188_v42, 9  ;;  %v9003_v59 = vld [vmem:[#allocation9_spill] sm:$0xff]  ;;  %v9005_v42 = vld [vmem:[#allocation10_spill] sm:$0xff] }
  0x6c   : > { %5998 = vmatmul.mubr.msk.bf16.gmra.mxu1 %vm669_vm3, %v5142_v33  ;;  %v1298_v33 = vrot.slane %v6500_v46, 5  ;;  %v6916_v39 = vsel %vm6720_vm7, %v5183_v4, %v1312_v15  ;;  %v1314_v44 = vrot.slane %v1312_v15, 4  ;;  %v1319_v40 = vrot.slane %v9001_v38, 5  ;;  %v9006_v15 = vld [vmem:[#allocation12_spill] sm:$0xff] }
  0x6d   : > { %6001 = vmatprep.mubr.msk.bf16.mxu1 %vm669_vm3, %v5143_v30  ;;  %v6912_v54 = vsel %vm6720_vm7, %v1307_v45, %v1308_v27  ;;  %v1322_v16 = vrot.slane %v9003_v59, 5  ;;  %v5185_v45 = vrot.slane %v1189_v18, 9  ;;  %v1326_v4 = vrot.slane %v9004_v48, 5 }
  0x6e   : > { %v6926_v27 = vsel %vm6720_vm7, %v1314_v44, %v1315_v29  ;;  %v1329_v50 = vrot.slane %v9006_v15, 5  ;;  %v6936_v19 = vsel %vm6720_vm7, %v5184_v49, %v1319_v40  ;;  %v1321_v7 = vrot.slane %v1319_v40, 4  ;;  %v9007_v29 = vld [vmem:[#allocation13_spill] sm:$0xff]  ;;  %v9008_v15 = vld [vmem:[#allocation2_spill] sm:$0xff]  ;;  %v6951_v49 = vld [vmem:[%s6390_s23 + $0x10] sm:$0xf] }
  0x6f   : > { %v6943_v18 = vsel %vm6720_vm7, %v5180_v32, %v1291_v51  ;;  %v6948_v59 = vsel %vm6720_vm7, %v5185_v45, %v1326_v4  ;;  %v1328_v30 = vrot.slane %v1326_v4, 4  ;;  %v5288_v40 = vld [vmem:[%s6390_s23 + $0x18] sm:$0xf]  ;;  %v1300_v20 = vrot.slane %v1298_v33, 4 }
  0x70   : > { %v2040_v44 = vshrl.u32 %v5285_v57, 16  ;;  %v2043_v32 = vshll.u32 %v5285_v57, 16  ;;  %v5196_v51 = vcombine.low %v6875_v47, %v6893_v63  ;;  %v6966_v45 = vsel %vm6720_vm7, %v1293_v5, %v1294_v6  ;;  %v1190_v57 = vld [vmem:[%s6390_s23 + $0xb4] sm:$0xe]  ;;  %v6987_v47 = vld [vmem:[%s6390_s23 + $0x14] sm:$0x1] }
  0x71   : > { %6036 = vmatmul.mubr.msk.bf16.gmra.mxu0 %vm669_vm3, %v5193_v60  ;;  %v1301_v60 = vrot.slane %v9008_v15, 5  ;;  %v6981_v11 = vsel %vm6720_vm7, %v5181_v1, %v1298_v33  ;;  %v2049_v6 = vshll.u32 %v6951_v49, 16  ;;  %v5289_v63 = vld [vmem:[%s6390_s23 + $0x1c] sm:$0xf]  ;;  %v2053_v17 = vshrl.u32 %v6951_v49, 16 }
  0x72   : > { %6039 = vmatprep.mubr.msk.bf16.mxu0 %vm669_vm3, %v5194_v9  ;;  %v6956_v9 = vsel %vm6720_vm7, %v1321_v7, %v1322_v16  ;;  %v6972_v7 = vsel %vm6720_vm7, %v1328_v30, %v1329_v50  ;;  %v2042_v5 = vrot.slane %v2040_v44, 4  ;;  %v2045_v34 = vrot.slane %v2043_v32, 5  ;;  %v5291_v15 = vld [vmem:[%s6390_s23 + $0x24] sm:$0xf]  ;;  %v7000_v44 = vld [vmem:[%s6390_s23 + $0x28] sm:$0xf] }
  0x73   : > { %v2064_v50 = vshrl.u32 %v5288_v40, 16  ;;  %v1302_v1 = vsel %vm6720_vm7, %v1300_v20, %v1301_v60  ;;  %v5186_v33 = vrot.slane %v1190_v57, 9  ;;  %v6995_v30 = vrot.slane %v2049_v6, 5 }
  0x74   : > { %6002 = vmatmul.mubr.msk.bf16.gmra.mxu1 %vm669_vm3, %v5144_v52  ;;  %v1333_v52 = vrot.slane %v6699_v37, 5  ;;  %v2067_v16 = vshll.u32 %v5288_v40, 16  ;;  %v1336_v23 = vrot.slane %v6704_v61, 5  ;;  %v2055_v4 = vrot.slane %v2053_v17, 4 }
  0x75   : > { %6005 = vmatprep.mubr.msk.bf16.mxu1 %vm669_vm3, %v5145_v8  ;;  %v5290_v8 = vld [vmem:[%s6390_s23 + $0x20] sm:$0x1]  ;;  %v2066_v3 = vrot.slane %v2064_v50, 4  ;;  %v2073_v13 = vshll.u32 %v5289_v63, 16  ;;  %v2059_v20 = vshll.u32 %v6987_v47, 16  ;;  %v2077_v57 = vshrl.u32 %v5289_v63, 16 }
  0x76   : > { %v1335_v32 = vrot.slane %v1333_v52, 4  ;;  %v2069_v60 = vrot.slane %v2067_v16, 5  ;;  %v5197_v61 = vcombine.low %v6943_v18, %v6966_v45  ;;  %v5198_v40 = vcombine.low %v6981_v11, %v1302_v1 }
  0x77   : > { %v2046_v6 = vor.u32 %v2045_v34, %v2042_v5  ;;  %v7011_v17 = vrot.slane %v2073_v13, 5  ;;  %v2056_v28 = vor.u32 %v2055_v4, %v6995_v30  ;;  %v2083_v50 = vshll.u32 %v5290_v8, 16  ;;  %v7038_v5 = vld [vmem:[%s6390_s23 + $0x34] sm:$0xf] }
  0x78   : > { %v2070_v56 = vor.u32 %v2069_v60, %v2066_v3  ;;  %v7023_v18 = vsel %vm6720_vm7, %v5186_v33, %v1333_v52  ;;  %v2088_v13 = vshrl.u32 %v5291_v15, 16  ;;  %v2091_v45 = vshll.u32 %v5291_v15, 16  ;;  %v5294_v52 = vld [vmem:[%s6390_s23 + $0x30] sm:$0xf] }
  0x79   : > { %6040 = vmatmul.mubr.msk.bf16.gmra.mxu0 %vm669_vm3, %v5195_v41  ;;  %v2079_v41 = vrot.slane %v2077_v57, 4  ;;  %v2097_v11 = vshll.u32 %v7000_v44, 16  ;;  %v9010_v3 = vcombine.low %v6409_v12, %v6413_v14  ;;  %v7032_v4 = vsel %vm6720_vm7, %v1335_v32, %v1336_v23 }
  0x7a   : > { %6043 = vmatprep.mubr.msk.bf16.mxu0 %vm669_vm3, %v5196_v51  ;;  %v9009_v51 = vcombine.low %v6675_v62, %v6682_v55  ;;  %v2061_v62 = vrot.slane %v2059_v20, 5  ;;  %v2101_v63 = vshrl.u32 %v7000_v44, 16  ;;  %v2047_v34 = vrot.slane %v2046_v6, 4 }
  0x7b   : > { %v2080_v55 = vor.u32 %v2079_v41, %v7011_v17  ;;  %v2090_v8 = vrot.slane %v2088_v13, 4  ;;  %v2093_v1 = vrot.slane %v2091_v45, 5  ;;  %v7040_v33 = vrot.slane %v2097_v11, 5  ;;  %v7046_v41 = vld [vmem:[%s6390_s23 + $0x38] sm:$0x1] }
  0x7c   : > { %6006 = vmatmul.mubr.msk.bf16.gmra.mxu1 %vm669_vm3, %v9009_v51  ;;  %v2057_v12 = vrot.slane %v2056_v28, 4  ;;  %v2071_v14 = vrot.slane %v2070_v56, 4  ;;  %v2085_v16 = vrot.slane %v2083_v50, 5  ;;  %v2103_v23 = vrot.slane %v2101_v63, 4  ;;  %v5297_v13 = vld [vmem:[%s6390_s23 + $0x3c] sm:$0xf] }
  0x7d   : > { %6009 = vmatprep.mubr.msk.bf16.mxu1 %vm669_vm3, %v9010_v3  ;;  %v2081_v15 = vrot.slane %v2080_v55, 4  ;;  %v2107_v32 = vshll.u32 %v7015_v21, 16  ;;  %v2112_v20 = vshrl.u32 %v5294_v52, 16  ;;  %v2115_v60 = vshll.u32 %v5294_v52, 16 }
  0x7e   : > { %v2094_v57 = vor.u32 %v2093_v1, %v2090_v8  ;;  %v2104_v6 = vor.u32 %v2103_v23, %v7040_v33  ;;  %v2121_v28 = vshll.u32 %v7038_v5, 16  ;;  %v2125_v56 = vshrl.u32 %v7038_v5, 16  ;;  %v5300_v8 = vld [vmem:[%s6390_s23 + $0x48] sm:$0xf]  ;;  %v7073_v1 = vld [vmem:[%s6390_s23 + $0x4c] sm:$0xf] }
  0x7f   : > { %v2114_v50 = vrot.slane %v2112_v20, 4  ;;  %v2117_v51 = vrot.slane %v2115_v60, 5  ;;  %v9011_v3 = vcombine.low %v6451_v53, %v6455_v58  ;;  %v5203_v55 = vcombine.low %v7023_v18, %v7032_v4 }
  0x80   : > { %v7052_v45 = vrot.slane %v2121_v28, 5  ;;  %v2127_v11 = vrot.slane %v2125_v56, 4  ;;  %v2062_v63 = vsel %vm6434_vm4, %v2057_v12, %v2061_v62  ;;  %v2076_v52 = vsel %vm6434_vm4, %v2071_v14, %v7011_v17 }
  0x81   : > { %6044 = vmatmul.mubr.msk.bf16.gmra.mxu0 %vm669_vm3, %v5197_v61  ;;  %v7055_v61 = vld [vmem:[%s6390_s23 + $0x40] sm:$0xf]  ;;  %v9012_v53 = vcombine.low %v6489_v35, %v6500_v46  ;;  %v2086_v58 = vsel %vm6434_vm4, %v2081_v15, %v2085_v16  ;;  %v2095_v23 = vrot.slane %v2094_v57, 4  ;;  %v2118_v20 = vor.u32 %v2117_v51, %v2114_v50  ;;  %v7107_v50 = vld [vmem:[%s6390_s23 + $0x44] sm:$0x1] }
  0x82   : > { %6047 = vmatprep.mubr.msk.bf16.mxu0 %vm669_vm3, %v5198_v40  ;;  %v2052_v40 = vsel %vm6434_vm4, %v2047_v34, %v6995_v30  ;;  %v2105_v30 = vrot.slane %v2104_v6, 4  ;;  %v2109_v34 = vrot.slane %v2107_v32, 5  ;;  %v2131_v62 = vshll.u32 %v7046_v41, 16  ;;  %v5303_v51 = vld [vmem:[%s6390_s23 + $0x54] sm:$0xf] }
  0x83   : > { %v2136_v12 = vshrl.u32 %v5297_v13, 16  ;;  %v2139_v17 = vshll.u32 %v5297_v13, 16  ;;  %v7084_v14 = vsel %vm718_vm0, %v6815_v22, 0  ;;  %v2128_v35 = vor.u32 %v2127_v11, %v7052_v45 }
  0x84   : > { %6010 = vmatmul.mubr.msk.bf16.gmra.mxu1 %vm669_vm3, %v9011_v3  ;;  %v2145_v46 = vshll.u32 %v7055_v61, 16  ;;  %v2149_v16 = vshrl.u32 %v7055_v61, 16  ;;  %v7089_v15 = vcombine.low %v2052_v40, %v2062_v63  ;;  %v7093_v32 = vsel %vm718_vm0, %v6787_v24, 0  ;;  %v7116_v40 = vld [vmem:[%s6390_s23 + $0x58] sm:$0xf] }
  0x85   : > { %6013 = vmatprep.mubr.msk.bf16.mxu1 %vm669_vm3, %v9012_v53  ;;  %v2160_v60 = vshrl.u32 %v5300_v8, 16  ;;  %v2163_v57 = vshll.u32 %v5300_v8, 16  ;;  %v9013_v6 = vcombine.low %v6902_v25, %v6912_v54  ;;  %v7099_v22 = vcombine.low %v2076_v52, %v2086_v58  ;;  %v7121_v8 = vld [vmem:[%s6390_s23 + $0x50] sm:$0x1] }
  0x86   : > { %v2100_v28 = vsel %vm6434_vm4, %v2095_v23, %v7040_v33  ;;  %v2110_v56 = vsel %vm6434_vm4, %v2105_v30, %v2109_v34  ;;  %v2169_v24 = vshll.u32 %v7073_v1, 16  ;;  %v9014_v25 = vcombine.low %v6916_v39, %v6926_v27  ;;  %v5306_v34 = vld [vmem:[%s6390_s23 + $0x60] sm:$0xf] }
  0x87   : > { %v2119_v54 = vrot.slane %v2118_v20, 4  ;;  %v2133_v13 = vrot.slane %v2131_v62, 5  ;;  %v2138_v11 = vrot.slane %v2136_v12, 4  ;;  %v2141_v3 = vrot.slane %v2139_v17, 5 }
  0x88   : > { %v2129_v33 = vrot.slane %v2128_v35, 4  ;;  %v7118_v63 = vrot.slane %v2145_v46, 5  ;;  %v2151_v52 = vrot.slane %v2149_v16, 4  ;;  %v2173_v53 = vshrl.u32 %v7073_v1, 16  ;;  %v7138_v35 = vld [vmem:[%s6390_s23 + $0x5c] sm:$0x1] }
  0x89   : > { %6048 = vmatmul.mubr.msk.bf16.gmra.mxu0 %vm669_vm3, %v9013_v6  ;;  %v9015_v39 = vcombine.low %v6539_v36, %v6546_v43  ;;  %v2162_v27 = vrot.slane %v2160_v60, 4  ;;  %v2165_v58 = vrot.slane %v2163_v57, 5  ;;  %v2184_v23 = vshrl.u32 %v5303_v51, 16 }
  0x8a   : > { %6051 = vmatprep.mubr.msk.bf16.mxu0 %vm669_vm3, %v9014_v25  ;;  %v2187_v30 = vshll.u32 %v5303_v51, 16  ;;  %v9016_v20 = vcombine.low %v8999_v2, %v8998_v10  ;;  %v7133_v62 = vcombine.low %v2100_v28, %v2110_v56  ;;  %v7135_v12 = vrot.slane %v2169_v24, 5  ;;  %v7151_v28 = vld [vmem:[%s6390_s23 + $0x64] sm:$0xf] }
  0x8b   : > { %v2175_v17 = vrot.slane %v2173_v53, 4  ;;  %v2193_v36 = vshll.u32 %v7116_v40, 16  ;;  %v2155_v43 = vshll.u32 %v7107_v50, 16  ;;  %v2186_v46 = vrot.slane %v2184_v23, 4 }
  0x8c   : > { %6014 = vmatmul.mubr.msk.bf16.gmra.mxu1 %vm669_vm3, %v9015_v39  ;;  %v2189_v16 = vrot.slane %v2187_v30, 5  ;;  %v2197_v60 = vshrl.u32 %v7116_v40, 16  ;;  %v2124_v10 = vsel %vm6434_vm4, %v2119_v54, %v7052_v45  ;;  %v2134_v2 = vsel %vm6434_vm4, %v2129_v33, %v2133_v13  ;;  %v7173_v30 = vld [vmem:[%s6390_s23 + $0x68] sm:$0x1] }
  0x8d   : > { %6017 = vmatprep.mubr.msk.bf16.mxu1 %vm669_vm3, %v9016_v20  ;;  %v2142_v57 = vor.u32 %v2141_v3, %v2138_v11  ;;  %v7148_v6 = vrot.slane %v2193_v36, 5  ;;  %v2152_v56 = vor.u32 %v2151_v52, %v7118_v63  ;;  %v2166_v24 = vor.u32 %v2165_v58, %v2162_v27  ;;  %v5309_v3 = vld [vmem:[%s6390_s23 + $0x6c] sm:$0xf]  ;;  %v7170_v27 = vld [vmem:[%s6390_s23 + $0x70] sm:$0xf] }
  0x8e   : > { %v2179_v51 = vshll.u32 %v7121_v8, 16  ;;  %v2199_v25 = vrot.slane %v2197_v60, 4  ;;  %v9017_v53 = vcombine.low %v6936_v19, %v6956_v9  ;;  %v2176_v45 = vor.u32 %v2175_v17, %v7135_v12 }
  0x8f   : > { %v2190_v54 = vor.u32 %v2189_v16, %v2186_v46  ;;  %v2208_v13 = vshrl.u32 %v5306_v34, 16  ;;  %v2211_v11 = vshll.u32 %v5306_v34, 16  ;;  %v9018_v33 = vcombine.low %v6948_v59, %v6972_v7  ;;  %v5312_v16 = vld [vmem:[%s6390_s23 + $0x78] sm:$0xf] }
  0x90   : > { %v2200_v52 = vor.u32 %v2199_v25, %v7148_v6  ;;  %v2203_v39 = vshll.u32 %v7138_v35, 16  ;;  %v2217_v19 = vshll.u32 %v7151_v28, 16  ;;  %v2221_v9 = vshrl.u32 %v7151_v28, 16 }
  0x91   : > { %6052 = vmatmul.mubr.msk.bf16.gmra.mxu0 %vm669_vm3, %v9017_v53  ;;  %v2143_v58 = vrot.slane %v2142_v57, 4  ;;  %v2157_v23 = vrot.slane %v2155_v43, 5  ;;  %v2210_v34 = vrot.slane %v2208_v13, 4  ;;  %v2213_v20 = vrot.slane %v2211_v11, 5 }
  0x92   : > { %6055 = vmatprep.mubr.msk.bf16.mxu0 %vm669_vm3, %v9018_v33  ;;  %v9019_v59 = vcombine.low %v9002_v26, %v9001_v38  ;;  %v7179_v7 = vcombine.low %v2124_v10, %v2134_v2  ;;  %v2153_v17 = vrot.slane %v2152_v56, 4  ;;  %v2167_v36 = vrot.slane %v2166_v24, 4  ;;  %v7189_v2 = vld [vmem:[%s6390_s23 + $0x7c] sm:$0xf] }
  0x93   : > { %v7181_v46 = vrot.slane %v2217_v19, 5  ;;  %v9020_v43 = vcombine.low %v9005_v42, %v9004_v48  ;;  %v2177_v60 = vrot.slane %v2176_v45, 4  ;;  %v2181_v57 = vrot.slane %v2179_v51, 5  ;;  %9021 = vst [vmem:[#allocation3_spill] sm:$0xff] %v7189_v2  ;;  %v5315_v19 = vld [vmem:[%s6390_s23 + $0x84] sm:$0xf] }
  0x94   : > { %6018 = vmatmul.mubr.msk.bf16.gmra.mxu1 %vm669_vm3, %v9019_v59  ;;  %v2191_v25 = vrot.slane %v2190_v54, 4  ;;  %v2223_v38 = vrot.slane %v2221_v9, 4  ;;  %v2201_v26 = vrot.slane %v2200_v52, 4  ;;  %v2205_v53 = vrot.slane %v2203_v39, 5 }
  0x95   : > { %6021 = vmatprep.mubr.msk.bf16.mxu1 %vm669_vm3, %v9020_v43  ;;  %v2214_v13 = vor.u32 %v2213_v20, %v2210_v34  ;;  %v2232_v10 = vshrl.u32 %v5309_v3, 16  ;;  %v2148_v56 = vsel %vm6434_vm4, %v2143_v58, %v7118_v63  ;;  %v2235_v24 = vshll.u32 %v5309_v3, 16  ;;  %v6300_v63 = vld [vmem:[%s6390_s23 + $0xc] sm:$0xff]   ;;  %v7223_v34 = vld [vmem:[%s6390_s23 + $0x88] sm:$0xf] }
  0x96   : > { %v2241_v48 = vshll.u32 %v7170_v27, 16  ;;  %v2245_v42 = vshrl.u32 %v7170_v27, 16  ;;  %v2158_v51 = vsel %vm6434_vm4, %v2153_v17, %v2157_v23  ;;  %v2172_v45 = vsel %vm6434_vm4, %v2167_v36, %v7135_v12  ;;  %9022 = vst [vmem:[#allocation5_spill] sm:$0xff] %v7223_v34  ;;  %v7232_v36 = vld [vmem:[%s6390_s23 + $0x74] sm:$0x1] }
  0x97   : > { %v2224_v54 = vor.u32 %v2223_v38, %v7181_v46  ;;  %v2227_v11 = vshll.u32 %v7173_v30, 16  ;;  %v2182_v3 = vsel %vm6434_vm4, %v2177_v60, %v2181_v57  ;;  %v2196_v33 = vsel %vm6434_vm4, %v2191_v25, %v7148_v6  ;;  %9024 = vst [vmem:[#allocation4_spill] sm:$0xff] %v7232_v36  ;;  %v7242_v38 = vld [vmem:[%s6390_s23 + $0x80] sm:$0x1] }
  0x98   : > { %v2256_v52 = vshrl.u32 %v5312_v16, 16  ;;  %v2259_v12 = vshll.u32 %v5312_v16, 16  ;;  %v2206_v18 = vsel %vm6434_vm4, %v2201_v26, %v2205_v53  ;;  %v2215_v4 = vrot.slane %v2214_v13, 4  ;;  %9025 = vst [vmem:[#allocation6_spill] sm:$0xff] %v7242_v38  ;;  %v7245_v26 = vld [vmem:[%s6390_s23 + $0x8c] sm:$0x1] }
  0x99   : > { %6056 = vmatmul.mubr.msk.bf16.gmra.mxu0 %vm669_vm3, %v5203_v55  ;;  %v2234_v55 = vrot.slane %v2232_v10, 4  ;;  %v2265_v39 = vshll.u32 %v7189_v2, 16  ;;  %v2237_v9 = vrot.slane %v2235_v24, 5  ;;  %v7219_v58 = vrot.slane %v2241_v48, 5  ;;  %9026 = vst [vmem:[#allocation8_spill] sm:$0xff] %v7245_v26  ;;  %v6301_v10 = vld [vmem:[%s6390_s23 + $0x18] sm:$0xff]  }
  0x9a   : > { %6095 = vmatprep.mubr.msk.bf16.mxu0 %vm669_vm3, %v7089_v15  ;;  %v2247_v23 = vrot.slane %v2245_v42, 4  ;;  %v2269_v6 = vshrl.u32 %v7189_v2, 16  ;;  %v9023_v15 = vcombine.low %v9007_v29, %v6699_v37  ;;  %v7229_v20 = vcombine.low %v2148_v56, %v2158_v51  ;;  %v5318_v51 = vld [vmem:[%s6390_s23 + $0x90] sm:$0xf] }
  0x9b   : > { %v2225_v59 = vrot.slane %v2224_v54, 4  ;;  %v2229_v17 = vrot.slane %v2227_v11, 5  ;;  %v2258_v16 = vrot.slane %v2256_v52, 4  ;;  %v2261_v43 = vrot.slane %v2259_v12, 5 }
  0x9c   : > { %6022 = vmatmul.mubr.msk.bf16.gmra.mxu1 %vm669_vm3, %v9023_v15  ;;  %v7235_v60 = vrot.slane %v2265_v39, 5  ;;  %v2271_v57 = vrot.slane %v2269_v6, 4  ;;  %v2280_v25 = vshrl.u32 %v5315_v19, 16  ;;  %v7237_v37 = vcombine.low %v2172_v45, %v2182_v3  ;;  %v7256_v45 = vld [vmem:[%s6390_s23 + $0x94] sm:$0xf] }
  0x9d   : > { %6061 = vmatprep.mubr.msk.bf16.mxu1 %vm669_vm3, %v6300_v63  ;;  %v7239_v29 = vcombine.low %v2196_v33, %v2206_v18  ;;  %v2283_v53 = vshll.u32 %v5315_v19, 16  ;;  %v2289_v13 = vshll.u32 %v7223_v34, 16  ;;  %v2220_v56 = vsel %vm6434_vm4, %v2215_v4, %v7181_v46  ;;  %9027 = vst [vmem:[#allocation7_spill] sm:$0xff] %v7256_v45  ;;  %v7264_v33 = vld [vmem:[%s8941_s1 + $0x10] sm:$0x3]  ;;  %v6302_v46 = vld [vmem:[%s6390_s23 + $0x24] sm:$0xff]  }
  0x9e   : > { %v2238_v24 = vor.u32 %v2237_v9, %v2234_v55  ;;  %v2248_v48 = vor.u32 %v2247_v23, %v7219_v58  ;;  %v2251_v42 = vshll.u32 %v7232_v36, 16  ;;  %v2282_v54 = vrot.slane %v2280_v25, 4  ;;  %9028 = vst [vmem:[#allocation9_spill] sm:$0xff] %v7264_v33 }
  0x9f   : > { %v2285_v11 = vrot.slane %v2283_v53, 5  ;;  %v7258_v63 = vrot.slane %v2289_v13, 5  ;;  %v2293_v3 = vshrl.u32 %v7223_v34, 16  ;;  %v2230_v52 = vsel %vm6434_vm4, %v2225_v59, %v2229_v17 }
  0xa0   : > { %v2262_v12 = vor.u32 %v2261_v43, %v2258_v16  ;;  %v2272_v18 = vor.u32 %v2271_v57, %v7235_v60  ;;  %v2275_v4 = vshll.u32 %v7242_v38, 16  ;;  %v2304_v19 = vshrl.u32 %v5318_v51, 16  ;;  %v7298_v57 = vld [vmem:[%s6390_s23 + $0xa0] sm:$0xf] }
  0xa1   : > { %6096 = vmatmul.mubr.msk.bf16.vlgmr.msra.gmra.mxu0 %vm669_vm3, %v7099_v22  ;;  %v2286_v55 = vor.u32 %v2285_v11, %v2282_v54  ;;  %v2295_v39 = vrot.slane %v2293_v3, 4  ;;  %v2307_v9 = vshll.u32 %v5318_v51, 16  ;;  %v5321_v22 = vld [vmem:[%s6390_s23 + $0x9c] sm:$0xf]  ;;  %v7277_v23 = vrot.slane %v2238_v24, 4  ;;  %9030 = vst [vmem:[#allocation10_spill] sm:$0xff] %v7298_v57 }
  0xa2   : > { %6162 = vmatpush3.bf16.msra.mxu0 %v7093_v32  ;;  %6099 = vmatprep.mubr.msk.bf16.mxu0 %vm669_vm3, %v7133_v62  ;;  %v7279_v6 = vrot.slane %v2251_v42, 5  ;;  %v2299_v15 = vshll.u32 %v7245_v26, 16  ;;  %v2313_v59 = vshll.u32 %v7256_v45, 16  ;;  %v7286_v32 = vld [vmem:[%s8941_s1 + $0xe] sm:$0x3]  ;;  %v7291_v62 = vcombine.low %v2220_v56, %v2230_v52 }
  0xa3   : > { %9029 = vst [vmem:[#allocation11_spill] sm:$0xff] %v7286_v32  ;;  %6274 = vmatprep.subr.msk.bf16.mxu0 %vm718_vm0, %v7264_v33  ;;  %v7293_v17 = vrot.slane %v2248_v48, 4  ;;  %v2296_v16 = vor.u32 %v2295_v39, %v7258_v63  ;;  %v2317_v43 = vshrl.u32 %v7256_v45, 16  ;;  %v7302_v25 = vrot.slane %v2262_v12, 4  ;;  %v7311_v56 = vld [vmem:[%s6390_s23 + $0x98] sm:$0x1] }
  0xa4   : > { %6062 = vmatmul.mubr.msk.bf16.vlgmr.msra.gmra.mxu1 %vm669_vm3, %v6301_v10  ;;  %v7304_v53 = vrot.slane %v2272_v18, 4  ;;  %v7306_v13 = vrot.slane %v2275_v4, 5  ;;  %v7308_v10 = vrot.slane %v2286_v55, 4  ;;  %9031 = vst [vmem:[#allocation12_spill] sm:$0xff] %v7311_v56  ;;  %v2306_v24 = vrot.slane %v2304_v19, 4  ;;  %v6304_v19 = vld [vmem:[%s6390_s23 + $0x3c] sm:$0xff]  }
  0xa5   : > { %6128 = vmatpush3.bf16.msra.mxu1 %v7084_v14  ;;  %6065 = vmatprep.mubr.msk.bf16.mxu1 %vm669_vm3, %v6302_v46  ;;  %v2309_v48 = vrot.slane %v2307_v9, 5  ;;  %v2328_v42 = vshrl.u32 %v5321_v22, 16  ;;  %v2331_v51 = vshll.u32 %v5321_v22, 16  ;;  %v6303_v14 = vld [vmem:[%s6390_s23 + $0x30] sm:$0xff]   ;;  %v7320_v11 = vrot.slane %v2299_v15, 5 }
  0xa6   : > { %6273 = vmatprep.subr.msk.bf16.mxu1 %vm718_vm0, %v7286_v32  ;;  %v7322_v3 = vrot.slane %v2313_v59, 5  ;;  %v2337_v46 = vshll.u32 %v7298_v57, 16  ;;  %v5324_v52 = vld [vmem:[%s6390_s23 + $0xa8] sm:$0xf]  ;;  %v7326_v12 = vrot.slane %v2296_v16, 4  ;;  %v2319_v18 = vrot.slane %v2317_v43, 4 }
  0xa7   : > { %v2323_v4 = vshll.u32 %v7311_v56, 16  ;;  %v2341_v55 = vshrl.u32 %v7298_v57, 16  ;;  %v7331_v39 = vld [vmem:[%s6390_s23 + $0xac] sm:$0xf]  ;;  %v2310_v59 = vor.u32 %v2309_v48, %v2306_v24  ;;  %v7355_v16 = vld [vmem:[%s6390_s23 + $0xa4] sm:$0x1] }
  0xa8   : > { %9032 = vst [vmem:[#allocation13_spill] sm:$0xff] %v7331_v39  ;;  %9033 = vst [vmem:[#allocation2_spill] sm:$0xff] %v7355_v16  ;;  %v2330_v43 = vrot.slane %v2328_v42, 4  ;;  %v2333_v22 = vrot.slane %v2331_v51, 5  ;;  %v2352_v54 = vshrl.u32 %v5324_v52, 16  ;;  %v7357_v9 = vrot.slane %v2337_v46, 5 }
  0xa9   : > { %6100 = vmatmul.mubr.msk.bf16.gmra.mxu0 %vm669_vm3, %v7179_v7  ;;  %v2343_v32 = vrot.slane %v2341_v55, 4  ;;  %v2355_v15 = vshll.u32 %v5324_v52, 16  ;;  %v2361_v33 = vshll.u32 %v7331_v39, 16  ;;  %v5327_v57 = vld [vmem:[%s6390_s23 + $0xb4] sm:$0xf]  ;;  %v2320_v24 = vor.u32 %v2319_v18, %v7322_v3 }
  0xaa   : > { %6103 = vmatprep.mubr.msk.bf16.mxu0 %vm669_vm3, %v7229_v20  ;;  %v2302_v20 = vsel %vm6434_vm4, %v7326_v12, %v7320_v11  ;;  %v7367_v48 = vrot.slane %v2323_v4, 5  ;;  %v7370_v42 = vld [vmem:[%s6390_s23 + $0xb0] sm:$0x1]  ;;  %v2354_v51 = vrot.slane %v2352_v54, 4  ;;  %v7373_v46 = vld [vmem:[%s6390_s23 + $0xb8] sm:$0xf]  ;;  %v2334_v18 = vor.u32 %v2333_v22, %v2330_v43 }
  0xab   : > { %9034 = vst [vmem:[#allocation14_spill] sm:$0xff] %v7370_v42  ;;  %9035 = vst [vmem:[#allocation15_spill] sm:$0xff] %v7373_v46  ;;  %v2357_v52 = vrot.slane %v2355_v15, 5  ;;  %v7377_v55 = vrot.slane %v2361_v33, 5  ;;  %v2365_v11 = vshrl.u32 %v7331_v39, 16  ;;  %v7380_v12 = vrot.slane %v2310_v59, 4 }
  0xac   : > { %6066 = vmatmul.mubr.msk.bf16.gmra.mxu1 %vm669_vm3, %v6303_v14  ;;  %v2347_v14 = vshll.u32 %v7355_v16, 16  ;;  %v7383_v4 = vld [vmem:[%s6390_s23 + $0xbc] sm:$0x1]  ;;  %v2376_v54 = vshrl.u32 %v5327_v57, 16  ;;  %v2379_v7 = vshll.u32 %v5327_v57, 16  ;;  %v2344_v56 = vor.u32 %v2343_v32, %v7357_v9  ;;  %v6305_v16 = vld [vmem:[%s6390_s23 + $0x48] sm:$0xff]  }
  0xad   : > { %6069 = vmatprep.mubr.msk.bf16.mxu1 %vm669_vm3, %v6304_v19  ;;  %v2367_v45 = vrot.slane %v2365_v11, 4  ;;  %v2371_v19 = vshll.u32 %v7370_v42, 16  ;;  %v2385_v15 = vshll.u32 %v7373_v46, 16  ;;  %v5330_v33 = vld [vmem:[%s6390_s23 + $0xc0] sm:$0xf]  ;;  %v2358_v26 = vor.u32 %v2357_v52, %v2354_v51  ;;  %v6306_v57 = vld [vmem:[%s6390_s23 + $0x54] sm:$0xff]  }
  0xae   : > { %v2378_v39 = vrot.slane %v2376_v54, 4  ;;  %v2381_v34 = vrot.slane %v2379_v7, 5  ;;  %v2389_v59 = vshrl.u32 %v7373_v46, 16  ;;  %v7392_v22 = vld [vmem:[%s6390_s23 + $0xc4] sm:$0xf]  ;;  %v2321_v43 = vrot.slane %v2320_v24, 4 }
  0xaf   : > { %v2349_v32 = vrot.slane %v2347_v14, 5  ;;  %v2368_v11 = vor.u32 %v2367_v45, %v7377_v55  ;;  %v2387_v42 = vrot.slane %v2385_v15, 5  ;;  %v2395_v7 = vshll.u32 %v7383_v4, 16  ;;  %v7404_v45 = vld [vmem:[%s6390_s23 + $0xc8] sm:$0x1] }
  0xb0   : > { %v2382_v51 = vor.u32 %v2381_v34, %v2378_v39  ;;  %v2391_v52 = vrot.slane %v2389_v59, 4  ;;  %v2400_v54 = vshrl.u32 %v5330_v33, 16  ;;  %v2335_v46 = vrot.slane %v2334_v18, 4 }
  0xb1   : > { %6104 = vmatmul.mubr.msk.bf16.gmra.mxu0 %vm669_vm3, %v7237_v37  ;;  %v2345_v38 = vrot.slane %v2344_v56, 4  ;;  %v2403_v2 = vshll.u32 %v5330_v33, 16  ;;  %v2409_v37 = vshll.u32 %v7392_v22, 16  ;;  %v2359_v24 = vrot.slane %v2358_v26, 4 }
  0xb2   : > { %6107 = vmatprep.mubr.msk.bf16.mxu0 %vm669_vm3, %v7239_v29  ;;  %v2373_v14 = vrot.slane %v2371_v19, 5  ;;  %v2392_v36 = vor.u32 %v2391_v52, %v2387_v42  ;;  %v2402_v15 = vrot.slane %v2400_v54, 4  ;;  %v2369_v34 = vrot.slane %v2368_v11, 4 }
  0xb3   : > { %v2405_v29 = vrot.slane %v2403_v2, 5  ;;  %v7407_v39 = vrot.slane %v2409_v37, 5  ;;  %v2413_v56 = vshrl.u32 %v7392_v22, 16  ;;  %v9036_v26 = vsel %vm6434_vm4, %v7293_v17, %v7279_v6 }
  0xb4   : > { %6070 = vmatmul.mubr.msk.bf16.gmra.mxu1 %vm669_vm3, %v6305_v16  ;;  %v9037_v16 = vsel %vm6434_vm4, %v7277_v23, %v7219_v58  ;;  %v2383_v19 = vrot.slane %v2382_v51, 4  ;;  %v2393_v33 = vrot.slane %v2392_v36, 4  ;;  %v2397_v2 = vrot.slane %v2395_v7, 5  ;;  %v6307_v23 = vld [vmem:[%s6390_s23 + $0x60] sm:$0xff]  }
  0xb5   : > { %6073 = vmatprep.mubr.msk.bf16.mxu1 %vm669_vm3, %v6306_v57  ;;  %v5342_v18 = vcombine.low %v9037_v16, %v9036_v26  ;;  %v9038_v59 = vsel %vm6434_vm4, %v7304_v53, %v7306_v13  ;;  %v9039_v6 = vsel %vm6434_vm4, %v7302_v25, %v7235_v60  ;;  %v2406_v57 = vor.u32 %v2405_v29, %v2402_v15  ;;  %v5368_v13 = vld [vmem:[%s6390_s23 + $0x24] sm:$0xe]  ;;  %v5371_v26 = vld [vmem:[%s6390_s23 + $0x48] sm:$0xe] }
  0xb6   : > { %v5343_v17 = vcombine.low %v9039_v6, %v9038_v59  ;;  %v2415_v11 = vrot.slane %v2413_v56, 4  ;;  %v2419_v58 = vshll.u32 %v7404_v45, 16  ;;  %v9040_v36 = vsel %vm6434_vm4, %v7308_v10, %v7258_v63  ;;  %v6308_v63 = vld [vmem:[%s6390_s23 + $0x6c] sm:$0xff]   ;;  %v5372_v6 = vld [vmem:[%s6390_s23 + $0x54] sm:$0xe] }
  0xb7   : > { %v5344_v51 = vcombine.low %v9040_v36, %v2302_v20  ;;  %v2316_v53 = vsel %vm6434_vm4, %v7380_v12, %v7322_v3  ;;  %v2326_v60 = vsel %vm6434_vm4, %v2321_v43, %v7367_v48  ;;  %v2340_v25 = vsel %vm6434_vm4, %v2335_v46, %v7357_v9  ;;  %v7460_v12 = vld [vmem:[%s6390_s23 + $0xc] sm:$0xe] }
  0xb8   : > { %v2350_v10 = vsel %vm6434_vm4, %v2345_v38, %v2349_v32  ;;  %v2364_v3 = vsel %vm6434_vm4, %v2359_v24, %v7377_v55  ;;  %v2374_v20 = vsel %vm6434_vm4, %v2369_v34, %v2373_v14  ;;  %v2416_v48 = vor.u32 %v2415_v11, %v7407_v39  ;;  %v5369_v55 = vld [vmem:[%s6390_s23 + $0x30] sm:$0xe]  ;;  %v5370_v14 = vld [vmem:[%s6390_s23 + $0x3c] sm:$0xe] }
  0xb9   : > { %6108 = vmatmul.mubr.msk.bf16.gmra.mxu0 %vm669_vm3, %v7291_v62  ;;  %v2388_v62 = vsel %vm6434_vm4, %v2383_v19, %v2387_v42  ;;  %v2398_v38 = vsel %vm6434_vm4, %v2393_v33, %v2397_v2  ;;  %v7467_v9 = vrot.slane %v2406_v57, 4  ;;  %v2783_v46 = vrot.slane %v6951_v49, 5  ;;  %v6309_v57 = vld [vmem:[%s6390_s23 + $0x78] sm:$0xff]  }
  0xba   : > { %6111 = vmatprep.mubr.msk.bf16.mxu0 %vm669_vm3, %v5342_v18  ;;  %v7471_v43 = vcombine.low %v2316_v53, %v2326_v60  ;;  %v7473_v32 = vrot.slane %v2416_v48, 4  ;;  %v7475_v52 = vrot.slane %v2419_v58, 5  ;;  %v5384_v7 = vrot.slane %v5368_v13, 9  ;;  %v6310_v53 = vld [vmem:[%s6390_s23 + $0x84] sm:$0xff]   ;;  %v5373_v13 = vld [vmem:[%s6390_s23 + $0x60] sm:$0xe] }
  0xbb   : > { %v7478_v54 = vcombine.low %v2340_v25, %v2350_v10  ;;  %v7480_v42 = vcombine.low %v2364_v3, %v2374_v20  ;;  %v5382_v37 = vrot.slane %v7460_v12, 9  ;;  %v2797_v24 = vrot.slane %v7000_v44, 5  ;;  %v6316_v49 = vld [vmem:[%s6390_s23 + $0x18] sm:$0xff]  }
  0xbc   : > { %6074 = vmatmul.mubr.msk.bf16.gmra.mxu1 %vm669_vm3, %v6307_v23  ;;  %v7486_v15 = vcombine.low %v2388_v62, %v2398_v38  ;;  %v2786_v34 = vrot.slane %v6987_v47, 5  ;;  %v2800_v29 = vrot.slane %v7015_v21, 5  ;;  %v5385_v56 = vrot.slane %v5369_v55, 9  ;;  %v5375_v55 = vld [vmem:[%s6390_s23 + $0x78] sm:$0xe] }
  0xbd   : > { %6077 = vmatprep.mubr.msk.bf16.mxu1 %vm669_vm3, %v6308_v63  ;;  %v2412_v16 = vsel %vm6434_vm4, %v7467_v9, %v7407_v39  ;;  %v7497_v44 = vrot.slane %v2783_v46, 4  ;;  %v7501_v18 = vsel %vm6720_vm7, %v5384_v7, %v2797_v24  ;;  %v2799_v19 = vrot.slane %v2797_v24, 4 }
  0xbe   : > { %v2422_v21 = vsel %vm6434_vm4, %v7473_v32, %v7475_v52  ;;  %v2804_v33 = vrot.slane %v7038_v5, 5  ;;  %v2807_v2 = vrot.slane %v7046_v41, 5  ;;  %v5386_v59 = vrot.slane %v5370_v14, 9  ;;  %v6315_v52 = vld [vmem:[%s6390_s23 + $0xc0] sm:$0xff]  }
  0xbf   : > { %v7513_v11 = vsel %vm6720_vm7, %v2799_v19, %v2800_v29  ;;  %v2811_v58 = vrot.slane %v7055_v61, 5  ;;  %v2814_v23 = vrot.slane %v7107_v50, 5  ;;  %v5387_v36 = vrot.slane %v5371_v26, 9  ;;  %v5376_v19 = vld [vmem:[%s6390_s23 + $0x84] sm:$0xe] }
  0xc0   : > { %v5401_v5 = vcombine.low %v7501_v18, %v7513_v11  ;;  %v7523_v41 = vsel %vm6720_vm7, %v5385_v56, %v2804_v33  ;;  %v2806_v60 = vrot.slane %v2804_v33, 4  ;;  %v2818_v25 = vrot.slane %v7073_v1, 5 }
  0xc1   : > { %6112 = vmatmul.mubr.msk.bf16.gmra.mxu0 %vm669_vm3, %v5343_v17  ;;  %v7530_v61 = vsel %vm6720_vm7, %v5386_v59, %v2811_v58  ;;  %v2813_v50 = vrot.slane %v2811_v58, 4  ;;  %v2821_v17 = vrot.slane %v7121_v8, 5  ;;  %v5388_v63 = vrot.slane %v5372_v6, 9  ;;  %v9041_v59 = vld [vmem:[#allocation4_spill] sm:$0xff] }
  0xc2   : > { %6115 = vmatprep.mubr.msk.bf16.mxu0 %vm669_vm3, %v5344_v51  ;;  %v7535_v10 = vsel %vm6720_vm7, %v2806_v60, %v2807_v2  ;;  %v7539_v3 = vsel %vm6720_vm7, %v5387_v36, %v2818_v25  ;;  %v2820_v1 = vrot.slane %v2818_v25, 4  ;;  %v2825_v20 = vrot.slane %v7116_v40, 5  ;;  %v5374_v51 = vld [vmem:[%s6390_s23 + $0x6c] sm:$0xe]  ;;  %v6311_v58 = vld [vmem:[%s6390_s23 + $0x90] sm:$0xff]  }
  0xc3   : > { %v5402_v48 = vcombine.low %v7523_v41, %v7535_v10  ;;  %v7548_v8 = vsel %vm6720_vm7, %v2813_v50, %v2814_v23  ;;  %v2828_v62 = vrot.slane %v7138_v35, 5  ;;  %v5389_v38 = vrot.slane %v5373_v13, 9  ;;  %v9042_v36 = vld [vmem:[#allocation3_spill] sm:$0xff]  ;;  %v5377_v60 = vld [vmem:[%s6390_s23 + $0x90] sm:$0xe]  ;;  %v9043_v50 = vld [vmem:[#allocation6_spill] sm:$0xff] }
  0xc4   : > { %6078 = vmatmul.mubr.msk.bf16.gmra.mxu1 %vm669_vm3, %v6309_v57  ;;  %v5403_v40 = vcombine.low %v7530_v61, %v7548_v8  ;;  %v7557_v7 = vsel %vm6720_vm7, %v2820_v1, %v2821_v17  ;;  %v7561_v24 = vsel %vm6720_vm7, %v5388_v63, %v2825_v20  ;;  %v2827_v14 = vrot.slane %v2825_v20, 4 }
  0xc5   : > { %6081 = vmatprep.mubr.msk.bf16.mxu1 %vm669_vm3, %v6310_v53  ;;  %v5404_v35 = vcombine.low %v7539_v3, %v7557_v7  ;;  %v2832_v29 = vrot.slane %v7151_v28, 5  ;;  %v2835_v56 = vrot.slane %v7173_v30, 5  ;;  %v5390_v26 = vrot.slane %v5374_v51, 9  ;;  %v9044_v51 = vld [vmem:[#allocation5_spill] sm:$0xff]  ;;  %v5508_v3 = vld [vmem:[%s6390_s23 + $0x48] sm:$0xf] }
  0xc6   : > { %v7570_v33 = vsel %vm6720_vm7, %v2827_v14, %v2828_v62  ;;  %v2839_v2 = vrot.slane %v7170_v27, 5  ;;  %v2842_v6 = vrot.slane %v9041_v59, 5  ;;  %v5391_v57 = vrot.slane %v5375_v55, 9  ;;  %v6312_v27 = vld [vmem:[%s6390_s23 + $0x9c] sm:$0xff]   ;;  %v9052_v55 = vld [vmem:[#allocation15_spill] sm:$0xff] }
  0xc7   : > { %v5405_v23 = vcombine.low %v7561_v24, %v7570_v33  ;;  %v7579_v28 = vsel %vm6720_vm7, %v5389_v38, %v2832_v29  ;;  %v2834_v30 = vrot.slane %v2832_v29, 4  ;;  %v2846_v53 = vrot.slane %v9042_v36, 5  ;;  %v5378_v38 = vld [vmem:[%s6390_s23 + $0x9c] sm:$0xe]  ;;  %v9047_v36 = vld [vmem:[#allocation12_spill] sm:$0xff] }
  0xc8   : > { %v7588_v25 = vsel %vm6720_vm7, %v5390_v26, %v2839_v2  ;;  %v2841_v13 = vrot.slane %v2839_v2, 4  ;;  %v2849_v17 = vrot.slane %v9043_v50, 5  ;;  %v5392_v63 = vrot.slane %v5376_v19, 9  ;;  %v5379_v26 = vld [vmem:[%s6390_s23 + $0xa8] sm:$0xe] }
  0xc9   : > { %6116 = vmatmul.mubr.msk.bf16.gmra.mxu0 %vm669_vm3, %v7471_v43  ;;  %v7595_v1 = vsel %vm6720_vm7, %v2834_v30, %v2835_v56  ;;  %v7599_v43 = vsel %vm6720_vm7, %v5391_v57, %v2846_v53  ;;  %v2848_v20 = vrot.slane %v2846_v53, 4  ;;  %v2853_v62 = vrot.slane %v9044_v51, 5  ;;  %v5381_v57 = vld [vmem:[%s6390_s23 + $0xc0] sm:$0xe]  ;;  %v6313_v19 = vld [vmem:[%s6390_s23 + $0xa8] sm:$0xff]  }
  0xca   : > { %6119 = vmatprep.mubr.msk.bf16.mxu0 %vm669_vm3, %v7478_v54  ;;  %v7607_v14 = vsel %vm6720_vm7, %v2841_v13, %v2842_v6  ;;  %v9045_v54 = vld [vmem:[#allocation8_spill] sm:$0xff]  ;;  %v5393_v56 = vrot.slane %v5377_v60, 9  ;;  %v2863_v53 = vrot.slane %v9047_v36, 5  ;;  %v5394_v60 = vrot.slane %v5378_v38, 9  ;;  %v9050_v38 = vld [vmem:[#allocation13_spill] sm:$0xff] }
  0xcb   : > { %v2856_v29 = vrot.slane %v9045_v54, 5  ;;  %v7616_v2 = vsel %vm6720_vm7, %v2848_v20, %v2849_v17  ;;  %v7620_v59 = vsel %vm6720_vm7, %v5392_v63, %v2853_v62  ;;  %v2855_v6 = vrot.slane %v2853_v62, 4  ;;  %v5380_v13 = vld [vmem:[%s6390_s23 + $0xb4] sm:$0xe]  ;;  %v9048_v17 = vld [vmem:[#allocation10_spill] sm:$0xff] }
  0xcc   : > { %6082 = vmatmul.mubr.msk.bf16.gmra.mxu1 %vm669_vm3, %v6311_v58  ;;  %v9046_v58 = vld [vmem:[#allocation7_spill] sm:$0xff]  ;;  %v2867_v63 = vrot.slane %v9048_v17, 5  ;;  %v9049_v20 = vld [vmem:[#allocation2_spill] sm:$0xff]  ;;  %v5395_v62 = vrot.slane %v5379_v26, 9  ;;  %v2874_v36 = vrot.slane %v9050_v38, 5  ;;  %v5396_v26 = vrot.slane %v5380_v13, 9 }
  0xcd   : > { %6085 = vmatprep.mubr.msk.bf16.mxu1 %vm669_vm3, %v6312_v27  ;;  %v2860_v30 = vrot.slane %v9046_v58, 5  ;;  %v7630_v50 = vsel %vm6720_vm7, %v2855_v6, %v2856_v29  ;;  %v2870_v51 = vrot.slane %v9049_v20, 5  ;;  %v9051_v17 = vld [vmem:[#allocation14_spill] sm:$0xff]  ;;  %v6314_v27 = vld [vmem:[%s6390_s23 + $0xb4] sm:$0xff]   ;;  %v2787_v39 = vsel %vm6720_vm7, %v7497_v44, %v2786_v34  ;;  %v7847_v7 = vld [vmem:[%s6390_s23 + $0x4c] sm:$0xf] }
  0xce   : > { %v7645_v29 = vsel %vm6720_vm7, %v5394_v60, %v2867_v63  ;;  %v2869_v6 = vrot.slane %v2867_v63, 4  ;;  %v2877_v20 = vrot.slane %v9051_v17, 5  ;;  %v2876_v38 = vrot.slane %v2874_v36, 4  ;;  %v6333_v44 = vld [vmem:[%s6390_s23 + $0x20] sm:$0x1] }
  0xcf   : > { %v7638_v54 = vsel %vm6720_vm7, %v5393_v56, %v2860_v30  ;;  %v2862_v58 = vrot.slane %v2860_v30, 4  ;;  %v7657_v30 = vsel %vm6720_vm7, %v5395_v62, %v2874_v36  ;;  %v2881_v60 = vrot.slane %v9052_v55, 5 }
  0xd0   : > { %v5397_v63 = vrot.slane %v5381_v57, 9  ;;  %v7673_v55 = vsel %vm6720_vm7, %v2876_v38, %v2877_v20  ;;  %v2888_v57 = vrot.slane %v7392_v22, 5  ;;  %v2784_v22 = vsel %vm6720_vm7, %v5382_v37, %v2783_v46  ;;  %v6318_v38 = vld [vmem:[%s6390_s23 + $0x30] sm:$0xff]  }
  0xd1   : > { %6120 = vmatmul.mubr.msk.bf16.gmra.mxu0 %vm669_vm3, %v7480_v42  ;;  %v7653_v56 = vsel %vm6720_vm7, %v2862_v58, %v2863_v53  ;;  %v7666_v42 = vsel %vm6720_vm7, %v2869_v6, %v2870_v51  ;;  %v2884_v53 = vrot.slane %v7383_v4, 5  ;;  %v2883_v58 = vrot.slane %v2881_v60, 4 }
  0xd2   : > { %6123 = vmatprep.mubr.msk.bf16.mxu0 %vm669_vm3, %v7486_v15  ;;  %v7677_v15 = vsel %vm6720_vm7, %v5396_v26, %v2881_v60  ;;  %v2891_v51 = vrot.slane %v7404_v45, 5  ;;  %v5367_v45 = vld [vmem:[%s6390_s23 + $0x18] sm:$0xe]  ;;  %v7717_v9 = vsel %vm6720_vm7, %v5397_v63, %v2888_v57  ;;  %v2890_v46 = vrot.slane %v2888_v57, 4  ;;  %v6317_v26 = vld [vmem:[%s6390_s23 + $0x24] sm:$0xff]  }
  0xd3   : > { %v7705_v32 = vsel %vm6720_vm7, %v2883_v58, %v2884_v53  ;;  %v5383_v37 = vrot.slane %v5367_v45, 9  ;;  %v5399_v34 = vcombine.low %v2784_v22, %v2787_v39  ;;  %v9053_v60 = vld [vmem:[#allocation9_spill] sm:$0xff] }
  0xd4   : > { %6086 = vmatmul.mubr.msk.bf16.gmra.mxu1 %vm669_vm3, %v6313_v19  ;;  %v5349_v19 = vcombine.low %v2412_v16, %v2422_v21  ;;  %v7722_v47 = vsel %vm6720_vm7, %v2890_v46, %v2891_v51  ;;  %v2793_v21 = vrot.slane %v6333_v44, 5  ;;  %v4547_v53 = vsel %vm718_vm0, %v9053_v60, 0  ;;  %v5496_v63 = vld [vmem:[%s6390_s23 + $0x18] sm:$0xf]  ;;  %v5497_v57 = vld [vmem:[%s6390_s23 + $0x1c] sm:$0xf] }
  0xd5   : > { %6089 = vmatprep.mubr.msk.bf16.mxu1 %vm669_vm3, %v6314_v27  ;;  %v6332_v27 = vld [vmem:[%s6390_s23 + $0x1c] sm:$0xf]  ;;  %v5499_v51 = vld [vmem:[%s6390_s23 + $0x24] sm:$0xf]  ;;  %v3595_v45 = vshrl.u32 %v5496_v63, 16  ;;  %v3604_v39 = vshll.u32 %v5497_v57, 16 }
  0xd6   : > { %v2790_v36 = vrot.slane %v6332_v27, 5  ;;  %v3598_v27 = vshll.u32 %v5496_v63, 16  ;;  %v3619_v46 = vshrl.u32 %v5499_v51, 16  ;;  %v6320_v44 = vld [vmem:[%s6390_s23 + $0x48] sm:$0xff]   ;;  %v5577_v60 = vld [vmem:[%s6390_s23 + $0x18] sm:$0xe] }
  0xd7   : > { %v7763_v63 = vld [vmem:[%s6390_s23 + $0x2c] sm:$0x1] }
  0xd8   : > { %v2792_v16 = vrot.slane %v2790_v36, 4  ;;  %v2791_v17 = vsel %vm6720_vm7, %v5383_v37, %v2790_v36  ;;  %v7747_v36 = vld [vmem:[%s6390_s23 + $0x28] sm:$0xf]  ;;  %v6319_v37 = vld [vmem:[%s6390_s23 + $0x3c] sm:$0xff]   ;;  %v3621_v18 = vrot.slane %v3619_v46, 4 }
  0xd9   : > { %6124 = vmatmul.mubr.msk.bf16.gmra.mxu0 %vm669_vm3, %v5349_v19  ;;  %v9054_v19 = vld [vmem:[#allocation11_spill] sm:$0xff] }
  0xda   : > { %6163 = vmatprep.mubr.msk.bf16.mxu0 %vm669_vm3, %v6316_v49  ;;  %v2794_v20 = vsel %vm6720_vm7, %v2792_v16, %v2793_v21  ;;  %v4077_v22 = vsel %vm718_vm0, %v9054_v19, 0  ;;  %v3608_v49 = vshrl.u32 %v5497_v57, 16  ;;  %v3632_v16 = vshrl.u32 %v7747_v36, 16  ;;  %v5498_v21 = vld [vmem:[%s6390_s23 + $0x20] sm:$0x1] }
  0xdb   : > { %v5400_v58 = vcombine.low %v2791_v17, %v2794_v20  ;;  %v3597_v17 = vrot.slane %v3595_v45, 4  ;;  %v3600_v20 = vrot.slane %v3598_v27, 5  ;;  %v5502_v19 = vld [vmem:[%s6390_s23 + $0x30] sm:$0xf]  ;;  %v3614_v45 = vshll.u32 %v5498_v21, 16 }
  0xdc   : > { %6090 = vmatmul.mubr.msk.bf16.gmra.mxu1 %vm669_vm3, %v6315_v52  ;;  %v3622_v52 = vshll.u32 %v5499_v51, 16  ;;  %v3634_v51 = vrot.slane %v3632_v16, 4  ;;  %v5593_v27 = vrot.slane %v5577_v60, 9  ;;  %v4341_v46 = vrot.slane %v5498_v21, 5  ;;  %v5578_v16 = vld [vmem:[%s6390_s23 + $0x24] sm:$0xe] }
  0xdd   : > { %6129 = vmatprep.mubr.msk.bf16.mxu1 %vm669_vm3, %v5399_v34  ;;  %v3628_v34 = vshll.u32 %v7747_v36, 16  ;;  %v6321_v21 = vld [vmem:[%s6390_s23 + $0x54] sm:$0xff]   ;;  %v3646_v10 = vshll.u32 %v5502_v19, 16  ;;  %v6322_v60 = vld [vmem:[%s6390_s23 + $0x60] sm:$0xff]  }
  0xde   : > { %v3624_v11 = vrot.slane %v3622_v52, 5  ;;  %v3638_v52 = vshll.u32 %v7763_v63, 16 }
  0xe1   : > { %6164 = vmatmul.mubr.msk.bf16.vlgmr.msra.gmra.mxu0 %vm669_vm3, %v6317_v26  ;;  %v7759_v26 = vrot.slane %v3604_v39, 5 }
  0xe2   : > { %6230 = vmatpush3.bf16.msra.mxu0 %v4547_v53  ;;  %6167 = vmatprep.mubr.msk.bf16.mxu0 %vm669_vm3, %v6318_v38  ;;  %v3610_v38 = vrot.slane %v3608_v49, 4  ;;  %v4338_v53 = vrot.slane %v5497_v57, 5  ;;  %v7773_v57 = vld [vmem:[%s6390_s23 + $0x34] sm:$0xf] }
  0xe4   : > { %6130 = vmatmul.mubr.msk.bf16.vlgmr.msra.gmra.mxu1 %vm669_vm3, %v5400_v58  ;;  %v7768_v58 = vrot.slane %v3628_v34, 5  ;;  %v3611_v39 = vor.u32 %v3610_v38, %v7759_v26  ;;  %v4340_v49 = vrot.slane %v4338_v53, 4  ;;  %v3625_v34 = vor.u32 %v3624_v11, %v3621_v18 }
  0xe5   : > { %6196 = vmatpush3.bf16.msra.mxu1 %v4077_v22  ;;  %6133 = vmatprep.mubr.msk.bf16.mxu1 %vm669_vm3, %v5401_v5  ;;  %v7766_v5 = vpop.f32.mrf.mxu0  ;;  %v3601_v22 = vor.u32 %v3600_v20, %v3597_v17  ;;  %v3643_v17 = vshrl.u32 %v5502_v19, 16  ;;  %v3656_v38 = vshrl.u32 %v7773_v57, 16  ;;  %v7798_v61 = vsel %vm6720_vm7, %v5593_v27, %v4338_v53  ;;  %v5505_v19 = vld [vmem:[%s6390_s23 + $0x3c] sm:$0xf] }
  0xe6   : > { %v3635_v41 = vor.u32 %v3634_v51, %v7768_v58  ;;  %v3612_v8 = vrot.slane %v3611_v39, 4  ;;  %v3640_v11 = vrot.slane %v3638_v52, 5  ;;  %v5594_v51 = vrot.slane %v5578_v16, 9  ;;  %v7812_v39 = vld [vmem:[%s6390_s23 + $0x38] sm:$0x1] }
  0xe7   : > { %v7790_v20 = vpop.f32.mrf.mxu0  ;;  %v3602_v18 = vrot.slane %v3601_v22, 4  ;;  %v3626_v12 = vrot.slane %v3625_v34, 4  ;;  %v4348_v22 = vrot.slane %v7763_v63, 5  ;;  %v3658_v52 = vrot.slane %v3656_v38, 4 }
  0xe8   : > { %v3636_v27 = vrot.slane %v3635_v41, 4  ;;  %v3667_v34 = vshrl.u32 %v5505_v19, 16  ;;  %v3670_v16 = vshll.u32 %v5505_v19, 16  ;;  %v7825_v41 = vld [vmem:[%s6390_s23 + $0x40] sm:$0xf] }
  0xe9   : > { %6168 = vmatmul.mubr.msk.bf16.gmra.mxu0 %vm669_vm3, %v6319_v37  ;;  %v7809_v53 = vpop.f32.mrf.mxu0  ;;  %v3607_v63 = vsel %vm6434_vm4, %v3602_v18, %v7759_v26  ;;  %v3631_v26 = vsel %vm6434_vm4, %v3626_v12, %v7768_v58  ;;  %v5579_v18 = vld [vmem:[%s6390_s23 + $0x30] sm:$0xe]  ;;  %v3676_v24 = vshll.u32 %v7825_v41, 16  ;;  %v3680_v33 = vshrl.u32 %v7825_v41, 16 }
  0xea   : > { %6171 = vmatprep.mubr.msk.bf16.mxu0 %vm669_vm3, %v6320_v44  ;;  %v7781_v37 = vpop.f32.mrf.mxu1  ;;  %v4345_v44 = vrot.slane %v7747_v36, 5  ;;  %v3616_v36 = vrot.slane %v3614_v45, 5  ;;  %v3645_v45 = vrot.slane %v3643_v17, 4  ;;  %v3641_v58 = vsel %vm6434_vm4, %v3636_v27, %v3640_v11 }
  0xeb   : > { %9055 = vst [vmem:[#allocation4_spill] sm:$0xff] %v7781_v37  ;;  %v7854_v12 = vpop.f32.mrf.mxu0  ;;  %v3672_v19 = vrot.slane %v3670_v16, 5  ;;  %v3704_v11 = vshrl.u32 %v7847_v7, 16 }
  0xec   : > { %6134 = vmatmul.mubr.msk.bf16.gmra.mxu1 %vm669_vm3, %v5402_v48  ;;  %v3652_v48 = vshll.u32 %v7773_v57, 16  ;;  %v7805_v6 = vpop.f32.mrf.mxu1  ;;  %v4347_v4 = vrot.slane %v4345_v44, 4  ;;  %v3617_v17 = vsel %vm6434_vm4, %v3612_v8, %v3616_v36  ;;  %v4352_v36 = vrot.slane %v7773_v57, 5  ;;  %v6324_v8 = vld [vmem:[%s6390_s23 + $0x78] sm:$0xff]  }
  0xed   : > { %6137 = vmatprep.mubr.msk.bf16.mxu1 %vm669_vm3, %v5403_v40  ;;  %v7802_v40 = vsel %vm6720_vm7, %v4340_v49, %v4341_v46  ;;  %9056 = vst [vmem:[#allocation3_spill] sm:$0xff] %v7805_v6  ;;  %v3648_v49 = vrot.slane %v3646_v10, 5  ;;  %v7868_v27 = vcombine.low %v3607_v63, %v3617_v17  ;;  %v7870_v57 = vcombine.low %v3631_v26, %v3641_v58  ;;  %v7884_v17 = vld [vmem:[%s6390_s23 + $0x58] sm:$0xf]  ;;  %v7890_v58 = vld [vmem:[%s6390_s23 + $0x44] sm:$0x1] }
  0xee   : > { %v7814_v46 = vrot.slane %v3652_v48, 5  ;;  %v7831_v10 = vpop.f32.mrf.mxu1  ;;  %v7838_v48 = vsel %vm6720_vm7, %v5594_v51, %v4345_v44  ;;  %v7842_v38 = vsel %vm6720_vm7, %v4347_v4, %v4348_v22  ;;  %v3669_v51 = vrot.slane %v3667_v34, 4  ;;  %v5511_v34 = vld [vmem:[%s6390_s23 + $0x54] sm:$0xf] }
  0xef   : > { %9057 = vst [vmem:[#allocation6_spill] sm:$0xff] %v7831_v10  ;;  %v3649_v44 = vor.u32 %v3648_v49, %v3645_v45  ;;  %v3694_v22 = vshll.u32 %v5508_v3, 16  ;;  %v4354_v13 = vrot.slane %v4352_v36, 4  ;;  %v4355_v63 = vrot.slane %v7812_v39, 5  ;;  %v5580_v49 = vld [vmem:[%s6390_s23 + $0x3c] sm:$0xe] }
  0xf0   : > { %v3659_v4 = vor.u32 %v3658_v52, %v7814_v46  ;;  %v7866_v45 = vpop.f32.mrf.mxu1  ;;  %v5595_v52 = vrot.slane %v5579_v18, 9  ;;  %v3673_v18 = vor.u32 %v3672_v19, %v3669_v51  ;;  %v9060_v6 = vcombine.low %v7579_v28, %v7595_v1 }
  0xf1   : > { %6172 = vmatmul.mubr.msk.bf16.gmra.mxu0 %vm669_vm3, %v6321_v21  ;;  %v3700_v21 = vshll.u32 %v7847_v7, 16  ;;  %9058 = vst [vmem:[#allocation5_spill] sm:$0xff] %v7866_v45  ;;  %v3696_v45 = vrot.slane %v3694_v22, 5  ;;  %v3715_v51 = vshrl.u32 %v5511_v34, 16  ;;  %v3718_v19 = vshll.u32 %v5511_v34, 16 }
  0xf2   : > { %6175 = vmatprep.mubr.msk.bf16.mxu0 %vm669_vm3, %v6322_v60  ;;  %v3662_v60 = vshll.u32 %v7812_v39, 16  ;;  %v7887_v26 = vrot.slane %v3659_v4, 4  ;;  %v3706_v39 = vrot.slane %v3704_v11, 4  ;;  %v7925_v22 = vsel %vm6720_vm7, %v4354_v13, %v4355_v63 }
  0xf3   : > { %v7895_v10 = vrot.slane %v3700_v21, 5  ;;  %v9062_v21 = vcombine.low %v7588_v25, %v7607_v14  ;;  %v4359_v25 = vrot.slane %v7825_v41, 5  ;;  %v6326_v14 = vld [vmem:[%s6390_s23 + $0x90] sm:$0xff]   ;;  %v5596_v1 = vrot.slane %v5580_v49, 9  ;;  %v5514_v41 = vld [vmem:[%s6390_s23 + $0x60] sm:$0xf] }
  0xf4   : > { %6138 = vmatmul.mubr.msk.bf16.gmra.mxu1 %vm669_vm3, %v5404_v35  ;;  %v6323_v35 = vld [vmem:[%s6390_s23 + $0x6c] sm:$0xff]   ;;  %v7880_v62 = vrot.slane %v3662_v60, 5  ;;  %v3717_v37 = vrot.slane %v3715_v51, 4 }
  0xf5   : > { %6141 = vmatprep.mubr.msk.bf16.mxu1 %vm669_vm3, %v5405_v23  ;;  %v3691_v23 = vshrl.u32 %v5508_v3, 16  ;;  %v7878_v3 = vrot.slane %v3649_v44, 4  ;;  %v3682_v44 = vrot.slane %v3680_v33, 4  ;;  %v3728_v33 = vshrl.u32 %v7884_v17, 16 }
  0xf6   : > { %v7876_v16 = vpop.f32.mrf.mxu0  ;;  %v3707_v13 = vor.u32 %v3706_v39, %v7895_v10  ;;  %v4366_v39 = vrot.slane %v7847_v7, 5  ;;  %v9066_v7 = vcombine.low %v7599_v43, %v7616_v2  ;;  %v9068_v43 = vcombine.low %v7620_v59, %v7630_v50  ;;  %v6327_v2 = vld [vmem:[%s6390_s23 + $0x9c] sm:$0xff]  }
  0xf7   : > { %9059 = vst [vmem:[#allocation8_spill] sm:$0xff] %v7876_v16  ;;  %v3693_v60 = vrot.slane %v3691_v23, 4  ;;  %v6325_v23 = vld [vmem:[%s6390_s23 + $0x84] sm:$0xff]   ;;  %v7952_v16 = vld [vmem:[%s6390_s23 + $0x5c] sm:$0x1]  ;;  %v4373_v59 = vrot.slane %v7884_v17, 5 }
  0xf8   : > { %v7913_v28 = vpop.f32.mrf.mxu0 }
  0xf9   : > { %6176 = vmatmul.mubr.msk.bf16.gmra.mxu0 %vm669_vm3, %v6323_v35  ;;  %v7892_v35 = vrot.slane %v3676_v24, 5  ;;  %v3724_v24 = vshll.u32 %v7884_v17, 16  ;;  %9063 = vst [vmem:[#allocation12_spill] sm:$0xff] %v7913_v28  ;;  %v3720_v28 = vrot.slane %v3718_v19, 5 }
  0xfa   : > { %6179 = vmatprep.mubr.msk.bf16.mxu0 %vm669_vm3, %v6324_v8  ;;  %v7901_v4 = vpop.f32.mrf.mxu1  ;;  %v7904_v8 = vld [vmem:[%s6390_s23 + $0x50] sm:$0x1]  ;;  %v7945_v49 = vpop.f32.mrf.mxu0 }
  0xfb   : > { %9061 = vst [vmem:[#allocation7_spill] sm:$0xff] %v7901_v4  ;;  %v3683_v34 = vor.u32 %v3682_v44, %v7892_v35  ;;  %v7935_v4 = vrot.slane %v3673_v18, 4  ;;  %v7942_v11 = vrot.slane %v3724_v24, 5  ;;  %v3730_v44 = vrot.slane %v3728_v33, 4  ;;  %9065 = vst [vmem:[#allocation2_spill] sm:$0xff] %v7945_v49 }
  0xfc   : > { %6142 = vmatmul.mubr.msk.bf16.gmra.mxu1 %vm669_vm3, %v9060_v6  ;;  %v7921_v6 = vsel %vm6720_vm7, %v5595_v52, %v4352_v36  ;;  %v3697_v36 = vor.u32 %v3696_v45, %v3693_v60  ;;  %v3710_v52 = vshll.u32 %v7904_v8, 16  ;;  %v7940_v63 = vpop.f32.mrf.mxu1  ;;  %v4361_v18 = vrot.slane %v4359_v25, 4  ;;  %v5581_v24 = vld [vmem:[%s6390_s23 + $0x48] sm:$0xe] }
  0xfd   : > { %6145 = vmatprep.mubr.msk.bf16.mxu1 %vm669_vm3, %v9062_v21  ;;  %v3686_v21 = vshll.u32 %v7890_v58, 16  ;;  %9064 = vst [vmem:[#allocation10_spill] sm:$0xff] %v7940_v63  ;;  %v4362_v60 = vrot.slane %v7890_v58, 5  ;;  %v3684_v51 = vrot.slane %v3683_v34, 4  ;;  %v3739_v33 = vshrl.u32 %v5514_v41, 16 }
  0xfe   : > { %v7958_v63 = vsel %vm6720_vm7, %v5596_v1, %v4359_v25  ;;  %v3698_v45 = vrot.slane %v3697_v36, 4  ;;  %v3708_v49 = vrot.slane %v3707_v13, 4  ;;  %v3712_v58 = vrot.slane %v3710_v52, 5  ;;  %v7973_v36 = vld [vmem:[%s6390_s23 + $0x64] sm:$0xf]  ;;  %v7980_v13 = vpop.f32.mrf.mxu0 }
  0xff   : > { %v3688_v19 = vrot.slane %v3686_v21, 5  ;;  %v3679_v34 = vsel %vm6434_vm4, %v7935_v4, %v7892_v35  ;;  %v3721_v21 = vor.u32 %v3720_v28, %v3717_v37  ;;  %v3731_v1 = vor.u32 %v3730_v44, %v7942_v11  ;;  %9069 = vst [vmem:[#allocation14_spill] sm:$0xff] %v7980_v13  ;;  %v5582_v28 = vld [vmem:[%s6390_s23 + $0x54] sm:$0xe]  ;;  %v6331_v13 = vld [vmem:[%s6390_s23 + $0xcc] sm:$0xff]  }
 0x100   : > { %v3734_v25 = vshll.u32 %v7952_v16, 16  ;;  %v7984_v52 = vsel %vm6720_vm7, %v4361_v18, %v4362_v60  ;;  %v5597_v35 = vrot.slane %v5581_v24, 9  ;;  %v4368_v37 = vrot.slane %v4366_v39, 4 }
 0x101   : > { %6180 = vmatmul.mubr.msk.bf16.gmra.mxu0 %vm669_vm3, %v6325_v23  ;;  %v3742_v23 = vshll.u32 %v5514_v41, 16  ;;  %v4369_v4 = vrot.slane %v7904_v8, 5  ;;  %v6328_v41 = vld [vmem:[%s6390_s23 + $0xa8] sm:$0xff]   ;;  %v3689_v44 = vsel %vm6434_vm4, %v3684_v51, %v3688_v19  ;;  %v3741_v50 = vrot.slane %v3739_v33, 4 }
 0x102   : > { %6183 = vmatprep.mubr.msk.bf16.mxu0 %vm669_vm3, %v6326_v14  ;;  %v7964_v14 = vpop.f32.mrf.mxu1  ;;  %v3713_v18 = vsel %vm6434_vm4, %v3708_v49, %v3712_v58  ;;  %v3748_v60 = vshll.u32 %v7973_v36, 16  ;;  %v3752_v8 = vshrl.u32 %v7973_v36, 16  ;;  %v3732_v51 = vrot.slane %v3731_v1, 4  ;;  %v8002_v33 = vld [vmem:[%s6390_s23 + $0x68] sm:$0x1] }
 0x103   : > { %9067 = vst [vmem:[#allocation13_spill] sm:$0xff] %v7964_v14  ;;  %v3722_v14 = vrot.slane %v3721_v21, 4  ;;  %v3736_v17 = vrot.slane %v3734_v25, 5  ;;  %v5598_v19 = vrot.slane %v5582_v28, 9  ;;  %v9072_v49 = vsel %vm6434_vm4, %v7887_v26, %v7880_v62  ;;  %v5517_v25 = vld [vmem:[%s6390_s23 + $0x6c] sm:$0xf] }
 0x104   : > { %6146 = vmatmul.mubr.msk.bf16.gmra.mxu1 %vm669_vm3, %v9066_v7  ;;  %v3744_v7 = vrot.slane %v3742_v23, 5  ;;  %v7999_v24 = vpop.f32.mrf.mxu1  ;;  %v8023_v21 = vsel %vm6720_vm7, %v5597_v35, %v4366_v39  ;;  %v8027_v1 = vsel %vm6720_vm7, %v4368_v37, %v4369_v4  ;;  %v8030_v62 = vcombine.low %v3679_v34, %v3689_v44  ;;  %v5583_v4 = vld [vmem:[%s6390_s23 + $0x60] sm:$0xe]  ;;  %v5523_v44 = vld [vmem:[%s6390_s23 + $0x84] sm:$0xf] }
 0x105   : > { %6149 = vmatprep.mubr.msk.bf16.mxu1 %vm669_vm3, %v9068_v43  ;;  %v3703_v43 = vsel %vm6434_vm4, %v3698_v45, %v7895_v10  ;;  %9070 = vst [vmem:[#allocation15_spill] sm:$0xff] %v7999_v24  ;;  %v9073_v45 = vsel %vm6434_vm4, %v7878_v3, %v7814_v46  ;;  %v4375_v46 = vrot.slane %v4373_v59, 4  ;;  %v4376_v3 = vrot.slane %v7952_v16, 5 }
 0x106   : > { %v8017_v23 = vcombine.low %v9073_v45, %v9072_v49  ;;  %9074 = vst [vmem:[#allocation11_spill] sm:$0xff] %v8030_v62  ;;  %v3745_v26 = vor.u32 %v3744_v7, %v3741_v50  ;;  %v8037_v28 = vcombine.low %v3703_v43, %v3713_v18  ;;  %v8039_v39 = vrot.slane %v3748_v60, 5 }
 0x107   : > { %v8005_v10 = vpop.f32.mrf.mxu0  ;;  %v8041_v35 = vrot.slane %v3752_v8, 4  ;;  %v3758_v37 = vshll.u32 %v8002_v33, 16  ;;  %v9076_v34 = vcombine.low %v7638_v54, %v7653_v56  ;;  %v3727_v50 = vsel %vm6434_vm4, %v3722_v14, %v7942_v11  ;;  %v5520_v54 = vld [vmem:[%s6390_s23 + $0x78] sm:$0xf] }
 0x108   : > { %9071 = vst [vmem:[#allocation9_spill] sm:$0xff] %v8005_v10  ;;  %9075 = vst [vmem:[#allocation16_spill] sm:$0xff] %v8037_v28  ;;  %v3737_v7 = vsel %vm6434_vm4, %v3732_v51, %v3736_v17  ;;  %v8061_v43 = vsel %vm6720_vm7, %v5598_v19, %v4373_v59  ;;  %v9078_v56 = vcombine.low %v7645_v29, %v7666_v42  ;;  %v3763_v60 = vshrl.u32 %v5517_v25, 16  ;;  %v8073_v51 = vld [vmem:[%s6390_s23 + $0x7c] sm:$0xf]  ;;  %v6330_v59 = vld [vmem:[%s6390_s23 + $0xc0] sm:$0xff]  }
 0x109   : > { %6184 = vmatmul.mubr.msk.bf16.gmra.mxu0 %vm669_vm3, %v6327_v2  ;;  %v8035_v2 = vld [vmem:[%s6390_s23 + $0x70] sm:$0xf]  ;;  %v8068_v18 = vpop.f32.mrf.mxu0  ;;  %v3766_v8 = vshll.u32 %v5517_v25, 16  ;;  %v8078_v17 = vsel %vm6720_vm7, %v4375_v46, %v4376_v3  ;;  %v8080_v29 = vrot.slane %v3745_v26, 4  ;;  %v5599_v42 = vrot.slane %v5583_v4, 9 }
 0x10a   : > { %6187 = vmatprep.mubr.msk.bf16.mxu0 %vm669_vm3, %v6328_v41  ;;  %v6329_v41 = vld [vmem:[%s6390_s23 + $0xb4] sm:$0xff]   ;;  %9079 = vst [vmem:[#allocation18_spill] sm:$0xff] %v8068_v18  ;;  %v3772_v11 = vshll.u32 %v8035_v2, 16  ;;  %v3776_v14 = vshrl.u32 %v8035_v2, 16  ;;  %v4380_v19 = vrot.slane %v7973_v36, 5  ;;  %v8083_v49 = vcombine.low %v3727_v50, %v3737_v7 }
 0x10b   : > { %v3755_v45 = vor.u32 %v8041_v35, %v8039_v39  ;;  %v8087_v25 = vrot.slane %v3758_v37, 5  ;;  %v3787_v46 = vshrl.u32 %v5520_v54, 16  ;;  %v3790_v3 = vshll.u32 %v5520_v54, 16  ;;  %v8099_v4 = vld [vmem:[%s6390_s23 + $0x88] sm:$0xf]  ;;  %v8102_v35 = vpop.f32.mrf.mxu0 }
 0x10c   : > { %6150 = vmatmul.mubr.msk.bf16.gmra.mxu1 %vm669_vm3, %v9076_v34  ;;  %v8049_v16 = vpop.f32.mrf.mxu1  ;;  %9080 = vst [vmem:[#allocation19_spill] sm:$0xff] %v8083_v49  ;;  %v4383_v34 = vrot.slane %v8002_v33, 5  ;;  %v3796_v36 = vshll.u32 %v8073_v51, 16  ;;  %v3800_v26 = vshrl.u32 %v8073_v51, 16  ;;  %9082 = vst [vmem:[#allocation21_spill] sm:$0xff] %v8102_v35  ;;  %v3765_v33 = vrot.slane %v3763_v60, 4 }
 0x10d   : > { %9077 = vst [vmem:[#allocation17_spill] sm:$0xff] %v8049_v16  ;;  %6153 = vmatprep.mubr.msk.bf16.mxu1 %vm669_vm3, %v9078_v56  ;;  %v8091_v56 = vld [vmem:[%s6390_s23 + $0x74] sm:$0x1]  ;;  %v3768_v37 = vrot.slane %v3766_v8, 5  ;;  %v8104_v50 = vrot.slane %v3772_v11, 5  ;;  %v3778_v7 = vrot.slane %v3776_v14, 4  ;;  %v9083_v54 = vcombine.low %v7657_v30, %v7673_v55  ;;  %v8132_v49 = vpop.f32.mrf.mxu0 }
 0x10e   : > { %v8094_v58 = vpop.f32.mrf.mxu1  ;;  %v4382_v16 = vrot.slane %v4380_v19, 4  ;;  %v8117_v60 = vld [vmem:[%s6390_s23 + $0x80] sm:$0x1]  ;;  %v8120_v8 = vld [vmem:[%s6390_s23 + $0x6c] sm:$0xe]  ;;  %v3811_v11 = vshrl.u32 %v5523_v44, 16 }
 0x10f   : > { %9081 = vst [vmem:[#allocation20_spill] sm:$0xff] %v8094_v58  ;;  %v8113_v58 = vsel %vm6720_vm7, %v5599_v42, %v4380_v19  ;;  %v3814_v14 = vshll.u32 %v5523_v44, 16  ;;  %v3824_v24 = vshrl.u32 %v8099_v4, 16  ;;  %v3789_v19 = vrot.slane %v3787_v46, 4  ;;  %9085 = vst [vmem:[#allocation23_spill] sm:$0xff] %v8132_v49 }
 0x110   : > { %v8128_v42 = vpop.f32.mrf.mxu1  ;;  %v3792_v35 = vrot.slane %v3790_v3, 5  ;;  %v8130_v18 = vrot.slane %v3796_v36, 5  ;;  %v3802_v10 = vrot.slane %v3800_v26, 4  ;;  %v9086_v44 = vcombine.low %v7677_v15, %v7705_v32  ;;  %v8151_v32 = vld [vmem:[%s6390_s23 + $0x8c] sm:$0x1] }
 0x111   : > { %6188 = vmatmul.mubr.msk.bf16.gmra.mxu0 %vm669_vm3, %v6329_v41  ;;  %v3782_v41 = vshll.u32 %v8091_v56, 16  ;;  %9084 = vst [vmem:[#allocation22_spill] sm:$0xff] %v8128_v42  ;;  %v3769_v30 = vor.u32 %v3768_v37, %v3765_v33  ;;  %v3779_v55 = vor.u32 %v3778_v7, %v8104_v50  ;;  %v3806_v46 = vshll.u32 %v8117_v60, 16  ;;  %v5585_v33 = vld [vmem:[%s6390_s23 + $0x78] sm:$0xe] }
 0x112   : > { %6191 = vmatprep.mubr.msk.bf16.mxu0 %vm669_vm3, %v6330_v59  ;;  %v3820_v59 = vshll.u32 %v8099_v4, 16  ;;  %v8142_v3 = vrot.slane %v3755_v45, 4  ;;  %v8146_v36 = vsel %vm6720_vm7, %v4382_v16, %v4383_v34  ;;  %v5600_v26 = vrot.slane %v8120_v8, 9  ;;  %v8156_v42 = vpop.f32.mrf.mxu1  ;;  %v5526_v8 = vld [vmem:[%s6390_s23 + $0x90] sm:$0xf] }
 0x113   : > { %v4394_v15 = vrot.slane %v8073_v51, 5  ;;  %v3813_v37 = vrot.slane %v3811_v11, 4  ;;  %v3816_v7 = vrot.slane %v3814_v14, 5  ;;  %9087 = vst [vmem:[#allocation24_spill] sm:$0xff] %v8156_v42  ;;  %v3784_v45 = vrot.slane %v3782_v41, 5 }
 0x114   : > { %6154 = vmatmul.mubr.msk.bf16.gmra.mxu1 %vm669_vm3, %v9083_v54  ;;  %v4387_v54 = vrot.slane %v8035_v2, 5  ;;  %v8154_v2 = vrot.slane %v3820_v59, 5  ;;  %v4390_v49 = vrot.slane %v8091_v56, 5  ;;  %v3793_v16 = vor.u32 %v3792_v35, %v3789_v19  ;;  %v8165_v59 = vld [vmem:[%s6390_s23 + $0x94] sm:$0xf] }
 0x115   : > { %6157 = vmatprep.mubr.msk.bf16.mxu1 %vm669_vm3, %v9086_v44  ;;  %v3826_v44 = vrot.slane %v3824_v24, 4  ;;  %v3803_v34 = vor.u32 %v3802_v10, %v8130_v18  ;;  %v3770_v51 = vrot.slane %v3769_v30, 4  ;;  %v3780_v11 = vrot.slane %v3779_v55, 4 }
 0x116   : > { %v4389_v62 = vrot.slane %v4387_v54, 4  ;;  %v3808_v14 = vrot.slane %v3806_v46, 5  ;;  %v9088_v24 = vcombine.low %v7798_v61, %v7802_v40  ;;  %v5601_v56 = vrot.slane %v5585_v33, 9 }
 0x117   : > { %v4396_v35 = vrot.slane %v4394_v15, 4  ;;  %v4397_v10 = vrot.slane %v8117_v60, 5  ;;  %v3830_v41 = vshll.u32 %v8151_v32, 16  ;;  %v3827_v30 = vor.u32 %v3826_v44, %v8154_v2 }
 0x118   : > { %v3835_v55 = vshrl.u32 %v5526_v8, 16  ;;  %v3838_v46 = vshll.u32 %v5526_v8, 16  ;;  %v9090_v61 = vcombine.low %v7717_v9, %v7722_v47  ;;  %v3794_v40 = vrot.slane %v3793_v16, 4 }
 0x119   : > { %v8161_v28 = vpop.f32.mrf.mxu0  ;;  %6192 = vmatmul.mubr.msk.bf16.gmra.mxu0 %vm669_vm3, %v6331_v13  ;;  %v3817_v13 = vor.u32 %v3816_v7, %v3813_v37  ;;  %v3804_v33 = vrot.slane %v3803_v34, 4  ;;  %v3844_v60 = vshll.u32 %v8165_v59, 16  ;;  %v3761_v37 = vsel %vm6434_vm4, %v8142_v3, %v8087_v25 }
 0x11a   : > { %6231 = vmatprep.mubr.msk.bf16.mxu0 %vm669_vm3, %v9088_v24  ;;  %v3848_v24 = vshrl.u32 %v8165_v59, 16  ;;  %v3775_v9 = vsel %vm6434_vm4, %v3770_v51, %v8104_v50  ;;  %v8197_v47 = vsel %vm6720_vm7, %v5600_v26, %v4387_v54  ;;  %v8201_v7 = vsel %vm6720_vm7, %v4389_v62, %v4390_v49  ;;  %v5586_v54 = vld [vmem:[%s6390_s23 + $0x84] sm:$0xe]  ;;  %v9129_v31 = vld [vmem:[#allocation24_spill] sm:$0xff] }
 0x11b   : > { %v8173_v19 = vpop.f32.mrf.mxu0  ;;  %v8209_v25 = vsel %vm6720_vm7, %v5601_v56, %v4394_v15  ;;  %v8213_v50 = vsel %vm6720_vm7, %v4396_v35, %v4397_v10  ;;  %v3832_v3 = vrot.slane %v3830_v41, 5  ;;  %v3818_v62 = vrot.slane %v3817_v13, 4  ;;  %v8237_v13 = vld [vmem:[%s6390_s23 + $0x98] sm:$0x1] }
 0x11c   : > { %9089 = vst [vmem:[#allocation25_spill] sm:$0xff] %v8173_v19  ;;  %v8176_v42 = vpop.f32.mrf.mxu1  ;;  %6158 = vmatmul.mubr.msk.bf16.gmra.mxu1 %vm669_vm3, %v9090_v61  ;;  %v3828_v49 = vrot.slane %v3827_v30, 4  ;;  %v3837_v16 = vrot.slane %v3835_v55, 4  ;;  %v3840_v34 = vrot.slane %v3838_v46, 5  ;;  %v3799_v15 = vsel %vm6434_vm4, %v3794_v40, %v8130_v18  ;;  %v5529_v30 = vld [vmem:[%s6390_s23 + $0x9c] sm:$0xf] }
 0x11d   : > { %v8184_v19 = vpop.f32.mrf.mxu0  ;;  %6197 = vmatprep.mubr.msk.bf16.mxu1 %vm669_vm3, %v7868_v27  ;;  %v3785_v27 = vsel %vm6434_vm4, %v3780_v11, %v3784_v45  ;;  %v3809_v45 = vsel %vm6434_vm4, %v3804_v33, %v3808_v14  ;;  %v8225_v51 = vrot.slane %v3844_v60, 5  ;;  %v3850_v11 = vrot.slane %v3848_v24, 4  ;;  %v8268_v24 = vld [vmem:[%s6390_s23 + $0xa0] sm:$0xf] }
 0x11e   : > { %v8203_v44 = vpop.f32.mrf.mxu1  ;;  %v9091_v35 = vcombine.low %v7838_v48, %v7842_v38  ;;  %v5615_v10 = vcombine.low %v8061_v43, %v8078_v17  ;;  %v5616_v41 = vcombine.low %v8113_v58, %v8146_v36  ;;  %v5602_v18 = vrot.slane %v5586_v54, 9 }
 0x11f   : > { %v8216_v26 = vpop.f32.mrf.mxu0  ;;  %v4401_v14 = vrot.slane %v8099_v4, 5  ;;  %v9092_v48 = vcombine.low %v7921_v6, %v7925_v22  ;;  %v9093_v38 = vsel %vm6434_vm4, %v8080_v29, %v8039_v39  ;;  %v8253_v61 = vcombine.low %v3775_v9, %v3785_v27  ;;  %v5587_v29 = vld [vmem:[%s6390_s23 + $0x90] sm:$0xe]  ;;  %v9100_v4 = vld [vmem:[#allocation2_spill] sm:$0xff] }
 0x120   : > { %v8218_v8 = vpop.f32.mrf.mxu1  ;;  %v8251_v46 = vcombine.low %v9093_v38, %v3761_v37  ;;  %v8259_v60 = vcombine.low %v3799_v15, %v3809_v45  ;;  %v3823_v6 = vsel %vm6434_vm4, %v3818_v62, %v8154_v2  ;;  %v3833_v22 = vsel %vm6434_vm4, %v3828_v49, %v3832_v3 }
 0x121   : > { %v6029_v56 = vpop.f32.mrf.mxu0  ;;  %6232 = vmatmul.mubr.msk.bf16.vlgmr.msra.gmra.mxu0 %vm669_vm3, %v9091_v35  ;;  %v3841_v39 = vor.u32 %v3840_v34, %v3837_v16  ;;  %v3851_v9 = vor.u32 %v3850_v11, %v8225_v51  ;;  %v3854_v27 = vshll.u32 %v8237_v13, 16  ;;  %v3859_v54 = vshrl.u32 %v5529_v30, 16 }
 0x122   : > { %v8240_v55 = vpop.f32.mrf.mxu1  ;;  %6235 = vmatprep.mubr.msk.bf16.mxu0 %vm669_vm3, %v9092_v48  ;;  %v3862_v15 = vshll.u32 %v5529_v30, 16  ;;  %v8279_v3 = vsel %vm6720_vm7, %v5602_v18, %v4401_v14  ;;  %v4403_v62 = vrot.slane %v4401_v14, 4  ;;  %v4404_v49 = vrot.slane %v8151_v32, 5 }
 0x123   : > { %v1473_v33 = vpop.f32.mrf.mxu0  ;;  %v5603_v16 = vrot.slane %v5587_v29, 9  ;;  %v4408_v34 = vrot.slane %v8165_v59, 5  ;;  %v3868_v11 = vshll.u32 %v8268_v24, 16  ;;  %v3872_v35 = vshrl.u32 %v8268_v24, 16 }
 0x124   : > { %v5995_v37 = vpop.f32.mrf.mxu1  ;;  %6198 = vmatmul.mubr.msk.bf16.vlgmr.msra.gmra.mxu1 %vm669_vm3, %v7870_v57  ;;  %v8288_v48 = vcombine.low %v3823_v6, %v3833_v22  ;;  %v8290_v18 = vrot.slane %v3841_v39, 4  ;;  %v3852_v32 = vrot.slane %v3851_v9, 4  ;;  %v3856_v38 = vrot.slane %v3854_v27, 5  ;;  %v5532_v22 = vld [vmem:[%s6390_s23 + $0xa8] sm:$0xf] }
 0x125   : > { %v1057_v45 = vadd.f32 %v5995_v37, %v7766_v5  ;;  %v6030_v2 = vpop.f32.mrf.mxu0  ;;  %6201 = vmatprep.mubr.msk.bf16.mxu1 %vm669_vm3, %v8017_v23  ;;  %v3861_v29 = vrot.slane %v3859_v54, 4  ;;  %v3864_v59 = vrot.slane %v3862_v15, 5  ;;  %v4411_v6 = vrot.slane %v8237_v13, 5  ;;  %v8316_v27 = vld [vmem:[%s6390_s23 + $0xac] sm:$0xf] }
 0x126   : > { %v1048_v57 = vpop.f32.mrf.mxu1  ;;  %v3874_v9 = vrot.slane %v3872_v35, 4  ;;  %v9097_v35 = vld [vmem:[#allocation8_spill] sm:$0xff] }
 0x127   : > { %v8285_v5 = vadd.f32 %v6029_v56, %v1057_v45  ;;  %v1049_v23 = vadd.f32 %v1048_v57, %v7790_v20  ;;  %v1476_v30 = vpop.f32.mrf.mxu0  ;;  %v9094_v45 = vcombine.low %v7958_v63, %v7984_v52  ;;  %v8301_v20 = vsel %vm6720_vm7, %v4403_v62, %v4404_v49  ;;  %v5588_v62 = vld [vmem:[%s6390_s23 + $0x9c] sm:$0xe] }
 0x128   : > { %v5996_v14 = vpop.f32.mrf.mxu1  ;;  %v4410_v63 = vrot.slane %v4408_v34, 4  ;;  %v8313_v52 = vrot.slane %v3868_v11, 5  ;;  %v4415_v49 = vrot.slane %v8268_v24, 5  ;;  %v3892_v24 = vshll.u32 %v8316_v27, 16 }
 0x129   : > { %v8292_v37 = vadd.f32 %v1473_v33, %v1049_v23  ;;  %v1060_v40 = vadd.f32 %v5996_v14, %v7809_v53  ;;  %v6033_v56 = vpop.f32.mrf.mxu0  ;;  %6236 = vmatmul.mubr.msk.bf16.gmra.mxu0 %vm669_vm3, %v9094_v45  ;;  %v9095_v33 = vcombine.low %v8023_v21, %v8027_v1  ;;  %v8311_v53 = vsel %vm6720_vm7, %v5603_v16, %v4408_v34  ;;  %v5531_v1 = vld [vmem:[%s6390_s23 + $0xa4] sm:$0x1]  ;;  %v9096_v16 = vld [vmem:[#allocation11_spill] sm:$0xff] }
 0x12a   : > { %v1051_v39 = vpop.f32.mrf.mxu1  ;;  %v3847_v21 = vsel %vm6434_vm4, %v8290_v18, %v8225_v51  ;;  %v3883_v34 = vshrl.u32 %v5532_v22, 16  ;;  %v9098_v51 = vld [vmem:[#allocation16_spill] sm:$0xff]  ;;  %v3896_v18 = vshrl.u32 %v8316_v27, 16 }
 0x12b   : > { %6239 = vmatprep.mubr.msk.bf16.mxu0 %vm669_vm3, %v9095_v33  ;;  %v8318_v54 = vadd.f32 %v6030_v2, %v1060_v40  ;;  %v1052_v13 = vadd.f32 %v1051_v39, %v7854_v12  ;;  %v1489_v15 = vpop.f32.mrf.mxu0  ;;  %v3857_v40 = vsel %vm6434_vm4, %v3852_v32, %v3856_v38  ;;  %v3865_v2 = vor.u32 %v3864_v59, %v3861_v29  ;;  %v9099_v59 = vld [vmem:[#allocation12_spill] sm:$0xff] }
 0x12c   : > { %v5999_v57 = vpop.f32.mrf.mxu1  ;;  %6202 = vmatmul.mubr.msk.bf16.gmra.mxu1 %vm669_vm3, %v9096_v16  ;;  %v3886_v12 = vshll.u32 %v5532_v22, 16  ;;  %v8341_v39 = vsel %vm6720_vm7, %v4410_v63, %v4411_v6  ;;  %v3875_v32 = vor.u32 %v3874_v9, %v8313_v52  ;;  %v3878_v38 = vshll.u32 %v5531_v1, 16 }
 0x12d   : > { %v8332_v11 = vadd.f32 %v1476_v30, %v1052_v13  ;;  %v1073_v23 = vadd.f32 %v5999_v57, %v9097_v35  ;;  %v6034_v14 = vpop.f32.mrf.mxu0  ;;  %6205 = vmatprep.mubr.msk.bf16.mxu1 %vm669_vm3, %v9098_v51  ;;  %v5604_v30 = vrot.slane %v5588_v62, 9  ;;  %v4417_v13 = vrot.slane %v4415_v49, 4 }
 0x12e   : > { %v1064_v45 = vpop.f32.mrf.mxu1  ;;  %v4418_v57 = vrot.slane %v5531_v1, 5  ;;  %v8349_v51 = vrot.slane %v3865_v2, 4  ;;  %v3885_v6 = vrot.slane %v3883_v34, 4  ;;  %v3888_v63 = vrot.slane %v3886_v12, 5  ;;  %v8359_v1 = vld [vmem:[%s6390_s23 + $0xb0] sm:$0x1] }
 0x12f   : > { %v8344_v29 = vadd.f32 %v6033_v56, %v1073_v23  ;;  %v1065_v22 = vadd.f32 %v1064_v45, %v9099_v59  ;;  %v1492_v33 = vpop.f32.mrf.mxu0  ;;  %v8361_v23 = vrot.slane %v3892_v24, 5  ;;  %v3898_v2 = vrot.slane %v3896_v18, 4  ;;  %v9101_v12 = vld [vmem:[#allocation14_spill] sm:$0xff] }
 0x130   : > { %v6000_v16 = vpop.f32.mrf.mxu1  ;;  %v8371_v43 = vrot.slane %v3875_v32, 4  ;;  %v8373_v17 = vrot.slane %v3878_v38, 5  ;;  %v8381_v58 = vsel %vm6720_vm7, %v5604_v30, %v4415_v49  ;;  %v8385_v36 = vsel %vm6720_vm7, %v4417_v13, %v4418_v57  ;;  %v8397_v30 = vld [vmem:[%s6390_s23 + $0xb8] sm:$0xf] }
 0x131   : > { %v8351_v9 = vadd.f32 %v1489_v15, %v1065_v22  ;;  %v1076_v62 = vadd.f32 %v6000_v16, %v9100_v4  ;;  %v6037_v56 = vpop.f32.mrf.mxu0  ;;  %6240 = vmatmul.mubr.msk.bf16.gmra.mxu0 %vm669_vm3, %v5615_v10  ;;  %v8367_v15 = vcombine.low %v3847_v21, %v3857_v40  ;;  %v5589_v10 = vld [vmem:[%s6390_s23 + $0xa8] sm:$0xe]  ;;  %v3889_v32 = vor.u32 %v3888_v63, %v3885_v6  ;;  %v9103_v22 = vld [vmem:[#allocation9_spill] sm:$0xff] }
 0x132   : > { %v1067_v45 = vpop.f32.mrf.mxu1  ;;  %6243 = vmatprep.mubr.msk.bf16.mxu0 %vm669_vm3, %v5616_v41  ;;  %v5535_v41 = vld [vmem:[%s6390_s23 + $0xb4] sm:$0xf]  ;;  %v9102_v40 = vld [vmem:[#allocation19_spill] sm:$0xff]  ;;  %v3902_v38 = vshll.u32 %v8359_v1, 16  ;;  %v4422_v49 = vrot.slane %v8316_v27, 5  ;;  %v3899_v16 = vor.u32 %v3898_v2, %v8361_v23  ;;  %v3881_v27 = vsel %vm6434_vm4, %v8371_v43, %v8373_v17 }
 0x133   : > { %v8376_v34 = vadd.f32 %v6034_v14, %v1076_v62  ;;  %v1068_v24 = vadd.f32 %v1067_v45, %v9101_v12  ;;  %v1505_v18 = vpop.f32.mrf.mxu0  ;;  %v5605_v62 = vrot.slane %v5589_v10, 9  ;;  %v3907_v6 = vshrl.u32 %v5535_v41, 16 }
 0x134   : > { %v6003_v21 = vpop.f32.mrf.mxu1  ;;  %6206 = vmatmul.mubr.msk.bf16.gmra.mxu1 %vm669_vm3, %v9102_v40  ;;  %v3910_v63 = vshll.u32 %v5535_v41, 16  ;;  %v3916_v2 = vshll.u32 %v8397_v30, 16  ;;  %v3920_v10 = vshrl.u32 %v8397_v30, 16  ;;  %v5538_v40 = vld [vmem:[%s6390_s23 + $0xc0] sm:$0xf]  ;;  %v3890_v4 = vrot.slane %v3889_v32, 4 }
 0x135   : > { %v8399_v59 = vadd.f32 %v1492_v33, %v1068_v24  ;;  %v1089_v13 = vadd.f32 %v6003_v21, %v9103_v22  ;;  %v6038_v57 = vpop.f32.mrf.mxu0  ;;  %6209 = vmatprep.mubr.msk.bf16.mxu1 %vm669_vm3, %v8251_v46  ;;  %v9105_v24 = vld [vmem:[#allocation18_spill] sm:$0xff]  ;;  %v3904_v43 = vrot.slane %v3902_v38, 5  ;;  %v4424_v17 = vrot.slane %v4422_v49, 4 }
 0x136   : > { %v1080_v45 = vpop.f32.mrf.mxu1  ;;  %v4425_v33 = vrot.slane %v8359_v1, 5  ;;  %v8427_v14 = vsel %vm6720_vm7, %v5605_v62, %v4422_v49  ;;  %v8430_v32 = vld [vmem:[%s6390_s23 + $0xc4] sm:$0xf]  ;;  %v9109_v1 = vcombine.low %v8209_v25, %v8213_v50  ;;  %v8442_v62 = vrot.slane %v3916_v2, 5 }
 0x137   : > { %v8411_v12 = vadd.f32 %v6037_v56, %v1089_v13  ;;  %v1081_v21 = vadd.f32 %v1080_v45, %v9105_v24  ;;  %v1508_v46 = vpop.f32.mrf.mxu0  ;;  %v9107_v56 = vld [vmem:[#allocation21_spill] sm:$0xff]  ;;  %v9108_v45 = vcombine.low %v8197_v47, %v8201_v7  ;;  %v3900_v24 = vrot.slane %v3899_v16, 4  ;;  %v9110_v16 = vld [vmem:[#allocation23_spill] sm:$0xff] }
 0x138   : > { %v6004_v22 = vpop.f32.mrf.mxu1  ;;  %v3931_v47 = vshrl.u32 %v5538_v40, 16  ;;  %v3934_v7 = vshll.u32 %v5538_v40, 16  ;;  %v3895_v25 = vsel %vm6434_vm4, %v3890_v4, %v8361_v23  ;;  %v8451_v50 = vsel %vm6720_vm7, %v4424_v17, %v4425_v33  ;;  %v5590_v40 = vld [vmem:[%s6390_s23 + $0xb4] sm:$0xe] }
 0x139   : > { %9104 = vst [vmem:[#allocation11_spill] sm:$0xff] %v8411_v12  ;;  %v8418_v35 = vadd.f32 %v1505_v18, %v1081_v21  ;;  %v1092_v41 = vadd.f32 %v6004_v22, %v9107_v56  ;;  %v6041_v13 = vpop.f32.mrf.mxu0  ;;  %6244 = vmatmul.mubr.msk.bf16.gmra.mxu0 %vm669_vm3, %v9108_v45  ;;  %v8437_v18 = vld [vmem:[%s6390_s23 + $0xbc] sm:$0x1]  ;;  %v3909_v21 = vrot.slane %v3907_v6, 4  ;;  %v3912_v22 = vrot.slane %v3910_v63, 5 }
 0x13a   : > { %v1083_v38 = vpop.f32.mrf.mxu1  ;;  %6247 = vmatprep.mubr.msk.bf16.mxu0 %vm669_vm3, %v9109_v1  ;;  %v3944_v6 = vshrl.u32 %v8430_v32, 16  ;;  %v3926_v23 = vshll.u32 %v8437_v18, 16  ;;  %v4429_v17 = vrot.slane %v8397_v30, 5  ;;  %v9111_v1 = vld [vmem:[#allocation25_spill] sm:$0xff] }
 0x13b   : > { %9106 = vst [vmem:[#allocation8_spill] sm:$0xff] %v8418_v35  ;;  %v8439_v56 = vadd.f32 %v6038_v57, %v1092_v41  ;;  %v1084_v45 = vadd.f32 %v1083_v38, %v9110_v16  ;;  %v1521_v49 = vpop.f32.mrf.mxu0  ;;  %v3922_v35 = vrot.slane %v3920_v10, 4  ;;  %v3940_v57 = vshll.u32 %v8430_v32, 16 }
 0x13c   : > { %v6007_v12 = vpop.f32.mrf.mxu1  ;;  %6210 = vmatmul.mubr.msk.bf16.gmra.mxu1 %vm669_vm3, %v8253_v61  ;;  %v3905_v61 = vsel %vm6434_vm4, %v3900_v24, %v3904_v43  ;;  %v3913_v33 = vor.u32 %v3912_v22, %v3909_v21  ;;  %v3933_v41 = vrot.slane %v3931_v47, 4  ;;  %v3936_v38 = vrot.slane %v3934_v7, 5 }
 0x13d   : > { %v8455_v63 = vadd.f32 %v1508_v46, %v1084_v45  ;;  %v1105_v2 = vadd.f32 %v6007_v12, %v8161_v28  ;;  %v6042_v10 = vpop.f32.mrf.mxu0  ;;  %6213 = vmatprep.mubr.msk.bf16.mxu1 %vm669_vm3, %v8259_v60  ;;  %v9112_v60 = vsel %vm6434_vm4, %v8349_v51, %v8313_v52  ;;  %v3923_v24 = vor.u32 %v3922_v35, %v8442_v62 }
 0x13e   : > { %v1096_v4 = vpop.f32.mrf.mxu1  ;;  %v8473_v43 = vcombine.low %v9112_v60, %v3881_v27  ;;  %v8476_v30 = vcombine.low %v3895_v25, %v3905_v61  ;;  %v8480_v22 = vrot.slane %v3940_v57, 5  ;;  %v3946_v47 = vrot.slane %v3944_v6, 4  ;;  %v5540_v27 = vld [vmem:[%s6390_s23 + $0xc8] sm:$0x1] }
 0x13f   : > { %v8465_v46 = vadd.f32 %v6041_v13, %v1105_v2  ;;  %v1097_v28 = vadd.f32 %v1096_v4, %v9111_v1  ;;  %v1524_v12 = vpop.f32.mrf.mxu0  ;;  %v5622_v13 = vcombine.low %v8427_v14, %v8451_v50  ;;  %v9113_v52 = vcombine.low %v8279_v3, %v8301_v20  ;;  %v5541_v14 = vld [vmem:[%s6390_s23 + $0xcc] sm:$0xf]  ;;  %v8501_v20 = vld [vmem:[%s6390_s23 + $0xd0] sm:$0xf]  ;;  %v5591_v4 = vld [vmem:[%s6390_s23 + $0xc0] sm:$0xe] }
 0x140   : > { %v6008_v21 = vpop.f32.mrf.mxu1  ;;  %v8489_v35 = vrot.slane %v3926_v23, 5  ;;  %v5606_v51 = vrot.slane %v5590_v40, 9  ;;  %v9114_v50 = vcombine.low %v8311_v53, %v8341_v39  ;;  %v4432_v57 = vrot.slane %v8437_v18, 5 }
 0x141   : > { %v8482_v7 = vadd.f32 %v1521_v49, %v1097_v28  ;;  %v1108_v16 = vadd.f32 %v6008_v21, %v8184_v19  ;;  %v6045_v45 = vpop.f32.mrf.mxu0  ;;  %6248 = vmatmul.mubr.msk.bf16.gmra.mxu0 %vm669_vm3, %v9113_v52  ;;  %v8497_v49 = vrot.slane %v3913_v33, 4  ;;  %v4431_v19 = vrot.slane %v4429_v17, 4 }
 0x142   : > { %v1099_v25 = vpop.f32.mrf.mxu1  ;;  %6251 = vmatprep.mubr.msk.bf16.mxu0 %vm669_vm3, %v9114_v50  ;;  %v3937_v3 = vor.u32 %v3936_v38, %v3933_v41  ;;  %v8506_v23 = vrot.slane %v3923_v24, 4  ;;  %v4436_v53 = vrot.slane %v8430_v32, 5  ;;  %v3947_v33 = vor.u32 %v3946_v47, %v8480_v22 }
 0x143   : > { %v8503_v6 = vadd.f32 %v6042_v10, %v1108_v16  ;;  %v1100_v2 = vadd.f32 %v1099_v25, %v8216_v26  ;;  %v1537_v61 = vpop.f32.mrf.mxu0  ;;  %v3950_v18 = vshll.u32 %v5540_v27, 16  ;;  %v3955_v40 = vshrl.u32 %v5541_v14, 16  ;;  %v9117_v10 = vld [vmem:[#allocation4_spill] sm:$0xff]  ;;  %v9118_v16 = vld [vmem:[#allocation3_spill] sm:$0xff] }
 0x144   : > { %v6011_v39 = vpop.f32.mrf.mxu1  ;;  %6214 = vmatmul.mubr.msk.bf16.gmra.mxu1 %vm669_vm3, %v8288_v48  ;;  %v3958_v41 = vshll.u32 %v5541_v14, 16  ;;  %v3964_v28 = vshll.u32 %v8501_v20, 16  ;;  %v3968_v32 = vshrl.u32 %v8501_v20, 16  ;;  %v4430_v48 = vsel %vm6720_vm7, %v5606_v51, %v4429_v17  ;;  %v9119_v17 = vld [vmem:[#allocation6_spill] sm:$0xff] }
 0x145   : > { %9115 = vst [vmem:[#allocation16_spill] sm:$0xff] %v8503_v6  ;;  %v8513_v38 = vadd.f32 %v1524_v12, %v1100_v2  ;;  %v1121_v1 = vadd.f32 %v6011_v39, %v9117_v10  ;;  %v6046_v26 = vpop.f32.mrf.mxu0  ;;  %6217 = vmatprep.mubr.msk.bf16.mxu1 %vm669_vm3, %v8367_v15  ;;  %v4433_v24 = vsel %vm6720_vm7, %v4431_v19, %v4432_v57  ;;  %v3938_v21 = vrot.slane %v3937_v3, 4 }
 0x146   : > { %v1112_v60 = vpop.f32.mrf.mxu1  ;;  %v5607_v12 = vrot.slane %v5591_v4, 9  ;;  %v4438_v25 = vrot.slane %v4436_v53, 4  ;;  %v4439_v15 = vrot.slane %v5540_v27, 5  ;;  %v3948_v2 = vrot.slane %v3947_v33, 4  ;;  %v5543_v33 = vld [vmem:[%s6390_s23 + $0xd4] sm:$0x1] }
 0x147   : > { %9116 = vst [vmem:[#allocation12_spill] sm:$0xff] %v8513_v38  ;;  %v8524_v47 = vadd.f32 %v6045_v45, %v1121_v1  ;;  %v1113_v52 = vadd.f32 %v1112_v60, %v9118_v16  ;;  %v1540_v14 = vpop.f32.mrf.mxu0  ;;  %v3952_v39 = vrot.slane %v3950_v18, 5  ;;  %v3957_v10 = vrot.slane %v3955_v40, 4  ;;  %v9121_v18 = vld [vmem:[#allocation5_spill] sm:$0xff] }
 0x148   : > { %v6012_v50 = vpop.f32.mrf.mxu1  ;;  %v3960_v38 = vrot.slane %v3958_v41, 5  ;;  %v9120_v45 = vcombine.low %v8381_v58, %v8385_v36  ;;  %v8534_v57 = vrot.slane %v3964_v28, 5  ;;  %v3970_v27 = vrot.slane %v3968_v32, 4 }
 0x149   : > { %v8527_v6 = vadd.f32 %v1537_v61, %v1113_v52  ;;  %v1124_v51 = vadd.f32 %v6012_v50, %v9119_v17  ;;  %v6049_v19 = vpop.f32.mrf.mxu0  ;;  %v3919_v61 = vsel %vm6434_vm4, %v8497_v49, %v8442_v62  ;;  %v3929_v4 = vsel %vm6434_vm4, %v8506_v23, %v8489_v35  ;;  %v5592_v62 = vld [vmem:[%s6390_s23 + $0xcc] sm:$0xe] }
 0x14a   : > { %6252 = vmatmul.mubr.msk.bf16.gmra.mxu0 %vm669_vm3, %v9120_v45  ;;  %v1115_v3 = vpop.f32.mrf.mxu1  ;;  %v4443_v58 = vrot.slane %v8501_v20, 5  ;;  %v4440_v1 = vsel %vm6720_vm7, %v4438_v25, %v4439_v15  ;;  %v5623_v35 = vcombine.low %v4430_v48, %v4433_v24  ;;  %v3943_v20 = vsel %vm6434_vm4, %v3938_v21, %v8480_v22  ;;  %v9123_v25 = vld [vmem:[#allocation10_spill] sm:$0xff] }
 0x14b   : > { %6255 = vmatprep.mubr.msk.bf16.mxu0 %vm669_vm3, %v5622_v13  ;;  %v8547_v36 = vadd.f32 %v6046_v26, %v1124_v51  ;;  %v1116_v40 = vadd.f32 %v1115_v3, %v9121_v18  ;;  %v1553_v41 = vpop.f32.mrf.mxu0  ;;  %v4437_v13 = vsel %vm6720_vm7, %v5607_v12, %v4436_v53  ;;  %v3953_v23 = vsel %vm6434_vm4, %v3948_v2, %v3952_v39  ;;  %v9122_v53 = vld [vmem:[#allocation7_spill] sm:$0xff] }
 0x14c   : > { %v6015_v49 = vpop.f32.mrf.mxu1  ;;  %6218 = vmatmul.mubr.msk.bf16.gmra.mxu1 %vm669_vm3, %v8473_v43  ;;  %v3961_v26 = vor.u32 %v3960_v38, %v3957_v10  ;;  %v3971_v12 = vor.u32 %v3970_v27, %v8534_v57  ;;  %v3974_v43 = vshll.u32 %v5543_v33, 16  ;;  %v5624_v24 = vcombine.low %v4437_v13, %v4440_v1 }
 0x14d   : > { %v8562_v28 = vadd.f32 %v1540_v14, %v1116_v40  ;;  %v1137_v32 = vadd.f32 %v6015_v49, %v9122_v53  ;;  %v6050_v60 = vpop.f32.mrf.mxu0  ;;  %6221 = vmatprep.mubr.msk.bf16.mxu1 %vm669_vm3, %v8476_v30  ;;  %v5608_v16 = vrot.slane %v5592_v62, 9  ;;  %v4445_v52 = vrot.slane %v4443_v58, 4  ;;  %v9124_v30 = vld [vmem:[#allocation13_spill] sm:$0xff] }
 0x14e   : > { %v1128_v48 = vpop.f32.mrf.mxu1  ;;  %v4446_v22 = vrot.slane %v5543_v33, 5  ;;  %v5558_v50 = vcombine.low %v3919_v61, %v3929_v4  ;;  %v5559_v2 = vcombine.low %v3943_v20, %v3953_v23  ;;  %v3962_v39 = vrot.slane %v3961_v26, 4  ;;  %v9125_v33 = vld [vmem:[#allocation15_spill] sm:$0xff]  ;;  %v9126_v62 = vld [vmem:[#allocation17_spill] sm:$0xff]  ;;  %v9127_v26 = vld [vmem:[#allocation20_spill] sm:$0xff] }
 0x14f   : > { %v8568_v21 = vadd.f32 %v6049_v19, %v1137_v32  ;;  %v1129_v38 = vadd.f32 %v1128_v48, %v9123_v25  ;;  %v1556_v14 = vpop.f32.mrf.mxu0  ;;  %v3972_v45 = vrot.slane %v3971_v12, 4  ;;  %v3976_v27 = vrot.slane %v3974_v43, 5  ;;  %v9128_v43 = vld [vmem:[#allocation22_spill] sm:$0xff] }
 0x150   : > { %v6016_v15 = vpop.f32.mrf.mxu1  ;;  %v4444_v19 = vsel %vm6720_vm7, %v5608_v16, %v4443_v58  ;;  %v4447_v61 = vsel %vm6720_vm7, %v4445_v52, %v4446_v22  ;;  %v3967_v13 = vsel %vm6434_vm4, %v3962_v39, %v8534_v57 }
 0x151   : > { %v8571_v10 = vadd.f32 %v1553_v41, %v1129_v38  ;;  %v1140_v17 = vadd.f32 %v6016_v15, %v9124_v30  ;;  %v6053_v51 = vpop.f32.mrf.mxu0  ;;  %v3977_v0 = vsel %vm6434_vm4, %v3972_v45, %v3976_v27 }
 0x152   : > { %6256 = vmatmul.mubr.msk.bf16.gmra.mxu0 %vm669_vm3, %v5623_v35  ;;  %v1131_v3 = vpop.f32.mrf.mxu1  ;;  %v5625_v35 = vcombine.low %v4444_v19, %v4447_v61  ;;  %v5560_v12 = vcombine.low %v3967_v13, %v3977_v0 }
 0x153   : > { %6259 = vmatprep.mubr.msk.bf16.mxu0 %vm669_vm3, %v5624_v24  ;;  %v8580_v4 = vadd.f32 %v6050_v60, %v1140_v17  ;;  %v1132_v18 = vadd.f32 %v1131_v3, %v9125_v33  ;;  %v1569_v40 = vpop.f32.mrf.mxu0 }
 0x154   : > { %v6019_v41 = vpop.f32.mrf.mxu1  ;;  %6222 = vmatmul.mubr.msk.bf16.gmra.mxu1 %vm669_vm3, %v5558_v50 }
 0x155   : > { %v8587_v1 = vadd.f32 %v1556_v14, %v1132_v18  ;;  %v1153_v49 = vadd.f32 %v6019_v41, %v9126_v62  ;;  %v6054_v58 = vpop.f32.mrf.mxu0  ;;  %6225 = vmatprep.mubr.msk.bf16.mxu1 %vm669_vm3, %v5559_v2 }
 0x156   : > { %v1144_v20 = vpop.f32.mrf.mxu1 }
 0x157   : > { %v8593_v23 = vadd.f32 %v6053_v51, %v1153_v49  ;;  %v1145_v53 = vadd.f32 %v1144_v20, %v9127_v26  ;;  %v1572_v32 = vpop.f32.mrf.mxu0 }
 0x158   : > { %v6020_v60 = vpop.f32.mrf.mxu1 }
 0x159   : > { %v8596_v57 = vadd.f32 %v1569_v40, %v1145_v53  ;;  %v1156_v48 = vadd.f32 %v6020_v60, %v9128_v43  ;;  %v6057_v24 = vpop.f32.mrf.mxu0 }
 0x15a   : > { %6260 = vmatmul.mubr.msk.bf16.gmra.mxu0 %vm669_vm3, %v5625_v35  ;;  %v1147_v16 = vpop.f32.mrf.mxu1 }
 0x15b   : > { %v8600_v52 = vadd.f32 %v6054_v58, %v1156_v48  ;;  %v1148_v22 = vadd.f32 %v1147_v16, %v9129_v31  ;;  %v1585_v25 = vpop.f32.mrf.mxu0 }
 0x15c   : > { %v6023_v38 = vpop.f32.mrf.mxu1  ;;  %6226 = vmatmul.mubr.msk.bf16.gmra.mxu1 %vm669_vm3, %v5560_v12 }
 0x15d   : > { %v8604_v14 = vadd.f32 %v1572_v32, %v1148_v22  ;;  %v1169_v15 = vadd.f32 %v6023_v38, %v8176_v42  ;;  %v6058_v50 = vpop.f32.mrf.mxu0 }
 0x15e   : > { %v1160_v2 = vpop.f32.mrf.mxu1 }
 0x15f   : > { %v8607_v39 = vadd.f32 %v6057_v24, %v1169_v15  ;;  %v1161_v30 = vadd.f32 %v1160_v2, %v8203_v44  ;;  %v1588_v17 = vpop.f32.mrf.mxu0 }
 0x160   : > { %v6024_v51 = vpop.f32.mrf.mxu1 }
 0x161   : > { %v8610_v45 = vadd.f32 %v1585_v25, %v1161_v30  ;;  %v1172_v27 = vadd.f32 %v6024_v51, %v8218_v8  ;;  %v6097_v3 = vpop.f32.mrf.mxu0  ;;  %v9130_v30 = vld [vmem:[#allocation11_spill] sm:$0xff] }
 0x162   : > { %v1163_v19 = vpop.f32.mrf.mxu1 }
 0x163   : > { %v8613_v61 = vadd.f32 %v6058_v50, %v1172_v27  ;;  %v1164_v33 = vadd.f32 %v1163_v19, %v8240_v55  ;;  %v2558_v18 = vpop.f32.mrf.mxu0 }
 0x164   : > { %v6063_v42 = vpop.f32.mrf.mxu1 }
 0x165   : > { %v8616_v40 = vadd.f32 %v1588_v17, %v1164_v33  ;;  %v1961_v41 = vadd.f32 %v6063_v42, %v8285_v5  ;;  %v6098_v13 = vpop.f32.mrf.mxu0 }
 0x166   : > { %v1832_v44 = vpop.f32.mrf.mxu1 }
 0x167   : > { %v8619_v62 = vadd.f32 %v6097_v3, %v1961_v41  ;;  %v1959_v49 = vadd.f32 %v1832_v44, %v8292_v37  ;;  %v2561_v58 = vpop.f32.mrf.mxu0  ;;  %v9131_v3 = vld [vmem:[#allocation8_spill] sm:$0xff] }
 0x168   : > { %v6064_v8 = vpop.f32.mrf.mxu1 }
 0x169   : > { %v8622_v0 = vadd.f32 %v2558_v18, %v1959_v49  ;;  %v1962_v35 = vadd.f32 %v6064_v8, %v8318_v54  ;;  %v6101_v20 = vpop.f32.mrf.mxu0 }
 0x16a   : > { %v1835_v55 = vpop.f32.mrf.mxu1 }
 0x16b   : > { %v8625_v26 = vadd.f32 %v6098_v13, %v1962_v35  ;;  %v1960_v53 = vadd.f32 %v1835_v55, %v8332_v11  ;;  %v2574_v32 = vpop.f32.mrf.mxu0 }
 0x16c   : > { %v6067_v5 = vpop.f32.mrf.mxu1 }
 0x16d   : > { %v8628_v60 = vadd.f32 %v2561_v58, %v1960_v53  ;;  %v1965_v12 = vadd.f32 %v6067_v5, %v8344_v29  ;;  %v6102_v43 = vpop.f32.mrf.mxu0 }
 0x16e   : > { %v1848_v37 = vpop.f32.mrf.mxu1 }
 0x16f   : > { %v8631_v48 = vadd.f32 %v6101_v20, %v1965_v12  ;;  %v1963_v24 = vadd.f32 %v1848_v37, %v8351_v9  ;;  %v2577_v16 = vpop.f32.mrf.mxu0 }
 0x170   : > { %v6068_v54 = vpop.f32.mrf.mxu1 }
 0x171   : > { %v8634_v31 = vadd.f32 %v2574_v32, %v1963_v24  ;;  %v1966_v22 = vadd.f32 %v6068_v54, %v8376_v34  ;;  %v6105_v25 = vpop.f32.mrf.mxu0  ;;  %v9133_v54 = vld [vmem:[#allocation12_spill] sm:$0xff] }
 0x172   : > { %v1851_v11 = vpop.f32.mrf.mxu1 }
 0x173   : > { %v8637_v38 = vadd.f32 %v6102_v43, %v1966_v22  ;;  %v1964_v15 = vadd.f32 %v1851_v11, %v8399_v59  ;;  %v2590_v50 = vpop.f32.mrf.mxu0  ;;  %v9132_v43 = vld [vmem:[#allocation16_spill] sm:$0xff] }
 0x174   : > { %v6071_v29 = vpop.f32.mrf.mxu1 }
 0x175   : > { %v8640_v2 = vadd.f32 %v2577_v16, %v1964_v15  ;;  %v1969_v17 = vadd.f32 %v6071_v29, %v9130_v30  ;;  %v6106_v51 = vpop.f32.mrf.mxu0 }
 0x176   : > { %v1864_v9 = vpop.f32.mrf.mxu1 }
 0x177   : > { %v8643_v27 = vadd.f32 %v6105_v25, %v1969_v17  ;;  %v1967_v19 = vadd.f32 %v1864_v9, %v9131_v3  ;;  %v2593_v33 = vpop.f32.mrf.mxu0 }
 0x178   : > { %v6072_v34 = vpop.f32.mrf.mxu1 }
 0x179   : > { %v8646_v18 = vadd.f32 %v2590_v50, %v1967_v19  ;;  %v1970_v42 = vadd.f32 %v6072_v34, %v8439_v56  ;;  %v6109_v41 = vpop.f32.mrf.mxu0 }
 0x17a   : > { %v1867_v59 = vpop.f32.mrf.mxu1 }
 0x17b   : > { %v8649_v13 = vadd.f32 %v6106_v51, %v1970_v42  ;;  %v1968_v44 = vadd.f32 %v1867_v59, %v8455_v63  ;;  %v2606_v49 = vpop.f32.mrf.mxu0 }
 0x17c   : > { %v6075_v58 = vpop.f32.mrf.mxu1 }
 0x17d   : > { %v8652_v8 = vadd.f32 %v2593_v33, %v1968_v44  ;;  %v1973_v35 = vadd.f32 %v6075_v58, %v8465_v46  ;;  %v6110_v20 = vpop.f32.mrf.mxu0 }
 0x17e   : > { %v1880_v55 = vpop.f32.mrf.mxu1 }
 0x17f   : > { %v8655_v53 = vadd.f32 %v6109_v41, %v1973_v35  ;;  %v1971_v32 = vadd.f32 %v1880_v55, %v8482_v7  ;;  %v2609_v5 = vpop.f32.mrf.mxu0 }
 0x180   : > { %v6076_v56 = vpop.f32.mrf.mxu1 }
 0x181   : > { %v8658_v12 = vadd.f32 %v2606_v49, %v1971_v32  ;;  %v1974_v37 = vadd.f32 %v6076_v56, %v9132_v43  ;;  %v6113_v24 = vpop.f32.mrf.mxu0 }
 0x182   : > { %v1883_v63 = vpop.f32.mrf.mxu1 }
 0x183   : > { %v8661_v16 = vadd.f32 %v6110_v20, %v1974_v37  ;;  %v1972_v22 = vadd.f32 %v1883_v63, %v9133_v54  ;;  %v2622_v25 = vpop.f32.mrf.mxu0 }
 0x184   : > { %v6079_v46 = vpop.f32.mrf.mxu1 }
 0x185   : > { %v8664_v11 = vadd.f32 %v2609_v5, %v1972_v22  ;;  %v1977_v15 = vadd.f32 %v6079_v46, %v8524_v47  ;;  %v6114_v50 = vpop.f32.mrf.mxu0 }
 0x186   : > { %v1896_v7 = vpop.f32.mrf.mxu1 }
 0x187   : > { %v8667_v29 = vadd.f32 %v6113_v24, %v1977_v15  ;;  %v1975_v30 = vadd.f32 %v1896_v7, %v8527_v6  ;;  %v2625_v17 = vpop.f32.mrf.mxu0 }
 0x188   : > { %v6080_v51 = vpop.f32.mrf.mxu1 }
 0x189   : > { %v8670_v9 = vadd.f32 %v2622_v25, %v1975_v30  ;;  %v1978_v3 = vadd.f32 %v6080_v51, %v8547_v36  ;;  %v6117_v19 = vpop.f32.mrf.mxu0 }
 0x18a   : > { %v1899_v33 = vpop.f32.mrf.mxu1 }
 0x18b   : > { %v8673_v34 = vadd.f32 %v6114_v50, %v1978_v3  ;;  %v1976_v42 = vadd.f32 %v1899_v33, %v8562_v28  ;;  %v2638_v41 = vpop.f32.mrf.mxu0 }
 0x18c   : > { %v6083_v47 = vpop.f32.mrf.mxu1 }
 0x18d   : > { %v8676_v59 = vadd.f32 %v2625_v17, %v1976_v42  ;;  %v1981_v44 = vadd.f32 %v6083_v47, %v8568_v21  ;;  %v6118_v49 = vpop.f32.mrf.mxu0 }
 0x18e   : > { %v1912_v6 = vpop.f32.mrf.mxu1 }
 0x18f   : > { %v8679_v58 = vadd.f32 %v6117_v19, %v1981_v44  ;;  %v1979_v35 = vadd.f32 %v1912_v6, %v8571_v10  ;;  %v2641_v20 = vpop.f32.mrf.mxu0 }
 0x190   : > { %v6084_v36 = vpop.f32.mrf.mxu1 }
 0x191   : > { %v8682_v55 = vadd.f32 %v2638_v41, %v1979_v35  ;;  %v1982_v32 = vadd.f32 %v6084_v36, %v8580_v4  ;;  %v6121_v5 = vpop.f32.mrf.mxu0 }
 0x192   : > { %v1915_v28 = vpop.f32.mrf.mxu1 }
 0x193   : > { %9134 = vst [vmem:[#allocation2_spill] sm:$0xff] %v8682_v55  ;;  %v8685_v56 = vadd.f32 %v6118_v49, %v1982_v32  ;;  %v1980_v43 = vadd.f32 %v1915_v28, %v8587_v1  ;;  %v2654_v37 = vpop.f32.mrf.mxu0 }
 0x194   : > { %v6087_v21 = vpop.f32.mrf.mxu1 }
 0x195   : > { %9135 = vst [vmem:[#allocation14_spill] sm:$0xff] %v8685_v56  ;;  %v8688_v24 = vadd.f32 %v2641_v20, %v1980_v43  ;;  %v1985_v63 = vadd.f32 %v6087_v21, %v8593_v23  ;;  %v6122_v54 = vpop.f32.mrf.mxu0 }
 0x196   : > { %v1928_v10 = vpop.f32.mrf.mxu1 }
 0x197   : > { %9136 = vst [vmem:[#allocation19_spill] sm:$0xff] %v8688_v24  ;;  %v8691_v22 = vadd.f32 %v6121_v5, %v1985_v63  ;;  %v1983_v25 = vadd.f32 %v1928_v10, %v8596_v57  ;;  %v2657_v46 = vpop.f32.mrf.mxu0 }
 0x198   : > { %v6088_v4 = vpop.f32.mrf.mxu1 }
 0x199   : > { %v8694_v15 = vadd.f32 %v2654_v37, %v1983_v25  ;;  %v1986_v50 = vadd.f32 %v6088_v4, %v8600_v52  ;;  %v6125_v7 = vpop.f32.mrf.mxu0 }
 0x19a   : > { %v1931_v1 = vpop.f32.mrf.mxu1 }
 0x19b   : > { %9137 = vst [vmem:[#allocation9_spill] sm:$0xff] %v8694_v15  ;;  %v8697_v30 = vadd.f32 %v6122_v54, %v1986_v50  ;;  %v1984_v17 = vadd.f32 %v1931_v1, %v8604_v14  ;;  %v2670_v51 = vpop.f32.mrf.mxu0 }
 0x19c   : > { %v6091_v23 = vpop.f32.mrf.mxu1 }
 0x19d   : > { %9138 = vst [vmem:[#allocation18_spill] sm:$0xff] %v8697_v30  ;;  %v8700_v3 = vadd.f32 %v2657_v46, %v1984_v17  ;;  %v1989_v19 = vadd.f32 %v6091_v23, %v8607_v39  ;;  %v6126_v33 = vpop.f32.mrf.mxu0 }
 0x19e   : > { %v1944_v57 = vpop.f32.mrf.mxu1 }
 0x19f   : > { %9139 = vst [vmem:[#allocation21_spill] sm:$0xff] %v8700_v3  ;;  %v8703_v42 = vadd.f32 %v6125_v7, %v1989_v19  ;;  %v1987_v41 = vadd.f32 %v1944_v57, %v8610_v45  ;;  %v2673_v47 = vpop.f32.mrf.mxu0 }
 0x1a0   : > { %v6092_v52 = vpop.f32.mrf.mxu1 }
 0x1a1   : > { %v8706_v44 = vadd.f32 %v2670_v51, %v1987_v41  ;;  %v1990_v49 = vadd.f32 %v6092_v52, %v8613_v61  ;;  %v6165_v6 = vpop.f32.mrf.mxu0 }
 0x1a2   : > { %v1947_v14 = vpop.f32.mrf.mxu1 }
 0x1a3   : > { %9140 = vst [vmem:[#allocation23_spill] sm:$0xff] %v8706_v44  ;;  %v8709_v35 = vadd.f32 %v6126_v33, %v1990_v49  ;;  %v1988_v20 = vadd.f32 %v1947_v14, %v8616_v40  ;;  %v3387_v36 = vpop.f32.mrf.mxu0 }
 0x1a4   : > { %v6131_v39 = vpop.f32.mrf.mxu1 }
 0x1a5   : > { %9141 = vst [vmem:[#allocation25_spill] sm:$0xff] %v8709_v35  ;;  %v8712_v32 = vadd.f32 %v2673_v47, %v1988_v20  ;;  %v3157_v5 = vadd.f32 %v6131_v39, %v8619_v62  ;;  %v8715_v28 = vpop.f32.mrf.mxu0 }
 0x1a6   : > { %v3028_v45 = vpop.f32.mrf.mxu1 }
 0x1a7   : > { %9142 = vst [vmem:[#allocation4_spill] sm:$0xff] %v8712_v32  ;;  %v8717_v43 = vadd.f32 %v6165_v6, %v3157_v5  ;;  %v3155_v37 = vadd.f32 %v3028_v45, %v8622_v0  ;;  %v8720_v61 = vpop.f32.mrf.mxu0 }
 0x1a8   : > { %v8722_v21 = vpop.f32.mrf.mxu1 }
 0x1a9   : > { %v8724_v63 = vadd.f32 %v3387_v36, %v3155_v37  ;;  %v6169_v40 = vpop.f32.mrf.mxu0 }
 0x1aa   : > { %v8726_v54 = vpop.f32.mrf.mxu1 }
 0x1ab   : > { %v8728_v10 = vpop.f32.mrf.mxu0 }
 0x1ac   : > { %v6135_v25 = vpop.f32.mrf.mxu1 }
 0x1ad   : > { %v3161_v62 = vadd.f32 %v6135_v25, %v8631_v48  ;;  %v8731_v46 = vpop.f32.mrf.mxu0 }
 0x1ae   : > { %v8733_v4 = vpop.f32.mrf.mxu1 }
 0x1af   : > { %v8735_v50 = vadd.f32 %v6169_v40, %v3161_v62  ;;  %v8737_v0 = vpop.f32.mrf.mxu0 }
 0x1b0   : > { %v8739_v7 = vpop.f32.mrf.mxu1 }
 0x1b1   : > { %v6173_v1 = vpop.f32.mrf.mxu0 }
 0x1b2   : > { %v8741_v17 = vpop.f32.mrf.mxu1 }
 0x1b3   : > { %v8743_v51 = vpop.f32.mrf.mxu0 }
 0x1b4   : > { %v6139_v23 = vpop.f32.mrf.mxu1 }
 0x1b5   : > { %v3165_v19 = vadd.f32 %v6139_v23, %v8643_v27  ;;  %v8746_v33 = vpop.f32.mrf.mxu0 }
 0x1b6   : > { %v8748_v48 = vpop.f32.mrf.mxu1 }
 0x1b7   : > { %v8750_v57 = vadd.f32 %v6173_v1, %v3165_v19  ;;  %v8752_v41 = vpop.f32.mrf.mxu0 }
 0x1b8   : > { %v8754_v47 = vpop.f32.mrf.mxu1 }
 0x1b9   : > { %v6177_v52 = vpop.f32.mrf.mxu0 }
 0x1ba   : > { %v8756_v49 = vpop.f32.mrf.mxu1 }
 0x1bb   : > { %v8758_v6 = vpop.f32.mrf.mxu0 }
 0x1bc   : > { %v6143_v14 = vpop.f32.mrf.mxu1 }
 0x1bd   : > { %v3169_v20 = vadd.f32 %v6143_v14, %v8655_v53  ;;  %v8761_v36 = vpop.f32.mrf.mxu0 }
 0x1be   : > { %v8763_v27 = vpop.f32.mrf.mxu1 }
 0x1bf   : > { %v8765_v39 = vadd.f32 %v6177_v52, %v3169_v20  ;;  %v8767_v5 = vpop.f32.mrf.mxu0 }
 0x1c0   : > { %v8769_v45 = vpop.f32.mrf.mxu1 }
 0x1c1   : > { %v6181_v37 = vpop.f32.mrf.mxu0 }
 0x1c2   : > { %v8771_v40 = vpop.f32.mrf.mxu1 }
 0x1c3   : > { %v8773_v25 = vpop.f32.mrf.mxu0 }
 0x1c4   : > { %v6147_v62 = vpop.f32.mrf.mxu1 }
 0x1c5   : > { %v3173_v1 = vadd.f32 %v6147_v62, %v8667_v29  ;;  %v8776_v23 = vpop.f32.mrf.mxu0 }
 0x1c6   : > { %v8778_v53 = vpop.f32.mrf.mxu1 }
 0x1c7   : > { %v8780_v19 = vadd.f32 %v6181_v37, %v3173_v1  ;;  %v8782_v52 = vpop.f32.mrf.mxu0 }
 0x1c8   : > { %9143 = vst [vmem:[#allocation3_spill] sm:$0xff] %v8782_v52  ;;  %v8784_v14 = vpop.f32.mrf.mxu1 }
 0x1c9   : > { %v6185_v20 = vpop.f32.mrf.mxu0 }
 0x1ca   : > { %v8786_v32 = vpop.f32.mrf.mxu1 }
 0x1cb   : > { %v8788_v35 = vpop.f32.mrf.mxu0 }
 0x1cc   : > { %9144 = vst [vmem:[#allocation6_spill] sm:$0xff] %v8788_v35  ;;  %v6151_v44 = vpop.f32.mrf.mxu1 }
 0x1cd   : > { %v3177_v3 = vadd.f32 %v6151_v44, %v8679_v58  ;;  %v8791_v30 = vpop.f32.mrf.mxu0 }
 0x1ce   : > { %9145 = vst [vmem:[#allocation5_spill] sm:$0xff] %v8791_v30  ;;  %v8793_v29 = vpop.f32.mrf.mxu1 }
 0x1cf   : > { %v8795_v62 = vadd.f32 %v6185_v20, %v3177_v3  ;;  %v8797_v37 = vpop.f32.mrf.mxu0 }
 0x1d0   : > { %9147 = vst [vmem:[#allocation10_spill] sm:$0xff] %v8797_v37  ;;  %v8799_v1 = vpop.f32.mrf.mxu1 }
 0x1d1   : > { %9146 = vst [vmem:[#allocation7_spill] sm:$0xff] %v8795_v62  ;;  %9148 = vst [vmem:[#allocation13_spill] sm:$0xff] %v8799_v1  ;;  %v6189_v15 = vpop.f32.mrf.mxu0 }
 0x1d2   : > { %v8801_v24 = vpop.f32.mrf.mxu1 }
 0x1d3   : > { %9149 = vst [vmem:[#allocation15_spill] sm:$0xff] %v8801_v24  ;;  %v8803_v56 = vpop.f32.mrf.mxu0 }
 0x1d4   : > { %9150 = vst [vmem:[#allocation17_spill] sm:$0xff] %v8803_v56  ;;  %v6155_v55 = vpop.f32.mrf.mxu1 }
 0x1d5   : > { %v3181_v35 = vadd.f32 %v6155_v55, %v8691_v22  ;;  %v8806_v52 = vpop.f32.mrf.mxu0 }
 0x1d6   : > { %9151 = vst [vmem:[#allocation20_spill] sm:$0xff] %v8806_v52  ;;  %v8808_v58 = vpop.f32.mrf.mxu1 }
 0x1d7   : > { %v8810_v44 = vadd.f32 %v6189_v15, %v3181_v35  ;;  %v8812_v3 = vpop.f32.mrf.mxu0 }
 0x1d8   : > { %9153 = vst [vmem:[#allocation24_spill] sm:$0xff] %v8812_v3  ;;  %v8814_v20 = vpop.f32.mrf.mxu1 }
 0x1d9   : > { %9152 = vst [vmem:[#allocation22_spill] sm:$0xff] %v8810_v44  ;;  %9154 = vst [vmem:[#allocation11_spill] sm:$0xff] %v8814_v20  ;;  %v6193_v37 = vpop.f32.mrf.mxu0 }
 0x1da   : > { %v8816_v62 = vpop.f32.mrf.mxu1 }
 0x1db   : > { %9155 = vst [vmem:[#allocation8_spill] sm:$0xff] %v8816_v62  ;;  %v8818_v30 = vpop.f32.mrf.mxu0 }
 0x1dc   : > { %9156 = vst [vmem:[#allocation16_spill] sm:$0xff] %v8818_v30  ;;  %v6159_v24 = vpop.f32.mrf.mxu1  ;;  %v3158_v30 = vadd.f32 %v8722_v21, %v8625_v26  ;;  %v3159_v21 = vadd.f32 %v8733_v4, %v8634_v31 }
 0x1dd   : > { %v3185_v56 = vadd.f32 %v6159_v24, %v8703_v42  ;;  %v8821_v1 = vpop.f32.mrf.mxu0  ;;  %v3156_v24 = vadd.f32 %v8726_v54, %v8628_v60  ;;  %v3162_v60 = vadd.f32 %v8739_v7, %v8637_v38 }
 0x1de   : > { %9157 = vst [vmem:[#allocation12_spill] sm:$0xff] %v8821_v1  ;;  %v8823_v55 = vpop.f32.mrf.mxu1  ;;  %v3518_v38 = vadd.f32 %v8728_v10, %v3159_v21  ;;  %v3166_v21 = vadd.f32 %v8754_v47, %v8649_v13 }
 0x1df   : > { %9158 = vst [vmem:[#allocation26_spill] sm:$0xff] %v8823_v55  ;;  %v8825_v22 = vadd.f32 %v6193_v37, %v3185_v56  ;;  %v8827_v15 = vpop.f32.mrf.mxu0  ;;  %v3517_v56 = vadd.f32 %v8715_v28, %v3158_v30  ;;  %v3521_v7 = vadd.f32 %v8731_v46, %v3162_v60 }
 0x1e0   : > { %9160 = vst [vmem:[#allocation28_spill] sm:$0xff] %v8827_v15  ;;  %v8829_v35 = vpop.f32.mrf.mxu1 }
 0x1e1   : > { %9159 = vst [vmem:[#allocation27_spill] sm:$0xff] %v8825_v22  ;;  %9161 = vst [vmem:[#allocation29_spill] sm:$0xff] %v8829_v35  ;;  %v6233_v3 = vpop.f32.mrf.mxu0 }
 0x1e2   : > { %v8831_v44 = vpop.f32.mrf.mxu1 }
 0x1e3   : > { %9162 = vst [vmem:[#allocation30_spill] sm:$0xff] %v8831_v44  ;;  %v4583_v52 = vpop.f32.mrf.mxu0  ;;  %v3515_v44 = vadd.f32 %v8720_v61, %v3156_v24 }
 0x1e4   : > { %v6199_v62 = vpop.f32.mrf.mxu1 }
 0x1e5   : > { %v6234_v42 = vpop.f32.mrf.mxu0  ;;  %v4242_v37 = vadd.f32 %v6199_v62, %v8717_v43 }
 0x1e6   : > { %v4113_v1 = vpop.f32.mrf.mxu1 }
 0x1e7   : > { %v4240_v15 = vadd.f32 %v4113_v1, %v8724_v63  ;;  %v4586_v22 = vpop.f32.mrf.mxu0  ;;  %v4712_v20 = vadd.f32 %v6233_v3, %v4242_v37  ;;  %v3160_v63 = vadd.f32 %v8741_v17, %v8640_v2 }
 0x1e8   : > { %v6200_v35 = vpop.f32.mrf.mxu1 }
 0x1e9   : > { %v4243_v55 = vadd.f32 %v6200_v35, %v3517_v56  ;;  %v6237_v26 = vpop.f32.mrf.mxu0  ;;  %v4710_v30 = vadd.f32 %v4583_v52, %v4240_v15  ;;  %v3519_v35 = vadd.f32 %v8737_v0, %v3160_v63  ;;  %v4941_v56 = vmul.f32 %v4712_v20, %v4712_v20 }
 0x1ea   : > { %v4116_v54 = vpop.f32.mrf.mxu1 }
 0x1eb   : > { %v4713_v28 = vadd.f32 %v6234_v42, %v4243_v55  ;;  %v4241_v43 = vadd.f32 %v4116_v54, %v3515_v44  ;;  %v4599_v62 = vpop.f32.mrf.mxu0  ;;  %v4939_v3 = vmul.f32 %v4710_v30, %v4710_v30 }
 0x1ec   : > { %v6203_v61 = vpop.f32.mrf.mxu1 }
 0x1ed   : > { %v5717_v31 = vpack.c.bf16 %v4713_v28, %v4712_v20  ;;  %v4711_v4 = vadd.f32 %v4586_v22, %v4241_v43  ;;  %v6238_v1 = vpop.f32.mrf.mxu0  ;;  %v4246_v52 = vadd.f32 %v6203_v61, %v8735_v50  ;;  %v3163_v22 = vadd.f32 %v8748_v48, %v8646_v18 }
 0x1ee   : > { %v4129_v44 = vpop.f32.mrf.mxu1  ;;  %v4942_v60 = vmul.f32 %v4713_v28, %v4713_v28 }
 0x1ef   : > { %5789 = vst [vmem:[%s8851_s14 + $0x8] sm:$0xff] %v5717_v31   ;;  %v5712_v2 = vpack.c.bf16 %v4711_v4, %v4710_v30  ;;  %v4902_v17 = vadd.f32 %v4711_v4, %v4710_v30  ;;  %v4940_v55 = vmul.f32 %v4711_v4, %v4711_v4  ;;  %v4602_v15 = vpop.f32.mrf.mxu0  ;;  %v4244_v24 = vadd.f32 %v4129_v44, %v3518_v38 }
 0x1f0   : > { %v6204_v42 = vpop.f32.mrf.mxu1  ;;  %v4716_v54 = vadd.f32 %v6237_v26, %v4246_v52  ;;  %v3522_v31 = vadd.f32 %v8743_v51, %v3163_v22  ;;  %v3525_v52 = vadd.f32 %v8746_v33, %v3166_v21 }
 0x1f1   : > { %5713 = vst [vmem:[%s8851_s14] sm:$0xff] %v5712_v2   ;;  %v4903_v10 = vadd.f32 %v4902_v17, %v4712_v20  ;;  %v4971_v46 = vadd.f32 %v4940_v55, %v4939_v3  ;;  %v4247_v37 = vadd.f32 %v6204_v42, %v3521_v7  ;;  %v6241_v50 = vpop.f32.mrf.mxu0  ;;  %v4714_v30 = vadd.f32 %v4599_v62, %v4244_v24 }
 0x1f2   : > { %v4132_v43 = vpop.f32.mrf.mxu1  ;;  %v3164_v20 = vadd.f32 %v8756_v49, %v8652_v8  ;;  %v4945_v24 = vmul.f32 %v4716_v54, %v4716_v54 }
 0x1f3   : > { %v4972_v61 = vadd.f32 %v4971_v46, %v4941_v56  ;;  %v4904_v0 = vadd.f32 %v4903_v10, %v4713_v28  ;;  %v4717_v63 = vadd.f32 %v6238_v1, %v4247_v37  ;;  %v4245_v18 = vadd.f32 %v4132_v43, %v3519_v35  ;;  %v4615_v48 = vpop.f32.mrf.mxu0 }
 0x1f4   : > { %v6207_v4 = vpop.f32.mrf.mxu1  ;;  %v4943_v7 = vmul.f32 %v4714_v30, %v4714_v30  ;;  %v3523_v55 = vadd.f32 %v8752_v41, %v3164_v20  ;;  %v3167_v35 = vadd.f32 %v8763_v27, %v8658_v12 }
 0x1f5   : > { %v4905_v38 = vadd.f32 %v4904_v0, %v4714_v30  ;;  %v4973_v44 = vadd.f32 %v4972_v61, %v4942_v60  ;;  %v5727_v13 = vpack.c.bf16 %v4717_v63, %v4716_v54  ;;  %v6242_v47 = vpop.f32.mrf.mxu0  ;;  %v4715_v26 = vadd.f32 %v4602_v15, %v4245_v18 }
 0x1f6   : > { %v4145_v62 = vpop.f32.mrf.mxu1  ;;  %v4250_v1 = vadd.f32 %v6207_v4, %v8750_v57  ;;  %v3170_v15 = vadd.f32 %v8769_v45, %v8661_v16  ;;  %v4946_v41 = vmul.f32 %v4717_v63, %v4717_v63  ;;  %v3526_v27 = vadd.f32 %v8758_v6, %v3167_v35 }
 0x1f7   : > { %v4974_v28 = vadd.f32 %v4973_v44, %v4943_v7  ;;  %5791 = vst [vmem:[%s8851_s14 + $0x18] sm:$0xff] %v5727_v13   ;;  %v4248_v3 = vadd.f32 %v4145_v62, %v3522_v31  ;;  %v4618_v51 = vpop.f32.mrf.mxu0  ;;  %v5722_v2 = vpack.c.bf16 %v4715_v26, %v4714_v30  ;;  %v4906_v17 = vadd.f32 %v4905_v38, %v4715_v26 }
 0x1f8   : > { %v4944_v8 = vmul.f32 %v4715_v26, %v4715_v26  ;;  %v6208_v49 = vpop.f32.mrf.mxu1  ;;  %v4720_v46 = vadd.f32 %v6241_v50, %v4250_v1  ;;  %v3168_v16 = vadd.f32 %v8771_v40, %v8664_v11  ;;  %v3529_v0 = vadd.f32 %v8761_v36, %v3170_v15 }
 0x1f9   : > { %v4251_v33 = vadd.f32 %v6208_v49, %v3525_v52  ;;  %v6245_v22 = vpop.f32.mrf.mxu0  ;;  %5790 = vst [vmem:[%s8851_s14 + $0x10] sm:$0xff] %v5722_v2   ;;  %v4907_v42 = vadd.f32 %v4906_v17, %v4716_v54  ;;  %v4718_v56 = vadd.f32 %v4615_v48, %v4248_v3  ;;  %v3171_v36 = vadd.f32 %v8778_v53, %v8670_v9 }
 0x1fa   : > { %v4975_v57 = vadd.f32 %v4974_v28, %v4944_v8  ;;  %v4148_v10 = vpop.f32.mrf.mxu1  ;;  %v3527_v40 = vadd.f32 %v8767_v5, %v3168_v16  ;;  %v3174_v13 = vadd.f32 %v8784_v14, %v8673_v34  ;;  %v4949_v62 = vmul.f32 %v4720_v46, %v4720_v46 }
 0x1fb   : > { %v4721_v37 = vadd.f32 %v6242_v47, %v4251_v33  ;;  %v4249_v21 = vadd.f32 %v4148_v10, %v3523_v55  ;;  %v4631_v60 = vpop.f32.mrf.mxu0  ;;  %v4908_v43 = vadd.f32 %v4907_v42, %v4717_v63  ;;  %v4947_v50 = vmul.f32 %v4718_v56, %v4718_v56 }
 0x1fc   : > { %v4976_v30 = vadd.f32 %v4975_v57, %v4945_v24  ;;  %v6211_v12 = vpop.f32.mrf.mxu1  ;;  %v3530_v53 = vadd.f32 %v8773_v25, %v3171_v36  ;;  %v3172_v34 = vadd.f32 %v8786_v32, %v8676_v59  ;;  %v3533_v15 = vadd.f32 %v8776_v23, %v3174_v13  ;;  %v9163_v32 = vld [vmem:[#allocation3_spill] sm:$0xff] }
 0x1fd   : > { %v5737_v45 = vpack.c.bf16 %v4721_v37, %v4720_v46  ;;  %v4719_v61 = vadd.f32 %v4618_v51, %v4249_v21  ;;  %v6246_v54 = vpop.f32.mrf.mxu0  ;;  %v4909_v18 = vadd.f32 %v4908_v43, %v4718_v56  ;;  %v4254_v63 = vadd.f32 %v6211_v12, %v8765_v39  ;;  %v9166_v43 = vld [vmem:[#allocation13_spill] sm:$0xff] }
 0x1fe   : > { %v4977_v48 = vadd.f32 %v4976_v30, %v4946_v41  ;;  %v4161_v31 = vpop.f32.mrf.mxu1  ;;  %v4950_v5 = vmul.f32 %v4721_v37, %v4721_v37  ;;  %v9164_v41 = vld [vmem:[#allocation2_spill] sm:$0xff] }
 0x1ff   : > { %5793 = vst [vmem:[%s8851_s14 + $0x28] sm:$0xff] %v5737_v45   ;;  %v5732_v20 = vpack.c.bf16 %v4719_v61, %v4718_v56  ;;  %v4948_v4 = vmul.f32 %v4719_v61, %v4719_v61  ;;  %v4252_v38 = vadd.f32 %v4161_v31, %v3526_v27  ;;  %v4634_v6 = vpop.f32.mrf.mxu0  ;;  %v4910_v44 = vadd.f32 %v4909_v18, %v4719_v61  ;;  %v9165_v30 = vld [vmem:[#allocation14_spill] sm:$0xff] }
 0x200   : > { %v4978_v7 = vadd.f32 %v4977_v48, %v4947_v50  ;;  %v6212_v11 = vpop.f32.mrf.mxu1  ;;  %v4724_v3 = vadd.f32 %v6245_v22, %v4254_v63  ;;  %v3175_v23 = vadd.f32 %v8793_v29, %v9164_v41  ;;  %v3178_v12 = vadd.f32 %v9166_v43, %v9165_v30  ;;  %v9177_v43 = vld [vmem:[#allocation21_spill] sm:$0xff] }
 0x201   : > { %5792 = vst [vmem:[%s8851_s14 + $0x20] sm:$0xff] %v5732_v20   ;;  %v4255_v47 = vadd.f32 %v6212_v11, %v3529_v0  ;;  %v6249_v26 = vpop.f32.mrf.mxu0  ;;  %v4911_v52 = vadd.f32 %v4910_v44, %v4720_v46  ;;  %v4722_v39 = vadd.f32 %v4631_v60, %v4252_v38  ;;  %v3531_v60 = vadd.f32 %v9163_v32, %v3172_v34  ;;  %v9167_v38 = vld [vmem:[#allocation6_spill] sm:$0xff]  ;;  %v9169_v44 = vld [vmem:[#allocation15_spill] sm:$0xff] }
 0x202   : > { %v4979_v28 = vadd.f32 %v4978_v7, %v4948_v4  ;;  %v4164_v1 = vpop.f32.mrf.mxu1  ;;  %v4953_v45 = vmul.f32 %v4724_v3, %v4724_v3  ;;  %v9168_v7 = vld [vmem:[#allocation19_spill] sm:$0xff] }
 0x203   : > { %v4725_v51 = vadd.f32 %v6246_v54, %v4255_v47  ;;  %v4253_v2 = vadd.f32 %v4164_v1, %v3527_v40  ;;  %v4647_v17 = vpop.f32.mrf.mxu0  ;;  %v4912_v49 = vadd.f32 %v4911_v52, %v4721_v37  ;;  %v4951_v22 = vmul.f32 %v4722_v39, %v4722_v39  ;;  %v9170_v47 = vld [vmem:[#allocation5_spill] sm:$0xff] }
 0x204   : > { %v4980_v8 = vadd.f32 %v4979_v28, %v4949_v62  ;;  %v6215_v9 = vpop.f32.mrf.mxu1  ;;  %v3176_v11 = vadd.f32 %v9169_v44, %v9168_v7  ;;  %v3537_v62 = vadd.f32 %v9170_v47, %v3178_v12  ;;  %v9178_v12 = vld [vmem:[#allocation8_spill] sm:$0xff] }
 0x205   : > { %v5747_v14 = vpack.c.bf16 %v4725_v51, %v4724_v3  ;;  %v4723_v55 = vadd.f32 %v4634_v6, %v4253_v2  ;;  %v6250_v35 = vpop.f32.mrf.mxu0  ;;  %v4913_v33 = vadd.f32 %v4912_v49, %v4722_v39  ;;  %v4258_v10 = vadd.f32 %v6215_v9, %v8780_v19 }
 0x206   : > { %v4981_v24 = vadd.f32 %v4980_v8, %v4950_v5  ;;  %v4177_v42 = vpop.f32.mrf.mxu1  ;;  %v4954_v20 = vmul.f32 %v4725_v51, %v4725_v51  ;;  %v3534_v6 = vadd.f32 %v9167_v38, %v3175_v23  ;;  %v9176_v23 = vld [vmem:[#allocation17_spill] sm:$0xff] }
 0x207   : > { %5795 = vst [vmem:[%s8851_s14 + $0x38] sm:$0xff] %v5747_v14   ;;  %v5742_v57 = vpack.c.bf16 %v4723_v55, %v4722_v39  ;;  %v4952_v56 = vmul.f32 %v4723_v55, %v4723_v55  ;;  %v4256_v46 = vadd.f32 %v4177_v42, %v3530_v53  ;;  %v4650_v25 = vpop.f32.mrf.mxu0  ;;  %v4914_v21 = vadd.f32 %v4913_v33, %v4723_v55  ;;  %v9172_v53 = vld [vmem:[#allocation10_spill] sm:$0xff]  ;;  %v9173_v14 = vld [vmem:[#allocation9_spill] sm:$0xff] }
 0x208   : > { %v4982_v37 = vadd.f32 %v4981_v24, %v4951_v22  ;;  %v6216_v59 = vpop.f32.mrf.mxu1  ;;  %v4728_v18 = vadd.f32 %v6249_v26, %v4258_v10  ;;  %v3535_v34 = vadd.f32 %v9172_v53, %v3176_v11  ;;  %v3179_v55 = vadd.f32 %v8808_v58, %v9173_v14  ;;  %v9181_v11 = vld [vmem:[#allocation24_spill] sm:$0xff] }
 0x209   : > { %5794 = vst [vmem:[%s8851_s14 + $0x30] sm:$0xff] %v5742_v57   ;;  %v4259_v27 = vadd.f32 %v6216_v59, %v3533_v15  ;;  %v4915_v61 = vadd.f32 %v4914_v21, %v4724_v3  ;;  %v4726_v19 = vadd.f32 %v4647_v17, %v4256_v46  ;;  %v9175_v15 = vld [vmem:[#allocation11_spill] sm:$0xff] }
 0x20a   : > { %v6253_v16 = vpop.f32.mrf.mxu0  ;;  %v4983_v54 = vadd.f32 %v4982_v37, %v4952_v56  ;;  %v4180_v0 = vpop.f32.mrf.mxu1  ;;  %v4957_v42 = vmul.f32 %v4728_v18, %v4728_v18  ;;  %v3538_v30 = vadd.f32 %v9176_v23, %v3179_v55 }
 0x20b   : > { %v4729_v50 = vadd.f32 %v6250_v35, %v4259_v27  ;;  %v4257_v48 = vadd.f32 %v4180_v0, %v3531_v60  ;;  %v4916_v63 = vadd.f32 %v4915_v61, %v4725_v51  ;;  %v4955_v26 = vmul.f32 %v4726_v19, %v4726_v19  ;;  %v9171_v51 = vld [vmem:[#allocation7_spill] sm:$0xff]  ;;  %v9174_v35 = vld [vmem:[#allocation18_spill] sm:$0xff] }
 0x20c   : > { %v4663_v31 = vpop.f32.mrf.mxu0  ;;  %v4984_v4 = vadd.f32 %v4983_v54, %v4953_v45  ;;  %v6219_v29 = vpop.f32.mrf.mxu1  ;;  %v3182_v33 = vadd.f32 %v9175_v15, %v9174_v35  ;;  %v3180_v27 = vadd.f32 %v9178_v12, %v9177_v43  ;;  %v9186_v35 = vld [vmem:[#allocation16_spill] sm:$0xff] }
 0x20d   : > { %v5757_v40 = vpack.c.bf16 %v4729_v50, %v4728_v18  ;;  %v4727_v36 = vadd.f32 %v4650_v25, %v4257_v48  ;;  %v4917_v52 = vadd.f32 %v4916_v63, %v4726_v19  ;;  %v4262_v2 = vadd.f32 %v6219_v29, %v9171_v51 }
 0x20e   : > { %v6254_v13 = vpop.f32.mrf.mxu0  ;;  %v4985_v28 = vadd.f32 %v4984_v4, %v4954_v20  ;;  %v4193_v39 = vpop.f32.mrf.mxu1  ;;  %v4958_v32 = vmul.f32 %v4729_v50, %v4729_v50 }
 0x20f   : > { %5797 = vst [vmem:[%s8851_s14 + $0x48] sm:$0xff] %v5757_v40   ;;  %v5752_v1 = vpack.c.bf16 %v4727_v36, %v4726_v19  ;;  %v4956_v3 = vmul.f32 %v4727_v36, %v4727_v36  ;;  %v4260_v17 = vadd.f32 %v4193_v39, %v3534_v6  ;;  %v4918_v49 = vadd.f32 %v4917_v52, %v4727_v36  ;;  %v9179_v19 = vld [vmem:[#allocation20_spill] sm:$0xff]  ;;  %v9182_v36 = vld [vmem:[#allocation23_spill] sm:$0xff]  ;;  %v9185_v52 = vld [vmem:[#allocation29_spill] sm:$0xff] }
 0x210   : > { %v4666_v5 = vpop.f32.mrf.mxu0  ;;  %v4986_v8 = vadd.f32 %v4985_v28, %v4955_v26  ;;  %v6220_v9 = vpop.f32.mrf.mxu1  ;;  %v4732_v25 = vadd.f32 %v6253_v16, %v4262_v2  ;;  %v3541_v0 = vadd.f32 %v9179_v19, %v3182_v33  ;;  %v3539_v40 = vadd.f32 %v9181_v11, %v3180_v27  ;;  %v9187_v33 = vld [vmem:[#allocation4_spill] sm:$0xff] }
 0x211   : > { %5796 = vst [vmem:[%s8851_s14 + $0x40] sm:$0xff] %v5752_v1   ;;  %v4263_v22 = vadd.f32 %v6220_v9, %v3537_v62  ;;  %v4919_v57 = vadd.f32 %v4918_v49, %v4728_v18  ;;  %v4730_v10 = vadd.f32 %v4663_v31, %v4260_v17  ;;  %v9184_v62 = vld [vmem:[#allocation25_spill] sm:$0xff]  ;;  %v9191_v27 = vld [vmem:[#allocation28_spill] sm:$0xff] }
 0x212   : > { %v6257_v24 = vpop.f32.mrf.mxu0  ;;  %v4987_v56 = vadd.f32 %v4986_v8, %v4956_v3  ;;  %v4196_v46 = vpop.f32.mrf.mxu1  ;;  %v3186_v26 = vadd.f32 %v9185_v52, %v9184_v62  ;;  %v4961_v1 = vmul.f32 %v4732_v25, %v4732_v25 }
 0x213   : > { %v4733_v37 = vadd.f32 %v6254_v13, %v4263_v22  ;;  %v4261_v21 = vadd.f32 %v4196_v46, %v3535_v34  ;;  %v4920_v41 = vadd.f32 %v4919_v57, %v4729_v50  ;;  %v4959_v16 = vmul.f32 %v4730_v10, %v4730_v10  ;;  %v9180_v50 = vld [vmem:[#allocation22_spill] sm:$0xff] }
 0x214   : > { %v4679_v59 = vpop.f32.mrf.mxu0  ;;  %v4988_v60 = vadd.f32 %v4987_v56, %v4957_v42  ;;  %v6223_v58 = vpop.f32.mrf.mxu1  ;;  %v9183_v13 = vld [vmem:[#allocation26_spill] sm:$0xff] }
 0x215   : > { %v5767_v45 = vpack.c.bf16 %v4733_v37, %v4732_v25  ;;  %v4731_v61 = vadd.f32 %v4666_v5, %v4261_v21  ;;  %v4921_v18 = vadd.f32 %v4920_v41, %v4730_v10  ;;  %v4266_v63 = vadd.f32 %v6223_v58, %v9180_v50  ;;  %v9188_v22 = vld [vmem:[#allocation30_spill] sm:$0xff] }
 0x216   : > { %v6258_v54 = vpop.f32.mrf.mxu0  ;;  %v4989_v48 = vadd.f32 %v4988_v60, %v4958_v32  ;;  %v4209_v31 = vpop.f32.mrf.mxu1  ;;  %v3183_v47 = vadd.f32 %v9183_v13, %v9182_v36  ;;  %v4962_v9 = vmul.f32 %v4733_v37, %v4733_v37  ;;  %v3184_v42 = vadd.f32 %v9188_v22, %v9187_v33 }
 0x217   : > { %5799 = vst [vmem:[%s8851_s14 + $0x58] sm:$0xff] %v5767_v45   ;;  %v5762_v20 = vpack.c.bf16 %v4731_v61, %v4730_v10  ;;  %v4960_v4 = vmul.f32 %v4731_v61, %v4731_v61  ;;  %v4264_v29 = vadd.f32 %v4209_v31, %v3538_v30  ;;  %v4922_v7 = vadd.f32 %v4921_v18, %v4731_v61  ;;  %v9189_v10 = vld [vmem:[#allocation12_spill] sm:$0xff] }
 0x218   : > { %v4682_v38 = vpop.f32.mrf.mxu0  ;;  %v4990_v6 = vadd.f32 %v4989_v48, %v4959_v16  ;;  %v6224_v44 = vpop.f32.mrf.mxu1  ;;  %v4736_v5 = vadd.f32 %v6257_v24, %v4266_v63  ;;  %v3542_v15 = vadd.f32 %v9186_v35, %v3183_v47  ;;  %v3545_v46 = vadd.f32 %v9189_v10, %v3186_v26 }
 0x219   : > { %5798 = vst [vmem:[%s8851_s14 + $0x50] sm:$0xff] %v5762_v20   ;;  %v4267_v28 = vadd.f32 %v6224_v44, %v3541_v0  ;;  %v4923_v3 = vadd.f32 %v4922_v7, %v4732_v25  ;;  %v4734_v2 = vadd.f32 %v4679_v59, %v4264_v29  ;;  %v3543_v45 = vadd.f32 %v9191_v27, %v3184_v42 }
 0x21a   : > { %v6261_v39 = vpop.f32.mrf.mxu0  ;;  %v4991_v51 = vadd.f32 %v4990_v6, %v4960_v4  ;;  %v4212_v17 = vpop.f32.mrf.mxu1 }
 0x21b   : > { %v4737_v8 = vadd.f32 %v6258_v54, %v4267_v28  ;;  %v4265_v49 = vadd.f32 %v4212_v17, %v3539_v40  ;;  %v4924_v34 = vadd.f32 %v4923_v3, %v4733_v37  ;;  %v4963_v24 = vmul.f32 %v4734_v2, %v4734_v2  ;;  %v9190_v37 = vld [vmem:[#allocation27_spill] sm:$0xff] }
 0x21c   : > { %v4992_v53 = vadd.f32 %v4991_v51, %v4961_v1  ;;  %v6227_v14 = vpop.f32.mrf.mxu1  ;;  %v4695_v55 = vpop.f32.mrf.mxu0  ;;  %v4965_v54 = vmul.f32 %v4736_v5, %v4736_v5 }
 0x21d   : > { %v5777_v57 = vpack.c.bf16 %v4737_v8, %v4736_v5  ;;  %v4735_v56 = vadd.f32 %v4682_v38, %v4265_v49  ;;  %v4925_v25 = vadd.f32 %v4924_v34, %v4734_v2  ;;  %v4270_v41 = vadd.f32 %v6227_v14, %v9190_v37 }
 0x21e   : > { %v4993_v21 = vadd.f32 %v4992_v53, %v4962_v9  ;;  %v4225_v59 = vpop.f32.mrf.mxu1  ;;  %v6262_v12 = vpop.f32.mrf.mxu0  ;;  %v4966_v4 = vmul.f32 %v4737_v8, %v4737_v8 }
 0x21f   : > { %5801 = vst [vmem:[%s8851_s14 + $0x68] sm:$0xff] %v5777_v57   ;;  %v5772_v32 = vpack.c.bf16 %v4735_v56, %v4734_v2  ;;  %v4964_v60 = vmul.f32 %v4735_v56, %v4735_v56  ;;  %v4268_v58 = vadd.f32 %v4225_v59, %v3542_v15  ;;  %v4926_v30 = vadd.f32 %v4925_v25, %v4735_v56 }
 0x220   : > { %v4994_v23 = vadd.f32 %v4993_v21, %v4963_v24  ;;  %v6228_v43 = vpop.f32.mrf.mxu1  ;;  %v4740_v48 = vadd.f32 %v6261_v39, %v4270_v41  ;;  %v4698_v29 = vpop.f32.mrf.mxu0 }
 0x221   : > { %5800 = vst [vmem:[%s8851_s14 + $0x60] sm:$0xff] %v5772_v32   ;;  %v4271_v61 = vadd.f32 %v6228_v43, %v3545_v46  ;;  %v4927_v19 = vadd.f32 %v4926_v30, %v4736_v5  ;;  %v4738_v18 = vadd.f32 %v4695_v55, %v4268_v58 }
 0x222   : > { %v4995_v0 = vadd.f32 %v4994_v23, %v4964_v60  ;;  %v4228_v16 = vpop.f32.mrf.mxu1  ;;  %v4969_v62 = vmul.f32 %v4740_v48, %v4740_v48 }
 0x223   : > { %v4741_v31 = vadd.f32 %v6262_v12, %v4271_v61  ;;  %v4269_v20 = vadd.f32 %v4228_v16, %v3543_v45  ;;  %v4928_v63 = vadd.f32 %v4927_v19, %v4737_v8  ;;  %v4967_v44 = vmul.f32 %v4738_v18, %v4738_v18 }
 0x224   : > { %v4996_v50 = vadd.f32 %v4995_v0, %v4965_v54 }
 0x225   : > { %v5787_v38 = vpack.c.bf16 %v4741_v31, %v4740_v48  ;;  %v4739_v6 = vadd.f32 %v4698_v29, %v4269_v20  ;;  %v4929_v7 = vadd.f32 %v4928_v63, %v4738_v18  ;;  %v4970_v28 = vmul.f32 %v4741_v31, %v4741_v31 }
 0x226   : > { %v4997_v11 = vadd.f32 %v4996_v50, %v4966_v4 }
 0x227   : > { %5803 = vst [vmem:[%s8851_s14 + $0x78] sm:$0xff] %v5787_v38   ;;  %v5782_v40 = vpack.c.bf16 %v4739_v6, %v4738_v18  ;;  %v4968_v36 = vmul.f32 %v4739_v6, %v4739_v6  ;;  %v4930_v47 = vadd.f32 %v4929_v7, %v4739_v6 }
 0x228   : > { %v4998_v13 = vadd.f32 %v4997_v11, %v4967_v44 }
 0x229   : > { %5802 = vst [vmem:[%s8851_s14 + $0x70] sm:$0xff] %v5782_v40   ;;  %v4931_v52 = vadd.f32 %v4930_v47, %v4740_v48 }
 0x22a   : > { %v4999_v26 = vadd.f32 %v4998_v13, %v4968_v36 }
 0x22b   : > { %v4932_v39 = vadd.f32 %v4931_v52, %v4741_v31 }
 0x22c   : > { %v5000_v1 = vadd.f32 %v4999_v26, %v4969_v62 }
 0x22d   : > { %v4933_v3 = vrot.slane %v4932_v39, 4 }
 0x22e   : > { %v5001_v51 = vadd.f32 %v5000_v1, %v4970_v28 }
 0x22f   : > { %v4934_v2 = vadd.f32 %v4933_v3, %v4932_v39 }
 0x230   : > { %v5002_v17 = vrot.slane %v5001_v51, 4 }
 0x231   : > { %v4935_v5 = vrot.slane %v4934_v2, 2 }
 0x232   : > { %v5003_v8 = vadd.f32 %v5002_v17, %v5001_v51 }
 0x233   : > { %v4936_v49 = vadd.f32 %v4935_v5, %v4934_v2 }
 0x234   : > { %v5004_v9 = vrot.slane %v5003_v8, 2 }
 0x235   : > { %v4937_v53 = vrot.slane %v4936_v49, 1 }
 0x236   : > { %v5005_v34 = vadd.f32 %v5004_v9, %v5003_v8 }
 0x237   : > { %v4938_v55 = vadd.f32 %v4937_v53, %v4936_v49 }
 0x238   : > { %v5006_v14 = vrot.slane %v5005_v34, 1 }
 0x23a   : > { %v5007_v35 = vadd.f32 %v5006_v14, %v5005_v34 }
 0x23c   : > { %v5009_v15 = vsel %vm5008_vm8, %v4938_v55, %v5007_v35 }
 0x23d   : > { %5010 = vst [vmem:[%s181_s18] sm:$0x3] %v5009_v15 }
 0x23e PF: > { %s14_s12 = sadd.s32 1, %s6340_s12  }
 0x23f   : > { %p11_p4 = scmp.ge.s32.totalorder %s14_s12, 4  }
 0x241   :  { %13 = sbr.rel (!%p11_p4) target bundleno = 1 (0x1), region = 80 }

// kernel: double_conv.4
= control target key start
LH: loop header
LB: loop body
LE: loop exit
PB: predicated region body
PF: predicated region fallthrough
CT: control target
= control target key end

     0   :  { %s7770_s15 = smov 0   ;;  %s10432_s0 = inlined_call_operand.vmem [shape: bf16[2,16,16,128], index: 0, kind: input, shape index: {}]   ;;  %s10433_s1 = inlined_call_operand.vmem [shape: bf16[9,128,128], index: 1, kind: input, shape index: {}]   ;;  %s10434_s2 = inlined_call_operand.vmem [shape: f32[2,128], index: 2, kind: input, shape index: {}]   ;;  %s10435_s3 = inlined_call_operand.vmem [shape: bf16[2,16,16,128], index: 3, kind: output, shape index: {0}]   ;;  %s10436_s4 = inlined_call_operand.vmem [shape: f32[2,2,128], index: 4, kind: output, shape index: {1}]  }
   0x1 LB: > { %s6204_s16 = sadd.s32 4294967295, %s7742_s15   ;;  %p6208_p0 = scmp.ge.s32.totalorder %s7742_s15, 1  ;;  %s7742_s15 = sphi %s7770_s15, %s15_s15  }
   0x2   : > { %p165_p1 = scmp.lt.s32.totalorder %s7742_s15, 3 }
   0x4   : > { %p166_p2 = pnand %p6208_p0, %p165_p1 }
   0x6   : > { %169 = sbr.rel (%p166_p2) target bundleno = 715 (0x2cb), region = 32 }
   0xb   : > { %p195_p3 = scmp.lt.s32.totalorder %s6204_s16, 1  ;;  %p6214_p4 = scmp.ne.s32.totalorder %s6204_s16, 0 }
   0xd   : > { %s196_s17 = scalar_select %p195_p3, %s6204_s16, 1 }
   0xe   : > { %213 = sbr.rel (%p6214_p4) target bundleno = 53 (0x35), region = 36 }
   0xf   : > { %s6675_s18 = sshll.u32 %s196_s17, 7  ;;  %s6213_s19 = sshll.u32 %s196_s17, 1 }
  0x10   : > { %s7781_s22 = scalar_lea.vmem %s10432_s0, %s6675_s18  ;;  %s7786_s25 = scalar_lea.vmem %s10435_s3, %s6675_s18 }
  0x11   : > { %s7791_s28 = scalar_lea.vmem %s10436_s4, %s6213_s19 }
  0x13   : > { %vm221_vm0 = vcmask 1040384   ;;  %vm222_vm1 = vsmask.f32 256  ;;  %v227_v0 = vld [vmem:[#allocation2 + $0xc] sm:$0x1]  ;;  %v7744_v1 = vmov 0  }
  0x14   : > { %214 = vst [vmem:[#allocation2] sm:$0xf] %v7744_v1  ;;  %215 = vst [vmem:[#allocation2 + $0x4] sm:$0xf] %v7744_v1  ;;  %v230_v3 = vld [vmem:[#allocation2 + $0x18] sm:$0x1] }
  0x15   : > { %216 = vst [vmem:[#allocation2 + $0x8] sm:$0x1] %v7744_v1  ;;  %218 = vst [vmem:[#allocation2 + $0xcc] sm:$0xf] %v7744_v1  ;;  %v233_v4 = vld [vmem:[#allocation2 + $0x24] sm:$0x1] }
  0x16   : > { %219 = vst [vmem:[#allocation2 + $0xd0] sm:$0xf] %v7744_v1  ;;  %220 = vst [vmem:[#allocation2 + $0xd4] sm:$0x1] %v7744_v1  ;;  %vm278_vm3 = vsmask.f32 7938 }
  0x17   : > { %vm7794_vm2 = vmand %vm221_vm0, %vm222_vm1  ;;  %v236_v8 = vld [vmem:[#allocation2 + $0x30] sm:$0x1]  ;;  %v239_v10 = vld [vmem:[#allocation2 + $0x3c] sm:$0x1] }
  0x18   : > { %v228_v5 = vsel %vm7794_vm2, 0, %v227_v0  ;;  %v231_v6 = vsel %vm7794_vm2, 0, %v230_v3  ;;  %v234_v7 = vsel %vm7794_vm2, 0, %v233_v4  ;;  %v237_v9 = vsel %vm7794_vm2, 0, %v236_v8  ;;  %v242_v11 = vld [vmem:[#allocation2 + $0x48] sm:$0x1]  ;;  %vm7828_vm4 = vmand %vm221_vm0, %vm278_vm3 }
  0x19   : > { %229 = vst [vmem:[#allocation2 + $0xc] sm:$0x1] %v228_v5  ;;  %232 = vst [vmem:[#allocation2 + $0x18] sm:$0x1] %v231_v6  ;;  %v240_v12 = vsel %vm7794_vm2, 0, %v239_v10  ;;  %v243_v13 = vsel %vm7794_vm2, 0, %v242_v11 }
  0x1a   : > { %235 = vst [vmem:[#allocation2 + $0x24] sm:$0x1] %v234_v7  ;;  %238 = vst [vmem:[#allocation2 + $0x30] sm:$0x1] %v237_v9  ;;  %v245_v14 = vld [vmem:[#allocation2 + $0x54] sm:$0x1] }
  0x1b   : > { %v248_v15 = vld [vmem:[#allocation2 + $0x60] sm:$0x1]  ;;  %241 = vst [vmem:[#allocation2 + $0x3c] sm:$0x1] %v240_v12  ;;  %244 = vst [vmem:[#allocation2 + $0x48] sm:$0x1] %v243_v13 }
  0x1c   : > { %v246_v16 = vsel %vm7794_vm2, 0, %v245_v14  ;;  %v249_v17 = vsel %vm7794_vm2, 0, %v248_v15  ;;  %v251_v18 = vld [vmem:[#allocation2 + $0x6c] sm:$0x1]  ;;  %v254_v19 = vld [vmem:[#allocation2 + $0x78] sm:$0x1] }
  0x1d   : > { %247 = vst [vmem:[#allocation2 + $0x54] sm:$0x1] %v246_v16  ;;  %250 = vst [vmem:[#allocation2 + $0x60] sm:$0x1] %v249_v17  ;;  %v252_v20 = vsel %vm7794_vm2, 0, %v251_v18  ;;  %v255_v21 = vsel %vm7794_vm2, 0, %v254_v19 }
  0x1e   : > { %v257_v22 = vld [vmem:[#allocation2 + $0x84] sm:$0x1]  ;;  %v260_v23 = vld [vmem:[#allocation2 + $0x90] sm:$0x1]  ;;  %253 = vst [vmem:[#allocation2 + $0x6c] sm:$0x1] %v252_v20 }
  0x1f   : > { %256 = vst [vmem:[#allocation2 + $0x78] sm:$0x1] %v255_v21  ;;  %v258_v24 = vsel %vm7794_vm2, 0, %v257_v22  ;;  %v261_v25 = vsel %vm7794_vm2, 0, %v260_v23  ;;  %v263_v26 = vld [vmem:[#allocation2 + $0x9c] sm:$0x1] }
  0x20   : > { %v266_v27 = vld [vmem:[#allocation2 + $0xa8] sm:$0x1]  ;;  %v224_v28 = vld [vmem:[#allocation2] sm:$0x1]  ;;  %259 = vst [vmem:[#allocation2 + $0x84] sm:$0x1] %v258_v24 }
  0x21   : > { %262 = vst [vmem:[#allocation2 + $0x90] sm:$0x1] %v261_v25  ;;  %v264_v29 = vsel %vm7794_vm2, 0, %v263_v26  ;;  %v267_v30 = vsel %vm7794_vm2, 0, %v266_v27  ;;  %v269_v31 = vld [vmem:[#allocation2 + $0xb4] sm:$0x1] }
  0x22   : > { %v225_v33 = vsel %vm7794_vm2, 0, %v224_v28  ;;  %265 = vst [vmem:[#allocation2 + $0x9c] sm:$0x1] %v264_v29  ;;  %268 = vst [vmem:[#allocation2 + $0xa8] sm:$0x1] %v267_v30  ;;  %v270_v34 = vsel %vm7794_vm2, 0, %v269_v31 }
  0x23   : > { %v272_v35 = vld [vmem:[#allocation2 + $0xc0] sm:$0x1]  ;;  %v275_v36 = vld [vmem:[#allocation2 + $0xcc] sm:$0x1]  ;;  %226 = vst [vmem:[#allocation2] sm:$0x1] %v225_v33 }
  0x24   : > { %271 = vst [vmem:[#allocation2 + $0xb4] sm:$0x1] %v270_v34  ;;  %v273_v37 = vsel %vm7794_vm2, 0, %v272_v35  ;;  %v276_v38 = vsel %vm7794_vm2, 0, %v275_v36  ;;  %v280_v39 = vld [vmem:[#allocation2 + $0x8] sm:$0x1] }
  0x25   : > { %v283_v40 = vld [vmem:[#allocation2 + $0x14] sm:$0x1]  ;;  %274 = vst [vmem:[#allocation2 + $0xc0] sm:$0x1] %v273_v37  ;;  %277 = vst [vmem:[#allocation2 + $0xcc] sm:$0x1] %v276_v38 }
  0x26   : > { %v281_v41 = vsel %vm7828_vm4, 0, %v280_v39  ;;  %v284_v42 = vsel %vm7828_vm4, 0, %v283_v40  ;;  %v286_v43 = vld [vmem:[#allocation2 + $0x20] sm:$0x1]  ;;  %v289_v44 = vld [vmem:[#allocation2 + $0x2c] sm:$0x1] }
  0x27   : > { %282 = vst [vmem:[#allocation2 + $0x8] sm:$0x1] %v281_v41  ;;  %285 = vst [vmem:[#allocation2 + $0x14] sm:$0x1] %v284_v42  ;;  %v287_v45 = vsel %vm7828_vm4, 0, %v286_v43  ;;  %v290_v46 = vsel %vm7828_vm4, 0, %v289_v44 }
  0x28   : > { %v292_v47 = vld [vmem:[#allocation2 + $0x38] sm:$0x1]  ;;  %v295_v48 = vld [vmem:[#allocation2 + $0x44] sm:$0x1]  ;;  %288 = vst [vmem:[#allocation2 + $0x20] sm:$0x1] %v287_v45 }
  0x29   : > { %291 = vst [vmem:[#allocation2 + $0x2c] sm:$0x1] %v290_v46  ;;  %v293_v49 = vsel %vm7828_vm4, 0, %v292_v47  ;;  %v296_v50 = vsel %vm7828_vm4, 0, %v295_v48  ;;  %v298_v51 = vld [vmem:[#allocation2 + $0x50] sm:$0x1] }
  0x2a   : > { %v301_v52 = vld [vmem:[#allocation2 + $0x5c] sm:$0x1]  ;;  %294 = vst [vmem:[#allocation2 + $0x38] sm:$0x1] %v293_v49  ;;  %297 = vst [vmem:[#allocation2 + $0x44] sm:$0x1] %v296_v50 }
  0x2b   : > { %v299_v53 = vsel %vm7828_vm4, 0, %v298_v51  ;;  %v302_v54 = vsel %vm7828_vm4, 0, %v301_v52  ;;  %v304_v55 = vld [vmem:[#allocation2 + $0x68] sm:$0x1]  ;;  %v307_v56 = vld [vmem:[#allocation2 + $0x74] sm:$0x1] }
  0x2c   : > { %300 = vst [vmem:[#allocation2 + $0x50] sm:$0x1] %v299_v53  ;;  %303 = vst [vmem:[#allocation2 + $0x5c] sm:$0x1] %v302_v54  ;;  %v305_v57 = vsel %vm7828_vm4, 0, %v304_v55  ;;  %v308_v58 = vsel %vm7828_vm4, 0, %v307_v56 }
  0x2d   : > { %v310_v59 = vld [vmem:[#allocation2 + $0x80] sm:$0x1]  ;;  %v313_v60 = vld [vmem:[#allocation2 + $0x8c] sm:$0x1]  ;;  %306 = vst [vmem:[#allocation2 + $0x68] sm:$0x1] %v305_v57 }
  0x2e   : > { %309 = vst [vmem:[#allocation2 + $0x74] sm:$0x1] %v308_v58  ;;  %v311_v61 = vsel %vm7828_vm4, 0, %v310_v59  ;;  %v314_v62 = vsel %vm7828_vm4, 0, %v313_v60  ;;  %v316_v63 = vld [vmem:[#allocation2 + $0x98] sm:$0x1] }
  0x2f   : > { %v319_v0 = vld [vmem:[#allocation2 + $0xa4] sm:$0x1]  ;;  %312 = vst [vmem:[#allocation2 + $0x80] sm:$0x1] %v311_v61  ;;  %315 = vst [vmem:[#allocation2 + $0x8c] sm:$0x1] %v314_v62 }
  0x30   : > { %v317_v1 = vsel %vm7828_vm4, 0, %v316_v63  ;;  %v320_v2 = vsel %vm7828_vm4, 0, %v319_v0  ;;  %v322_v3 = vld [vmem:[#allocation2 + $0xb0] sm:$0x1]  ;;  %v325_v4 = vld [vmem:[#allocation2 + $0xbc] sm:$0x1] }
  0x31   : > { %318 = vst [vmem:[#allocation2 + $0x98] sm:$0x1] %v317_v1  ;;  %321 = vst [vmem:[#allocation2 + $0xa4] sm:$0x1] %v320_v2  ;;  %v323_v5 = vsel %vm7828_vm4, 0, %v322_v3  ;;  %v326_v6 = vsel %vm7828_vm4, 0, %v325_v4 }
  0x32   : > { %v328_v7 = vld [vmem:[#allocation2 + $0xc8] sm:$0x1]  ;;  %v331_v8 = vld [vmem:[#allocation2 + $0xd4] sm:$0x1]  ;;  %324 = vst [vmem:[#allocation2 + $0xb0] sm:$0x1] %v323_v5 }
  0x33   : > { %327 = vst [vmem:[#allocation2 + $0xbc] sm:$0x1] %v326_v6  ;;  %v329_v9 = vsel %vm7828_vm4, 0, %v328_v7  ;;  %v332_v10 = vsel %vm7828_vm4, 0, %v331_v8 }
  0x34   : > { %330 = vst [vmem:[#allocation2 + $0xc8] sm:$0x1] %v329_v9  ;;  %333 = vst [vmem:[#allocation2 + $0xd4] sm:$0x1] %v332_v10 }
  0x35 PF: > { %v7588_v11 = vld [vmem:[%s10433_s1 + $0x78] sm:$0xff]   ;;  %v7589_v12 = vld [vmem:[%s10433_s1 + $0x70] sm:$0xff]   ;;  %v7590_v13 = vld [vmem:[%s10433_s1 + $0x68] sm:$0xff]   ;;  %vm1105_vm5 = vsmask.f32 3328  ;;  %vm924_vm9 = vcmask 1043456  }
  0x36   : > { %7131 = vmatprep.subr.bf16.mxu0 %v7588_v11  ;;  %7563 = vmatprep.subr.bf16.mxu1 %v7588_v11  ;;  %v7591_v14 = vld [vmem:[%s10433_s1 + $0x60] sm:$0xff]   ;;  %v7888_v17 = vld [vmem:[#allocation2 + $0x8] sm:$0x1]  ;;  %vm1106_vm6 = vsmask.f32 7440  ;;  %v6891_v27 = vld [vmem:[%s7781_s22 + $0x38] sm:$0xff]  }
  0x37   : > { %7132 = vmatpush3.bf16.msra.mxu0 %v7588_v11  ;;  %7571 = vmatpush3.bf16.msra.mxu1 %v7588_v11  ;;  %v1041_v15 = vld [vmem:[#allocation2] sm:$0xf]  ;;  %v1042_v16 = vld [vmem:[#allocation2 + $0x4] sm:$0xf]  ;;  %v1128_v22 = vshll.u32 %v7888_v17, 16  ;;  %v7592_v28 = vld [vmem:[%s10433_s1 + $0x58] sm:$0xff]   ;;  %v6771_v39 = vunpack.c.l.bf16 %v6891_v27  ;;  %v6772_v42 = vunpack.c.h.bf16 %v6891_v27 }
  0x38   : > { %7133 = vmatprep.subr.bf16.mxu0 %v7589_v12  ;;  %7564 = vmatprep.subr.bf16.mxu1 %v7589_v12  ;;  %v1109_v18 = vshrl.u32 %v1041_v15, 16  ;;  %v1112_v19 = vshll.u32 %v1041_v15, 16  ;;  %v1118_v20 = vshll.u32 %v1042_v16, 16  ;;  %v1122_v21 = vshrl.u32 %v1042_v16, 16  ;;  %v7894_v25 = vld [vmem:[%s10434_s2] ss:$0 sm:$0xff]  ;;  %vm7908_vm7 = vmor %vm1105_vm5, %vm1106_vm6 }
  0x39   : > { %v6742_v26 = vld [vmem:[%s7781_s22] sm:$0xff]   ;;  %v1130_v33 = vrot.slane %v1128_v22, 5  ;;  %vm600_vm8 = vsmask.f32 256  ;;  %vm931_vm10 = vcmask 1040384   ;;  %v7593_v43 = vld [vmem:[%s10433_s1 + $0x50] sm:$0xff]   ;;  %v418_v46 = vmul.f32 %v6771_v39, %v7894_v25 }
  0x3a   : > { %v1111_v23 = vrot.slane %v1109_v18, 4  ;;  %v1114_v24 = vrot.slane %v1112_v19, 5  ;;  %v1120_v29 = vrot.slane %v1118_v20, 5  ;;  %v1124_v30 = vrot.slane %v1122_v21, 4  ;;  %v7904_v34 = vld [vmem:[%s10434_s2 + $0x1] ss:$0 sm:$0xff]  ;;  %vm7956_vm15 = vmand %vm931_vm10, %vm600_vm8 }
  0x3b   : > { %7134 = vmatpush3.bf16.msra.mxu0 %v7589_v12  ;;  %7572 = vmatpush3.bf16.msra.mxu1 %v7589_v12  ;;  %v6743_v31 = vunpack.c.l.bf16 %v6742_v26  ;;  %v6744_v35 = vunpack.c.h.bf16 %v6742_v26  ;;  %vm601_vm11 = vsmask.f32 4368  ;;  %v419_v49 = vmul.f32 %v6772_v42, %v7894_v25  ;;  %v6892_v50 = vld [vmem:[%s7781_s22 + $0x40] sm:$0xff]   ;;  %v7594_v55 = vld [vmem:[%s10433_s1 + $0x48] sm:$0xff]   ;;  %v933_v16 = vld [vmem:[#allocation2 + $0x14] sm:$0x1] }
  0x3c   : > { %7135 = vmatprep.subr.bf16.mxu0 %v7590_v13  ;;  %7565 = vmatprep.subr.bf16.mxu1 %v7590_v13  ;;  %v1115_v32 = vor.u32 %v1114_v24, %v1111_v23  ;;  %v1125_v37 = vor.u32 %v1124_v30, %v1120_v29  ;;  %v454_v53 = vadd.f32 %v7904_v34, %v418_v46  ;;  %v6775_v54 = vunpack.c.l.bf16 %v6892_v50  ;;  %v7933_v63 = vld [vmem:[%s7781_s22 + $0x8] sm:$0xff]   ;;  %v7595_v8 = vld [vmem:[%s10433_s1 + $0x40] sm:$0xff]   ;;  %vm7944_vm13 = vmor %vm600_vm8, %vm601_vm11 }
  0x3d   : > { %v404_v38 = vmul.f32 %v6743_v31, %v7894_v25  ;;  %v405_v41 = vmul.f32 %v6744_v35, %v7894_v25  ;;  %v455_v58 = vadd.f32 %v7904_v34, %v419_v49  ;;  %v6776_v59 = vunpack.c.h.bf16 %v6892_v50  ;;  %v927_v11 = vld [vmem:[#allocation2 + $0xc] sm:$0xf]  ;;  %v6886_v50 = vld [vmem:[%s7781_s22 + $0x10] sm:$0xff]  }
  0x3e   : > { %v1116_v40 = vrot.slane %v1115_v32, 4  ;;  %v1126_v44 = vrot.slane %v1125_v37, 4  ;;  %vm925_vm12 = vsmask.f32 7938  ;;  %v486_v61 = vmax.f32 %v454_v53, 0.0 }
  0x3f   : > { %7136 = vmatpush3.bf16.msra.mxu0 %v7590_v13  ;;  %7573 = vmatpush3.bf16.msra.mxu1 %v7590_v13  ;;  %v440_v45 = vadd.f32 %v7904_v34, %v404_v38  ;;  %v441_v48 = vadd.f32 %v7904_v34, %v405_v41  ;;  %v420_v62 = vmul.f32 %v6775_v54, %v7894_v25  ;;  %v487_v1 = vmax.f32 %v455_v58, 0.0  ;;  %vm7950_vm14 = vmand %vm924_vm9, %vm925_vm12  ;;  %v978_v37 = vld [vmem:[#allocation2 + $0x60] sm:$0xf]  ;;  %v982_v38 = vld [vmem:[#allocation2 + $0x68] sm:$0x1] }
  0x40   : > { %7137 = vmatprep.subr.bf16.mxu0 %v7591_v14  ;;  %7566 = vmatprep.subr.bf16.mxu1 %v7591_v14  ;;  %v1121_v47 = vsel %vm7908_vm7, %v1116_v40, %v1120_v29  ;;  %v1131_v51 = vsel %vm7908_vm7, %v1126_v44, %v1130_v33  ;;  %v421_v2 = vmul.f32 %v6776_v59, %v7894_v25  ;;  %v6747_v3 = vunpack.c.l.bf16 %v7933_v63  ;;  %v7970_v44 = vld [vmem:[%s10433_s1 + $0xb8] sm:$0xff]   ;;  %v985_v59 = vld [vmem:[#allocation2 + $0x6c] sm:$0xf] }
  0x41   : > { %v472_v52 = vmax.f32 %v440_v45, 0.0  ;;  %v6265_v56 = vcombine.low %v1121_v47, %v1131_v51  ;;  %v473_v57 = vmax.f32 %v441_v48, 0.0  ;;  %v6691_v6 = vpack.c.bf16 %v486_v61, %v486_v61 }
  0x42   : > { %v456_v7 = vadd.f32 %v7904_v34, %v420_v62  ;;  %v6692_v12 = vpack.c.bf16 %v487_v1, %v487_v1  ;;  %v457_v13 = vadd.f32 %v7904_v34, %v421_v2  ;;  %v10457_v22 = vmov 0  ;;  %v989_v2 = vld [vmem:[#allocation2 + $0x74] sm:$0x1] }
  0x43   : > { %7138 = vmatpush3.bf16.msra.mxu0 %v7591_v14  ;;  %7574 = vmatpush3.bf16.msra.mxu1 %v7591_v14  ;;  %v6677_v60 = vpack.c.bf16 %v472_v52, %v472_v52  ;;  %v6678_v0 = vpack.c.bf16 %v473_v57, %v473_v57  ;;  %v10454_v14 = vmov 0  ;;  %v723_v18 = vshrl.u32 %v6691_v6, 16 }
  0x44   : > { %7139 = vmatprep.subr.bf16.mxu0 %v7592_v28  ;;  %7567 = vmatprep.subr.bf16.mxu1 %v7592_v28  ;;  %v10455_v14 = vsel %vm7944_vm13, 4294967295, %v10454_v14  ;;  %v726_v19 = vshll.u32 %v6691_v6, 16  ;;  %v488_v20 = vmax.f32 %v456_v7, 0.0  ;;  %v10458_v22 = vsel %vm7950_vm14, 4294967295, %v10457_v22 }
  0x45   : > { %7147 = vmatprep.mubr.bf16.mxu0 %v6265_v56  ;;  %v604_v4 = vshrl.u32 %v6677_v60, 16  ;;  %v607_v5 = vshll.u32 %v6677_v60, 16  ;;  %v612_v9 = vshrl.u32 %v6678_v0, 16  ;;  %v615_v10 = vshll.u32 %v6678_v0, 16  ;;  %10456 = vst [vmem:[#allocation3_spill] sm:$0xff] %v10455_v14  ;;  %10459 = vst [vmem:[#allocation4_spill] sm:$0xff] %v10458_v22 }
  0x46   : > { %v731_v23 = vshrl.u32 %v6692_v12, 16  ;;  %v734_v24 = vshll.u32 %v6692_v12, 16  ;;  %v489_v26 = vmax.f32 %v457_v13, 0.0  ;;  %v10460_v29 = vmov 0 }
  0x47   : > { %7140 = vmatpush3.bf16.msra.mxu0 %v7592_v28  ;;  %7575 = vmatpush3.bf16.msra.mxu1 %v7592_v28  ;;  %v606_v15 = vrot.slane %v604_v4, 7  ;;  %v614_v21 = vrot.slane %v612_v9, 7  ;;  %v10461_v29 = vsel %vm7956_vm15, 4294967295, %v10460_v29  ;;  %v725_v30 = vrot.slane %v723_v18, 7 }
  0x48   : > { %7141 = vmatprep.subr.bf16.mxu0 %v7593_v43  ;;  %7568 = vmatprep.subr.bf16.mxu1 %v7593_v43  ;;  %10462 = vst [vmem:[#allocation5_spill] sm:$0xff] %v10461_v29  ;;  %v6693_v31 = vpack.c.bf16 %v488_v20, %v488_v20  ;;  %v733_v35 = vrot.slane %v731_v23, 7  ;;  %v6694_v39 = vpack.c.bf16 %v489_v26, %v489_v26  ;;  %v6748_v60 = vunpack.c.h.bf16 %v7933_v63 }
  0x49   : > { %v609_v27 = vor.u32 %v607_v5, %v606_v15  ;;  %v610_v28 = vrot.slane %v606_v15, 4  ;;  %v617_v32 = vor.u32 %v615_v10, %v614_v21  ;;  %v619_v33 = vrot.slane %v614_v21, 4 }
  0x4a   : > { %v728_v41 = vor.u32 %v726_v19, %v725_v30  ;;  %v729_v42 = vrot.slane %v725_v30, 4  ;;  %v740_v45 = vshrl.u32 %v6693_v31, 16  ;;  %v736_v48 = vor.u32 %v734_v24, %v733_v35 }
  0x4b   : > { %7142 = vmatpush3.bf16.msra.mxu0 %v7593_v43  ;;  %7576 = vmatpush3.bf16.msra.mxu1 %v7593_v43  ;;  %v928_v40 = vsel %vm7950_vm14, %v609_v27, %v927_v11  ;;  %v7965_v43 = vld [vmem:[%s10433_s1 + $0x38] sm:$0xff]   ;;  %v618_v46 = vsel %vm7944_vm13, %v610_v28, %v617_v32  ;;  %v934_v47 = vsel %vm7956_vm15, %v619_v33, %v933_v16  ;;  %v738_v49 = vrot.slane %v733_v35, 4 }
  0x4c   : > { %7143 = vmatprep.subr.bf16.mxu0 %v7594_v55  ;;  %7569 = vmatprep.subr.bf16.mxu1 %v7594_v55  ;;  %929 = vst [vmem:[#allocation2 + $0xc] sm:$0xf] %v928_v40  ;;  %930 = vst [vmem:[#allocation2 + $0x10] sm:$0xf] %v618_v46  ;;  %v979_v51 = vsel %vm7950_vm14, %v728_v41, %v978_v37  ;;  %v742_v52 = vrot.slane %v740_v45, 7  ;;  %v743_v53 = vshll.u32 %v6693_v31, 16  ;;  %v6751_v5 = vunpack.c.l.bf16 %v6886_v50 }
  0x4d   : > { %935 = vst [vmem:[#allocation2 + $0x14] sm:$0x1] %v934_v47  ;;  %v748_v54 = vshrl.u32 %v6694_v39, 16  ;;  %v737_v56 = vsel %vm7944_vm13, %v729_v42, %v736_v48  ;;  %980 = vst [vmem:[#allocation2 + $0x60] sm:$0xf] %v979_v51  ;;  %v983_v57 = vsel %vm7956_vm15, %v738_v49, %v982_v38  ;;  %v751_v58 = vshll.u32 %v6694_v39, 16 }
  0x4e   : > { %981 = vst [vmem:[#allocation2 + $0x64] sm:$0xf] %v737_v56  ;;  %984 = vst [vmem:[#allocation2 + $0x68] sm:$0x1] %v983_v57  ;;  %v745_v61 = vor.u32 %v743_v53, %v742_v52  ;;  %v746_v62 = vrot.slane %v742_v52, 4  ;;  %v406_v1 = vmul.f32 %v6747_v3, %v7894_v25  ;;  %v407_v4 = vmul.f32 %v6748_v60, %v7894_v25 }
  0x4f   : > { %7144 = vmatpush3.bf16.msra.mxu0 %v7594_v55  ;;  %7577 = vmatpush3.bf16.msra.mxu1 %v7594_v55  ;;  %v6893_v55 = vld [vmem:[%s7781_s22 + $0x48] sm:$0xff]   ;;  %v750_v0 = vrot.slane %v748_v54, 7  ;;  %v6752_v6 = vunpack.c.h.bf16 %v6886_v50  ;;  %v2143_v12 = vrot.slane %v7888_v17, 5  ;;  %v408_v63 = vmul.f32 %v6751_v5, %v7894_v25 }
  0x50   : > { %7145 = vmatprep.subr.bf16.mxu0 %v7595_v8  ;;  %7570 = vmatprep.subr.bf16.mxu1 %v7595_v8  ;;  %v6779_v7 = vunpack.c.l.bf16 %v6893_v55  ;;  %v986_v10 = vsel %vm7950_vm14, %v745_v61, %v985_v59  ;;  %v442_v11 = vadd.f32 %v7904_v34, %v406_v1  ;;  %v7996_v13 = vadd.f32 %v7904_v34, %v407_v4 }
  0x51   : > { %v755_v9 = vrot.slane %v750_v0, 4  ;;  %987 = vst [vmem:[#allocation2 + $0x6c] sm:$0xf] %v986_v10  ;;  %v409_v3 = vmul.f32 %v6752_v6, %v7894_v25  ;;  %v6780_v20 = vunpack.c.h.bf16 %v6893_v55  ;;  %v8007_v27 = vadd.f32 %v7904_v34, %v408_v63 }
  0x52   : > { %v474_v19 = vmax.f32 %v442_v11, 0.0  ;;  %v422_v28 = vmul.f32 %v6779_v7, %v7894_v25  ;;  %vm2135_vm0 = vcmask 1042432   ;;  %vm2136_vm1 = vcmask 1046532  }
  0x53   : > { %7146 = vmatpush3.bf16.msra.mxu0 %v7595_v8  ;;  %7578 = vmatpush3.bf16.msra.mxu1 %v7595_v8  ;;  %v753_v8 = vor.u32 %v751_v58, %v750_v0  ;;  %v1043_v15 = vld [vmem:[#allocation2 + $0xc] sm:$0xf]  ;;  %v990_v18 = vsel %vm7956_vm15, %v755_v9, %v989_v2  ;;  %v1044_v21 = vld [vmem:[#allocation2 + $0x10] sm:$0xf]  ;;  %v8015_v42 = vadd.f32 %v7904_v34, %v409_v3  ;;  %vm8377_vm2 = vmor %vm2135_vm0, %vm2136_vm1 }
  0x54   : > { %7179 = vmatprep.subr.bf16.mxu1 %v7965_v43  ;;  %7227 = vmatprep.subr.bf16.mxu0 %v7970_v44  ;;  %v8004_v23 = vld [vmem:[#allocation2 + $0x14] sm:$0x1]  ;;  %v1133_v24 = vshrl.u32 %v1043_v15, 16  ;;  %v1136_v26 = vshll.u32 %v1043_v15, 16  ;;  %991 = vst [vmem:[#allocation2 + $0x74] sm:$0x1] %v990_v18  ;;  %v8012_v41 = vpack.c.bf16 %v474_v19, %v474_v19  ;;  %v423_v48 = vmul.f32 %v6780_v20, %v7894_v25 }
  0x55   : > { %v754_v16 = vsel %vm7944_vm13, %v746_v62, %v753_v8  ;;  %v1142_v30 = vshll.u32 %v1044_v21, 16  ;;  %v1146_v31 = vshrl.u32 %v1044_v21, 16  ;;  %v1152_v32 = vshll.u32 %v8004_v23, 16  ;;  %v1057_v35 = vld [vmem:[#allocation2 + $0x60] sm:$0xf]  ;;  %v7599_v20 = vld [vmem:[%s10433_s1 + $0xb0] sm:$0xff]  }
  0x56   : > { %988 = vst [vmem:[#allocation2 + $0x70] sm:$0xf] %v754_v16  ;;  %v2150_v33 = vrot.slane %v8004_v23, 5  ;;  %v1135_v37 = vrot.slane %v1133_v24, 4  ;;  %v1138_v38 = vrot.slane %v1136_v26, 5  ;;  %v1301_v47 = vshrl.u32 %v1057_v35, 16 }
  0x57   : > { %v1058_v39 = vld [vmem:[#allocation2 + $0x64] sm:$0xf]  ;;  %v1097_v40 = vld [vmem:[#allocation2 + $0x68] sm:$0x1]  ;;  %v1144_v45 = vrot.slane %v1142_v30, 5  ;;  %v1148_v46 = vrot.slane %v1146_v31, 4  ;;  %v8019_v4 = vadd.f32 %v7904_v34, %v422_v28  ;;  %v8022_v5 = vadd.f32 %v7904_v34, %v423_v48 }
  0x58   : > { %v1139_v49 = vor.u32 %v1138_v38, %v1135_v37  ;;  %v1304_v50 = vshll.u32 %v1057_v35, 16  ;;  %v1310_v51 = vshll.u32 %v1058_v39, 16  ;;  %v1314_v52 = vshrl.u32 %v1058_v39, 16  ;;  %v1059_v57 = vld [vmem:[#allocation2 + $0x6c] sm:$0xf] }
  0x59   : > { %v1149_v53 = vor.u32 %v1148_v46, %v1144_v45  ;;  %v1154_v54 = vrot.slane %v1152_v32, 5  ;;  %v1303_v55 = vrot.slane %v1301_v47, 4  ;;  %v1320_v56 = vshll.u32 %v1097_v40, 16 }
  0x5a   : > { %v1140_v58 = vrot.slane %v1139_v49, 4  ;;  %v1306_v59 = vrot.slane %v1304_v50, 5  ;;  %v1312_v60 = vrot.slane %v1310_v51, 5  ;;  %v1316_v61 = vrot.slane %v1314_v52, 4 }
  0x5b   : > { %v1150_v62 = vrot.slane %v1149_v53, 4  ;;  %v1322_v0 = vrot.slane %v1320_v56, 5  ;;  %v1098_v2 = vld [vmem:[#allocation2 + $0x74] sm:$0x1]  ;;  %v1325_v9 = vshrl.u32 %v1059_v57, 16  ;;  %v1328_v11 = vshll.u32 %v1059_v57, 16 }
  0x5c   : > { %v1145_v6 = vsel %vm7908_vm7, %v1140_v58, %v1144_v45  ;;  %v1307_v7 = vor.u32 %v1306_v59, %v1303_v55  ;;  %v1317_v8 = vor.u32 %v1316_v61, %v1312_v60  ;;  %v1344_v28 = vshll.u32 %v1098_v2, 16  ;;  %v936_v45 = vld [vmem:[#allocation2 + $0x18] sm:$0xf]  ;;  %v7598_v57 = vld [vmem:[%s10433_s1 + $0x30] sm:$0xff]   ;;  %v940_v58 = vld [vmem:[#allocation2 + $0x20] sm:$0x1] }
  0x5d   : > { %v1060_v1 = vld [vmem:[#allocation2 + $0x70] sm:$0xf]  ;;  %v1155_v10 = vsel %vm7908_vm7, %v1150_v62, %v1154_v54  ;;  %v1327_v19 = vrot.slane %v1325_v9, 4  ;;  %v1330_v21 = vrot.slane %v1328_v11, 5  ;;  %v475_v32 = vmax.f32 %v7996_v13, 0.0  ;;  %v7601_v13 = vld [vmem:[%s10433_s1 + $0xa8] sm:$0xff]  }
  0x5e   : > { %v1334_v63 = vshll.u32 %v1060_v1, 16  ;;  %v1338_v3 = vshrl.u32 %v1060_v1, 16  ;;  %v6266_v15 = vcombine.low %v1145_v6, %v1155_v10  ;;  %v1308_v16 = vrot.slane %v1307_v7, 4  ;;  %v6894_v1 = vld [vmem:[%s7781_s22 + $0x50] sm:$0xff]   ;;  %v7603_v2 = vld [vmem:[%s10433_s1 + $0xa0] sm:$0xff]  }
  0x5f   : > { %v1318_v18 = vrot.slane %v1317_v8, 4  ;;  %v621_v35 = vshrl.u32 %v8012_v41, 16  ;;  %v1331_v38 = vor.u32 %v1330_v21, %v1327_v19  ;;  %v1346_v40 = vrot.slane %v1344_v28, 5  ;;  %v943_v11 = vld [vmem:[#allocation2 + $0x24] sm:$0xf]  ;;  %v8066_v21 = vld [vmem:[%s10433_s1 + $0x98] sm:$0xff]  }
  0x60   : > { %v1336_v24 = vrot.slane %v1334_v63, 5  ;;  %v1340_v26 = vrot.slane %v1338_v3, 4  ;;  %7148 = vmatmul.mubr.bf16.vlgmr.msra.gmra.mxu0 %v6266_v15  ;;  %v1313_v30 = vsel %vm7908_vm7, %v1308_v16, %v1312_v60  ;;  %v6680_v46 = vpack.c.bf16 %v475_v32, %v475_v32  ;;  %v947_v63 = vld [vmem:[#allocation2 + $0x2c] sm:$0x1] }
  0x61   : > { %v1323_v31 = vsel %vm7908_vm7, %v1318_v18, %v1322_v0  ;;  %7228 = vmatpush3.bf16.msra.mxu0 %v7970_v44  ;;  %v623_v47 = vrot.slane %v621_v35, 7  ;;  %v624_v48 = vshll.u32 %v8012_v41, 16  ;;  %v476_v49 = vmax.f32 %v8007_v27, 0.0  ;;  %v7600_v18 = vld [vmem:[%s10433_s1 + $0x28] sm:$0xff]  }
  0x62   : > { %v6273_v37 = vcombine.low %v1313_v30, %v1323_v31  ;;  %v1341_v39 = vor.u32 %v1340_v26, %v1336_v24  ;;  %7229 = vmatprep.subr.bf16.mxu0 %v7599_v20  ;;  %v1332_v50 = vrot.slane %v1331_v38, 4  ;;  %v477_v52 = vmax.f32 %v8015_v42, 0.0 }
  0x63   : > { %v490_v53 = vmax.f32 %v8019_v4, 0.0  ;;  %v626_v44 = vor.u32 %v624_v48, %v623_v47  ;;  %v627_v54 = vrot.slane %v623_v47, 4  ;;  %v629_v55 = vshrl.u32 %v6680_v46, 16 }
  0x64   : > { %7163 = vmatprep.mubr.bf16.mxu1 %v6273_v37  ;;  %v1342_v51 = vrot.slane %v1341_v39, 4  ;;  %v632_v56 = vshll.u32 %v6680_v46, 16  ;;  %v1337_v41 = vsel %vm7908_vm7, %v1332_v50, %v1336_v24  ;;  %v6681_v42 = vpack.c.bf16 %v476_v49, %v476_v49  ;;  %v992_v49 = vld [vmem:[#allocation2 + $0x78] sm:$0xf] }
  0x65   : > { %7230 = vmatpush3.bf16.msra.mxu0 %v7599_v20  ;;  %v6682_v59 = vpack.c.bf16 %v477_v52, %v477_v52  ;;  %v631_v61 = vrot.slane %v629_v55, 7  ;;  %v937_v62 = vsel %vm7950_vm14, %v626_v44, %v936_v45  ;;  %v491_v0 = vmax.f32 %v8022_v5, 0.0  ;;  %v6887_v45 = vld [vmem:[%s7781_s22 + $0x18] sm:$0xff]   ;;  %v7602_v55 = vld [vmem:[%s10433_s1 + $0x20] sm:$0xff]  }
  0x66   : > { %v1347_v27 = vsel %vm7908_vm7, %v1342_v51, %v1346_v40  ;;  %7231 = vmatprep.subr.bf16.mxu0 %v7601_v13  ;;  %938 = vst [vmem:[#allocation2 + $0x18] sm:$0xf] %v937_v62  ;;  %v638_v4 = vshrl.u32 %v6681_v42, 16  ;;  %v641_v6 = vshll.u32 %v6681_v42, 16  ;;  %v6695_v3 = vpack.c.bf16 %v490_v53, %v490_v53 }
  0x67   : > { %v6274_v60 = vcombine.low %v1337_v41, %v1347_v27  ;;  %v646_v7 = vshrl.u32 %v6682_v59, 16  ;;  %v649_v8 = vshll.u32 %v6682_v59, 16  ;;  %v634_v9 = vor.u32 %v632_v56, %v631_v61  ;;  %v7607_v56 = vld [vmem:[%s10433_s1 + $0x90] sm:$0xff]  }
  0x68   : > { %v636_v10 = vrot.slane %v631_v61, 4  ;;  %v6696_v15 = vpack.c.bf16 %v491_v0, %v491_v0  ;;  %v640_v5 = vrot.slane %v638_v4, 7  ;;  %v6783_v19 = vunpack.c.l.bf16 %v6894_v1  ;;  %v7604_v4 = vld [vmem:[%s10433_s1 + $0x18] sm:$0xff]  }
  0x69   : > { %7164 = vmatmul.mubr.bf16.vlgmr.msra.gmra.mxu1 %v6274_v60  ;;  %v648_v16 = vrot.slane %v646_v7, 7  ;;  %v6784_v20 = vunpack.c.h.bf16 %v6894_v1  ;;  %7232 = vmatpush3.bf16.msra.mxu0 %v7601_v13  ;;  %v635_v24 = vsel %vm7944_vm13, %v627_v54, %v634_v9  ;;  %v757_v26 = vshrl.u32 %v6695_v3, 16  ;;  %v996_v13 = vld [vmem:[#allocation2 + $0x80] sm:$0x1] }
  0x6a   : > { %7180 = vmatpush3.bf16.msra.mxu1 %v7965_v43  ;;  %v941_v43 = vsel %vm7956_vm15, %v636_v10, %v940_v58  ;;  %v760_v28 = vshll.u32 %v6695_v3, 16  ;;  %7233 = vmatprep.subr.bf16.mxu0 %v7603_v2  ;;  %939 = vst [vmem:[#allocation2 + $0x1c] sm:$0xf] %v635_v24  ;;  %v643_v30 = vor.u32 %v641_v6, %v640_v5  ;;  %v644_v31 = vrot.slane %v640_v5, 4  ;;  %v7606_v24 = vld [vmem:[%s10433_s1 + $0x10] sm:$0xff]  }
  0x6b   : > { %7181 = vmatprep.subr.bf16.mxu1 %v7598_v57  ;;  %942 = vst [vmem:[#allocation2 + $0x20] sm:$0x1] %v941_v43  ;;  %v651_v32 = vor.u32 %v649_v8, %v648_v16  ;;  %v653_v35 = vrot.slane %v648_v16, 4  ;;  %v759_v37 = vrot.slane %v757_v26, 7  ;;  %v765_v38 = vshrl.u32 %v6696_v15, 16  ;;  %v7609_v43 = vld [vmem:[%s10433_s1 + $0x88] sm:$0xff]  }
  0x6c   : > { %v768_v39 = vshll.u32 %v6696_v15, 16  ;;  %v424_v40 = vmul.f32 %v6783_v19, %v7894_v25  ;;  %v944_v47 = vsel %vm7950_vm14, %v643_v30, %v943_v11  ;;  %v425_v50 = vmul.f32 %v6784_v20, %v7894_v25 }
  0x6d   : > { %v652_v46 = vsel %vm7944_vm13, %v644_v31, %v651_v32  ;;  %v948_v48 = vsel %vm7956_vm15, %v653_v35, %v947_v63  ;;  %v1045_v51 = vld [vmem:[#allocation2 + $0x18] sm:$0xf]  ;;  %945 = vst [vmem:[#allocation2 + $0x24] sm:$0xf] %v944_v47  ;;  %v762_v52 = vor.u32 %v760_v28, %v759_v37  ;;  %v763_v53 = vrot.slane %v759_v37, 4  ;;  %7234 = vmatpush3.bf16.msra.mxu0 %v7603_v2 }
  0x6e   : > { %7182 = vmatpush3.bf16.msra.mxu1 %v7598_v57  ;;  %946 = vst [vmem:[#allocation2 + $0x28] sm:$0xf] %v652_v46  ;;  %949 = vst [vmem:[#allocation2 + $0x2c] sm:$0x1] %v948_v48  ;;  %v767_v44 = vrot.slane %v765_v38, 7  ;;  %v460_v54 = vadd.f32 %v7904_v34, %v424_v40  ;;  %v1157_v41 = vshrl.u32 %v1045_v51, 16  ;;  %v461_v57 = vadd.f32 %v7904_v34, %v425_v50 }
  0x6f   : > { %7183 = vmatprep.subr.bf16.mxu1 %v7600_v18  ;;  %v1160_v27 = vshll.u32 %v1045_v51, 16  ;;  %v6755_v58 = vunpack.c.l.bf16 %v6887_v45  ;;  %7235 = vmatprep.subr.bf16.mxu0 %v8066_v21  ;;  %v993_v60 = vsel %vm7950_vm14, %v762_v52, %v992_v49  ;;  %v6756_v2 = vunpack.c.h.bf16 %v6887_v45  ;;  %v7611_v49 = vld [vmem:[%s10433_s1 + $0x80] sm:$0xff]  }
  0x70   : > { %v770_v42 = vor.u32 %v768_v39, %v767_v44  ;;  %v772_v59 = vrot.slane %v767_v44, 4  ;;  %v492_v61 = vmax.f32 %v460_v54, 0.0  ;;  %v1159_v62 = vrot.slane %v1157_v41, 4  ;;  %994 = vst [vmem:[#allocation2 + $0x78] sm:$0xf] %v993_v60  ;;  %v7608_v44 = vld [vmem:[%s10433_s1 + $0x8] sm:$0xff]  }
  0x71   : > { %v1162_v0 = vrot.slane %v1160_v27, 5  ;;  %v493_v1 = vmax.f32 %v461_v57, 0.0  ;;  %v1046_v6 = vld [vmem:[#allocation2 + $0x1c] sm:$0xf]  ;;  %v410_v11 = vmul.f32 %v6755_v58, %v7894_v25  ;;  %7236 = vmatpush3.bf16.msra.mxu0 %v8066_v21  ;;  %v411_v20 = vmul.f32 %v6756_v2, %v7894_v25 }
  0x72   : > { %7184 = vmatpush3.bf16.msra.mxu1 %v7600_v18  ;;  %v1091_v7 = vld [vmem:[#allocation2 + $0x20] sm:$0x1]  ;;  %v771_v8 = vsel %vm7944_vm13, %v763_v53, %v770_v42  ;;  %v997_v9 = vsel %vm7956_vm15, %v772_v59, %v996_v13  ;;  %v6697_v10 = vpack.c.bf16 %v492_v61, %v492_v61  ;;  %v1166_v3 = vshll.u32 %v1046_v6, 16  ;;  %7237 = vmatprep.subr.bf16.mxu0 %v7607_v56  ;;  %v999_v61 = vld [vmem:[#allocation2 + $0x84] sm:$0xf] }
  0x73   : > { %7185 = vmatprep.subr.bf16.mxu1 %v7602_v55  ;;  %v1163_v63 = vor.u32 %v1162_v0, %v1159_v62  ;;  %v1170_v15 = vshrl.u32 %v1046_v6, 16  ;;  %v1176_v5 = vshll.u32 %v1091_v7, 16  ;;  %995 = vst [vmem:[#allocation2 + $0x7c] sm:$0xf] %v771_v8  ;;  %998 = vst [vmem:[#allocation2 + $0x80] sm:$0x1] %v997_v9  ;;  %v8101_v16 = vpack.c.bf16 %v493_v1, %v493_v1 }
  0x74   : > { %v774_v18 = vshrl.u32 %v6697_v10, 16  ;;  %v777_v19 = vshll.u32 %v6697_v10, 16  ;;  %v1168_v28 = vrot.slane %v1166_v3, 5  ;;  %v1047_v21 = vld [vmem:[#allocation2 + $0x24] sm:$0xf]  ;;  %v8111_v39 = vadd.f32 %v7904_v34, %v410_v11  ;;  %v7615_v9 = vld [vmem:[%s10433_s1 + $0x138] sm:$0xff]  }
  0x75   : > { %v1164_v26 = vrot.slane %v1163_v63, 4  ;;  %v1172_v30 = vrot.slane %v1170_v15, 4  ;;  %v1178_v31 = vrot.slane %v1176_v5, 5  ;;  %v1048_v32 = vld [vmem:[#allocation2 + $0x28] sm:$0xf]  ;;  %v1181_v37 = vshrl.u32 %v1047_v21, 16  ;;  %7238 = vmatpush3.bf16.msra.mxu0 %v7607_v56 }
  0x76   : > { %7186 = vmatpush3.bf16.msra.mxu1 %v7602_v55  ;;  %v1092_v35 = vld [vmem:[#allocation2 + $0x2c] sm:$0x1]  ;;  %v1184_v38 = vshll.u32 %v1047_v21, 16  ;;  %v8114_v40 = vadd.f32 %v7904_v34, %v411_v20  ;;  %v1190_v47 = vshll.u32 %v1048_v32, 16  ;;  %v1194_v48 = vshrl.u32 %v1048_v32, 16  ;;  %7239 = vmatprep.subr.bf16.mxu0 %v7609_v43  ;;  %v6888_v15 = vld [vmem:[%s7781_s22 + $0x20] sm:$0xff]  }
  0x77   : > { %7187 = vmatprep.subr.bf16.mxu1 %v7604_v4  ;;  %v1169_v45 = vsel %vm7908_vm7, %v1164_v26, %v1168_v28  ;;  %v1173_v46 = vor.u32 %v1172_v30, %v1168_v28  ;;  %v1183_v13 = vrot.slane %v1181_v37, 4  ;;  %v1200_v51 = vshll.u32 %v1092_v35, 16  ;;  %v1061_v52 = vld [vmem:[#allocation2 + $0x78] sm:$0xf]  ;;  %v7610_v5 = vld [vmem:[%s10433_s1] sm:$0xff]  }
  0x78   : > { %v1186_v50 = vrot.slane %v1184_v38, 5  ;;  %v8121_v53 = vrot.slane %v774_v18, 7  ;;  %v1192_v55 = vrot.slane %v1190_v47, 5  ;;  %v1196_v41 = vrot.slane %v1194_v48, 4  ;;  %v8146_v21 = vld [vmem:[%s7781_s22 + $0x58] sm:$0xff]  }
  0x79   : > { %v1174_v54 = vrot.slane %v1173_v46, 4  ;;  %v1349_v27 = vshrl.u32 %v1061_v52, 16  ;;  %v1202_v57 = vrot.slane %v1200_v51, 5  ;;  %v1352_v59 = vshll.u32 %v1061_v52, 16  ;;  %7240 = vmatpush3.bf16.msra.mxu0 %v7609_v43  ;;  %v8428_v23 = vld [vmem:[#allocation2 + $0x24] sm:$0xf] }
  0x7a   : > { %7188 = vmatpush3.bf16.msra.mxu1 %v7604_v4  ;;  %v1187_v56 = vor.u32 %v1186_v50, %v1183_v13  ;;  %v1062_v58 = vld [vmem:[#allocation2 + $0x7c] sm:$0xf]  ;;  %v1099_v42 = vld [vmem:[#allocation2 + $0x80] sm:$0x1]  ;;  %v779_v60 = vor.u32 %v777_v19, %v8121_v53  ;;  %v1197_v0 = vor.u32 %v1196_v41, %v1192_v55  ;;  %7241 = vmatprep.subr.bf16.mxu0 %v7611_v49  ;;  %v780_v3 = vrot.slane %v8121_v53, 4 }
  0x7b   : > { %7189 = vmatprep.subr.bf16.mxu1 %v7606_v24  ;;  %v1179_v62 = vsel %vm7908_vm7, %v1174_v54, %v1178_v31  ;;  %v1351_v1 = vrot.slane %v1349_v27, 4  ;;  %v1358_v2 = vshll.u32 %v1062_v58, 16  ;;  %v1354_v4 = vrot.slane %v1352_v59, 5  ;;  %v1003_v31 = vld [vmem:[#allocation2 + $0x8c] sm:$0x1]  ;;  %v8165_v27 = vld [vmem:[%s7781_s22 + $0x60] sm:$0xff]  }
  0x7c   : > { %v6267_v6 = vcombine.low %v1169_v45, %v1179_v62  ;;  %v1188_v7 = vrot.slane %v1187_v56, 4  ;;  %v1362_v8 = vshrl.u32 %v1062_v58, 16  ;;  %v1198_v10 = vrot.slane %v1197_v0, 4  ;;  %v7613_v45 = vld [vmem:[%s10433_s1 + $0xf8] sm:$0xff]   ;;  %v950_v59 = vld [vmem:[#allocation2 + $0x30] sm:$0xf] }
  0x7d   : > { %v1360_v11 = vrot.slane %v1358_v2, 5  ;;  %v1368_v63 = vshll.u32 %v1099_v42, 16  ;;  %v1355_v19 = vor.u32 %v1354_v4, %v1351_v1  ;;  %v782_v43 = vshrl.u32 %v8101_v16, 16  ;;  %7242 = vmatpush3.bf16.msra.mxu0 %v7611_v49  ;;  %v8690_v22 = vld [vmem:[#allocation2 + $0x28] sm:$0xf] }
  0x7e   : > { %7190 = vmatpush3.bf16.msra.mxu1 %v7606_v24  ;;  %7151 = vmatprep.mubr.bf16.mxu0 %v6267_v6  ;;  %v1193_v18 = vsel %vm7908_vm7, %v1188_v7, %v1192_v55  ;;  %v1364_v20 = vrot.slane %v1362_v8, 4  ;;  %v1203_v26 = vsel %vm7908_vm7, %v1198_v10, %v1202_v57  ;;  %v785_v30 = vshll.u32 %v8101_v16, 16  ;;  %v8173_v7 = vld [vmem:[%s10434_s2] ss:$0 sm:$0xff] }
  0x7f   : > { %7191 = vmatprep.subr.bf16.mxu1 %v7608_v44  ;;  %v1370_v28 = vrot.slane %v1368_v63, 5  ;;  %v1000_v24 = vsel %vm7950_vm14, %v779_v60, %v999_v61  ;;  %v6268_v32 = vcombine.low %v1193_v18, %v1203_v26  ;;  %v1356_v35 = vrot.slane %v1355_v19, 4  ;;  %7323 = vmatprep.subr.bf16.mxu0 %v7615_v9  ;;  %v954_v60 = vld [vmem:[#allocation2 + $0x38] sm:$0x1] }
  0x80   : > { %v1365_v37 = vor.u32 %v1364_v20, %v1360_v11  ;;  %v784_v38 = vrot.slane %v782_v43, 7  ;;  %1001 = vst [vmem:[#allocation2 + $0x84] sm:$0xf] %v1000_v24  ;;  %v478_v46 = vmax.f32 %v8111_v39, 0.0  ;;  %v479_v16 = vmax.f32 %v8114_v40, 0.0 }
  0x81   : > { %v6759_v47 = vunpack.c.l.bf16 %v6888_v15  ;;  %v6760_v48 = vunpack.c.h.bf16 %v6888_v15  ;;  %7152 = vmatmul.mubr.bf16.gmra.mxu0 %v6268_v32  ;;  %v1361_v49 = vsel %vm7908_vm7, %v1356_v35, %v1360_v11  ;;  %v6787_v41 = vunpack.c.l.bf16 %v8146_v21 }
  0x82   : > { %7192 = vmatpush3.bf16.msra.mxu1 %v7608_v44  ;;  %v1366_v13 = vrot.slane %v1365_v37, 4  ;;  %v787_v50 = vor.u32 %v785_v30, %v784_v38  ;;  %v789_v51 = vrot.slane %v784_v38, 4  ;;  %v6683_v52 = vpack.c.bf16 %v478_v46, %v478_v46  ;;  %v8187_v38 = vld [vmem:[%s10434_s2 + $0x1] ss:$0 sm:$0xff] }
  0x83   : > { %7193 = vmatprep.subr.bf16.mxu1 %v7610_v5  ;;  %v6684_v53 = vpack.c.bf16 %v479_v16, %v479_v16  ;;  %v412_v54 = vmul.f32 %v6759_v47, %v7894_v25  ;;  %v413_v39 = vmul.f32 %v6760_v48, %v7894_v25  ;;  %v6788_v0 = vunpack.c.h.bf16 %v8146_v21 }
  0x84   : > { %v1371_v40 = vsel %vm7908_vm7, %v1366_v13, %v1370_v28  ;;  %v788_v44 = vsel %vm7944_vm13, %v780_v3, %v787_v50  ;;  %v1004_v55 = vsel %vm7956_vm15, %v789_v51, %v1003_v31  ;;  %v655_v57 = vshrl.u32 %v6683_v52, 16  ;;  %v957_v51 = vld [vmem:[#allocation2 + $0x3c] sm:$0xf] }
  0x85   : > { %v6275_v56 = vcombine.low %v1361_v49, %v1371_v40  ;;  %1002 = vst [vmem:[#allocation2 + $0x88] sm:$0xf] %v788_v44  ;;  %1005 = vst [vmem:[#allocation2 + $0x8c] sm:$0x1] %v1004_v55  ;;  %v658_v58 = vshll.u32 %v6683_v52, 16  ;;  %v663_v42 = vshrl.u32 %v6684_v53, 16  ;;  %v448_v61 = vadd.f32 %v7904_v34, %v412_v54 }
  0x86   : > { %7194 = vmatpush3.bf16.msra.mxu1 %v7610_v5  ;;  %v666_v25 = vshll.u32 %v6684_v53, 16  ;;  %v449_v62 = vadd.f32 %v7904_v34, %v413_v39  ;;  %v657_v2 = vrot.slane %v655_v57, 7  ;;  %v426_v4 = vmul.f32 %v8173_v7, %v6787_v41  ;;  %v961_v44 = vld [vmem:[#allocation2 + $0x44] sm:$0x1] }
  0x87   : > { %7275 = vmatprep.subr.bf16.mxu1 %v7613_v45  ;;  %7167 = vmatprep.mubr.bf16.mxu1 %v6275_v56  ;;  %v1063_v1 = vld [vmem:[#allocation2 + $0x84] sm:$0xf]  ;;  %v665_v6 = vrot.slane %v663_v42, 7  ;;  %v6791_v8 = vunpack.c.l.bf16 %v8165_v27  ;;  %v480_v11 = vmax.f32 %v448_v61, 0.0  ;;  %v427_v24 = vmul.f32 %v8173_v7, %v6788_v0 }
  0x88   : > { %v1373_v9 = vshrl.u32 %v1063_v1, 16  ;;  %v1376_v10 = vshll.u32 %v1063_v1, 16  ;;  %v481_v34 = vmax.f32 %v449_v62, 0.0  ;;  %v660_v63 = vor.u32 %v658_v58, %v657_v2 }
  0x89   : > { %v661_v3 = vrot.slane %v657_v2, 4  ;;  %v668_v15 = vor.u32 %v666_v25, %v665_v6  ;;  %v670_v5 = vrot.slane %v665_v6, 4  ;;  %v6685_v20 = vpack.c.bf16 %v480_v11, %v480_v11 }
  0x8a   : > { %v1375_v18 = vrot.slane %v1373_v9, 4  ;;  %v1378_v19 = vrot.slane %v1376_v10, 5  ;;  %v6686_v43 = vpack.c.bf16 %v481_v34, %v481_v34  ;;  %v951_v28 = vsel %vm7950_vm14, %v660_v63, %v950_v59 }
  0x8b   : > { %v669_v26 = vsel %vm7944_vm13, %v661_v3, %v668_v15  ;;  %v955_v30 = vsel %vm7956_vm15, %v670_v5, %v954_v60  ;;  %952 = vst [vmem:[#allocation2 + $0x30] sm:$0xf] %v951_v28  ;;  %v672_v35 = vshrl.u32 %v6685_v20, 16  ;;  %v675_v37 = vshll.u32 %v6685_v20, 16  ;;  %v1006_v28 = vld [vmem:[#allocation2 + $0x90] sm:$0xf] }
  0x8c   : > { %v1064_v31 = vld [vmem:[#allocation2 + $0x88] sm:$0xf]  ;;  %v1100_v21 = vld [vmem:[#allocation2 + $0x8c] sm:$0x1]  ;;  %v1379_v32 = vor.u32 %v1378_v19, %v1375_v18  ;;  %953 = vst [vmem:[#allocation2 + $0x34] sm:$0xf] %v669_v26  ;;  %v462_v45 = vadd.f32 %v8187_v38, %v426_v4  ;;  %v463_v52 = vadd.f32 %v8187_v38, %v427_v24  ;;  %v6792_v0 = vunpack.c.h.bf16 %v8165_v27 }
  0x8d   : > { %956 = vst [vmem:[#allocation2 + $0x38] sm:$0x1] %v955_v30  ;;  %v1382_v46 = vshll.u32 %v1064_v31, 16  ;;  %v1386_v16 = vshrl.u32 %v1064_v31, 16  ;;  %v1392_v47 = vshll.u32 %v1100_v21, 16  ;;  %v680_v48 = vshrl.u32 %v6686_v43, 16 }
  0x8e   : > { %v1380_v49 = vrot.slane %v1379_v32, 4  ;;  %v674_v13 = vrot.slane %v672_v35, 7  ;;  %v683_v50 = vshll.u32 %v6686_v43, 16  ;;  %v494_v56 = vmax.f32 %v462_v45, 0.0  ;;  %v6889_v30 = vld [vmem:[%s7781_s22 + $0x28] sm:$0xff]  }
  0x8f   : > { %v1384_v53 = vrot.slane %v1382_v46, 5  ;;  %v1388_v54 = vrot.slane %v1386_v16, 4  ;;  %v1394_v39 = vrot.slane %v1392_v47, 5  ;;  %v682_v40 = vrot.slane %v680_v48, 7 }
  0x90   : > { %v677_v55 = vor.u32 %v675_v37, %v674_v13  ;;  %v678_v41 = vrot.slane %v674_v13, 4  ;;  %v495_v57 = vmax.f32 %v463_v52, 0.0  ;;  %v6699_v61 = vpack.c.bf16 %v494_v56, %v494_v56 }
  0x91   : > { %v1385_v58 = vsel %vm7908_vm7, %v1380_v49, %v1384_v53  ;;  %v1389_v42 = vor.u32 %v1388_v54, %v1384_v53  ;;  %v685_v25 = vor.u32 %v683_v50, %v682_v40  ;;  %v687_v59 = vrot.slane %v682_v40, 4 }
  0x92   : > { %v958_v60 = vsel %vm7950_vm14, %v677_v55, %v957_v51  ;;  %v6700_v62 = vpack.c.bf16 %v495_v57, %v495_v57  ;;  %v8196_v2 = vld [vmem:[#allocation2 + $0x30] sm:$0xf]  ;;  %v428_v10 = vmul.f32 %v8173_v7, %v6791_v8  ;;  %v791_v18 = vshrl.u32 %v6699_v61, 16 }
  0x93   : > { %v1390_v1 = vrot.slane %v1389_v42, 4  ;;  %v8198_v6 = vld [vmem:[#allocation2 + $0x34] sm:$0xf]  ;;  %v686_v4 = vsel %vm7944_vm13, %v678_v41, %v685_v25  ;;  %959 = vst [vmem:[#allocation2 + $0x3c] sm:$0xf] %v958_v60  ;;  %v962_v9 = vsel %vm7956_vm15, %v687_v59, %v961_v44  ;;  %v1205_v34 = vshrl.u32 %v8196_v2, 16 }
  0x94   : > { %v8205_v11 = vld [vmem:[#allocation2 + $0x38] sm:$0x1]  ;;  %v1208_v27 = vshll.u32 %v8196_v2, 16  ;;  %v1214_v63 = vshll.u32 %v8198_v6, 16  ;;  %v1218_v3 = vshrl.u32 %v8198_v6, 16  ;;  %v794_v8 = vshll.u32 %v6699_v61, 16 }
  0x95   : > { %960 = vst [vmem:[#allocation2 + $0x40] sm:$0xf] %v686_v4  ;;  %963 = vst [vmem:[#allocation2 + $0x44] sm:$0x1] %v962_v9  ;;  %v1395_v15 = vsel %vm7908_vm7, %v1390_v1, %v1394_v39  ;;  %v1224_v5 = vshll.u32 %v8205_v11, 16  ;;  %v1207_v20 = vrot.slane %v1205_v34, 4  ;;  %v429_v45 = vmul.f32 %v8173_v7, %v6792_v0 }
  0x96   : > { %v6276_v19 = vcombine.low %v1385_v58, %v1395_v15  ;;  %v1210_v43 = vrot.slane %v1208_v27, 5  ;;  %v1216_v26 = vrot.slane %v1214_v63, 5  ;;  %v1220_v24 = vrot.slane %v1218_v3, 4  ;;  %v1010_v9 = vld [vmem:[#allocation2 + $0x98] sm:$0x1] }
  0x97   : > { %v1226_v31 = vrot.slane %v1224_v5, 5  ;;  %v793_v21 = vrot.slane %v791_v18, 7  ;;  %v799_v32 = vshrl.u32 %v6700_v62, 16  ;;  %v802_v37 = vshll.u32 %v6700_v62, 16 }
  0x98   : > { %7168 = vmatmul.mubr.bf16.gmra.mxu1 %v6276_v19  ;;  %v1211_v35 = vor.u32 %v1210_v43, %v1207_v20  ;;  %v464_v46 = vadd.f32 %v8187_v38, %v428_v10  ;;  %v1221_v16 = vor.u32 %v1220_v24, %v1216_v26  ;;  %v465_v51 = vadd.f32 %v8187_v38, %v429_v45 }
  0x99   : > { %v796_v47 = vor.u32 %v794_v8, %v793_v21  ;;  %v797_v48 = vrot.slane %v793_v21, 4  ;;  %v801_v49 = vrot.slane %v799_v32, 7  ;;  %v6763_v53 = vunpack.c.l.bf16 %v6889_v30  ;;  %v6890_v8 = vld [vmem:[%s7781_s22 + $0x30] sm:$0xff]  }
  0x9a   : > { %v1212_v13 = vrot.slane %v1211_v35, 4  ;;  %v8217_v50 = vld [vmem:[#allocation2 + $0x3c] sm:$0xf]  ;;  %v496_v52 = vmax.f32 %v464_v46, 0.0  ;;  %v1222_v54 = vrot.slane %v1221_v16, 4  ;;  %v497_v27 = vmax.f32 %v465_v51, 0.0 }
  0x9b   : > { %v1229_v44 = vshrl.u32 %v8217_v50, 16  ;;  %v804_v55 = vor.u32 %v802_v37, %v801_v49  ;;  %v1007_v41 = vsel %vm7950_vm14, %v796_v47, %v1006_v28  ;;  %v1232_v57 = vshll.u32 %v8217_v50, 16 }
  0x9c   : > { %v8220_v39 = vld [vmem:[#allocation2 + $0x40] sm:$0xf]  ;;  %v8222_v40 = vld [vmem:[#allocation2 + $0x44] sm:$0x1]  ;;  %v1217_v56 = vsel %vm7908_vm7, %v1212_v13, %v1216_v26  ;;  %1008 = vst [vmem:[#allocation2 + $0x90] sm:$0xf] %v1007_v41  ;;  %v1227_v25 = vsel %vm7908_vm7, %v1222_v54, %v1226_v31  ;;  %v6701_v63 = vpack.c.bf16 %v496_v52, %v496_v52  ;;  %v6764_v5 = vunpack.c.h.bf16 %v6889_v30 }
  0x9d   : > { %v1238_v58 = vshll.u32 %v8220_v39, 16  ;;  %v1242_v42 = vshrl.u32 %v8220_v39, 16  ;;  %v1231_v59 = vrot.slane %v1229_v44, 4  ;;  %v1248_v60 = vshll.u32 %v8222_v40, 16 }
  0x9e   : > { %v805_v61 = vsel %vm7944_vm13, %v797_v48, %v804_v55  ;;  %v6269_v62 = vcombine.low %v1217_v56, %v1227_v25  ;;  %v1234_v0 = vrot.slane %v1232_v57, 5  ;;  %v806_v34 = vrot.slane %v801_v49, 4  ;;  %v1013_v49 = vld [vmem:[#allocation2 + $0x9c] sm:$0xf]  ;;  %v1017_v57 = vld [vmem:[#allocation2 + $0xa4] sm:$0x1] }
  0x9f   : > { %v1240_v1 = vrot.slane %v1238_v58, 5  ;;  %v1244_v4 = vrot.slane %v1242_v42, 4  ;;  %1009 = vst [vmem:[#allocation2 + $0x94] sm:$0xf] %v805_v61  ;;  %v1250_v10 = vrot.slane %v1248_v60, 5  ;;  %v414_v18 = vmul.f32 %v8173_v7, %v6763_v53 }
  0xa0   : > { %7155 = vmatprep.mubr.bf16.mxu0 %v6269_v62  ;;  %v1235_v3 = vor.u32 %v1234_v0, %v1231_v59  ;;  %v1011_v19 = vsel %vm7956_vm15, %v806_v34, %v1010_v9  ;;  %v6702_v20 = vpack.c.bf16 %v497_v27, %v497_v27  ;;  %v808_v43 = vshrl.u32 %v6701_v63, 16 }
  0xa1   : > { %v1245_v15 = vor.u32 %v1244_v4, %v1240_v1  ;;  %v811_v26 = vshll.u32 %v6701_v63, 16  ;;  %1012 = vst [vmem:[#allocation2 + $0x98] sm:$0x1] %v1011_v19  ;;  %v415_v31 = vmul.f32 %v8173_v7, %v6764_v5  ;;  %v450_v21 = vadd.f32 %v8187_v38, %v414_v18 }
  0xa2   : > { %v1236_v28 = vrot.slane %v1235_v3, 4  ;;  %v810_v35 = vrot.slane %v808_v43, 7  ;;  %v816_v30 = vshrl.u32 %v6702_v20, 16  ;;  %v819_v37 = vshll.u32 %v6702_v20, 16 }
  0xa3   : > { %v1246_v24 = vrot.slane %v1245_v15, 4  ;;  %v8243_v32 = vld [vmem:[#allocation2 + $0x90] sm:$0xf]  ;;  %v6767_v45 = vunpack.c.l.bf16 %v6890_v8  ;;  %v451_v59 = vadd.f32 %v8187_v38, %v415_v31  ;;  %v482_v0 = vmax.f32 %v450_v21, 0.0 }
  0xa4   : > { %v1241_v46 = vsel %vm7908_vm7, %v1236_v28, %v1240_v1  ;;  %v1397_v47 = vshrl.u32 %v8243_v32, 16  ;;  %v1400_v48 = vshll.u32 %v8243_v32, 16  ;;  %v813_v52 = vor.u32 %v811_v26, %v810_v35  ;;  %v8259_v1 = vld [vmem:[%s7781_s22 + $0x68] sm:$0xff]  }
  0xa5   : > { %v1251_v16 = vsel %vm7908_vm7, %v1246_v24, %v1250_v10  ;;  %v814_v53 = vrot.slane %v810_v35, 4  ;;  %v818_v54 = vrot.slane %v816_v30, 7  ;;  %v483_v34 = vmax.f32 %v451_v59, 0.0 }
  0xa6   : > { %v6270_v13 = vcombine.low %v1241_v46, %v1251_v16  ;;  %v8251_v51 = vld [vmem:[#allocation2 + $0x94] sm:$0xf]  ;;  %v1399_v44 = vrot.slane %v1397_v47, 4  ;;  %v1402_v55 = vrot.slane %v1400_v48, 5  ;;  %v1014_v25 = vsel %vm7950_vm14, %v813_v52, %v1013_v49  ;;  %v968_v52 = vld [vmem:[#allocation2 + $0x50] sm:$0x1] }
  0xa7   : > { %v1406_v41 = vshll.u32 %v8251_v51, 16  ;;  %v1410_v56 = vshrl.u32 %v8251_v51, 16  ;;  %v821_v58 = vor.u32 %v819_v37, %v818_v54  ;;  %v823_v42 = vrot.slane %v818_v54, 4  ;;  %1015 = vst [vmem:[#allocation2 + $0x9c] sm:$0xf] %v1014_v25 }
  0xa8   : > { %7156 = vmatmul.mubr.bf16.gmra.mxu0 %v6270_v13  ;;  %v1403_v60 = vor.u32 %v1402_v55, %v1399_v44  ;;  %v8261_v4 = vld [vmem:[#allocation2 + $0x98] sm:$0x1]  ;;  %v6768_v27 = vunpack.c.h.bf16 %v6890_v8  ;;  %v6687_v5 = vpack.c.bf16 %v482_v0, %v482_v0  ;;  %v6688_v18 = vpack.c.bf16 %v483_v34, %v483_v34 }
  0xa9   : > { %v1408_v61 = vrot.slane %v1406_v41, 5  ;;  %v1412_v62 = vrot.slane %v1410_v56, 4  ;;  %v822_v9 = vsel %vm7944_vm13, %v814_v53, %v821_v58  ;;  %v1018_v10 = vsel %vm7956_vm15, %v823_v42, %v1017_v57 }
  0xaa   : > { %v1404_v63 = vrot.slane %v1403_v60, 4  ;;  %v1416_v15 = vshll.u32 %v8261_v4, 16  ;;  %1016 = vst [vmem:[#allocation2 + $0xa0] sm:$0xf] %v822_v9  ;;  %1019 = vst [vmem:[#allocation2 + $0xa4] sm:$0x1] %v1018_v10  ;;  %v416_v19 = vmul.f32 %v8173_v7, %v6767_v45  ;;  %v417_v20 = vmul.f32 %v8173_v7, %v6768_v27 }
  0xab   : > { %v1413_v3 = vor.u32 %v1412_v62, %v1408_v61  ;;  %v6795_v43 = vunpack.c.l.bf16 %v8259_v1  ;;  %v689_v8 = vshrl.u32 %v6687_v5, 16  ;;  %v692_v31 = vshll.u32 %v6687_v5, 16  ;;  %v964_v45 = vld [vmem:[#allocation2 + $0x48] sm:$0xf] }
  0xac   : > { %v1409_v26 = vsel %vm7908_vm7, %v1404_v63, %v1408_v61  ;;  %v1418_v24 = vrot.slane %v1416_v15, 5  ;;  %v697_v21 = vshrl.u32 %v6688_v18, 16  ;;  %v700_v35 = vshll.u32 %v6688_v18, 16  ;;  %v6898_v18 = vld [vmem:[%s7781_s22 + $0x70] sm:$0xff]  }
  0xad   : > { %v1414_v28 = vrot.slane %v1413_v3, 4  ;;  %v452_v30 = vadd.f32 %v8187_v38, %v416_v19  ;;  %v691_v46 = vrot.slane %v689_v8, 7  ;;  %v453_v16 = vadd.f32 %v8187_v38, %v417_v20 }
  0xae   : > { %v6796_v47 = vunpack.c.h.bf16 %v8259_v1  ;;  %v8278_v49 = vld [vmem:[#allocation2 + $0x9c] sm:$0xf]  ;;  %v699_v13 = vrot.slane %v697_v21, 7  ;;  %v430_v54 = vmul.f32 %v8173_v7, %v6795_v43 }
  0xaf   : > { %v1419_v37 = vsel %vm7908_vm7, %v1414_v28, %v1418_v24  ;;  %v484_v53 = vmax.f32 %v452_v30, 0.0  ;;  %v1421_v44 = vshrl.u32 %v8278_v49, 16  ;;  %v1424_v55 = vshll.u32 %v8278_v49, 16 }
  0xb0   : > { %v6277_v48 = vcombine.low %v1409_v26, %v1419_v37  ;;  %v694_v41 = vor.u32 %v692_v31, %v691_v46  ;;  %v695_v56 = vrot.slane %v691_v46, 4  ;;  %v702_v42 = vor.u32 %v700_v35, %v699_v13  ;;  %v971_v35 = vld [vmem:[#allocation2 + $0x54] sm:$0xf] }
  0xb1   : > { %v8283_v57 = vld [vmem:[#allocation2 + $0xa0] sm:$0xf]  ;;  %v8285_v58 = vld [vmem:[#allocation2 + $0xa4] sm:$0x1]  ;;  %v704_v25 = vrot.slane %v699_v13, 4  ;;  %v485_v59 = vmax.f32 %v453_v16, 0.0  ;;  %v6689_v60 = vpack.c.bf16 %v484_v53, %v484_v53  ;;  %v431_v26 = vmul.f32 %v8173_v7, %v6796_v47 }
  0xb2   : > { %7171 = vmatprep.mubr.bf16.mxu1 %v6277_v48  ;;  %v1423_v61 = vrot.slane %v1421_v44, 4  ;;  %v1426_v62 = vrot.slane %v1424_v55, 5  ;;  %v1430_v0 = vshll.u32 %v8283_v57, 16  ;;  %v1434_v1 = vshrl.u32 %v8283_v57, 16  ;;  %v975_v13 = vld [vmem:[#allocation2 + $0x5c] sm:$0x1] }
  0xb3   : > { %v1440_v9 = vshll.u32 %v8285_v58, 16  ;;  %v703_v10 = vsel %vm7944_vm13, %v695_v56, %v702_v42  ;;  %v965_v34 = vsel %vm7950_vm14, %v694_v41, %v964_v45  ;;  %v969_v27 = vsel %vm7956_vm15, %v704_v25, %v968_v52 }
  0xb4   : > { %v1427_v63 = vor.u32 %v1426_v62, %v1423_v61  ;;  %v1432_v3 = vrot.slane %v1430_v0, 5  ;;  %v1436_v15 = vrot.slane %v1434_v1, 4  ;;  %966 = vst [vmem:[#allocation2 + $0x48] sm:$0xf] %v965_v34  ;;  %967 = vst [vmem:[#allocation2 + $0x4c] sm:$0xf] %v703_v10  ;;  %v6690_v5 = vpack.c.bf16 %v485_v59, %v485_v59 }
  0xb5   : > { %970 = vst [vmem:[#allocation2 + $0x50] sm:$0x1] %v969_v27  ;;  %v1442_v19 = vrot.slane %v1440_v9, 5  ;;  %v706_v20 = vshrl.u32 %v6689_v60, 16  ;;  %v709_v43 = vshll.u32 %v6689_v60, 16  ;;  %v466_v30 = vadd.f32 %v8187_v38, %v430_v54 }
  0xb6   : > { %v1428_v28 = vrot.slane %v1427_v63, 4  ;;  %v1437_v24 = vor.u32 %v1436_v15, %v1432_v3  ;;  %v714_v8 = vshrl.u32 %v6690_v5, 16  ;;  %v717_v31 = vshll.u32 %v6690_v5, 16 }
  0xb7   : > { %v708_v21 = vrot.slane %v706_v20, 7  ;;  %v467_v37 = vadd.f32 %v8187_v38, %v431_v26  ;;  %v6799_v46 = vunpack.c.l.bf16 %v6898_v18  ;;  %v6800_v52 = vunpack.c.h.bf16 %v6898_v18 }
  0xb8   : > { %v1433_v45 = vsel %vm7908_vm7, %v1428_v28, %v1432_v3  ;;  %v1438_v16 = vrot.slane %v1437_v24, 4  ;;  %v716_v48 = vrot.slane %v714_v8, 7  ;;  %v498_v44 = vmax.f32 %v466_v30, 0.0  ;;  %v1020_v30 = vld [vmem:[#allocation2 + $0xa8] sm:$0xf] }
  0xb9   : > { %v711_v53 = vor.u32 %v709_v43, %v708_v21  ;;  %v712_v47 = vrot.slane %v708_v21, 4  ;;  %v499_v55 = vmax.f32 %v467_v37, 0.0  ;;  %v432_v54 = vmul.f32 %v8173_v7, %v6799_v46 }
  0xba   : > { %v1443_v41 = vsel %vm7908_vm7, %v1438_v16, %v1442_v19  ;;  %v719_v56 = vor.u32 %v717_v31, %v716_v48  ;;  %v721_v42 = vrot.slane %v716_v48, 4  ;;  %v6703_v0 = vpack.c.bf16 %v498_v44, %v498_v44 }
  0xbb   : > { %v6278_v25 = vcombine.low %v1433_v45, %v1443_v41  ;;  %v8305_v59 = vld [vmem:[#allocation2 + $0x48] sm:$0xf]  ;;  %v8307_v60 = vld [vmem:[#allocation2 + $0x4c] sm:$0xf]  ;;  %v972_v62 = vsel %vm7950_vm14, %v711_v53, %v971_v35  ;;  %v6704_v1 = vpack.c.bf16 %v499_v55, %v499_v55  ;;  %v433_v37 = vmul.f32 %v8173_v7, %v6800_v52  ;;  %v1024_v55 = vld [vmem:[#allocation2 + $0xb0] sm:$0x1] }
  0xbc   : > { %v8309_v61 = vld [vmem:[#allocation2 + $0x50] sm:$0x1]  ;;  %v1253_v9 = vshrl.u32 %v8305_v59, 16  ;;  %v1256_v10 = vshll.u32 %v8305_v59, 16  ;;  %v1262_v34 = vshll.u32 %v8307_v60, 16  ;;  %v1266_v27 = vshrl.u32 %v8307_v60, 16 }
  0xbd   : > { %973 = vst [vmem:[#allocation2 + $0x54] sm:$0xf] %v972_v62  ;;  %7172 = vmatmul.mubr.bf16.gmra.mxu1 %v6278_v25  ;;  %v1272_v63 = vshll.u32 %v8309_v61, 16  ;;  %v720_v3 = vsel %vm7944_vm13, %v712_v47, %v719_v56  ;;  %v976_v15 = vsel %vm7956_vm15, %v721_v42, %v975_v13  ;;  %v825_v5 = vshrl.u32 %v6703_v0, 16  ;;  %v8324_v13 = vld [vmem:[#allocation2 + $0x68] sm:$0x1] }
  0xbe   : > { %v1255_v18 = vrot.slane %v1253_v9, 4  ;;  %v1258_v19 = vrot.slane %v1256_v10, 5  ;;  %v1264_v20 = vrot.slane %v1262_v34, 5  ;;  %v1268_v43 = vrot.slane %v1266_v27, 4  ;;  %974 = vst [vmem:[#allocation2 + $0x58] sm:$0xf] %v720_v3 }
  0xbf   : > { %977 = vst [vmem:[#allocation2 + $0x5c] sm:$0x1] %v976_v15  ;;  %v1274_v26 = vrot.slane %v1272_v63, 5  ;;  %v827_v28 = vrot.slane %v825_v5, 7  ;;  %v828_v24 = vshll.u32 %v6703_v0, 16  ;;  %v833_v8 = vshrl.u32 %v6704_v1, 16 }
  0xc0   : > { %v1259_v31 = vor.u32 %v1258_v19, %v1255_v18  ;;  %v1269_v21 = vor.u32 %v1268_v43, %v1264_v20  ;;  %v836_v35 = vshll.u32 %v6704_v1, 16  ;;  %v468_v48 = vadd.f32 %v8187_v38, %v432_v54 }
  0xc1   : > { %v830_v46 = vor.u32 %v828_v24, %v827_v28  ;;  %v831_v45 = vrot.slane %v827_v28, 4  ;;  %v835_v16 = vrot.slane %v833_v8, 7  ;;  %v469_v41 = vadd.f32 %v8187_v38, %v433_v37  ;;  %v8338_v38 = vld [vmem:[#allocation2] sm:$0xe] }
  0xc2   : > { %v1260_v47 = vrot.slane %v1259_v31, 4  ;;  %v1270_v44 = vrot.slane %v1269_v21, 4  ;;  %v500_v52 = vmax.f32 %v468_v48, 0.0  ;;  %v6313_v31 = vrot.slane %v8338_v38, 9  ;;  %v8352_v21 = vld [vmem:[#allocation2 + $0xc] sm:$0xe] }
  0xc3   : > { %v838_v42 = vor.u32 %v836_v35, %v835_v16  ;;  %v840_v25 = vrot.slane %v835_v16, 4  ;;  %v1021_v7 = vsel %vm7950_vm14, %v830_v46, %v1020_v30  ;;  %v501_v3 = vmax.f32 %v469_v41, 0.0 }
  0xc4   : > { %v8328_v56 = vld [vmem:[#allocation2 + $0x54] sm:$0xf]  ;;  %v1265_v54 = vsel %vm7908_vm7, %v1260_v47, %v1264_v20  ;;  %v1275_v62 = vsel %vm7908_vm7, %v1270_v44, %v1274_v26  ;;  %1022 = vst [vmem:[#allocation2 + $0xa8] sm:$0xf] %v1021_v7  ;;  %v6705_v43 = vpack.c.bf16 %v500_v52, %v500_v52  ;;  %v8354_v47 = vld [vmem:[#allocation2 + $0x4] sm:$0xf] }
  0xc5   : > { %v1277_v0 = vshrl.u32 %v8328_v56, 16  ;;  %v1280_v1 = vshll.u32 %v8328_v56, 16  ;;  %v6271_v9 = vcombine.low %v1265_v54, %v1275_v62  ;;  %v8340_v10 = vld [vmem:[#allocation2 + $0x58] sm:$0xf]  ;;  %v839_v27 = vsel %vm7944_vm13, %v831_v45, %v838_v42  ;;  %v8359_v7 = vld [vmem:[#allocation2] sm:$0xf] }
  0xc6   : > { %v8342_v34 = vld [vmem:[#allocation2 + $0x5c] sm:$0x1]  ;;  %v1025_v63 = vsel %vm7956_vm15, %v840_v25, %v1024_v55  ;;  %v1286_v18 = vshll.u32 %v8340_v10, 16  ;;  %v1290_v19 = vshrl.u32 %v8340_v10, 16  ;;  %1023 = vst [vmem:[#allocation2 + $0xac] sm:$0xf] %v839_v27  ;;  %v6706_v26 = vpack.c.bf16 %v501_v3, %v501_v3 }
  0xc7   : > { %v1279_v15 = vrot.slane %v1277_v0, 4  ;;  %v1282_v5 = vrot.slane %v1280_v1, 5  ;;  %1026 = vst [vmem:[#allocation2 + $0xb0] sm:$0x1] %v1025_v63  ;;  %7159 = vmatprep.mubr.bf16.mxu0 %v6271_v9  ;;  %v1296_v20 = vshll.u32 %v8342_v34, 16  ;;  %v842_v30 = vshrl.u32 %v6705_v43, 16 }
  0xc8   : > { %v1288_v24 = vrot.slane %v1286_v18, 5  ;;  %v1292_v8 = vrot.slane %v1290_v19, 4  ;;  %v845_v37 = vshll.u32 %v6705_v43, 16  ;;  %v850_v46 = vshrl.u32 %v6706_v26, 16  ;;  %v1027_v25 = vld [vmem:[#allocation2 + $0xb4] sm:$0xf] }
  0xc9   : > { %v1283_v28 = vor.u32 %v1282_v5, %v1279_v15  ;;  %v1298_v35 = vrot.slane %v1296_v20, 5  ;;  %v853_v48 = vshll.u32 %v6706_v26, 16  ;;  %v2140_v44 = vrot.slane %v8354_v47, 5  ;;  %v1031_v9 = vld [vmem:[#allocation2 + $0xbc] sm:$0x1] }
  0xca   : > { %v1293_v16 = vor.u32 %v1292_v8, %v1288_v24  ;;  %v844_v41 = vrot.slane %v842_v30, 7  ;;  %v852_v42 = vrot.slane %v850_v46, 7  ;;  %v6289_v52 = vcombine.low %v8359_v7, %v8354_v47  ;;  %v8510_v47 = vld [vmem:[#allocation2 + $0x70] sm:$0xf] }
  0xcb   : > { %v1284_v45 = vrot.slane %v1283_v28, 4  ;;  %v8357_v55 = vld [vmem:[#allocation2 + $0xa8] sm:$0xf]  ;;  %v6314_v54 = vrot.slane %v8352_v21, 9  ;;  %v10463_v28 = vmov 0  ;;  %v2203_v7 = vrot.slane %v8510_v47, 5 }
  0xcc   : > { %v1294_v0 = vrot.slane %v1293_v16, 4  ;;  %v1445_v1 = vshrl.u32 %v8357_v55, 16  ;;  %v1448_v38 = vshll.u32 %v8357_v55, 16  ;;  %v847_v3 = vor.u32 %v845_v37, %v844_v41  ;;  %v2089_v37 = vld [vmem:[#allocation2 + $0x18] sm:$0xe] }
  0xcd   : > { %v1289_v62 = vsel %vm7908_vm7, %v1284_v45, %v1288_v24  ;;  %v8368_v27 = vld [vmem:[#allocation2 + $0xac] sm:$0xf]  ;;  %v848_v15 = vrot.slane %v844_v41, 4  ;;  %v855_v5 = vor.u32 %v853_v48, %v852_v42  ;;  %v857_v18 = vrot.slane %v852_v42, 4 }
  0xce   : > { %v8370_v63 = vld [vmem:[#allocation2 + $0xb0] sm:$0x1]  ;;  %v1299_v19 = vsel %vm7908_vm7, %v1294_v0, %v1298_v35  ;;  %v1447_v20 = vrot.slane %v1445_v1, 4  ;;  %v1450_v43 = vrot.slane %v1448_v38, 5  ;;  %v1454_v26 = vshll.u32 %v8368_v27, 16 }
  0xcf   : > { %v10464_v28 = vsel %vm8377_vm2, 4294967295, %v10463_v28  ;;  %v6272_v24 = vcombine.low %v1289_v62, %v1299_v19  ;;  %v1458_v8 = vshrl.u32 %v8368_v27, 16  ;;  %v1464_v21 = vshll.u32 %v8370_v63, 16  ;;  %v8391_v1 = vld [vmem:[#allocation2 + $0x10] sm:$0xf] }
  0xd0   : > { %10465 = vst [vmem:[#allocation6_spill] sm:$0xff] %v10464_v28  ;;  %v856_v30 = vsel %vm7944_vm13, %v848_v15, %v855_v5  ;;  %v1451_v35 = vor.u32 %v1450_v43, %v1447_v20  ;;  %v1456_v46 = vrot.slane %v1454_v26, 5  ;;  %v1028_v45 = vsel %vm7950_vm14, %v847_v3, %v1027_v25  ;;  %v8394_v15 = vld [vmem:[#allocation2 + $0xc] sm:$0xf]  ;;  %v2090_v20 = vld [vmem:[#allocation2 + $0x24] sm:$0xe] }
  0xd1   : > { %1030 = vst [vmem:[#allocation2 + $0xb8] sm:$0xf] %v856_v30  ;;  %v1032_v16 = vsel %vm7956_vm15, %v857_v18, %v1031_v9  ;;  %7160 = vmatmul.mubr.bf16.gmra.mxu0 %v6272_v24  ;;  %v1460_v48 = vrot.slane %v1458_v8, 4  ;;  %v1466_v41 = vrot.slane %v1464_v21, 5  ;;  %1029 = vst [vmem:[#allocation2 + $0xb4] sm:$0xf] %v1028_v45  ;;  %v2141_v42 = vsel %vm8377_vm2, %v6313_v31, %v2140_v44 }
  0xd2   : > { %1033 = vst [vmem:[#allocation2 + $0xbc] sm:$0x1] %v1032_v16  ;;  %v2142_v62 = vrot.slane %v2140_v44, 4  ;;  %v1452_v0 = vrot.slane %v1451_v35, 4  ;;  %v2147_v38 = vrot.slane %v8391_v1, 5  ;;  %v6315_v9 = vrot.slane %v2089_v37, 9 }
  0xd3   : > { %v1461_v3 = vor.u32 %v1460_v48, %v1456_v46  ;;  %v8402_v18 = vld [vmem:[#allocation2 + $0x1c] sm:$0xf]  ;;  %v7716_v44 = vld [vmem:[#allocation2 + $0x20] sm:$0x1]  ;;  %v8411_v30 = vld [vmem:[#allocation2 + $0x18] sm:$0xf] }
  0xd4   : > { %v2144_v5 = vsel %vm8377_vm2, %v2142_v62, %v2143_v12  ;;  %v2154_v31 = vrot.slane %v8402_v18, 5  ;;  %v2157_v19 = vrot.slane %v7716_v44, 5  ;;  %v1457_v43 = vsel %vm7908_vm7, %v1452_v0, %v1456_v46  ;;  %v8419_v45 = vld [vmem:[#allocation2 + $0x28] sm:$0xf]  ;;  %v7719_v16 = vld [vmem:[#allocation2 + $0x2c] sm:$0x1] }
  0xd5   : > { %v6345_v26 = vcombine.low %v2141_v42, %v2144_v5  ;;  %v2148_v24 = vsel %vm8377_vm2, %v6314_v54, %v2147_v38  ;;  %v2149_v8 = vrot.slane %v2147_v38, 4  ;;  %v1462_v21 = vrot.slane %v1461_v3, 4  ;;  %v2091_v3 = vld [vmem:[#allocation2 + $0x30] sm:$0xe] }
  0xd6   : > { %v2155_v17 = vsel %vm8377_vm2, %v6315_v9, %v2154_v31  ;;  %v2156_v12 = vrot.slane %v2154_v31, 4  ;;  %v6316_v46 = vrot.slane %v2090_v20, 9  ;;  %v2161_v54 = vrot.slane %v8419_v45, 5  ;;  %v7619_v9 = vld [vmem:[%s10433_s1 + $0x130] sm:$0xff]  }
  0xd7   : > { %7243 = vmatprep.mubr.bf16.mxu0 %v6345_v26  ;;  %v2151_v35 = vsel %vm8377_vm2, %v2149_v8, %v2150_v33  ;;  %v2164_v48 = vrot.slane %v7719_v16, 5  ;;  %v1467_v42 = vsel %vm7908_vm7, %v1462_v21, %v1466_v41  ;;  %v2093_v33 = vld [vmem:[#allocation2 + $0x48] sm:$0xe] }
  0xd8   : > { %v8424_v62 = vld [vmem:[#allocation2 + $0xb8] sm:$0xf]  ;;  %v6346_v0 = vcombine.low %v2148_v24, %v2151_v35  ;;  %v2158_v38 = vsel %vm8377_vm2, %v2156_v12, %v2157_v19  ;;  %v6279_v5 = vcombine.low %v1457_v43, %v1467_v42  ;;  %v8435_v31 = vld [vmem:[#allocation2 + $0xb4] sm:$0xf]  ;;  %v2162_v21 = vsel %vm8377_vm2, %v6316_v46, %v2161_v54  ;;  %v2092_v43 = vld [vmem:[#allocation2 + $0x3c] sm:$0xe] }
  0xd9   : > { %v8437_v41 = vld [vmem:[#allocation2 + $0xbc] sm:$0x1]  ;;  %v1478_v44 = vshll.u32 %v8424_v62, 16  ;;  %v1482_v20 = vshrl.u32 %v8424_v62, 16  ;;  %v6347_v19 = vcombine.low %v2155_v17, %v2158_v38  ;;  %v1469_v26 = vshrl.u32 %v8435_v31, 16  ;;  %v7623_v12 = vld [vmem:[%s10433_s1 + $0x128] sm:$0xff]  }
  0xda   : > { %v1472_v24 = vshll.u32 %v8435_v31, 16  ;;  %v1488_v8 = vshll.u32 %v8437_v41, 16  ;;  %7244 = vmatmul.mubr.bf16.vlgmr.msra.gmra.mxu0 %v6346_v0  ;;  %7175 = vmatprep.mubr.bf16.mxu1 %v6279_v5  ;;  %v7721_v17 = vld [vmem:[%s10433_s1 + $0x138] sm:$0xff]   ;;  %v2163_v42 = vrot.slane %v2161_v54, 4  ;;  %v6317_v38 = vrot.slane %v2091_v3, 9 }
  0xdb   : > { %v1480_v35 = vrot.slane %v1478_v44, 5  ;;  %v1484_v16 = vrot.slane %v1482_v20, 4  ;;  %7324 = vmatpush3.bf16.msra.mxu0 %v7721_v17  ;;  %v1471_v0 = vrot.slane %v1469_v26, 4  ;;  %7247 = vmatprep.mubr.bf16.mxu0 %v6347_v19  ;;  %v2168_v46 = vrot.slane %v8198_v6, 5 }
  0xdc   : > { %v1474_v37 = vrot.slane %v1472_v24, 5  ;;  %v1490_v25 = vrot.slane %v1488_v8, 5  ;;  %7325 = vmatprep.subr.bf16.mxu0 %v7619_v9  ;;  %v2165_v5 = vsel %vm8377_vm2, %v2163_v42, %v2164_v48  ;;  %v2171_v44 = vrot.slane %v8205_v11, 5  ;;  %v7627_v11 = vld [vmem:[%s10433_s1 + $0x120] sm:$0xff]  }
  0xdd   : > { %v1485_v53 = vor.u32 %v1484_v16, %v1480_v35  ;;  %v6348_v54 = vcombine.low %v2162_v21, %v2165_v5  ;;  %v2169_v3 = vsel %vm8377_vm2, %v6317_v38, %v2168_v46  ;;  %v2170_v26 = vrot.slane %v2168_v46, 4 }
  0xde   : > { %v1475_v17 = vor.u32 %v1474_v37, %v1471_v0  ;;  %v6318_v19 = vrot.slane %v2092_v43, 9  ;;  %v2175_v8 = vrot.slane %v8220_v39, 5  ;;  %v2178_v16 = vrot.slane %v8222_v40, 5 }
  0xdf   : > { %v1486_v24 = vrot.slane %v1485_v53, 4  ;;  %7326 = vmatpush3.bf16.msra.mxu0 %v7619_v9  ;;  %v2172_v37 = vsel %vm8377_vm2, %v2170_v26, %v2171_v44  ;;  %v6319_v42 = vrot.slane %v2093_v33, 9  ;;  %v2094_v53 = vld [vmem:[#allocation2 + $0x54] sm:$0xe]  ;;  %v2095_v9 = vld [vmem:[#allocation2 + $0x60] sm:$0xe] }
  0xe0   : > { %v1476_v48 = vrot.slane %v1475_v17, 4  ;;  %7327 = vmatprep.subr.bf16.mxu0 %v7623_v12  ;;  %v6349_v38 = vcombine.low %v2169_v3, %v2172_v37  ;;  %v2176_v40 = vsel %vm8377_vm2, %v6318_v19, %v2175_v8  ;;  %v2177_v0 = vrot.slane %v2175_v8, 4  ;;  %v2096_v17 = vld [vmem:[#allocation2 + $0x6c] sm:$0xe]  ;;  %v8544_v33 = vld [vmem:[#allocation2 + $0x78] sm:$0xf] }
  0xe1   : > { %v1491_v43 = vsel %vm7908_vm7, %v1486_v24, %v1490_v25  ;;  %v2182_v5 = vrot.slane %v8307_v60, 5  ;;  %v2185_v44 = vrot.slane %v8309_v61, 5  ;;  %v7631_v25 = vld [vmem:[%s10433_s1 + $0x118] sm:$0xff]   ;;  %v2192_v8 = vrot.slane %v8342_v34, 5  ;;  %v8499_v34 = vld [vmem:[#allocation2 + $0x64] sm:$0xf] }
  0xe2   : > { %v1481_v46 = vsel %vm7908_vm7, %v1476_v48, %v1480_v35  ;;  %7248 = vmatmul.mubr.bf16.gmra.mxu0 %v6348_v54  ;;  %v2179_v26 = vsel %vm8377_vm2, %v2177_v0, %v2178_v16  ;;  %v6320_v35 = vrot.slane %v2094_v53, 9  ;;  %v2189_v54 = vrot.slane %v8340_v10, 5  ;;  %v2097_v53 = vld [vmem:[#allocation2 + $0x78] sm:$0xe] }
  0xe3   : > { %v6280_v3 = vcombine.low %v1481_v46, %v1491_v43  ;;  %7251 = vmatprep.mubr.bf16.mxu0 %v6349_v38  ;;  %7328 = vmatpush3.bf16.msra.mxu0 %v7623_v12  ;;  %v6350_v24 = vcombine.low %v2176_v40, %v2179_v26  ;;  %v2183_v61 = vsel %vm8377_vm2, %v6319_v42, %v2182_v5  ;;  %v2184_v19 = vrot.slane %v2182_v5, 4  ;;  %v8502_v38 = vld [vmem:[#allocation2 + $0x60] sm:$0xf]  ;;  %v2098_v46 = vld [vmem:[#allocation2 + $0x84] sm:$0xe] }
  0xe4   : > { %7329 = vmatprep.subr.bf16.mxu0 %v7627_v11  ;;  %v8490_v48 = vsel %vm8377_vm2, %v6320_v35, %v2189_v54  ;;  %v2191_v37 = vrot.slane %v2189_v54, 4  ;;  %v6321_v16 = vrot.slane %v2095_v9, 9  ;;  %v2196_v43 = vrot.slane %v8499_v34, 5  ;;  %v8519_v35 = vld [vmem:[#allocation2 + $0x6c] sm:$0xf] }
  0xe5   : > { %7176 = vmatmul.mubr.bf16.gmra.mxu1 %v6280_v3  ;;  %v2186_v42 = vsel %vm8377_vm2, %v2184_v19, %v2185_v44  ;;  %v6322_v0 = vrot.slane %v2096_v17, 9  ;;  %v7728_v40 = vld [vmem:[#allocation2 + $0x80] sm:$0x1]  ;;  %v2227_v20 = vrot.slane %v8261_v4, 5  ;;  %v2958_v4 = vld [vmem:[#allocation2 + $0xc] sm:$0xf] }
  0xe6   : > { %7195 = vmatprep.mubr.bf16.mxu1 %v6289_v52  ;;  %v6351_v9 = vcombine.low %v2183_v61, %v2186_v42  ;;  %v8508_v5 = vsel %vm8377_vm2, %v2191_v37, %v2192_v8  ;;  %v7725_v52 = vld [vmem:[#allocation2 + $0x74] sm:$0x1]  ;;  %v8517_v26 = vsel %vm8377_vm2, %v6321_v16, %v2196_v43  ;;  %v2198_v17 = vrot.slane %v2196_v43, 4  ;;  %v8535_v16 = vld [vmem:[#allocation2 + $0x7c] sm:$0xf] }
  0xe7   : > { %7330 = vmatpush3.bf16.msra.mxu0 %v7627_v11  ;;  %v2206_v44 = vrot.slane %v7725_v52, 5  ;;  %v6352_v3 = vcombine.low %v8490_v48, %v8508_v5  ;;  %v7635_v11 = vld [vmem:[%s10433_s1 + $0x110] sm:$0xff]   ;;  %v8533_v19 = vsel %vm8377_vm2, %v6322_v0, %v2203_v7  ;;  %v2205_v8 = vrot.slane %v2203_v7, 4  ;;  %v2100_v7 = vld [vmem:[#allocation2 + $0x9c] sm:$0xe] }
  0xe8   : > { %7331 = vmatprep.subr.bf16.mxu0 %v7631_v25  ;;  %v8529_v61 = vld [vmem:[%s10433_s1 + $0xf0] sm:$0xff]   ;;  %v6323_v37 = vrot.slane %v2097_v53, 9  ;;  %v2210_v42 = vrot.slane %v8535_v16, 5  ;;  %v10466_v52 = vrot.slane %v8324_v13, 5  ;;  %v2213_v12 = vrot.slane %v7728_v40, 5 }
  0xe9   : > { %v2099_v43 = vld [vmem:[#allocation2 + $0x90] sm:$0xe]  ;;  %v6324_v53 = vrot.slane %v2098_v46, 9  ;;  %v8552_v13 = vsel %vm8377_vm2, %v2205_v8, %v2206_v44  ;;  %v2101_v46 = vld [vmem:[#allocation2 + $0xa8] sm:$0xe]  ;;  %v10468_v8 = vcombine.low %v8411_v30, %v8402_v18 }
  0xea   : > { %7252 = vmatmul.mubr.bf16.gmra.mxu0 %v6350_v24  ;;  %v8542_v54 = vsel %vm8377_vm2, %v2198_v17, %v10466_v52  ;;  %v8556_v24 = vsel %vm8377_vm2, %v6323_v37, %v2210_v42  ;;  %v2212_v40 = vrot.slane %v2210_v42, 4  ;;  %v7639_v17 = vld [vmem:[%s10433_s1 + $0x108] sm:$0xff]   ;;  %v10467_v37 = vcombine.low %v8394_v15, %v8391_v1 }
  0xeb   : > { %7255 = vmatprep.mubr.bf16.mxu0 %v6351_v9  ;;  %v6353_v21 = vcombine.low %v8517_v26, %v8542_v54  ;;  %7332 = vmatpush3.bf16.msra.mxu0 %v7631_v25  ;;  %v8563_v52 = vld [vmem:[#allocation2 + $0x88] sm:$0xf]  ;;  %v7731_v44 = vld [vmem:[#allocation2 + $0x8c] sm:$0x1]  ;;  %v8566_v25 = vld [vmem:[#allocation2 + $0x84] sm:$0xf] }
  0xec   : > { %v2217_v26 = vrot.slane %v8563_v52, 5  ;;  %v2220_v54 = vrot.slane %v7731_v44, 5  ;;  %7333 = vmatprep.subr.bf16.mxu0 %v7635_v11  ;;  %v8575_v42 = vsel %vm8377_vm2, %v2212_v40, %v2213_v12  ;;  %v6325_v0 = vrot.slane %v2099_v43, 9  ;;  %v7733_v44 = vld [vmem:[%s10433_s1 + $0xf8] sm:$0xff]   ;;  %v7621_v43 = vld [vmem:[%s10433_s1 + $0xe8] sm:$0xff]  }
  0xed   : > { %7196 = vmatmul.mubr.bf16.vlgmr.msra.gmra.mxu1 %v10467_v37  ;;  %v2224_v9 = vrot.slane %v8251_v51, 5  ;;  %v6326_v40 = vrot.slane %v2100_v7, 9  ;;  %v7625_v37 = vld [vmem:[%s10433_s1 + $0xe0] sm:$0xff]  }
  0xee   : > { %7276 = vmatpush3.bf16.msra.mxu1 %v7733_v44  ;;  %7199 = vmatprep.mubr.bf16.mxu1 %v10468_v8  ;;  %v8589_v15 = vsel %vm8377_vm2, %v6324_v53, %v2217_v26  ;;  %v2219_v12 = vrot.slane %v2217_v26, 4  ;;  %v2231_v53 = vrot.slane %v8283_v57, 5  ;;  %v2234_v8 = vrot.slane %v8285_v58, 5  ;;  %v7643_v58 = vld [vmem:[%s10433_s1 + $0x100] sm:$0xff]  }
  0xef   : > { %7277 = vmatprep.subr.bf16.mxu1 %v8529_v61  ;;  %7334 = vmatpush3.bf16.msra.mxu0 %v7635_v11  ;;  %v8599_v18 = vsel %vm8377_vm2, %v6325_v0, %v2224_v9  ;;  %v2226_v30 = vrot.slane %v2224_v9, 4  ;;  %v6327_v44 = vrot.slane %v2101_v46, 9  ;;  %v2102_v11 = vld [vmem:[#allocation2 + $0xb4] sm:$0xe]  ;;  %v8624_v46 = vld [vmem:[#allocation2 + $0x14] sm:$0x1] }
  0xf0   : > { %v8604_v26 = vsel %vm8377_vm2, %v2219_v12, %v2220_v54  ;;  %7335 = vmatprep.subr.bf16.mxu0 %v7639_v17  ;;  %v8617_v9 = vsel %vm8377_vm2, %v6326_v40, %v2231_v53  ;;  %v2233_v54 = vrot.slane %v2231_v53, 4  ;;  %v8622_v12 = vld [vmem:[#allocation2 + $0x10] sm:$0xf]  ;;  %10470 = vst [vmem:[#allocation8_spill] sm:$0xff] %v8624_v46  ;;  %v2241_v40 = vrot.slane %v8370_v63, 5 }
  0xf1   : > { %v8613_v7 = vsel %vm8377_vm2, %v2226_v30, %v2227_v20  ;;  %10469 = vst [vmem:[#allocation7_spill] sm:$0xff] %v8622_v12  ;;  %v2238_v30 = vrot.slane %v8368_v27, 5  ;;  %v6328_v5 = vrot.slane %v2102_v11, 9  ;;  %v2961_v0 = vld [vmem:[#allocation2 + $0x18] sm:$0xf] }
  0xf2   : > { %7278 = vmatpush3.bf16.msra.mxu1 %v8529_v61  ;;  %7256 = vmatmul.mubr.bf16.gmra.mxu0 %v6352_v3  ;;  %v8641_v48 = vsel %vm8377_vm2, %v2233_v54, %v2234_v8  ;;  %v2245_v3 = vrot.slane %v8424_v62, 5  ;;  %v2248_v61 = vrot.slane %v8437_v41, 5  ;;  %v10471_v8 = vcombine.low %v8428_v23, %v8419_v45  ;;  %v8660_v63 = vld [vmem:[#allocation2 + $0x1c] sm:$0xf] }
  0xf3   : > { %7279 = vmatprep.subr.bf16.mxu1 %v7621_v43  ;;  %7259 = vmatprep.mubr.bf16.mxu0 %v6353_v21  ;;  %v8649_v53 = vsel %vm8377_vm2, %v6327_v44, %v2238_v30  ;;  %v2240_v20 = vrot.slane %v2238_v30, 4  ;;  %v3010_v54 = vshll.u32 %v2958_v4, 16  ;;  %10472 = vst [vmem:[#allocation9_spill] sm:$0xff] %v8660_v63  ;;  %v8665_v44 = vld [vmem:[%s10433_s1 + $0x1b8] sm:$0xff]   ;;  %v10473_v30 = vcombine.low %v8196_v2, %v8198_v6 }
  0xf4   : > { %7336 = vmatpush3.bf16.msra.mxu0 %v7639_v17  ;;  %v8658_v41 = vsel %vm8377_vm2, %v6328_v5, %v2245_v3  ;;  %v2247_v11 = vrot.slane %v2245_v3, 4  ;;  %v3007_v17 = vshrl.u32 %v2958_v4, 16  ;;  %v7629_v45 = vld [vmem:[%s10433_s1 + $0xd8] sm:$0xff]   ;;  %v3016_v4 = vshll.u32 %v8622_v12, 16 }
  0xf5   : > { %7200 = vmatmul.mubr.bf16.gmra.mxu1 %v10471_v8  ;;  %7337 = vmatprep.subr.bf16.mxu0 %v7643_v58  ;;  %v8675_v23 = vsel %vm8377_vm2, %v2240_v20, %v2241_v40  ;;  %v3020_v5 = vshrl.u32 %v8622_v12, 16  ;;  %v3026_v3 = vshll.u32 %v8624_v46, 16  ;;  %v8680_v8 = vld [vmem:[#allocation2 + $0x20] sm:$0x1]  ;;  %v2964_v20 = vld [vmem:[#allocation2 + $0x24] sm:$0xf] }
  0xf6   : > { %7203 = vmatprep.mubr.bf16.mxu1 %v10473_v30  ;;  %7280 = vmatpush3.bf16.msra.mxu1 %v7621_v43  ;;  %10474 = vst [vmem:[#allocation10_spill] sm:$0xff] %v8680_v8  ;;  %v8686_v6 = vsel %vm8377_vm2, %v2247_v11, %v2248_v61  ;;  %v3009_v43 = vrot.slane %v3007_v17, 4  ;;  %v3012_v30 = vrot.slane %v3010_v54, 5  ;;  %v3018_v21 = vrot.slane %v3016_v4, 5  ;;  %v8694_v61 = vld [vmem:[#allocation2 + $0x2c] sm:$0x1] }
  0xf7   : > { %7281 = vmatprep.subr.bf16.mxu1 %v7625_v37  ;;  %v3022_v1 = vrot.slane %v3020_v5, 4  ;;  %v3028_v29 = vrot.slane %v3026_v3, 5  ;;  %v3031_v46 = vshrl.u32 %v2961_v0, 16  ;;  %v3034_v12 = vshll.u32 %v2961_v0, 16 }
  0xf8   : > { %7338 = vmatpush3.bf16.msra.mxu0 %v7643_v58  ;;  %v3013_v14 = vor.u32 %v3012_v30, %v3009_v43  ;;  %v3040_v2 = vshll.u32 %v8660_v63, 16  ;;  %v10475_v11 = vcombine.low %v8533_v19, %v8552_v13  ;;  %v7633_v58 = vld [vmem:[%s10433_s1 + $0xd0] sm:$0xff]   ;;  %v3044_v54 = vshrl.u32 %v8660_v63, 16 }
  0xf9   : > { %7419 = vmatprep.subr.bf16.mxu0 %v8665_v44  ;;  %v3023_v17 = vor.u32 %v3022_v1, %v3018_v21  ;;  %v3050_v0 = vshll.u32 %v8680_v8, 16  ;;  %v3055_v4 = vshrl.u32 %v2964_v20, 16  ;;  %v10476_v5 = vcombine.low %v8556_v24, %v8575_v42  ;;  %v2967_v42 = vld [vmem:[#allocation2 + $0x30] sm:$0xf] }
  0xfa   : > { %7282 = vmatpush3.bf16.msra.mxu1 %v7625_v37  ;;  %7260 = vmatmul.mubr.bf16.gmra.mxu0 %v10475_v11  ;;  %v3014_v37 = vrot.slane %v3013_v14, 4  ;;  %v3033_v3 = vrot.slane %v3031_v46, 4  ;;  %v3036_v43 = vrot.slane %v3034_v12, 5  ;;  %v3042_v19 = vrot.slane %v3040_v2, 5  ;;  %v8713_v14 = vld [vmem:[#allocation2 + $0x34] sm:$0xf] }
  0xfb   : > { %7283 = vmatprep.subr.bf16.mxu1 %v7629_v45  ;;  %7263 = vmatprep.mubr.bf16.mxu0 %v10476_v5  ;;  %v3024_v13 = vrot.slane %v3023_v17, 4  ;;  %v3046_v30 = vrot.slane %v3044_v54, 4  ;;  %v3052_v11 = vrot.slane %v3050_v0, 5  ;;  %v3057_v40 = vrot.slane %v3055_v4, 4  ;;  %v7637_v2 = vld [vmem:[%s10433_s1 + $0xc8] sm:$0xff]  }
  0xfc   : > { %v10477_v1 = vcombine.low %v8217_v50, %v8220_v39  ;;  %v3019_v8 = vsel %vm7908_vm7, %v3014_v37, %v3018_v21  ;;  %v3037_v28 = vor.u32 %v3036_v43, %v3033_v3  ;;  %v3058_v63 = vshll.u32 %v2964_v20, 16 }
  0xfd   : > { %v3064_v24 = vshll.u32 %v8690_v22, 16  ;;  %v10478_v12 = vcombine.low %v8305_v59, %v8307_v60  ;;  %v3029_v46 = vsel %vm7908_vm7, %v3024_v13, %v3028_v29  ;;  %v3047_v50 = vor.u32 %v3046_v30, %v3042_v19  ;;  %v8727_v60 = vld [vmem:[#allocation2 + $0x38] sm:$0x1]  ;;  %v2970_v13 = vld [vmem:[#allocation2 + $0x3c] sm:$0xf] }
  0xfe   : > { %7204 = vmatmul.mubr.bf16.gmra.mxu1 %v10477_v1  ;;  %v3068_v39 = vshrl.u32 %v8690_v22, 16  ;;  %v3074_v21 = vshll.u32 %v8694_v61, 16  ;;  %v8725_v20 = vcombine.low %v3019_v8, %v3029_v46  ;;  %v3038_v17 = vrot.slane %v3037_v28, 4  ;;  %v8732_v30 = vld [vmem:[#allocation2 + $0x40] sm:$0xf] }
  0xff   : > { %7207 = vmatprep.mubr.bf16.mxu1 %v10478_v12  ;;  %7284 = vmatpush3.bf16.msra.mxu1 %v7629_v45  ;;  %v3060_v54 = vrot.slane %v3058_v63, 5  ;;  %v3066_v59 = vrot.slane %v3064_v24, 5  ;;  %v3048_v45 = vrot.slane %v3047_v50, 4  ;;  %v3079_v4 = vshrl.u32 %v2967_v42, 16  ;;  %v8748_v12 = vld [vmem:[#allocation2 + $0x44] sm:$0x1] }
 0x100   : > { %7285 = vmatprep.subr.bf16.mxu1 %v7633_v58  ;;  %v3070_v0 = vrot.slane %v3068_v39, 4  ;;  %v3076_v29 = vrot.slane %v3074_v21, 5  ;;  %v3043_v5 = vsel %vm7908_vm7, %v3038_v17, %v3042_v19  ;;  %v3082_v3 = vshll.u32 %v2967_v42, 16  ;;  %v7641_v19 = vld [vmem:[%s10433_s1 + $0xc0] sm:$0xff]  }
 0x101   : > { %v3061_v37 = vor.u32 %v3060_v54, %v3057_v40  ;;  %v3088_v43 = vshll.u32 %v8713_v14, 16  ;;  %v10479_v28 = vcombine.low %v8589_v15, %v8604_v26  ;;  %v3053_v63 = vsel %vm7908_vm7, %v3048_v45, %v3052_v11  ;;  %v2973_v45 = vld [vmem:[#allocation2 + $0x48] sm:$0xf] }
 0x102   : > { %v3071_v8 = vor.u32 %v3070_v0, %v3066_v59  ;;  %v3081_v1 = vrot.slane %v3079_v4, 4  ;;  %v3092_v24 = vshrl.u32 %v8713_v14, 16  ;;  %v10480_v40 = vcombine.low %v8599_v18, %v8613_v7  ;;  %v8757_v0 = vld [vmem:[#allocation2 + $0x4c] sm:$0xf] }
 0x103   : > { %7264 = vmatmul.mubr.bf16.gmra.mxu0 %v10479_v28  ;;  %7286 = vmatpush3.bf16.msra.mxu1 %v7633_v58  ;;  %v8746_v42 = vcombine.low %v3043_v5, %v3053_v63  ;;  %v3062_v15 = vrot.slane %v3061_v37, 4  ;;  %v3084_v26 = vrot.slane %v3082_v3, 5  ;;  %v3090_v58 = vrot.slane %v3088_v43, 5 }
 0x104   : > { %7267 = vmatprep.mubr.bf16.mxu0 %v10480_v40  ;;  %7287 = vmatprep.subr.bf16.mxu1 %v7637_v2  ;;  %v3072_v11 = vrot.slane %v3071_v8, 4  ;;  %v3094_v46 = vrot.slane %v3092_v24, 4  ;;  %v3098_v50 = vshll.u32 %v8727_v60, 16  ;;  %v3103_v39 = vshrl.u32 %v2970_v13, 16 }
 0x105   : > { %v10481_v18 = vcombine.low %v8328_v56, %v8340_v10  ;;  %v3067_v7 = vsel %vm7908_vm7, %v3062_v15, %v3066_v59  ;;  %v3085_v21 = vor.u32 %v3084_v26, %v3081_v1  ;;  %v3106_v17 = vshll.u32 %v2970_v13, 16  ;;  %v8767_v59 = vld [vmem:[%s10433_s1 + $0x178] sm:$0xff]   ;;  %v2976_v15 = vld [vmem:[#allocation2 + $0x54] sm:$0xf] }
 0x106   : > { %v3112_v54 = vshll.u32 %v8732_v30, 16  ;;  %v10482_v4 = vcombine.low %v8502_v38, %v8499_v34  ;;  %v3077_v5 = vsel %vm7908_vm7, %v3072_v11, %v3076_v29  ;;  %v3095_v56 = vor.u32 %v3094_v46, %v3090_v58  ;;  %v8771_v34 = vld [vmem:[#allocation2 + $0x50] sm:$0x1]  ;;  %v8778_v26 = vld [vmem:[#allocation2 + $0x58] sm:$0xf] }
 0x107   : > { %7208 = vmatmul.mubr.bf16.gmra.mxu1 %v10481_v18  ;;  %v3100_v10 = vrot.slane %v3098_v50, 5  ;;  %v3105_v37 = vrot.slane %v3103_v39, 4  ;;  %v8769_v3 = vcombine.low %v3067_v7, %v3077_v5  ;;  %v3086_v43 = vrot.slane %v3085_v21, 4 }
 0x108   : > { %7211 = vmatprep.mubr.bf16.mxu1 %v10482_v4  ;;  %7288 = vmatpush3.bf16.msra.mxu1 %v7637_v2  ;;  %v3108_v13 = vrot.slane %v3106_v17, 5  ;;  %v3114_v28 = vrot.slane %v3112_v54, 5  ;;  %v3096_v38 = vrot.slane %v3095_v56, 4  ;;  %v3116_v2 = vshrl.u32 %v8732_v30, 16  ;;  %v8798_v56 = vld [vmem:[#allocation2 + $0x5c] sm:$0x1] }
 0x109   : > { %7289 = vmatprep.subr.bf16.mxu1 %v7641_v19  ;;  %v3122_v29 = vshll.u32 %v8748_v12, 16  ;;  %v3127_v63 = vshrl.u32 %v2973_v45, 16  ;;  %v3091_v8 = vsel %vm7908_vm7, %v3086_v43, %v3090_v58  ;;  %v3130_v24 = vshll.u32 %v2973_v45, 16 }
 0x10a   : > { %v3109_v1 = vor.u32 %v3108_v13, %v3105_v37  ;;  %v3136_v40 = vshll.u32 %v8757_v0, 16  ;;  %v10483_v11 = vcombine.low %v8617_v9, %v8641_v48  ;;  %v3101_v46 = vsel %vm7908_vm7, %v3096_v38, %v3100_v10  ;;  %v2979_v9 = vld [vmem:[#allocation2 + $0x60] sm:$0xf] }
 0x10b   : > { %v3118_v50 = vrot.slane %v3116_v2, 4  ;;  %v3124_v39 = vrot.slane %v3122_v29, 5  ;;  %v3129_v18 = vrot.slane %v3127_v63, 4  ;;  %v10484_v58 = vcombine.low %v8649_v53, %v8675_v23  ;;  %v8804_v63 = vld [vmem:[#allocation2 + $0x64] sm:$0xf] }
 0x10c   : > { %7268 = vmatmul.mubr.bf16.gmra.mxu0 %v10483_v11  ;;  %7290 = vmatpush3.bf16.msra.mxu1 %v7641_v19  ;;  %v8789_v7 = vcombine.low %v3091_v8, %v3101_v46  ;;  %v3110_v21 = vrot.slane %v3109_v1, 4  ;;  %v3132_v17 = vrot.slane %v3130_v24, 5  ;;  %v3138_v54 = vrot.slane %v3136_v40, 5  ;;  %v8807_v1 = vld [vmem:[#allocation2 + $0x68] sm:$0x1] }
 0x10d   : > { %7271 = vmatprep.mubr.bf16.mxu0 %v10484_v58  ;;  %7371 = vmatprep.subr.bf16.mxu1 %v8767_v59  ;;  %v3119_v48 = vor.u32 %v3118_v50, %v3114_v28  ;;  %v3140_v19 = vshrl.u32 %v8757_v0, 16  ;;  %v3146_v45 = vshll.u32 %v8771_v34, 16  ;;  %v3151_v4 = vshrl.u32 %v2976_v15, 16 }
 0x10e   : > { %v10485_v5 = vcombine.low %v8519_v35, %v8510_v47  ;;  %v3115_v53 = vsel %vm7908_vm7, %v3110_v21, %v3114_v28  ;;  %v3133_v23 = vor.u32 %v3132_v17, %v3129_v18  ;;  %v3154_v10 = vshll.u32 %v2976_v15, 16  ;;  %v2982_v15 = vld [vmem:[#allocation2 + $0x6c] sm:$0xf] }
 0x10f   : > { %v3160_v37 = vshll.u32 %v8778_v26, 16  ;;  %v10486_v43 = vcombine.low %v8544_v33, %v8535_v16  ;;  %v3120_v13 = vrot.slane %v3119_v48, 4  ;;  %v3142_v38 = vrot.slane %v3140_v19, 4  ;;  %v8819_v19 = vld [vmem:[#allocation2 + $0x70] sm:$0xf] }
 0x110   : > { %7212 = vmatmul.mubr.bf16.gmra.mxu1 %v10485_v5  ;;  %v3148_v2 = vrot.slane %v3146_v45, 5  ;;  %v3153_v29 = vrot.slane %v3151_v4, 4  ;;  %v3134_v47 = vrot.slane %v3133_v23, 4  ;;  %v3156_v35 = vrot.slane %v3154_v10, 5 }
 0x111   : > { %7215 = vmatprep.mubr.bf16.mxu1 %v10486_v43  ;;  %v3162_v8 = vrot.slane %v3160_v37, 5  ;;  %v3164_v28 = vshrl.u32 %v8778_v26, 16  ;;  %v3125_v24 = vsel %vm7908_vm7, %v3120_v13, %v3124_v39  ;;  %v3143_v40 = vor.u32 %v3142_v38, %v3138_v54  ;;  %v2985_v38 = vld [vmem:[#allocation2 + $0x78] sm:$0xf] }
 0x112   : > { %v3170_v33 = vshll.u32 %v8798_v56, 16  ;;  %v3175_v16 = vshrl.u32 %v2979_v9, 16  ;;  %v8812_v11 = vcombine.low %v3115_v53, %v3125_v24  ;;  %v3139_v46 = vsel %vm7908_vm7, %v3134_v47, %v3138_v54  ;;  %v8824_v53 = vld [vmem:[#allocation2 + $0x74] sm:$0x1]  ;;  %v8839_v24 = vld [vmem:[#allocation2 + $0x7c] sm:$0xf] }
 0x113   : > { %v3157_v50 = vor.u32 %v3156_v35, %v3153_v29  ;;  %v3166_v18 = vrot.slane %v3164_v28, 4  ;;  %v10487_v58 = vcombine.low %v8658_v41, %v8686_v6  ;;  %v3144_v21 = vrot.slane %v3143_v40, 4 }
 0x114   : > { %v3172_v17 = vrot.slane %v3170_v33, 5  ;;  %v3177_v48 = vrot.slane %v3175_v16, 4  ;;  %v3178_v39 = vshll.u32 %v2979_v9, 16  ;;  %v3184_v5 = vshll.u32 %v8804_v63, 16 }
 0x115   : > { %7272 = vmatmul.mubr.bf16.gmra.mxu0 %v10487_v58  ;;  %v3158_v45 = vrot.slane %v3157_v50, 4  ;;  %v3167_v4 = vor.u32 %v3166_v18, %v3162_v8  ;;  %v3188_v54 = vshrl.u32 %v8804_v63, 16  ;;  %v3149_v41 = vsel %vm7908_vm7, %v3144_v21, %v3148_v2 }
 0x116   : > { %7339 = vmatprep.mubr.bf16.mxu0 %v8725_v20  ;;  %v3180_v6 = vrot.slane %v3178_v39, 5  ;;  %v3194_v23 = vshll.u32 %v8807_v1, 16  ;;  %v3199_v10 = vshrl.u32 %v2982_v15, 16  ;;  %v10488_v9 = vcombine.low %v8566_v25, %v8563_v52  ;;  %v7651_v52 = vld [vmem:[%s10433_s1 + $0x1b0] sm:$0xff]   ;;  %v2988_v39 = vld [vmem:[#allocation2 + $0x84] sm:$0xf] }
 0x117   : > { %v8832_v20 = vcombine.low %v3139_v46, %v3149_v41  ;;  %v3163_v37 = vsel %vm7908_vm7, %v3158_v45, %v3162_v8  ;;  %v3168_v43 = vrot.slane %v3167_v4, 4  ;;  %v3186_v13 = vrot.slane %v3184_v5, 5 }
 0x118   : > { %7216 = vmatmul.mubr.bf16.gmra.mxu1 %v10488_v9  ;;  %v10489_v29 = vcombine.low %v8243_v32, %v8251_v51  ;;  %v3181_v2 = vor.u32 %v3180_v6, %v3177_v48  ;;  %v3190_v47 = vrot.slane %v3188_v54, 4  ;;  %v3196_v35 = vrot.slane %v3194_v23, 5  ;;  %v8848_v32 = vld [vmem:[#allocation2 + $0x80] sm:$0x1]  ;;  %v8859_v23 = vld [vmem:[#allocation2 + $0x88] sm:$0xf] }
 0x119   : > { %v3201_v28 = vrot.slane %v3199_v10, 4  ;;  %v3173_v25 = vsel %vm7908_vm7, %v3168_v43, %v3172_v17  ;;  %v3202_v8 = vshll.u32 %v2982_v15, 16  ;;  %v3208_v40 = vshll.u32 %v8819_v19, 16 }
 0x11a   : > { %7219 = vmatprep.mubr.bf16.mxu1 %v10489_v29  ;;  %v3212_v33 = vshrl.u32 %v8819_v19, 16  ;;  %v8850_v51 = vcombine.low %v3163_v37, %v3173_v25  ;;  %v3182_v16 = vrot.slane %v3181_v2, 4  ;;  %v3191_v46 = vor.u32 %v3190_v47, %v3186_v13  ;;  %v8868_v37 = vld [vmem:[#allocation2 + $0x8c] sm:$0x1]  ;;  %v2991_v47 = vld [vmem:[#allocation2 + $0x90] sm:$0xf] }
 0x11b   : > { %v3218_v50 = vshll.u32 %v8824_v53, 16  ;;  %v3204_v18 = vrot.slane %v3202_v8, 5  ;;  %v3210_v58 = vrot.slane %v3208_v40, 5  ;;  %v3223_v48 = vshrl.u32 %v2985_v38, 16 }
 0x11c   : > { %v3214_v21 = vrot.slane %v3212_v33, 4  ;;  %v3187_v15 = vsel %vm7908_vm7, %v3182_v16, %v3186_v13  ;;  %v3192_v17 = vrot.slane %v3191_v46, 4  ;;  %v3226_v4 = vshll.u32 %v2985_v38, 16 }
 0x11d   : > { %7340 = vmatmul.mubr.bf16.vlgmr.msra.gmra.mxu0 %v8746_v42  ;;  %v3220_v45 = vrot.slane %v3218_v50, 5  ;;  %v3205_v5 = vor.u32 %v3204_v18, %v3201_v28  ;;  %v3225_v41 = vrot.slane %v3223_v48, 4  ;;  %v3232_v6 = vshll.u32 %v8839_v24, 16  ;;  %v7655_v42 = vld [vmem:[%s10433_s1 + $0x1a8] sm:$0xff]   ;;  %v7659_v28 = vld [vmem:[%s10433_s1 + $0x1a0] sm:$0xff]  }
 0x11e   : > { %7420 = vmatpush3.bf16.msra.mxu0 %v8665_v44  ;;  %7343 = vmatprep.mubr.bf16.mxu0 %v8769_v3  ;;  %v3215_v54 = vor.u32 %v3214_v21, %v3210_v58  ;;  %v3197_v10 = vsel %vm7908_vm7, %v3192_v17, %v3196_v35  ;;  %v3228_v9 = vrot.slane %v3226_v4, 5  ;;  %v3236_v44 = vshrl.u32 %v8839_v24, 16  ;;  %v8888_v21 = vld [vmem:[#allocation2 + $0x94] sm:$0xf]  ;;  %v8892_v17 = vld [vmem:[#allocation2 + $0x98] sm:$0x1] }
 0x11f   : > { %7421 = vmatprep.subr.bf16.mxu0 %v7651_v52  ;;  %v3242_v3 = vshll.u32 %v8848_v32, 16  ;;  %v10490_v43 = vcombine.low %v8278_v49, %v8283_v57  ;;  %v8873_v13 = vcombine.low %v3187_v15, %v3197_v10  ;;  %v3206_v38 = vrot.slane %v3205_v5, 4 }
 0x120   : > { %v3216_v29 = vrot.slane %v3215_v54, 4  ;;  %v3234_v2 = vrot.slane %v3232_v6, 5  ;;  %v10491_v35 = vcombine.low %v8357_v55, %v8368_v27  ;;  %v3229_v25 = vor.u32 %v3228_v9, %v3225_v41 }
 0x121   : > { %7220 = vmatmul.mubr.bf16.gmra.mxu1 %v10490_v43  ;;  %v3238_v8 = vrot.slane %v3236_v44, 4  ;;  %v3244_v40 = vrot.slane %v3242_v3, 5  ;;  %v3247_v33 = vshrl.u32 %v2988_v39, 16  ;;  %v3211_v49 = vsel %vm7908_vm7, %v3206_v38, %v3210_v58  ;;  %v2994_v44 = vld [vmem:[#allocation2 + $0x9c] sm:$0xf] }
 0x122   : > { %7223 = vmatprep.mubr.bf16.mxu1 %v10491_v35  ;;  %7422 = vmatpush3.bf16.msra.mxu0 %v7651_v52  ;;  %v3221_v57 = vsel %vm7908_vm7, %v3216_v29, %v3220_v45  ;;  %v3250_v16 = vshll.u32 %v2988_v39, 16  ;;  %v3256_v46 = vshll.u32 %v8859_v23, 16  ;;  %v3230_v27 = vrot.slane %v3229_v25, 4  ;;  %v7644_v45 = vld [vmem:[#allocation2 + $0xc] sm:$0xff]  }
 0x123   : > { %7423 = vmatprep.subr.bf16.mxu0 %v7655_v42  ;;  %v8886_v55 = vcombine.low %v3211_v49, %v3221_v57  ;;  %v3239_v50 = vor.u32 %v3238_v8, %v3234_v2  ;;  %v3249_v18 = vrot.slane %v3247_v33, 4  ;;  %v3260_v52 = vshrl.u32 %v8859_v23, 16 }
 0x124   : > { %v3252_v48 = vrot.slane %v3250_v16, 5  ;;  %v3258_v15 = vrot.slane %v3256_v46, 5  ;;  %v3266_v58 = vshll.u32 %v8868_v37, 16  ;;  %v3235_v39 = vsel %vm7908_vm7, %v3230_v27, %v3234_v2  ;;  %v8915_v46 = vld [vmem:[#allocation2 + $0xa4] sm:$0x1] }
 0x125   : > { %7344 = vmatmul.mubr.bf16.gmra.mxu0 %v8789_v7  ;;  %v3240_v4 = vrot.slane %v3239_v50, 4  ;;  %v3271_v5 = vshrl.u32 %v2991_v47, 16  ;;  %v3274_v54 = vshll.u32 %v2991_v47, 16  ;;  %v3262_v6 = vrot.slane %v3260_v52, 4  ;;  %v7663_v7 = vld [vmem:[%s10433_s1 + $0x198] sm:$0xff]  }
 0x126   : > { %7347 = vmatprep.mubr.bf16.mxu0 %v8812_v11  ;;  %7424 = vmatpush3.bf16.msra.mxu0 %v7655_v42  ;;  %v3253_v41 = vor.u32 %v3252_v48, %v3249_v18  ;;  %v3268_v10 = vrot.slane %v3266_v58, 5  ;;  %v3280_v9 = vshll.u32 %v8888_v21, 16  ;;  %v3284_v29 = vshrl.u32 %v8888_v21, 16  ;;  %v8905_v11 = vld [vmem:[#allocation2 + $0xa0] sm:$0xf]  ;;  %v7667_v48 = vld [vmem:[%s10433_s1 + $0x190] sm:$0xff]  }
 0x127   : > { %7425 = vmatprep.subr.bf16.mxu0 %v7659_v28  ;;  %v3245_v3 = vsel %vm7908_vm7, %v3240_v4, %v3244_v40  ;;  %v3273_v43 = vrot.slane %v3271_v5, 4  ;;  %v3276_v38 = vrot.slane %v3274_v54, 5  ;;  %v10492_v42 = vcombine.low %v8435_v31, %v8424_v62  ;;  %v2997_v58 = vld [vmem:[#allocation2 + $0xa8] sm:$0xf]  ;;  %v8924_v5 = vld [vmem:[#allocation2 + $0xac] sm:$0xf] }
 0x128   : > { %v8910_v2 = vcombine.low %v3235_v39, %v3245_v3  ;;  %v3254_v47 = vrot.slane %v3253_v41, 4  ;;  %v3263_v35 = vor.u32 %v3262_v6, %v3258_v15  ;;  %v3282_v25 = vrot.slane %v3280_v9, 5  ;;  %v7648_v54 = vld [vmem:[#allocation2 + $0x24] sm:$0xff]  }
 0x129   : > { %7224 = vmatmul.mubr.bf16.gmra.mxu1 %v10492_v42  ;;  %v3277_v8 = vor.u32 %v3276_v38, %v3273_v43  ;;  %v3286_v40 = vrot.slane %v3284_v29, 4  ;;  %v3290_v33 = vshll.u32 %v8892_v17, 16  ;;  %v3295_v49 = vshrl.u32 %v2994_v44, 16  ;;  %v8936_v38 = vld [vmem:[#allocation2 + $0xb0] sm:$0x1] }
 0x12a   : > { %7291 = vmatprep.mubr.bf16.mxu1 %v7644_v45  ;;  %7426 = vmatpush3.bf16.msra.mxu0 %v7659_v28  ;;  %v3259_v57 = vsel %vm7908_vm7, %v3254_v47, %v3258_v15  ;;  %v3264_v16 = vrot.slane %v3263_v35, 4  ;;  %v3298_v62 = vshll.u32 %v2994_v44, 16  ;;  %v3304_v31 = vshll.u32 %v8905_v11, 16  ;;  %v7646_v28 = vld [vmem:[#allocation2 + $0x18] sm:$0xff]  }
 0x12b   : > { %7427 = vmatprep.subr.bf16.mxu0 %v7663_v7  ;;  %v3278_v27 = vrot.slane %v3277_v8, 4  ;;  %v3287_v50 = vor.u32 %v3286_v40, %v3282_v25  ;;  %v3292_v18 = vrot.slane %v3290_v33, 5  ;;  %v3297_v52 = vrot.slane %v3295_v49, 4 }
 0x12c   : > { %v3269_v15 = vsel %vm7908_vm7, %v3264_v16, %v3268_v10  ;;  %v3300_v45 = vrot.slane %v3298_v62, 5  ;;  %v3306_v39 = vrot.slane %v3304_v31, 5  ;;  %v3308_v4 = vshrl.u32 %v8905_v11, 16  ;;  %v7649_v10 = vld [vmem:[%s10433_s1 + $0x170] sm:$0xff]  }
 0x12d   : > { %7348 = vmatmul.mubr.bf16.gmra.mxu0 %v8832_v20  ;;  %v8927_v41 = vcombine.low %v3259_v57, %v3269_v15  ;;  %v3283_v6 = vsel %vm7908_vm7, %v3278_v27, %v3282_v25  ;;  %v3288_v9 = vrot.slane %v3287_v50, 4  ;;  %v3314_v44 = vshll.u32 %v8915_v46, 16  ;;  %v8947_v57 = vld [vmem:[#allocation2 + $0xb8] sm:$0xf]  ;;  %v7653_v50 = vld [vmem:[%s10433_s1 + $0x168] sm:$0xff]  }
 0x12e   : > { %7351 = vmatprep.mubr.bf16.mxu0 %v8850_v51  ;;  %7428 = vmatpush3.bf16.msra.mxu0 %v7663_v7  ;;  %v3301_v3 = vor.u32 %v3300_v45, %v3297_v52  ;;  %v3310_v43 = vrot.slane %v3308_v4, 4  ;;  %v3319_v20 = vshrl.u32 %v2997_v58, 16  ;;  %v3322_v29 = vshll.u32 %v2997_v58, 16  ;;  %v7671_v51 = vld [vmem:[%s10433_s1 + $0x188] sm:$0xff]   ;;  %v3000_v7 = vld [vmem:[#allocation2 + $0xb4] sm:$0xf] }
 0x12f   : > { %v3293_v42 = vsel %vm7908_vm7, %v3288_v9, %v3292_v18  ;;  %7429 = vmatprep.subr.bf16.mxu0 %v7667_v48  ;;  %v3316_v47 = vrot.slane %v3314_v44, 5  ;;  %v3328_v35 = vshll.u32 %v8924_v5, 16  ;;  %v3332_v25 = vshrl.u32 %v8924_v5, 16  ;;  %v6899_v9 = vld [vmem:[%s7781_s22 + $0x78] sm:$0xff]  }
 0x130   : > { %v8945_v8 = vcombine.low %v3283_v6, %v3293_v42  ;;  %v3302_v40 = vrot.slane %v3301_v3, 4  ;;  %v3311_v33 = vor.u32 %v3310_v43, %v3306_v39  ;;  %v3321_v49 = vrot.slane %v3319_v20, 4  ;;  %v7675_v43 = vld [vmem:[%s10433_s1 + $0x180] sm:$0xff]   ;;  %v3712_v20 = vld [vmem:[#allocation2 + $0xc] sm:$0xe] }
 0x131   : > { %7292 = vmatmul.mubr.bf16.vlgmr.msra.gmra.mxu1 %v7646_v28  ;;  %v3324_v16 = vrot.slane %v3322_v29, 5  ;;  %v3330_v62 = vrot.slane %v3328_v35, 5  ;;  %v3334_v31 = vrot.slane %v3332_v25, 4  ;;  %v3338_v27 = vshll.u32 %v8936_v38, 16  ;;  %v7652_v29 = vld [vmem:[#allocation2 + $0x3c] sm:$0xff]  }
 0x132   : > { %7372 = vmatpush3.bf16.msra.mxu1 %v8767_v59  ;;  %7295 = vmatprep.mubr.bf16.mxu1 %v7648_v54  ;;  %v3307_v18 = vsel %vm7908_vm7, %v3302_v40, %v3306_v39  ;;  %v3312_v52 = vrot.slane %v3311_v33, 4  ;;  %v3343_v58 = vshrl.u32 %v3000_v7, 16  ;;  %v3346_v28 = vshll.u32 %v3000_v7, 16  ;;  %v7650_v59 = vld [vmem:[#allocation2 + $0x30] sm:$0xff]   ;;  %v8956_v54 = vld [vmem:[#allocation2 + $0xbc] sm:$0x1] }
 0x133   : > { %7373 = vmatprep.subr.bf16.mxu1 %v7649_v10  ;;  %7430 = vmatpush3.bf16.msra.mxu0 %v7667_v48  ;;  %v3325_v15 = vor.u32 %v3324_v16, %v3321_v49  ;;  %v3335_v45 = vor.u32 %v3334_v31, %v3330_v62  ;;  %v3340_v4 = vrot.slane %v3338_v27, 5  ;;  %v3352_v6 = vshll.u32 %v8947_v57, 16 }
 0x134   : > { %7431 = vmatprep.subr.bf16.mxu0 %v7671_v51  ;;  %v3317_v44 = vsel %vm7908_vm7, %v3312_v52, %v3316_v47  ;;  %v3345_v48 = vrot.slane %v3343_v58, 4  ;;  %v3348_v3 = vrot.slane %v3346_v28, 5  ;;  %v3356_v39 = vshrl.u32 %v8947_v57, 16  ;;  %v7657_v47 = vld [vmem:[%s10433_s1 + $0x160] sm:$0xff]  }
 0x135   : > { %7352 = vmatmul.mubr.bf16.gmra.mxu0 %v8873_v13  ;;  %v8967_v42 = vcombine.low %v3307_v18, %v3317_v44  ;;  %v3326_v35 = vrot.slane %v3325_v15, 4  ;;  %v3336_v25 = vrot.slane %v3335_v45, 4  ;;  %v3354_v7 = vrot.slane %v3352_v6, 5  ;;  %v3713_v18 = vld [vmem:[#allocation2 + $0x18] sm:$0xe]  ;;  %v10494_v6 = vld [vmem:[#allocation8_spill] sm:$0xff] }
 0x136   : > { %7374 = vmatpush3.bf16.msra.mxu1 %v7649_v10  ;;  %7355 = vmatprep.mubr.bf16.mxu0 %v8886_v55  ;;  %v3349_v40 = vor.u32 %v3348_v3, %v3345_v48  ;;  %v3358_v33 = vrot.slane %v3356_v39, 4  ;;  %v3362_v49 = vshll.u32 %v8956_v54, 16  ;;  %v6803_v10 = vunpack.c.l.bf16 %v6899_v9  ;;  %v8983_v15 = vld [vmem:[%s10433_s1 + $0x238] sm:$0xff]   ;;  %v10495_v39 = vld [vmem:[#allocation9_spill] sm:$0xff] }
 0x137   : > { %7375 = vmatprep.subr.bf16.mxu1 %v7653_v50  ;;  %v3331_v13 = vsel %vm7908_vm7, %v3326_v35, %v3330_v62  ;;  %v3341_v16 = vsel %vm7908_vm7, %v3336_v25, %v3340_v4  ;;  %7432 = vmatpush3.bf16.msra.mxu0 %v7671_v51  ;;  %v6804_v31 = vunpack.c.h.bf16 %v6899_v9  ;;  %v6449_v27 = vrot.slane %v3712_v20, 9  ;;  %v7734_v51 = vld [vmem:[%s10434_s2] ss:$0 sm:$0xff]  ;;  %v7661_v44 = vld [vmem:[%s10433_s1 + $0x158] sm:$0xff]  }
 0x138   : > { %v8978_v52 = vcombine.low %v3331_v13, %v3341_v16  ;;  %v3350_v58 = vrot.slane %v3349_v40, 4  ;;  %v3359_v55 = vor.u32 %v3358_v33, %v3354_v7  ;;  %v3364_v28 = vrot.slane %v3362_v49, 5  ;;  %7433 = vmatprep.subr.bf16.mxu0 %v7675_v43  ;;  %v7654_v13 = vld [vmem:[#allocation2 + $0x48] sm:$0xff]  }
 0x139   : > { %7296 = vmatmul.mubr.bf16.gmra.mxu1 %v7650_v59  ;;  %v434_v62 = vmul.f32 %v7734_v51, %v6803_v10  ;;  %v435_v45 = vmul.f32 %v7734_v51, %v6804_v31  ;;  %v10493_v59 = vld [vmem:[#allocation7_spill] sm:$0xff]  ;;  %v3781_v9 = vrot.slane %v10494_v6, 5  ;;  %v3785_v20 = vrot.slane %v10495_v39, 5  ;;  %v3714_v10 = vld [vmem:[#allocation2 + $0x24] sm:$0xe] }
 0x13a   : > { %7299 = vmatprep.mubr.bf16.mxu1 %v7652_v29  ;;  %7376 = vmatpush3.bf16.msra.mxu1 %v7653_v50  ;;  %v3778_v4 = vrot.slane %v10493_v59, 5  ;;  %v3355_v48 = vsel %vm7908_vm7, %v3350_v58, %v3354_v7  ;;  %v3360_v3 = vrot.slane %v3359_v55, 4  ;;  %v6450_v50 = vrot.slane %v3713_v18, 9  ;;  %v7735_v29 = vld [vmem:[%s10434_s2 + $0x1] ss:$0 sm:$0xff]  ;;  %v10497_v18 = vld [vmem:[#allocation10_spill] sm:$0xff] }
 0x13b   : > { %7377 = vmatprep.subr.bf16.mxu1 %v7657_v47  ;;  %v470_v35 = vadd.f32 %v7735_v29, %v434_v62  ;;  %v471_v25 = vadd.f32 %v7735_v29, %v435_v45  ;;  %7434 = vmatpush3.bf16.msra.mxu0 %v7675_v43  ;;  %v3787_v31 = vrot.slane %v3785_v20, 4  ;;  %v3788_v58 = vrot.slane %v10497_v18, 5  ;;  %v7656_v43 = vld [vmem:[#allocation2 + $0x54] sm:$0xff]   ;;  %v3715_v62 = vld [vmem:[#allocation2 + $0x30] sm:$0xe] }
 0x13c   : > { %v9001_v33 = vsel %vm8377_vm2, %v6449_v27, %v3778_v4  ;;  %v3780_v49 = vrot.slane %v3778_v4, 4  ;;  %v3365_v7 = vsel %vm7908_vm7, %v3360_v3, %v3364_v28  ;;  %v9007_v16 = vsel %vm8377_vm2, %v6450_v50, %v3785_v20  ;;  %7515 = vmatprep.subr.bf16.mxu0 %v8983_v15  ;;  %v7665_v45 = vld [vmem:[%s10433_s1 + $0x150] sm:$0xff]   ;;  %v3716_v29 = vld [vmem:[#allocation2 + $0x3c] sm:$0xe] }
 0x13d   : > { %7356 = vmatmul.mubr.bf16.gmra.mxu0 %v8910_v2  ;;  %v9012_v27 = vcombine.low %v3355_v48, %v3365_v7  ;;  %v502_v55 = vmax.f32 %v470_v35, 0.0  ;;  %v503_v51 = vmax.f32 %v471_v25, 0.0  ;;  %v9026_v2 = vsel %vm8377_vm2, %v3787_v31, %v3788_v58  ;;  %v1034_v58 = vld [vmem:[#allocation2 + $0xc0] sm:$0xf] }
 0x13e   : > { %7378 = vmatpush3.bf16.msra.mxu1 %v7657_v47  ;;  %v9016_v28 = vsel %vm8377_vm2, %v3780_v49, %v3781_v9  ;;  %7359 = vmatprep.mubr.bf16.mxu0 %v8927_v41  ;;  %v6451_v59 = vrot.slane %v3714_v10, 9  ;;  %v3792_v4 = vrot.slane %v8690_v22, 5  ;;  %v6482_v48 = vcombine.low %v9007_v16, %v9026_v2  ;;  %v3717_v10 = vld [vmem:[#allocation2 + $0x48] sm:$0xe] }
 0x13f   : > { %7379 = vmatprep.subr.bf16.mxu1 %v7661_v44  ;;  %v6481_v47 = vcombine.low %v9001_v33, %v9016_v28  ;;  %v6707_v6 = vpack.c.bf16 %v502_v55, %v502_v55  ;;  %v6708_v9 = vpack.c.bf16 %v503_v51, %v503_v51  ;;  %v3795_v41 = vrot.slane %v8694_v61, 5  ;;  %v7669_v61 = vld [vmem:[%s10433_s1 + $0x148] sm:$0xff]   ;;  %v7658_v51 = vld [vmem:[#allocation2 + $0x60] sm:$0xff]   ;;  %v7682_v28 = vld [vmem:[%s10433_s1 + $0x1f0] sm:$0xff]  }
 0x140   : > { %v9034_v3 = vsel %vm8377_vm2, %v6451_v59, %v3792_v4  ;;  %v3794_v50 = vrot.slane %v3792_v4, 4  ;;  %v6452_v39 = vrot.slane %v3715_v62, 9  ;;  %v3799_v20 = vrot.slane %v8713_v14, 5  ;;  %v1038_v62 = vld [vmem:[#allocation2 + $0xc8] sm:$0x1] }
 0x141   : > { %7300 = vmatmul.mubr.bf16.gmra.mxu1 %v7654_v13  ;;  %v859_v22 = vshrl.u32 %v6707_v6, 16  ;;  %v862_v35 = vshll.u32 %v6707_v6, 16  ;;  %v867_v25 = vshrl.u32 %v6708_v9, 16  ;;  %v870_v49 = vshll.u32 %v6708_v9, 16  ;;  %v7686_v16 = vld [vmem:[%s10433_s1 + $0x1e8] sm:$0xff]  }
 0x142   : > { %7303 = vmatprep.mubr.bf16.mxu1 %v7656_v43  ;;  %7380 = vmatpush3.bf16.msra.mxu1 %v7661_v44  ;;  %v9042_v13 = vsel %vm8377_vm2, %v3794_v50, %v3795_v41  ;;  %v9046_v14 = vsel %vm8377_vm2, %v6452_v39, %v3799_v20  ;;  %v3801_v7 = vrot.slane %v3799_v20, 4  ;;  %v3802_v44 = vrot.slane %v8727_v60, 5  ;;  %v7660_v41 = vld [vmem:[#allocation2 + $0x6c] sm:$0xff]  }
 0x143   : > { %7381 = vmatprep.subr.bf16.mxu1 %v7665_v45  ;;  %v861_v31 = vrot.slane %v859_v22, 7  ;;  %v869_v18 = vrot.slane %v867_v25, 7  ;;  %v6483_v43 = vcombine.low %v9034_v3, %v9042_v13  ;;  %v6453_v55 = vrot.slane %v3716_v29, 9  ;;  %v3718_v29 = vld [vmem:[#allocation2 + $0x54] sm:$0xe]  ;;  %v7673_v22 = vld [vmem:[%s10433_s1 + $0x140] sm:$0xff]  }
 0x144   : > { %v9053_v59 = vsel %vm8377_vm2, %v3801_v7, %v3802_v44  ;;  %v3806_v4 = vrot.slane %v8732_v30, 5  ;;  %v3809_v6 = vrot.slane %v8748_v12, 5  ;;  %v6454_v9 = vrot.slane %v3717_v10, 9 }
 0x145   : > { %7360 = vmatmul.mubr.bf16.gmra.mxu0 %v8945_v8  ;;  %v864_v60 = vor.u32 %v862_v35, %v861_v31  ;;  %v865_v50 = vrot.slane %v861_v31, 4  ;;  %v872_v39 = vor.u32 %v870_v49, %v869_v18  ;;  %v874_v20 = vrot.slane %v869_v18, 4  ;;  %v3719_v35 = vld [vmem:[#allocation2 + $0x60] sm:$0xe]  ;;  %v3720_v18 = vld [vmem:[#allocation2 + $0x6c] sm:$0xe] }
 0x146   : > { %7382 = vmatpush3.bf16.msra.mxu1 %v7665_v45  ;;  %7363 = vmatprep.mubr.bf16.mxu0 %v8967_v42  ;;  %v6484_v30 = vcombine.low %v9046_v14, %v9053_v59  ;;  %v9066_v12 = vsel %vm8377_vm2, %v6453_v55, %v3806_v4  ;;  %v3808_v8 = vrot.slane %v3806_v4, 4  ;;  %v3813_v45 = vrot.slane %v8757_v0, 5  ;;  %v7707_v14 = vld [vmem:[%s10433_s1 + $0x200] sm:$0xff]  }
 0x147   : > { %7383 = vmatprep.subr.bf16.mxu1 %v7669_v61  ;;  %v873_v49 = vsel %vm7944_vm13, %v865_v50, %v872_v39  ;;  %v1035_v10 = vsel %vm7950_vm14, %v864_v60, %v1034_v58  ;;  %v1039_v44 = vsel %vm7956_vm15, %v874_v20, %v1038_v62  ;;  %v3816_v31 = vrot.slane %v8771_v34, 5  ;;  %v3721_v50 = vld [vmem:[#allocation2 + $0x78] sm:$0xe]  ;;  %v4606_v34 = vld [vmem:[#allocation2 + $0x3c] sm:$0xf] }
 0x148   : > { %1036 = vst [vmem:[#allocation2 + $0xc0] sm:$0xf] %v1035_v10  ;;  %1037 = vst [vmem:[#allocation2 + $0xc4] sm:$0xf] %v873_v49  ;;  %v9078_v0 = vsel %vm8377_vm2, %v3808_v8, %v3809_v6  ;;  %v9082_v55 = vsel %vm8377_vm2, %v6454_v9, %v3813_v45  ;;  %v3815_v4 = vrot.slane %v3813_v45, 4  ;;  %v6455_v58 = vrot.slane %v3718_v29, 9 }
 0x149   : > { %7304 = vmatmul.mubr.bf16.gmra.mxu1 %v7658_v51  ;;  %1040 = vst [vmem:[#allocation2 + $0xc8] sm:$0x1] %v1039_v44  ;;  %v3820_v51 = vrot.slane %v8778_v26, 5  ;;  %v3823_v62 = vrot.slane %v8798_v56, 5  ;;  %v6456_v60 = vrot.slane %v3719_v35, 9  ;;  %v9091_v6 = vld [vmem:[%s10433_s1 + $0x1f8] sm:$0xff]  }
 0x14a   : > { %7307 = vmatprep.mubr.bf16.mxu1 %v7660_v41  ;;  %7384 = vmatpush3.bf16.msra.mxu1 %v7669_v61  ;;  %v9095_v9 = vsel %vm8377_vm2, %v3815_v4, %v3816_v31  ;;  %v3827_v61 = vrot.slane %v8804_v63, 5  ;;  %v3830_v41 = vrot.slane %v8807_v1, 5  ;;  %v6457_v39 = vrot.slane %v3720_v18, 9  ;;  %v3722_v8 = vld [vmem:[#allocation2 + $0x84] sm:$0xe]  ;;  %v7662_v45 = vld [vmem:[#allocation2 + $0x78] sm:$0xff]  }
 0x14b   : > { %7385 = vmatprep.subr.bf16.mxu1 %v7673_v22  ;;  %v9103_v56 = vsel %vm8377_vm2, %v6455_v58, %v3820_v51  ;;  %v3822_v20 = vrot.slane %v3820_v51, 4  ;;  %v3834_v29 = vrot.slane %v8819_v19, 5  ;;  %v3837_v1 = vrot.slane %v8824_v53, 5  ;;  %v7664_v49 = vld [vmem:[#allocation2 + $0x84] sm:$0xff]  }
 0x14c   : > { %v9108_v35 = vsel %vm8377_vm2, %v6456_v60, %v3827_v61  ;;  %v3829_v63 = vrot.slane %v3827_v61, 4  ;;  %v6458_v25 = vrot.slane %v3721_v50, 9  ;;  %v3841_v7 = vrot.slane %v8839_v24, 5  ;;  %v3723_v50 = vld [vmem:[#allocation2 + $0x90] sm:$0xe] }
 0x14d   : > { %7364 = vmatmul.mubr.bf16.gmra.mxu0 %v8978_v52  ;;  %v9114_v42 = vsel %vm8377_vm2, %v3822_v20, %v3823_v62  ;;  %v9118_v19 = vsel %vm8377_vm2, %v6457_v39, %v3834_v29  ;;  %v3836_v10 = vrot.slane %v3834_v29, 4  ;;  %v6459_v44 = vrot.slane %v3722_v8, 9  ;;  %v3724_v61 = vld [vmem:[#allocation2 + $0x9c] sm:$0xe]  ;;  %v7666_v24 = vld [vmem:[#allocation2 + $0x90] sm:$0xff]  }
 0x14e   : > { %7386 = vmatpush3.bf16.msra.mxu1 %v7673_v22  ;;  %7367 = vmatprep.mubr.bf16.mxu0 %v9012_v27  ;;  %v9127_v52 = vsel %vm8377_vm2, %v3829_v63, %v3830_v41  ;;  %v3844_v22 = vrot.slane %v8848_v32, 5  ;;  %v9142_v58 = vsel %vm8377_vm2, %v6458_v25, %v3841_v7  ;;  %v3843_v20 = vrot.slane %v3841_v7, 4 }
 0x14f   : > { %7467 = vmatprep.subr.bf16.mxu1 %v9091_v6  ;;  %v3003_v31 = vld [vmem:[#allocation2 + $0xc0] sm:$0xf]  ;;  %v9130_v18 = vld [vmem:[#allocation2 + $0xc4] sm:$0xf]  ;;  %v9138_v27 = vsel %vm8377_vm2, %v3836_v10, %v3837_v1  ;;  %v3848_v29 = vrot.slane %v8859_v23, 5  ;;  %v3851_v7 = vrot.slane %v8868_v37, 5 }
 0x150   : > { %v9132_v4 = vld [vmem:[#allocation2 + $0xc8] sm:$0x1]  ;;  %v3367_v51 = vshrl.u32 %v3003_v31, 16  ;;  %v3370_v32 = vshll.u32 %v3003_v31, 16  ;;  %v3376_v62 = vshll.u32 %v9130_v18, 16  ;;  %v3380_v60 = vshrl.u32 %v9130_v18, 16 }
 0x151   : > { %7308 = vmatmul.mubr.bf16.gmra.mxu1 %v7662_v45  ;;  %v3386_v41 = vshll.u32 %v9132_v4, 16  ;;  %v9152_v10 = vsel %vm8377_vm2, %v3843_v20, %v3844_v22  ;;  %v3850_v31 = vrot.slane %v3848_v29, 4  ;;  %v3858_v22 = vrot.slane %v8892_v17, 5 }
 0x152   : > { %7311 = vmatprep.mubr.bf16.mxu1 %v7664_v49  ;;  %v3369_v8 = vrot.slane %v3367_v51, 4  ;;  %v3372_v63 = vrot.slane %v3370_v32, 5  ;;  %v3378_v45 = vrot.slane %v3376_v62, 5  ;;  %v3382_v1 = vrot.slane %v3380_v60, 4  ;;  %v7668_v51 = vld [vmem:[#allocation2 + $0x9c] sm:$0xff]  }
 0x153   : > { %v3388_v25 = vrot.slane %v3386_v41, 5  ;;  %v9156_v49 = vsel %vm8377_vm2, %v6459_v44, %v3848_v29  ;;  %v6460_v32 = vrot.slane %v3723_v50, 9  ;;  %v3855_v62 = vrot.slane %v8888_v21, 5  ;;  %v3726_v50 = vld [vmem:[#allocation2 + $0xb4] sm:$0xe] }
 0x154   : > { %v3373_v53 = vor.u32 %v3372_v63, %v3369_v8  ;;  %v3383_v39 = vor.u32 %v3382_v1, %v3378_v45  ;;  %v6461_v60 = vrot.slane %v3724_v61, 9  ;;  %v9165_v44 = vsel %vm8377_vm2, %v3850_v31, %v3851_v7  ;;  %v3725_v8 = vld [vmem:[#allocation2 + $0xa8] sm:$0xe] }
 0x155   : > { %v3862_v29 = vrot.slane %v8905_v11, 5  ;;  %v9172_v37 = vsel %vm8377_vm2, %v6460_v32, %v3855_v62  ;;  %v3857_v21 = vrot.slane %v3855_v62, 4  ;;  %v3865_v17 = vrot.slane %v8915_v46, 5  ;;  %v7676_v11 = vld [vmem:[#allocation2 + $0x18] sm:$0xff]   ;;  %v3727_v32 = vld [vmem:[#allocation2 + $0xc0] sm:$0xe] }
 0x156   : > { %v3374_v41 = vrot.slane %v3373_v53, 4  ;;  %v3384_v20 = vrot.slane %v3383_v39, 4  ;;  %v6462_v46 = vrot.slane %v3725_v8, 9  ;;  %v3872_v62 = vrot.slane %v8936_v38, 5 }
 0x157   : > { %v9181_v39 = vsel %vm8377_vm2, %v6461_v60, %v3862_v29  ;;  %v3864_v1 = vrot.slane %v3862_v29, 4  ;;  %v9185_v7 = vsel %vm8377_vm2, %v3857_v21, %v3858_v22  ;;  %v6463_v60 = vrot.slane %v3726_v50, 9 }
 0x158   : > { %v3379_v53 = vsel %vm7908_vm7, %v3374_v41, %v3378_v45  ;;  %v3389_v61 = vsel %vm7908_vm7, %v3384_v20, %v3388_v25  ;;  %v3876_v41 = vrot.slane %v8947_v57, 5  ;;  %v7670_v20 = vld [vmem:[#allocation2 + $0xa8] sm:$0xff]   ;;  %v3879_v29 = vrot.slane %v8956_v54, 5  ;;  %v4600_v57 = vld [vmem:[#allocation2 + $0x24] sm:$0xf] }
 0x159   : > { %7312 = vmatmul.mubr.bf16.gmra.mxu1 %v7666_v24  ;;  %v6440_v31 = vcombine.low %v3379_v53, %v3389_v61  ;;  %v3869_v24 = vrot.slane %v8924_v5, 5  ;;  %v9192_v25 = vsel %vm8377_vm2, %v3864_v1, %v3865_v17  ;;  %v6464_v8 = vrot.slane %v3727_v32, 9  ;;  %v7672_v17 = vld [vmem:[#allocation2 + $0xb4] sm:$0xff]  }
 0x15a   : > { %7315 = vmatprep.mubr.bf16.mxu1 %v7668_v51  ;;  %v3883_v21 = vrot.slane %v9130_v18, 5  ;;  %v3886_v38 = vrot.slane %v9132_v4, 5  ;;  %v9211_v53 = vsel %vm8377_vm2, %v6463_v60, %v3876_v41  ;;  %v3878_v61 = vrot.slane %v3876_v41, 4  ;;  %v7680_v1 = vld [vmem:[#allocation2 + $0x30] sm:$0xff]   ;;  %v7687_v60 = vld [vmem:[%s10433_s1 + $0x228] sm:$0xff]   ;;  %v7681_v41 = vld [vmem:[#allocation2 + $0x3c] sm:$0xff]  }
 0x15b   : > { %7368 = vmatmul.mubr.bf16.gmra.mxu0 %v6440_v31  ;;  %v9199_v22 = vsel %vm8377_vm2, %v6462_v46, %v3869_v24  ;;  %v3871_v5 = vrot.slane %v3869_v24, 4  ;;  %v7683_v24 = vld [vmem:[%s10433_s1 + $0x230] sm:$0xff]   ;;  %v9271_v31 = vld [vmem:[#allocation2 + $0x28] sm:$0xf]  ;;  %v9289_v51 = vld [vmem:[#allocation2 + $0x2c] sm:$0x1] }
 0x15c   : > { %7435 = vmatprep.mubr.bf16.mxu0 %v7676_v11  ;;  %v9217_v54 = vsel %vm8377_vm2, %v6464_v8, %v3883_v21  ;;  %v3885_v18 = vrot.slane %v3883_v21, 4  ;;  %v7677_v11 = vld [vmem:[#allocation2 + $0x24] sm:$0xff]   ;;  %v9221_v4 = vsel %vm8377_vm2, %v3878_v61, %v3879_v29  ;;  %v4597_v29 = vld [vmem:[#allocation2 + $0x18] sm:$0xf]  ;;  %v4598_v21 = vld [vmem:[#allocation2 + $0x1c] sm:$0xf] }
 0x15d   : > { %v9207_v50 = vsel %vm8377_vm2, %v3871_v5, %v3872_v62  ;;  %10501 = vst [vmem:[#allocation7_spill] sm:$0xff] %v9217_v54  ;;  %v7674_v62 = vld [vmem:[#allocation2 + $0xc0] sm:$0xff]   ;;  %v9238_v5 = vpop.f32.mrf.mxu0  ;;  %v5417_v61 = vrot.slane %v4598_v21, 5  ;;  %v4683_v45 = vshrl.u32 %v9271_v31, 16  ;;  %v5427_v26 = vrot.slane %v9289_v51, 5 }
 0x15e   : > { %v9227_v46 = vsel %vm8377_vm2, %v3885_v18, %v3886_v38  ;;  %10503 = vst [vmem:[#allocation9_spill] sm:$0xff] %v9238_v5  ;;  %v9248_v38 = vld [vmem:[#allocation2 + $0x20] sm:$0x1]  ;;  %v4646_v18 = vshrl.u32 %v4597_v29, 16  ;;  %v7696_v5 = vld [vmem:[#allocation2 + $0x90] sm:$0xff]  }
 0x15f   : > { %10502 = vst [vmem:[#allocation8_spill] sm:$0xff] %v9227_v46  ;;  %v9246_v8 = vpop.f32.mrf.mxu0 }
 0x160   : > { %10504 = vst [vmem:[#allocation6_spill] sm:$0xff] %v9246_v8  ;;  %v4648_v32 = vrot.slane %v4646_v18, 4  ;;  %v7699_v18 = vld [vmem:[%s10433_s1 + $0x210] sm:$0xff]   ;;  %v4685_v8 = vrot.slane %v4683_v45, 4  ;;  %v7694_v45 = vld [vmem:[%s10433_s1 + $0x1d8] sm:$0xff]  }
 0x161   : > { %7316 = vmatmul.mubr.bf16.gmra.mxu1 %v7670_v20  ;;  %v7684_v20 = vld [vmem:[#allocation2 + $0x48] sm:$0xff]   ;;  %v9250_v33 = vpop.f32.mrf.mxu0 }
 0x162   : > { %7319 = vmatprep.mubr.bf16.mxu1 %v7672_v17  ;;  %v5351_v17 = vld [vmem:[#allocation2 + $0x18] sm:$0xe]  ;;  %10505 = vst [vmem:[#allocation10_spill] sm:$0xff] %v9250_v33 }
 0x163   : > { %7436 = vmatmul.mubr.bf16.vlgmr.msra.gmra.mxu0 %v7677_v11  ;;  %v4649_v11 = vshll.u32 %v4597_v29, 16 }
 0x164   : > { %7516 = vmatpush3.bf16.msra.mxu0 %v8983_v15  ;;  %7439 = vmatprep.mubr.bf16.mxu0 %v7680_v1  ;;  %v7691_v15 = vld [vmem:[%s10433_s1 + $0x220] sm:$0xff]   ;;  %v6585_v1 = vrot.slane %v5351_v17, 9  ;;  %v9266_v17 = vpop.f32.mrf.mxu0 }
 0x165   : > { %7517 = vmatprep.subr.bf16.mxu0 %v7683_v24  ;;  %v4651_v29 = vrot.slane %v4649_v11, 5  ;;  %10506 = vst [vmem:[#allocation3_spill] sm:$0xff] %v9266_v17  ;;  %v4659_v11 = vshrl.u32 %v4598_v21, 16 }
 0x166   : > { %v9278_v2 = vsel %vm8377_vm2, %v6585_v1, %v5417_v61  ;;  %v4673_v1 = vshll.u32 %v4600_v57, 16 }
 0x167   : > { %v4652_v13 = vor.u32 %v4651_v29, %v4648_v32  ;;  %v4661_v32 = vrot.slane %v4659_v11, 4  ;;  %v7692_v11 = vld [vmem:[#allocation2 + $0x78] sm:$0xff]  }
 0x168   : > { %7518 = vmatpush3.bf16.msra.mxu0 %v7683_v24  ;;  %v5420_v24 = vrot.slane %v9248_v38, 5  ;;  %v4675_v17 = vrot.slane %v4673_v1, 5  ;;  %v4721_v1 = vshll.u32 %v4606_v34, 16 }
 0x169   : > { %7320 = vmatmul.mubr.bf16.gmra.mxu1 %v7674_v62  ;;  %7519 = vmatprep.subr.bf16.mxu0 %v7687_v60  ;;  %v7685_v62 = vld [vmem:[#allocation2 + $0x54] sm:$0xff]  }
 0x16a   : > { %7387 = vmatprep.mubr.bf16.mxu1 %v6481_v47  ;;  %v7695_v47 = vld [vmem:[%s10433_s1 + $0x218] sm:$0xff]  }
 0x16b   : > { %7440 = vmatmul.mubr.bf16.gmra.mxu0 %v7681_v41  ;;  %v5419_v41 = vrot.slane %v5417_v61, 4  ;;  %v4670_v61 = vshrl.u32 %v4600_v57, 16  ;;  %v7703_v57 = vld [vmem:[%s10433_s1 + $0x208] sm:$0xff]  }
 0x16c   : > { %7443 = vmatprep.mubr.bf16.mxu0 %v7684_v20  ;;  %7520 = vmatpush3.bf16.msra.mxu0 %v7687_v60  ;;  %v4655_v20 = vshll.u32 %v4598_v21, 16  ;;  %v7688_v60 = vld [vmem:[#allocation2 + $0x60] sm:$0xff]   ;;  %v9287_v21 = vld [vmem:[#allocation2 + $0x34] sm:$0xf] }
 0x16d   : > { %7521 = vmatprep.subr.bf16.mxu0 %v7691_v15  ;;  %v9282_v3 = vsel %vm8377_vm2, %v5419_v41, %v5420_v24  ;;  %v9293_v24 = vpop.f32.mrf.mxu0  ;;  %v4707_v63 = vshrl.u32 %v9287_v21, 16 }
 0x16e   : > { %10507 = vst [vmem:[#allocation4_spill] sm:$0xff] %v9293_v24  ;;  %v4672_v24 = vrot.slane %v4670_v61, 4 }
 0x170   : > { %7522 = vmatpush3.bf16.msra.mxu0 %v7691_v15  ;;  %v5352_v15 = vld [vmem:[#allocation2 + $0x24] sm:$0xe] }
 0x171   : > { %7388 = vmatmul.mubr.bf16.vlgmr.msra.gmra.mxu1 %v6482_v48  ;;  %7523 = vmatprep.subr.bf16.mxu0 %v7695_v47  ;;  %v4603_v48 = vld [vmem:[#allocation2 + $0x30] sm:$0xf] }
 0x172   : > { %7468 = vmatpush3.bf16.msra.mxu1 %v9091_v6  ;;  %7391 = vmatprep.mubr.bf16.mxu1 %v6483_v43  ;;  %v9284_v43 = vrot.slane %v4655_v20, 5  ;;  %v4665_v6 = vshll.u32 %v9248_v38, 16  ;;  %v5424_v38 = vrot.slane %v9271_v31, 5  ;;  %v4694_v41 = vshrl.u32 %v4603_v48, 16  ;;  %v7689_v20 = vld [vmem:[#allocation2 + $0x6c] sm:$0xff]  }
 0x173   : > { %7469 = vmatprep.subr.bf16.mxu1 %v7682_v28  ;;  %7444 = vmatmul.mubr.bf16.gmra.mxu0 %v7685_v62  ;;  %v4679_v62 = vshll.u32 %v9271_v31, 16  ;;  %v4697_v29 = vshll.u32 %v4603_v48, 16  ;;  %v9306_v48 = vrot.slane %v4652_v13, 4  ;;  %v9318_v31 = vld [vmem:[#allocation2 + $0x40] sm:$0xf]  ;;  %v10509_v13 = vcombine.low %v9066_v12, %v9078_v0 }
 0x174   : > { %7447 = vmatprep.mubr.bf16.mxu0 %v7688_v60  ;;  %7524 = vmatpush3.bf16.msra.mxu0 %v7695_v47  ;;  %v7690_v47 = vld [vmem:[%s10433_s1 + $0x1e0] sm:$0xff]   ;;  %v6586_v60 = vrot.slane %v5352_v15, 9  ;;  %v9308_v23 = vrot.slane %v4665_v6, 5  ;;  %v9314_v15 = vpop.f32.mrf.mxu1  ;;  %v9323_v6 = vpop.f32.mrf.mxu0  ;;  %v4662_v59 = vor.u32 %v4661_v32, %v9284_v43  ;;  %v4709_v0 = vrot.slane %v4707_v63, 4 }
 0x175   : > { %7525 = vmatprep.subr.bf16.mxu0 %v7699_v18  ;;  %10508 = vst [vmem:[#allocation5_spill] sm:$0xff] %v9314_v15  ;;  %v9316_v33 = vrot.slane %v4679_v62, 5  ;;  %10510 = vst [vmem:[#allocation11_spill] sm:$0xff] %v9323_v6  ;;  %v4699_v61 = vrot.slane %v4697_v29, 5  ;;  %v4689_v32 = vshll.u32 %v9289_v51, 16  ;;  %v4727_v29 = vshll.u32 %v9318_v31, 16 }
 0x176   : > { %7470 = vmatpush3.bf16.msra.mxu1 %v7682_v28  ;;  %v4703_v28 = vshll.u32 %v9287_v21, 16  ;;  %v9336_v62 = vsel %vm8377_vm2, %v6586_v60, %v5424_v38  ;;  %v9343_v15 = vpop.f32.mrf.mxu1  ;;  %v4676_v63 = vor.u32 %v4675_v17, %v4672_v24  ;;  %v5431_v51 = vrot.slane %v9287_v21, 5  ;;  %v9351_v60 = vpop.f32.mrf.mxu0  ;;  %v5354_v24 = vld [vmem:[#allocation2 + $0x3c] sm:$0xe] }
 0x177   : > { %7471 = vmatprep.subr.bf16.mxu1 %v7686_v16  ;;  %10511 = vst [vmem:[#allocation12_spill] sm:$0xff] %v9343_v15  ;;  %10512 = vst [vmem:[#allocation13_spill] sm:$0xff] %v9351_v60  ;;  %v4608_v15 = vld [vmem:[#allocation2 + $0x44] sm:$0x1]  ;;  %v9365_v6 = vrot.slane %v4689_v32, 5 }
 0x178   : > { %7526 = vmatpush3.bf16.msra.mxu0 %v7699_v18  ;;  %v4696_v18 = vrot.slane %v4694_v41, 4  ;;  %v9332_v12 = vrot.slane %v4703_v28, 5  ;;  %v9339_v41 = vld [vmem:[#allocation2 + $0x38] sm:$0x1]  ;;  %v9353_v28 = vrot.slane %v4662_v59, 4  ;;  %v4723_v59 = vrot.slane %v4721_v1, 5  ;;  %v9378_v32 = vpop.f32.mrf.mxu0 }
 0x179   : > { %7392 = vmatmul.mubr.bf16.gmra.mxu1 %v6484_v30  ;;  %v5426_v30 = vrot.slane %v5424_v38, 4  ;;  %7527 = vmatprep.subr.bf16.mxu0 %v7703_v57  ;;  %v4686_v38 = vor.u32 %v4685_v8, %v9316_v33  ;;  %v7698_v8 = vld [vmem:[%s10433_s1 + $0x1d0] sm:$0xff]   ;;  %v4713_v21 = vshll.u32 %v9339_v41, 16  ;;  %v7693_v60 = vld [vmem:[#allocation2 + $0x84] sm:$0xff]   ;;  %v5433_v54 = vrot.slane %v5431_v51, 4 }
 0x17a   : > { %7395 = vmatprep.mubr.bf16.mxu1 %v10509_v13  ;;  %7472 = vmatpush3.bf16.msra.mxu1 %v7686_v16  ;;  %v4718_v16 = vshrl.u32 %v4606_v34, 16  ;;  %v4731_v13 = vshrl.u32 %v9318_v31, 16  ;;  %v5438_v34 = vrot.slane %v9318_v31, 5  ;;  %v4710_v17 = vor.u32 %v4709_v0, %v9332_v12 }
 0x17b   : > { %7473 = vmatprep.subr.bf16.mxu1 %v7690_v47  ;;  %7448 = vmatmul.mubr.bf16.gmra.mxu0 %v7689_v20  ;;  %v5353_v20 = vld [vmem:[#allocation2 + $0x30] sm:$0xe]  ;;  %v10513_v31 = vcombine.low %v9082_v55, %v9095_v9  ;;  %v4677_v0 = vrot.slane %v4676_v63, 4  ;;  %v4687_v46 = vrot.slane %v4686_v38, 4  ;;  %v10515_v1 = vcombine.low %v9103_v56, %v9114_v42 }
 0x17c   : > { %7451 = vmatprep.mubr.bf16.mxu0 %v7692_v11  ;;  %7528 = vmatpush3.bf16.msra.mxu0 %v7703_v57  ;;  %v9357_v57 = vsel %vm8377_vm2, %v5426_v30, %v5427_v26  ;;  %v4700_v11 = vor.u32 %v4699_v61, %v4696_v18  ;;  %v6587_v26 = vrot.slane %v5353_v20, 9  ;;  %v9367_v30 = vrot.slane %v4727_v29, 5  ;;  %v9372_v61 = vpop.f32.mrf.mxu1  ;;  %v4609_v20 = vld [vmem:[#allocation2 + $0x48] sm:$0xf] }
 0x17d   : > { %7529 = vmatprep.subr.bf16.mxu0 %v7707_v14  ;;  %v4733_v18 = vrot.slane %v4731_v13, 4  ;;  %10514 = vst [vmem:[#allocation14_spill] sm:$0xff] %v9372_v61  ;;  %v6588_v13 = vrot.slane %v5354_v24, 9  ;;  %v5440_v55 = vrot.slane %v5438_v34, 4  ;;  %v5441_v9 = vrot.slane %v4608_v15, 5 }
 0x17e   : > { %7474 = vmatpush3.bf16.msra.mxu1 %v7690_v47  ;;  %v4720_v47 = vrot.slane %v4718_v16, 4  ;;  %v5434_v16 = vrot.slane %v9339_v41, 5  ;;  %v4701_v29 = vrot.slane %v4700_v11, 4  ;;  %v4711_v63 = vrot.slane %v4710_v17, 4  ;;  %v4610_v61 = vld [vmem:[#allocation2 + $0x4c] sm:$0xf]  ;;  %v9403_v17 = vpop.f32.mrf.mxu0 }
 0x17f   : > { %7475 = vmatprep.subr.bf16.mxu1 %v7694_v45  ;;  %v4715_v38 = vrot.slane %v4713_v21, 5  ;;  %v4668_v56 = vsel %vm7908_vm7, %v9353_v28, %v9308_v23  ;;  %v9389_v42 = vsel %vm8377_vm2, %v6587_v26, %v5431_v51  ;;  %v5355_v11 = vld [vmem:[#allocation2 + $0x48] sm:$0xe]  ;;  %v5445_v24 = vrot.slane %v4610_v61, 5  ;;  %v9401_v23 = vld [vmem:[#allocation2 + $0x50] sm:$0x1] }
 0x180   : > { %7530 = vmatpush3.bf16.msra.mxu0 %v7707_v14  ;;  %v7702_v14 = vld [vmem:[%s10433_s1 + $0x1c8] sm:$0xff]   ;;  %v4724_v41 = vor.u32 %v4723_v59, %v4720_v47  ;;  %v4742_v28 = vshrl.u32 %v4609_v20, 16  ;;  %v4745_v51 = vshll.u32 %v4609_v20, 16  ;;  %v4692_v21 = vsel %vm7908_vm7, %v4687_v46, %v9365_v6 }
 0x181   : > { %7396 = vmatmul.mubr.bf16.gmra.mxu1 %v10513_v31  ;;  %v4737_v31 = vshll.u32 %v4608_v15, 16  ;;  %v4682_v15 = vsel %vm7908_vm7, %v4677_v0, %v9316_v33  ;;  %v9413_v33 = vsel %vm8377_vm2, %v6588_v13, %v5438_v34  ;;  %v4716_v46 = vsel %vm7908_vm7, %v4711_v63, %v4715_v38  ;;  %v7700_v13 = vld [vmem:[#allocation2 + $0xa8] sm:$0xff]  }
 0x182   : > { %7399 = vmatprep.mubr.bf16.mxu1 %v10515_v1  ;;  %7476 = vmatpush3.bf16.msra.mxu1 %v7694_v45  ;;  %v4734_v45 = vor.u32 %v4733_v18, %v9367_v30  ;;  %v9392_v1 = vpop.f32.mrf.mxu1  ;;  %v4725_v6 = vrot.slane %v4724_v41, 4  ;;  %v6589_v59 = vrot.slane %v5355_v11, 9  ;;  %v5447_v18 = vrot.slane %v5445_v24, 4  ;;  %v9435_v41 = vpop.f32.mrf.mxu0 }
 0x183   : > { %7477 = vmatprep.subr.bf16.mxu1 %v7698_v8  ;;  %7452 = vmatmul.mubr.bf16.gmra.mxu0 %v7693_v60  ;;  %10516 = vst [vmem:[#allocation15_spill] sm:$0xff] %v9392_v1  ;;  %v9399_v60 = vsel %vm8377_vm2, %v5433_v54, %v5434_v16  ;;  %v9417_v54 = vsel %vm8377_vm2, %v5440_v55, %v5441_v9  ;;  %v4739_v47 = vrot.slane %v4737_v31, 5  ;;  %v5448_v34 = vrot.slane %v9401_v23, 5 }
 0x184   : > { %7455 = vmatprep.mubr.bf16.mxu0 %v7696_v5  ;;  %v4706_v5 = vsel %vm7908_vm7, %v4701_v29, %v9332_v12  ;;  %v7697_v12 = vld [vmem:[#allocation2 + $0x9c] sm:$0xff]   ;;  %v4735_v26 = vrot.slane %v4734_v45, 4  ;;  %v4751_v0 = vshll.u32 %v4610_v61, 16  ;;  %v10517_v16 = vcombine.low %v9108_v35, %v9127_v52  ;;  %v9428_v29 = vpop.f32.mrf.mxu1  ;;  %10520 = vst [vmem:[#allocation17_spill] sm:$0xff] %v9435_v41 }
 0x185   : > { %10518 = vst [vmem:[#allocation16_spill] sm:$0xff] %v9428_v29  ;;  %v4744_v9 = vrot.slane %v4742_v28, 4  ;;  %v4747_v20 = vrot.slane %v4745_v51, 5  ;;  %v4755_v63 = vshrl.u32 %v4610_v61, 16  ;;  %v10519_v38 = vcombine.low %v9118_v19, %v9138_v27  ;;  %v4612_v61 = vld [vmem:[#allocation2 + $0x54] sm:$0xf] }
 0x186   : > { %7478 = vmatpush3.bf16.msra.mxu1 %v7698_v8  ;;  %v7706_v8 = vld [vmem:[%s10433_s1 + $0x1c0] sm:$0xff]   ;;  %v10521_v35 = vsel %vm7908_vm7, %v9306_v48, %v9284_v43  ;;  %v9444_v31 = vcombine.low %v4682_v15, %v4692_v21  ;;  %v9448_v11 = vcombine.low %v4706_v5, %v4716_v46  ;;  %v4730_v27 = vsel %vm7908_vm7, %v4725_v6, %v9367_v30  ;;  %v4613_v48 = vld [vmem:[#allocation2 + $0x58] sm:$0xf]  ;;  %v9470_v5 = vpop.f32.mrf.mxu1  ;;  %v9472_v6 = vld [vmem:[#allocation2 + $0x5c] sm:$0x1] }
 0x187   : > { %7479 = vmatprep.subr.bf16.mxu1 %v7702_v14  ;;  %v9442_v52 = vcombine.low %v10521_v35, %v4668_v56  ;;  %v9457_v43 = vsel %vm8377_vm2, %v6589_v59, %v5445_v24  ;;  %v4740_v56 = vsel %vm7908_vm7, %v4735_v26, %v4739_v47  ;;  %v9463_v15 = vsel %vm8377_vm2, %v5447_v18, %v5448_v34  ;;  %v9468_v21 = vld [vmem:[#allocation2 + $0x64] sm:$0xf]  ;;  %v4615_v30 = vld [vmem:[#allocation2 + $0x60] sm:$0xf] }
 0x188   : > { %v9465_v28 = vrot.slane %v4751_v0, 5  ;;  %v4761_v51 = vshll.u32 %v9401_v23, 16  ;;  %10522 = vst [vmem:[#allocation18_spill] sm:$0xff] %v9470_v5  ;;  %v4748_v24 = vor.u32 %v4747_v20, %v4744_v9  ;;  %v4757_v46 = vrot.slane %v4755_v63, 4  ;;  %v4618_v20 = vld [vmem:[#allocation2 + $0x6c] sm:$0xf] }
 0x189   : > { %7400 = vmatmul.mubr.bf16.gmra.mxu1 %v10517_v16  ;;  %v4766_v59 = vshrl.u32 %v4612_v61, 16  ;;  %v4769_v47 = vshll.u32 %v4612_v61, 16  ;;  %v5452_v18 = vrot.slane %v4613_v48, 5  ;;  %v4775_v34 = vshll.u32 %v4613_v48, 16  ;;  %v9485_v61 = vld [vmem:[#allocation2 + $0x70] sm:$0xf] }
 0x18a   : > { %7403 = vmatprep.mubr.bf16.mxu1 %v10519_v38  ;;  %7480 = vmatpush3.bf16.msra.mxu1 %v7702_v14  ;;  %v5356_v14 = vld [vmem:[#allocation2 + $0x54] sm:$0xe]  ;;  %v4779_v0 = vshrl.u32 %v4613_v48, 16  ;;  %v4790_v23 = vshrl.u32 %v4615_v30, 16  ;;  %v4793_v16 = vshll.u32 %v4615_v30, 16  ;;  %v4799_v38 = vshll.u32 %v9468_v21, 16 }
 0x18b   : > { %7481 = vmatprep.subr.bf16.mxu1 %v7706_v8  ;;  %7456 = vmatmul.mubr.bf16.gmra.mxu0 %v7697_v12  ;;  %v9474_v12 = vpop.f32.mrf.mxu0  ;;  %v6590_v26 = vrot.slane %v5356_v14, 9  ;;  %v4803_v35 = vshrl.u32 %v9468_v21, 16  ;;  %v9478_v9 = vcombine.low %v4730_v27, %v4740_v56  ;;  %v9482_v63 = vrot.slane %v4761_v51, 5  ;;  %v9490_v14 = vpop.f32.mrf.mxu1  ;;  %v7704_v30 = vld [vmem:[#allocation2 + $0xc0] sm:$0xff]  }
 0x18c   : > { %7459 = vmatprep.mubr.bf16.mxu0 %v7700_v13  ;;  %10523 = vst [vmem:[#allocation19_spill] sm:$0xff] %v9474_v12  ;;  %v7701_v13 = vld [vmem:[#allocation2 + $0xb4] sm:$0xff]   ;;  %v10524_v48 = vcombine.low %v9142_v58, %v9152_v10  ;;  %10525 = vst [vmem:[#allocation20_spill] sm:$0xff] %v9490_v14  ;;  %v9492_v19 = vrot.slane %v4748_v24, 4  ;;  %v4758_v27 = vor.u32 %v4757_v46, %v9465_v28  ;;  %v4768_v56 = vrot.slane %v4766_v59, 4 }
 0x18d   : > { %v4771_v45 = vrot.slane %v4769_v47, 5  ;;  %v10526_v51 = vcombine.low %v9156_v49, %v9165_v44  ;;  %v9498_v55 = vpop.f32.mrf.mxu0  ;;  %v9502_v58 = vsel %vm8377_vm2, %v6590_v26, %v5452_v18  ;;  %v5454_v10 = vrot.slane %v5452_v18, 4  ;;  %v9506_v14 = vld [vmem:[#allocation2 + $0x60] sm:$0xe]  ;;  %v4617_v49 = vld [vmem:[#allocation2 + $0x68] sm:$0x1]  ;;  %v9512_v1 = vpop.f32.mrf.mxu1 }
 0x18e   : > { %7482 = vmatpush3.bf16.msra.mxu1 %v7706_v8  ;;  %v5455_v8 = vrot.slane %v9472_v6, 5  ;;  %10527 = vst [vmem:[#allocation21_spill] sm:$0xff] %v9498_v55  ;;  %v4781_v24 = vrot.slane %v4779_v0, 4  ;;  %v4792_v46 = vrot.slane %v4790_v23, 4  ;;  %v4795_v59 = vrot.slane %v4793_v16, 5  ;;  %10528 = vst [vmem:[#allocation22_spill] sm:$0xff] %v9512_v1 }
 0x18f   : > { %v9508_v47 = vrot.slane %v4799_v38, 5  ;;  %v4805_v5 = vrot.slane %v4803_v35, 4  ;;  %v4814_v44 = vshrl.u32 %v4618_v20, 16  ;;  %v4823_v29 = vshll.u32 %v9485_v61, 16 }
 0x190   : > { %v4827_v26 = vshrl.u32 %v9485_v61, 16  ;;  %v4772_v0 = vor.u32 %v4771_v45, %v4768_v56  ;;  %v5459_v23 = vrot.slane %v9468_v21, 5  ;;  %v9525_v38 = vsel %vm8377_vm2, %v5454_v10, %v5455_v8  ;;  %v5358_v45 = vld [vmem:[#allocation2 + $0x6c] sm:$0xe] }
 0x191   : > { %7404 = vmatmul.mubr.bf16.gmra.mxu1 %v10524_v48  ;;  %v9504_v48 = vrot.slane %v4775_v34, 5  ;;  %v9518_v34 = vrot.slane %v4758_v27, 4  ;;  %v9521_v16 = vpop.f32.mrf.mxu0  ;;  %v4796_v1 = vor.u32 %v4795_v59, %v4792_v46  ;;  %v4806_v27 = vor.u32 %v4805_v5, %v9508_v47 }
 0x192   : > { %7407 = vmatprep.mubr.bf16.mxu1 %v10526_v51  ;;  %v4817_v51 = vshll.u32 %v4618_v20, 16  ;;  %10529 = vst [vmem:[#allocation23_spill] sm:$0xff] %v9521_v16  ;;  %v6591_v20 = vrot.slane %v9506_v14, 9  ;;  %v4809_v18 = vshll.u32 %v4617_v49, 16  ;;  %v5466_v21 = vrot.slane %v9485_v61, 5  ;;  %v9539_v14 = vpop.f32.mrf.mxu1 }
 0x193   : > { %7460 = vmatmul.mubr.bf16.gmra.mxu0 %v7701_v13  ;;  %v4782_v35 = vor.u32 %v4781_v24, %v9504_v48  ;;  %v4785_v13 = vshll.u32 %v9472_v6, 16  ;;  %v9532_v56 = vpop.f32.mrf.mxu0  ;;  %v4620_v16 = vld [vmem:[#allocation2 + $0x74] sm:$0x1]  ;;  %v4816_v55 = vrot.slane %v4814_v44, 4  ;;  %v9534_v10 = vrot.slane %v4823_v29, 5  ;;  %10532 = vst [vmem:[#allocation25_spill] sm:$0xff] %v9539_v14 }
 0x194   : > { %7463 = vmatprep.mubr.bf16.mxu0 %v7704_v30  ;;  %v7705_v30 = vld [vmem:[#allocation2 + $0xcc] sm:$0xff]   ;;  %10530 = vst [vmem:[#allocation24_spill] sm:$0xff] %v9532_v56  ;;  %v4819_v8 = vrot.slane %v4817_v51, 5  ;;  %v4829_v24 = vrot.slane %v4827_v26, 4  ;;  %v10531_v6 = vcombine.low %v9172_v37, %v9185_v7  ;;  %v4764_v5 = vsel %vm7908_vm7, %v9518_v34, %v9482_v63  ;;  %v4621_v63 = vld [vmem:[#allocation2 + $0x78] sm:$0xf] }
 0x195   : > { %v4773_v61 = vrot.slane %v4772_v0, 4  ;;  %v5461_v46 = vrot.slane %v5459_v23, 4  ;;  %v5462_v59 = vrot.slane %v4617_v49, 5  ;;  %v10533_v44 = vcombine.low %v9181_v39, %v9192_v25  ;;  %v9548_v29 = vpop.f32.mrf.mxu0  ;;  %v4630_v37 = vld [vmem:[#allocation2 + $0x9c] sm:$0xf] }
 0x196   : > { %10534 = vst [vmem:[#allocation26_spill] sm:$0xff] %v9548_v29  ;;  %v4783_v7 = vrot.slane %v4782_v35, 4  ;;  %v4787_v51 = vrot.slane %v4785_v13, 5  ;;  %v6592_v26 = vrot.slane %v5358_v45, 9  ;;  %v4811_v14 = vrot.slane %v4809_v18, 5  ;;  %v9555_v29 = vpop.f32.mrf.mxu1 }
 0x197   : > { %v5468_v56 = vrot.slane %v5466_v21, 4  ;;  %v5469_v12 = vrot.slane %v4620_v16, 5  ;;  %v9552_v34 = vpop.f32.mrf.mxu0  ;;  %v4807_v49 = vrot.slane %v4806_v27, 4  ;;  %v4820_v0 = vor.u32 %v4819_v8, %v4816_v55  ;;  %10536 = vst [vmem:[#allocation28_spill] sm:$0xff] %v9555_v29 }
 0x198   : > { %10535 = vst [vmem:[#allocation27_spill] sm:$0xff] %v9552_v34  ;;  %v4830_v39 = vor.u32 %v4829_v24, %v9534_v10  ;;  %v4833_v25 = vshll.u32 %v4620_v16, 16  ;;  %v10537_v35 = vcombine.low %v9278_v2, %v9282_v3  ;;  %v9565_v18 = vsel %vm8377_vm2, %v6591_v20, %v5459_v23  ;;  %v9579_v3 = vld [vmem:[#allocation2 + $0x80] sm:$0x1] }
 0x199   : > { %7408 = vmatmul.mubr.bf16.gmra.mxu1 %v10531_v6  ;;  %v4797_v6 = vrot.slane %v4796_v1, 4  ;;  %v4778_v1 = vsel %vm7908_vm7, %v4773_v61, %v9504_v48  ;;  %v9569_v55 = vsel %vm8377_vm2, %v5461_v46, %v5462_v59  ;;  %v9577_v2 = vsel %vm8377_vm2, %v6592_v26, %v5466_v21  ;;  %v5359_v48 = vld [vmem:[#allocation2 + $0x78] sm:$0xe]  ;;  %v9595_v26 = vpop.f32.mrf.mxu1 }
 0x19a   : > { %7411 = vmatprep.mubr.bf16.mxu1 %v10533_v44  ;;  %v4622_v44 = vld [vmem:[#allocation2 + $0x7c] sm:$0xf]  ;;  %v9571_v13 = vpop.f32.mrf.mxu0  ;;  %v4838_v27 = vshrl.u32 %v4621_v63, 16  ;;  %v4841_v23 = vshll.u32 %v4621_v63, 16  ;;  %v9586_v45 = vsel %vm8377_vm2, %v5468_v56, %v5469_v12  ;;  %v4812_v21 = vsel %vm7908_vm7, %v4807_v49, %v4811_v14  ;;  %10539 = vst [vmem:[#allocation29_spill] sm:$0xff] %v9595_v26 }
 0x19b   : > { %7464 = vmatmul.mubr.bf16.gmra.mxu0 %v7705_v30  ;;  %v5473_v16 = vrot.slane %v4622_v44, 5  ;;  %v4788_v30 = vsel %vm7908_vm7, %v4783_v7, %v4787_v51  ;;  %v4802_v20 = vsel %vm7908_vm7, %v4797_v6, %v9508_v47  ;;  %v4847_v8 = vshll.u32 %v4622_v44, 16  ;;  %v4624_v63 = vld [vmem:[#allocation2 + $0x84] sm:$0xf] }
 0x19c   : > { %7531 = vmatprep.mubr.bf16.mxu0 %v10537_v35  ;;  %v4851_v24 = vshrl.u32 %v4622_v44, 16  ;;  %v9588_v61 = vpop.f32.mrf.mxu0  ;;  %v4821_v46 = vrot.slane %v4820_v0, 4  ;;  %v4831_v59 = vrot.slane %v4830_v39, 4  ;;  %v4835_v7 = vrot.slane %v4833_v25, 5 }
 0x19d   : > { %v10538_v51 = vcombine.low %v9199_v22, %v9207_v50  ;;  %v10540_v12 = vsel %vm7908_vm7, %v9492_v19, %v9465_v28  ;;  %v6593_v56 = vrot.slane %v5359_v48, 9  ;;  %v5475_v6 = vrot.slane %v5473_v16, 4  ;;  %v9614_v28 = vld [vmem:[#allocation2 + $0x88] sm:$0xf] }
 0x19e   : > { %v9602_v47 = vcombine.low %v10540_v12, %v4764_v5  ;;  %v5476_v14 = vrot.slane %v9579_v3, 5  ;;  %v10541_v49 = vcombine.low %v9211_v53, %v9221_v4  ;;  %v9608_v22 = vpop.f32.mrf.mxu0  ;;  %v9610_v50 = vcombine.low %v4778_v1, %v4788_v30  ;;  %v4627_v4 = vld [vmem:[#allocation2 + $0x90] sm:$0xf] }
 0x19f   : > { %v4840_v39 = vrot.slane %v4838_v27, 4  ;;  %v4843_v19 = vrot.slane %v4841_v23, 5  ;;  %v9616_v5 = vcombine.low %v4802_v20, %v4812_v21  ;;  %v9620_v44 = vrot.slane %v4847_v8, 5  ;;  %v9632_v20 = vld [vmem:[#allocation2 + $0x94] sm:$0xf]  ;;  %v9634_v8 = vpop.f32.mrf.mxu1 }
 0x1a0   : > { %v4853_v53 = vrot.slane %v4851_v24, 4  ;;  %v10542_v35 = vcombine.low %v9336_v62, %v9357_v57  ;;  %v9625_v1 = vpop.f32.mrf.mxu0  ;;  %v4826_v30 = vsel %vm7908_vm7, %v4821_v46, %v9534_v10  ;;  %v4836_v48 = vsel %vm7908_vm7, %v4831_v59, %v4835_v7  ;;  %10543 = vst [vmem:[#allocation30_spill] sm:$0xff] %v9634_v8  ;;  %v5360_v10 = vld [vmem:[#allocation2 + $0x84] sm:$0xe] }
 0x1a1   : > { %7412 = vmatmul.mubr.bf16.gmra.mxu1 %v10538_v51  ;;  %v4862_v27 = vshrl.u32 %v4624_v63, 16  ;;  %v4865_v23 = vshll.u32 %v4624_v63, 16  ;;  %v10544_v24 = vcombine.low %v9389_v42, %v9399_v60  ;;  %v9641_v62 = vsel %vm8377_vm2, %v6593_v56, %v5473_v16  ;;  %v9652_v42 = vld [vmem:[#allocation2 + $0x8c] sm:$0x1] }
 0x1a2   : > { %7415 = vmatprep.mubr.bf16.mxu1 %v10541_v49  ;;  %v9645_v57 = vsel %vm8377_vm2, %v5475_v6, %v5476_v14  ;;  %v4871_v21 = vshll.u32 %v9614_v28, 16  ;;  %v4875_v46 = vshrl.u32 %v9614_v28, 16  ;;  %v9649_v59 = vpop.f32.mrf.mxu0  ;;  %v4844_v7 = vor.u32 %v4843_v19, %v4840_v39 }
 0x1a3   : > { %7532 = vmatmul.mubr.bf16.vlgmr.msra.gmra.mxu0 %v10542_v35  ;;  %v4857_v51 = vshll.u32 %v9579_v3, 16  ;;  %v4886_v60 = vshrl.u32 %v4627_v4, 16  ;;  %v4889_v12 = vshll.u32 %v4627_v4, 16  ;;  %v9654_v16 = vcombine.low %v4826_v30, %v4836_v48  ;;  %v10548_v4 = vld [vmem:[#allocation8_spill] sm:$0xff] }
 0x1a4   : > { %7535 = vmatprep.mubr.bf16.mxu0 %v10544_v24  ;;  %v4854_v56 = vor.u32 %v4853_v53, %v9620_v44  ;;  %v4895_v6 = vshll.u32 %v9632_v20, 16  ;;  %v4899_v14 = vshrl.u32 %v9632_v20, 16  ;;  %v9659_v63 = vpop.f32.mrf.mxu0  ;;  %v6594_v39 = vrot.slane %v5360_v10, 9  ;;  %v10547_v24 = vld [vmem:[#allocation7_spill] sm:$0xff] }
 0x1a5   : > { %10545 = vst [vmem:[#allocation31_spill] sm:$0xff] %v9654_v16  ;;  %v4864_v19 = vrot.slane %v4862_v27, 4  ;;  %v4867_v3 = vrot.slane %v4865_v23, 5  ;;  %v9663_v35 = vpop.f32.mrf.mxu1  ;;  %v10549_v30 = vcombine.low %v10547_v24, %v10548_v4  ;;  %v5480_v53 = vrot.slane %v9614_v28, 5  ;;  %v9679_v24 = vld [vmem:[#allocation2 + $0xa0] sm:$0xf] }
 0x1a6   : > { %10546 = vst [vmem:[#allocation32_spill] sm:$0xff] %v9663_v35  ;;  %v5483_v48 = vrot.slane %v9652_v42, 5  ;;  %v9670_v25 = vrot.slane %v4871_v21, 5  ;;  %v4877_v0 = vrot.slane %v4875_v46, 4  ;;  %v9673_v49 = vpop.f32.mrf.mxu0  ;;  %v9675_v27 = vrot.slane %v4844_v7, 4 }
 0x1a7   : > { %v9677_v23 = vrot.slane %v4857_v51, 5  ;;  %v4888_v10 = vrot.slane %v4886_v60, 4  ;;  %v4891_v35 = vrot.slane %v4889_v12, 5  ;;  %v9681_v4 = vpop.f32.mrf.mxu1  ;;  %v9683_v28 = vrot.slane %v4854_v56, 4  ;;  %v5361_v46 = vld [vmem:[#allocation2 + $0x90] sm:$0xe] }
 0x1a8   : > { %10550 = vst [vmem:[#allocation7_spill] sm:$0xff] %v9681_v4  ;;  %v4881_v21 = vshll.u32 %v9652_v42, 16  ;;  %v10551_v7 = vcombine.low %v9413_v33, %v9417_v54  ;;  %v9691_v51 = vpop.f32.mrf.mxu0  ;;  %v9695_v60 = vsel %vm8377_vm2, %v6594_v39, %v5480_v53  ;;  %v4868_v12 = vor.u32 %v4867_v3, %v4864_v19  ;;  %v4629_v4 = vld [vmem:[#allocation2 + $0x98] sm:$0x1] }
 0x1a9   : > { %7416 = vmatmul.mubr.bf16.gmra.mxu1 %v10549_v30  ;;  %v9686_v30 = vrot.slane %v4895_v6, 5  ;;  %v4910_v56 = vshrl.u32 %v4630_v37, 16  ;;  %v4913_v8 = vshll.u32 %v4630_v37, 16  ;;  %v9697_v26 = vpop.f32.mrf.mxu1  ;;  %v10553_v42 = vcombine.low %v9457_v43, %v9463_v15 }
 0x1aa   : > { %7483 = vmatprep.mubr.bf16.mxu1 %v9442_v52  ;;  %v4901_v52 = vrot.slane %v4899_v14, 4  ;;  %10552 = vst [vmem:[#allocation8_spill] sm:$0xff] %v9697_v26  ;;  %v4878_v6 = vor.u32 %v4877_v0, %v9670_v25  ;;  %v5487_v33 = vrot.slane %v9632_v20, 5  ;;  %v4919_v54 = vshll.u32 %v9679_v24, 16  ;;  %v9706_v39 = vpop.f32.mrf.mxu0 }
 0x1ab   : > { %7536 = vmatmul.mubr.bf16.gmra.mxu0 %v10551_v7  ;;  %v4923_v14 = vshrl.u32 %v9679_v24, 16  ;;  %10554 = vst [vmem:[#allocation33_spill] sm:$0xff] %v9706_v39  ;;  %v5482_v19 = vrot.slane %v5480_v53, 4  ;;  %v6595_v3 = vrot.slane %v5361_v46, 9  ;;  %v4892_v7 = vor.u32 %v4891_v35, %v4888_v10  ;;  %v9712_v43 = vpop.f32.mrf.mxu1  ;;  %v4632_v39 = vld [vmem:[#allocation2 + $0xa4] sm:$0x1] }
 0x1ac   : > { %7539 = vmatprep.mubr.bf16.mxu0 %v10553_v42  ;;  %10555 = vst [vmem:[#allocation34_spill] sm:$0xff] %v9712_v43  ;;  %v9714_v15 = vrot.slane %v4881_v21, 5  ;;  %v4902_v0 = vor.u32 %v4901_v52, %v9686_v30  ;;  %v4905_v20 = vshll.u32 %v4629_v4, 16  ;;  %v5362_v42 = vld [vmem:[#allocation2 + $0x9c] sm:$0xe]  ;;  %v5494_v26 = vrot.slane %v9679_v24, 5  ;;  %v9718_v29 = vpop.f32.mrf.mxu0 }
 0x1ad   : > { %10556 = vst [vmem:[#allocation35_spill] sm:$0xff] %v9718_v29  ;;  %v4869_v34 = vrot.slane %v4868_v12, 4  ;;  %v5490_v16 = vrot.slane %v4629_v4, 5  ;;  %v4912_v41 = vrot.slane %v4910_v56, 4  ;;  %v4915_v37 = vrot.slane %v4913_v8, 5  ;;  %v9720_v53 = vpop.f32.mrf.mxu1 }
 0x1ae   : > { %v4879_v35 = vrot.slane %v4878_v6, 4  ;;  %v5489_v10 = vrot.slane %v5487_v33, 4  ;;  %v9723_v21 = vrot.slane %v4919_v54, 5  ;;  %v4925_v46 = vrot.slane %v4923_v14, 4  ;;  %v9726_v52 = vpop.f32.mrf.mxu0  ;;  %v4634_v12 = vld [vmem:[#allocation2 + $0xac] sm:$0xf] }
 0x1af   : > { %10557 = vst [vmem:[#allocation36_spill] sm:$0xff] %v9726_v52  ;;  %v4860_v24 = vsel %vm7908_vm7, %v9683_v28, %v9677_v23  ;;  %v9734_v8 = vsel %vm8377_vm2, %v5482_v19, %v5483_v48  ;;  %v4893_v4 = vrot.slane %v4892_v7, 4  ;;  %v1960_v56 = vpop.f32.mrf.mxu1  ;;  %v4903_v6 = vrot.slane %v4902_v0, 4 }
 0x1b0   : > { %v4907_v54 = vrot.slane %v4905_v20, 5  ;;  %v5496_v14 = vrot.slane %v5494_v26, 4  ;;  %v5497_v43 = vrot.slane %v4632_v39, 5  ;;  %v10558_v52 = vcombine.low %v9502_v58, %v9525_v38  ;;  %v9739_v29 = vpop.f32.mrf.mxu0 }
 0x1b1   : > { %7484 = vmatmul.mubr.bf16.vlgmr.msra.gmra.mxu1 %v9444_v31  ;;  %v6596_v31 = vrot.slane %v5362_v42, 9  ;;  %v4874_v48 = vsel %vm7908_vm7, %v4869_v34, %v9670_v25  ;;  %v9746_v23 = vsel %vm8377_vm2, %v6595_v3, %v5487_v33  ;;  %v4916_v28 = vor.u32 %v4915_v37, %v4912_v41  ;;  %v7198_v7 = vpop.f32.mrf.mxu1  ;;  %v4635_v33 = vld [vmem:[#allocation2 + $0xb0] sm:$0x1]  ;;  %v5363_v3 = vld [vmem:[#allocation2 + $0xa8] sm:$0xe] }
 0x1b2   : > { %7487 = vmatprep.mubr.bf16.mxu1 %v9448_v11  ;;  %v4633_v11 = vld [vmem:[#allocation2 + $0xa8] sm:$0xf]  ;;  %v5501_v19 = vrot.slane %v4634_v12, 5  ;;  %v10559_v0 = vcombine.low %v9565_v18, %v9569_v55  ;;  %v4884_v58 = vsel %vm7908_vm7, %v4879_v35, %v9714_v15  ;;  %v9756_v38 = vsel %vm8377_vm2, %v5489_v10, %v5490_v16  ;;  %v9759_v41 = vpop.f32.mrf.mxu0 }
 0x1b3   : > { %7540 = vmatmul.mubr.bf16.gmra.mxu0 %v10558_v52  ;;  %v4926_v34 = vor.u32 %v4925_v46, %v9723_v21  ;;  %v4929_v25 = vshll.u32 %v4632_v39, 16  ;;  %v4898_v18 = vsel %vm7908_vm7, %v4893_v4, %v9686_v30  ;;  %v9766_v55 = vsel %vm8377_vm2, %v6596_v31, %v5494_v26  ;;  %v1963_v20 = vpop.f32.mrf.mxu1 }
 0x1b4   : > { %7543 = vmatprep.mubr.bf16.mxu0 %v10559_v0  ;;  %v4934_v37 = vshrl.u32 %v4633_v11, 16  ;;  %v4937_v15 = vshll.u32 %v4633_v11, 16  ;;  %v4908_v16 = vsel %vm7908_vm7, %v4903_v6, %v4907_v54  ;;  %v9772_v39 = vsel %vm8377_vm2, %v5496_v14, %v5497_v43  ;;  %v9774_v10 = vpop.f32.mrf.mxu0 }
 0x1b5   : > { %v4943_v42 = vshll.u32 %v4634_v12, 16  ;;  %v4947_v35 = vshrl.u32 %v4634_v12, 16  ;;  %v4917_v46 = vrot.slane %v4916_v28, 4  ;;  %v6597_v30 = vrot.slane %v5363_v3, 9  ;;  %v7201_v26 = vpop.f32.mrf.mxu1 }
 0x1b6   : > { %v5503_v52 = vrot.slane %v5501_v19, 4  ;;  %v5504_v4 = vrot.slane %v4635_v33, 5  ;;  %v10560_v31 = vsel %vm7908_vm7, %v9675_v27, %v9620_v44  ;;  %v6626_v43 = vcombine.low %v9695_v60, %v9734_v8  ;;  %v9787_v14 = vpop.f32.mrf.mxu0 }
 0x1b7   : > { %v9782_v6 = vcombine.low %v10560_v31, %v4860_v24  ;;  %v4927_v12 = vrot.slane %v4926_v34, 4  ;;  %v4931_v54 = vrot.slane %v4929_v25, 5  ;;  %v9789_v11 = vcombine.low %v4874_v48, %v4884_v58  ;;  %v1976_v3 = vpop.f32.mrf.mxu1  ;;  %v5364_v25 = vld [vmem:[#allocation2 + $0xb4] sm:$0xe] }
 0x1b8   : > { %v4936_v28 = vrot.slane %v4934_v37, 4  ;;  %v4939_v0 = vrot.slane %v4937_v15, 5  ;;  %v9793_v44 = vcombine.low %v4898_v18, %v4908_v16  ;;  %v9797_v24 = vrot.slane %v4943_v42, 5  ;;  %v9802_v48 = vpop.f32.mrf.mxu0  ;;  %v10562_v16 = vld [vmem:[#allocation9_spill] sm:$0xff] }
 0x1b9   : > { %7488 = vmatmul.mubr.bf16.gmra.mxu1 %v9478_v9  ;;  %v4949_v34 = vrot.slane %v4947_v35, 4  ;;  %v4922_v58 = vsel %vm7908_vm7, %v4917_v46, %v9723_v21  ;;  %v9809_v18 = vsel %vm8377_vm2, %v6597_v30, %v5501_v19  ;;  %v9813_v37 = vsel %vm8377_vm2, %v5503_v52, %v5504_v4  ;;  %v10564_v35 = vld [vmem:[#allocation10_spill] sm:$0xff]  ;;  %v10566_v46 = vld [vmem:[#allocation3_spill] sm:$0xff]  ;;  %v10567_v52 = vld [vmem:[#allocation4_spill] sm:$0xff] }
 0x1ba   : > { %7491 = vmatprep.mubr.bf16.mxu1 %v9602_v47  ;;  %v10561_v47 = vcombine.low %v9577_v2, %v9586_v45  ;;  %v4953_v15 = vshll.u32 %v4635_v33, 16  ;;  %v1969_v42 = vadd.f32 %v9720_v53, %v10562_v16  ;;  %v10563_v2 = vld [vmem:[#allocation6_spill] sm:$0xff]  ;;  %v1972_v31 = vadd.f32 %v7198_v7, %v10564_v35  ;;  %v9826_v33 = vpop.f32.mrf.mxu0  ;;  %v9828_v53 = vld [vmem:[#allocation2 + $0xbc] sm:$0x1] }
 0x1bb   : > { %v1961_v45 = vadd.f32 %v1960_v56, %v10563_v2  ;;  %v10565_v21 = vcombine.low %v9641_v62, %v9645_v57  ;;  %v4932_v19 = vsel %vm7908_vm7, %v4927_v12, %v4931_v54  ;;  %v1964_v30 = vadd.f32 %v1963_v20, %v10566_v46  ;;  %v10568_v16 = vld [vmem:[#allocation11_spill] sm:$0xff]  ;;  %v10569_v2 = vld [vmem:[#allocation13_spill] sm:$0xff] }
 0x1bc   : > { %7544 = vmatmul.mubr.bf16.gmra.mxu0 %v10561_v47  ;;  %v7202_v47 = vpop.f32.mrf.mxu1  ;;  %v1985_v4 = vadd.f32 %v7201_v26, %v10567_v52  ;;  %v4940_v27 = vor.u32 %v4939_v0, %v4936_v28  ;;  %v6598_v56 = vrot.slane %v5364_v25, 9  ;;  %v1977_v7 = vadd.f32 %v1976_v3, %v10568_v16  ;;  %v9835_v12 = vld [vmem:[#allocation2 + $0xb8] sm:$0xf]  ;;  %v9838_v26 = vpop.f32.mrf.mxu0  ;;  %v9893_v16 = vld [vmem:[#allocation2 + $0xc8] sm:$0x1] }
 0x1bd   : > { %7547 = vmatprep.mubr.bf16.mxu0 %v10565_v21  ;;  %v1988_v35 = vadd.f32 %v7202_v47, %v10569_v2  ;;  %v4950_v57 = vor.u32 %v4949_v34, %v9797_v24  ;;  %v9840_v54 = vcombine.low %v4922_v58, %v4932_v19  ;;  %v4955_v28 = vrot.slane %v4953_v15, 5  ;;  %v4636_v47 = vld [vmem:[#allocation2 + $0xb4] sm:$0xf] }
 0x1be   : > { %v1979_v9 = vpop.f32.mrf.mxu1  ;;  %v5508_v0 = vrot.slane %v9835_v12, 5  ;;  %v5511_v25 = vrot.slane %v9828_v53, 5  ;;  %v9846_v21 = vadd.f32 %v9571_v13, %v1969_v42  ;;  %v9849_v34 = vadd.f32 %v9588_v61, %v1961_v45  ;;  %v9856_v58 = vpop.f32.mrf.mxu0  ;;  %v9864_v61 = vld [vmem:[#allocation2 + $0xc4] sm:$0xf] }
 0x1bf   : > { %v1980_v20 = vadd.f32 %v1979_v9, %v9378_v32  ;;  %v9852_v32 = vadd.f32 %v9608_v22, %v1972_v31  ;;  %v4941_v15 = vrot.slane %v4940_v27, 4  ;;  %v9862_v19 = vadd.f32 %v9649_v59, %v1985_v4  ;;  %v10570_v27 = vld [vmem:[#allocation17_spill] sm:$0xff]  ;;  %v5365_v31 = vld [vmem:[#allocation2 + $0xc0] sm:$0xe] }
 0x1c0   : > { %v7205_v3 = vpop.f32.mrf.mxu1  ;;  %v4951_v42 = vrot.slane %v4950_v57, 4  ;;  %v9867_v22 = vadd.f32 %v9659_v63, %v1977_v7  ;;  %v4958_v59 = vshrl.u32 %v4636_v47, 16  ;;  %v5515_v46 = vrot.slane %v9864_v61, 5  ;;  %v4639_v63 = vld [vmem:[#allocation2 + $0xc0] sm:$0xf]  ;;  %v10573_v7 = vld [vmem:[#allocation19_spill] sm:$0xff] }
 0x1c1   : > { %7492 = vmatmul.mubr.bf16.gmra.mxu1 %v9610_v50  ;;  %v2001_v9 = vadd.f32 %v7205_v3, %v9403_v17  ;;  %v9859_v50 = vadd.f32 %v9625_v1, %v1964_v30  ;;  %v9870_v17 = vadd.f32 %v9673_v49, %v1988_v35  ;;  %v9879_v1 = vpop.f32.mrf.mxu0  ;;  %v10571_v30 = vld [vmem:[#allocation33_spill] sm:$0xff]  ;;  %v9890_v4 = vsel %vm8377_vm2, %v6598_v56, %v5508_v0 }
 0x1c2   : > { %7495 = vmatprep.mubr.bf16.mxu1 %v9616_v5  ;;  %v1992_v13 = vpop.f32.mrf.mxu1  ;;  %v9873_v5 = vadd.f32 %v9691_v51, %v1980_v20  ;;  %v10572_v51 = vcombine.low %v9746_v23, %v9756_v38  ;;  %v5510_v60 = vrot.slane %v5508_v0, 4  ;;  %v4961_v8 = vshll.u32 %v4636_v47, 16  ;;  %v10574_v38 = vld [vmem:[#allocation35_spill] sm:$0xff] }
 0x1c3   : > { %v1993_v45 = vadd.f32 %v1992_v13, %v10570_v27  ;;  %v9883_v52 = vadd.f32 %v10571_v30, %v2001_v9  ;;  %v9896_v35 = vpop.f32.mrf.mxu0  ;;  %v4946_v57 = vsel %vm7908_vm7, %v4941_v15, %v9797_v24  ;;  %v4971_v23 = vshrl.u32 %v9835_v12, 16  ;;  %v10575_v13 = vld [vmem:[#allocation21_spill] sm:$0xff]  ;;  %v10576_v24 = vld [vmem:[#allocation36_spill] sm:$0xff] }
 0x1c4   : > { %7548 = vmatmul.mubr.bf16.gmra.mxu0 %v6626_v43  ;;  %v7206_v49 = vpop.f32.mrf.mxu1  ;;  %v4967_v43 = vshll.u32 %v9835_v12, 16  ;;  %v4956_v0 = vsel %vm7908_vm7, %v4951_v42, %v4955_v28  ;;  %v6599_v3 = vrot.slane %v5365_v31, 9  ;;  %v4982_v47 = vshrl.u32 %v4639_v63, 16  ;;  %v10579_v31 = vld [vmem:[#allocation23_spill] sm:$0xff] }
 0x1c5   : > { %7551 = vmatprep.mubr.bf16.mxu0 %v10572_v51  ;;  %v2004_v2 = vadd.f32 %v7206_v49, %v10573_v7  ;;  %v9903_v20 = vadd.f32 %v10574_v38, %v1993_v45  ;;  %v4985_v9 = vshll.u32 %v4639_v63, 16  ;;  %v9908_v30 = vpop.f32.mrf.mxu0  ;;  %v5517_v49 = vrot.slane %v5515_v46, 4  ;;  %v10578_v45 = vld [vmem:[#allocation31_spill] sm:$0xff] }
 0x1c6   : > { %v1995_v56 = vpop.f32.mrf.mxu1  ;;  %v5518_v51 = vrot.slane %v9893_v16, 5  ;;  %v4960_v7 = vrot.slane %v4958_v59, 4  ;;  %v4963_v38 = vrot.slane %v4961_v8, 5  ;;  %v4991_v28 = vshll.u32 %v9864_v61, 16 }
 0x1c7   : > { %v1996_v27 = vadd.f32 %v1995_v56, %v10575_v13  ;;  %v9912_v15 = vadd.f32 %v10576_v24, %v2004_v2  ;;  %v4995_v42 = vshrl.u32 %v9864_v61, 16  ;;  %v9919_v56 = vpop.f32.mrf.mxu0  ;;  %v9921_v13 = vcombine.low %v4946_v57, %v4956_v0 }
 0x1c8   : > { %v7209_v12 = vpop.f32.mrf.mxu1  ;;  %v5512_v2 = vsel %vm8377_vm2, %v5510_v60, %v5511_v25  ;;  %v9928_v8 = vrot.slane %v4967_v43, 5  ;;  %v4984_v62 = vrot.slane %v4982_v47, 4  ;;  %v4987_v61 = vrot.slane %v4985_v9, 5  ;;  %v4643_v60 = vld [vmem:[#allocation2 + $0xd0] sm:$0xf] }
 0x1c9   : > { %10577 = vst [vmem:[#allocation9_spill] sm:$0xff] %v9912_v15  ;;  %7496 = vmatmul.mubr.bf16.gmra.mxu1 %v10578_v45  ;;  %v2017_v63 = vadd.f32 %v7209_v12, %v10579_v31  ;;  %v9926_v24 = vadd.f32 %v9739_v29, %v1996_v27  ;;  %v4973_v45 = vrot.slane %v4971_v23, 4  ;;  %v10580_v15 = vld [vmem:[#allocation24_spill] sm:$0xff]  ;;  %v9934_v57 = vpop.f32.mrf.mxu0  ;;  %v5516_v25 = vsel %vm8377_vm2, %v6599_v3, %v5515_v46  ;;  %v9940_v43 = vld [vmem:[#allocation2 + $0xd4] sm:$0x1] }
 0x1ca   : > { %7499 = vmatprep.mubr.bf16.mxu1 %v9782_v6  ;;  %v2008_v59 = vpop.f32.mrf.mxu1  ;;  %v10581_v6 = vcombine.low %v9766_v55, %v9772_v39  ;;  %v5519_v29 = vsel %vm8377_vm2, %v5517_v49, %v5518_v51  ;;  %v10582_v47 = vcombine.low %v9809_v18, %v9813_v37  ;;  %v6630_v55 = vcombine.low %v9890_v4, %v5512_v2  ;;  %v5366_v46 = vld [vmem:[#allocation2 + $0xcc] sm:$0xe]  ;;  %v10583_v27 = vld [vmem:[#allocation26_spill] sm:$0xff]  ;;  %v10584_v2 = vld [vmem:[#allocation27_spill] sm:$0xff] }
 0x1cb   : > { %v2009_v12 = vadd.f32 %v2008_v59, %v10580_v15  ;;  %v9943_v23 = vadd.f32 %v9759_v41, %v2017_v63  ;;  %v9949_v39 = vrot.slane %v4991_v28, 5  ;;  %v4997_v9 = vrot.slane %v4995_v42, 4  ;;  %v4642_v31 = vld [vmem:[#allocation2 + $0xcc] sm:$0xf] }
 0x1cc   : > { %7552 = vmatmul.mubr.bf16.gmra.mxu0 %v10581_v6  ;;  %v7210_v0 = vpop.f32.mrf.mxu1  ;;  %v5522_v3 = vrot.slane %v4643_v60, 5  ;;  %v9952_v51 = vpop.f32.mrf.mxu0  ;;  %v4964_v15 = vor.u32 %v4963_v38, %v4960_v7  ;;  %v4977_v41 = vshll.u32 %v9828_v53, 16  ;;  %v4974_v37 = vor.u32 %v4973_v45, %v9928_v8 }
 0x1cd   : > { %7555 = vmatprep.mubr.bf16.mxu0 %v10582_v47  ;;  %v2020_v49 = vadd.f32 %v7210_v0, %v10583_v27  ;;  %v9956_v63 = vadd.f32 %v9774_v10, %v2009_v12  ;;  %v6631_v4 = vcombine.low %v5516_v25, %v5519_v29  ;;  %v4988_v28 = vor.u32 %v4987_v61, %v4984_v62  ;;  %v10585_v61 = vld [vmem:[#allocation5_spill] sm:$0xff] }
 0x1ce   : > { %v2011_v18 = vpop.f32.mrf.mxu1  ;;  %v5001_v42 = vshll.u32 %v9893_v16, 16  ;;  %v9961_v6 = vpop.f32.mrf.mxu0  ;;  %v6600_v0 = vrot.slane %v5366_v46, 9  ;;  %v5525_v7 = vrot.slane %v9940_v43, 5  ;;  %v4998_v10 = vor.u32 %v4997_v9, %v9949_v39  ;;  %v10586_v9 = vld [vmem:[#allocation12_spill] sm:$0xff] }
 0x1cf   : > { %v2012_v59 = vadd.f32 %v2011_v18, %v10584_v2  ;;  %v9965_v53 = vadd.f32 %v9787_v14, %v2020_v49  ;;  %v5524_v45 = vrot.slane %v5522_v3, 4  ;;  %v5006_v12 = vshrl.u32 %v4642_v31, 16 }
 0x1d0   : > { %v7213_v38 = vpop.f32.mrf.mxu1  ;;  %v5009_v62 = vshll.u32 %v4642_v31, 16  ;;  %v9971_v25 = vpop.f32.mrf.mxu0  ;;  %v5015_v29 = vshll.u32 %v4643_v60, 16  ;;  %v5019_v47 = vshrl.u32 %v4643_v60, 16  ;;  %v4965_v27 = vrot.slane %v4964_v15, 4 }
 0x1d1   : > { %7500 = vmatmul.mubr.bf16.gmra.mxu1 %v9789_v11  ;;  %v2033_v16 = vadd.f32 %v7213_v38, %v10585_v61  ;;  %v9974_v46 = vadd.f32 %v9802_v48, %v2012_v59  ;;  %v4975_v49 = vrot.slane %v4974_v37, 4  ;;  %v4979_v11 = vrot.slane %v4977_v41, 5 }
 0x1d2   : > { %7503 = vmatprep.mubr.bf16.mxu1 %v9793_v44  ;;  %v2024_v14 = vpop.f32.mrf.mxu1  ;;  %v4989_v18 = vrot.slane %v4988_v28, 4  ;;  %v9977_v31 = vpop.f32.mrf.mxu0  ;;  %v5003_v38 = vrot.slane %v5001_v42, 5  ;;  %v5523_v44 = vsel %vm8377_vm2, %v6600_v0, %v5522_v3  ;;  %v4999_v48 = vrot.slane %v4998_v10, 4  ;;  %v10587_v28 = vld [vmem:[#allocation14_spill] sm:$0xff] }
 0x1d3   : > { %v2025_v2 = vadd.f32 %v2024_v14, %v10586_v9  ;;  %v9982_v61 = vadd.f32 %v9826_v33, %v2033_v16  ;;  %v5526_v15 = vsel %vm8377_vm2, %v5524_v45, %v5525_v7  ;;  %v5008_v41 = vrot.slane %v5006_v12, 4  ;;  %v10588_v33 = vld [vmem:[#allocation15_spill] sm:$0xff]  ;;  %v10589_v16 = vld [vmem:[#allocation16_spill] sm:$0xff] }
 0x1d4   : > { %7556 = vmatmul.mubr.bf16.gmra.mxu0 %v6630_v55  ;;  %v7214_v60 = vpop.f32.mrf.mxu1  ;;  %v5011_v37 = vrot.slane %v5009_v62, 5  ;;  %v5017_v14 = vrot.slane %v5015_v29, 5  ;;  %v5021_v42 = vrot.slane %v5019_v47, 4  ;;  %v6632_v40 = vcombine.low %v5523_v44, %v5526_v15 }
 0x1d5   : > { %7559 = vmatprep.mubr.bf16.mxu0 %v6631_v4  ;;  %v2036_v59 = vadd.f32 %v7214_v60, %v10587_v28  ;;  %v9987_v55 = vpop.f32.mrf.mxu0  ;;  %v9990_v9 = vadd.f32 %v9838_v26, %v2025_v2  ;;  %v4970_v4 = vsel %vm7908_vm7, %v4965_v27, %v9928_v8  ;;  %v4980_v26 = vsel %vm7908_vm7, %v4975_v49, %v4979_v11  ;;  %v10590_v11 = vld [vmem:[#allocation18_spill] sm:$0xff] }
 0x1d6   : > { %v2027_v3 = vpop.f32.mrf.mxu1  ;;  %v4994_v12 = vsel %vm7908_vm7, %v4989_v18, %v9949_v39  ;;  %v5004_v62 = vsel %vm7908_vm7, %v4999_v48, %v5003_v38  ;;  %v5025_v8 = vshll.u32 %v9940_v43, 16  ;;  %v5022_v47 = vor.u32 %v5021_v42, %v5017_v14  ;;  %v10591_v48 = vld [vmem:[#allocation20_spill] sm:$0xff] }
 0x1d7   : > { %v2028_v0 = vadd.f32 %v2027_v3, %v10588_v33  ;;  %v9996_v7 = vpop.f32.mrf.mxu0  ;;  %v9999_v10 = vadd.f32 %v9856_v58, %v2036_v59  ;;  %v5012_v58 = vor.u32 %v5011_v37, %v5008_v41  ;;  %v6574_v43 = vcombine.low %v4970_v4, %v4980_v26  ;;  %v10592_v59 = vld [vmem:[#allocation22_spill] sm:$0xff] }
 0x1d8   : > { %v7217_v45 = vpop.f32.mrf.mxu1  ;;  %v6575_v44 = vcombine.low %v4994_v12, %v5004_v62  ;;  %v5027_v60 = vrot.slane %v5025_v8, 5  ;;  %v5023_v41 = vrot.slane %v5022_v47, 4  ;;  %v10594_v62 = vld [vmem:[#allocation28_spill] sm:$0xff]  ;;  %v10595_v47 = vld [vmem:[#allocation29_spill] sm:$0xff] }
 0x1d9   : > { %7504 = vmatmul.mubr.bf16.gmra.mxu1 %v9840_v54  ;;  %v2049_v29 = vadd.f32 %v7217_v45, %v10589_v16  ;;  %v7274_v27 = vpop.f32.mrf.mxu0  ;;  %v10013_v54 = vadd.f32 %v9879_v1, %v2028_v0  ;;  %v5013_v15 = vrot.slane %v5012_v58, 4  ;;  %v10593_v0 = vld [vmem:[#allocation25_spill] sm:$0xff] }
 0x1da   : > { %7507 = vmatprep.mubr.bf16.mxu1 %v9921_v13  ;;  %v2040_v49 = vpop.f32.mrf.mxu1  ;;  %v5028_v45 = vsel %vm7908_vm7, %v5023_v41, %v5027_v60  ;;  %v10597_v60 = vld [vmem:[#allocation32_spill] sm:$0xff]  ;;  %v10598_v41 = vld [vmem:[#allocation7_spill] sm:$0xff] }
 0x1db   : > { %v2041_v2 = vadd.f32 %v2040_v49, %v10590_v11  ;;  %v2528_v39 = vpop.f32.mrf.mxu0  ;;  %v10017_v18 = vadd.f32 %v9896_v35, %v2049_v29 }
 0x1dc   : > { %7560 = vmatmul.mubr.bf16.gmra.mxu0 %v6632_v40  ;;  %v7218_v38 = vpop.f32.mrf.mxu1  ;;  %v5018_v40 = vsel %vm7908_vm7, %v5013_v15, %v5017_v14 }
 0x1dd   : > { %v2052_v13 = vadd.f32 %v7218_v38, %v10591_v48  ;;  %v7341_v37 = vpop.f32.mrf.mxu0  ;;  %v10021_v1 = vadd.f32 %v9908_v30, %v2041_v2  ;;  %v6576_v58 = vcombine.low %v5018_v40, %v5028_v45  ;;  %v10596_v2 = vld [vmem:[#allocation30_spill] sm:$0xff] }
 0x1de   : > { %v2043_v28 = vpop.f32.mrf.mxu1  ;;  %v10600_v45 = vld [vmem:[#allocation34_spill] sm:$0xff] }
 0x1df   : > { %v2044_v42 = vadd.f32 %v2043_v28, %v10592_v59  ;;  %v3553_v3 = vpop.f32.mrf.mxu0  ;;  %v10025_v33 = vadd.f32 %v9919_v56, %v2052_v13 }
 0x1e1   : > { %v7221_v35 = vpop.f32.mrf.mxu1  ;;  %7508 = vmatmul.mubr.bf16.gmra.mxu1 %v6574_v43  ;;  %v7342_v30 = vpop.f32.mrf.mxu0  ;;  %v10033_v26 = vadd.f32 %v9934_v57, %v2044_v42 }
 0x1e2   : > { %v2065_v4 = vadd.f32 %v7221_v35, %v10593_v0  ;;  %7511 = vmatprep.mubr.bf16.mxu1 %v6575_v44  ;;  %v10599_v35 = vld [vmem:[#allocation8_spill] sm:$0xff] }
 0x1e3   : > { %v2056_v12 = vpop.f32.mrf.mxu1  ;;  %v3556_v56 = vpop.f32.mrf.mxu0 }
 0x1e4   : > { %v2057_v8 = vadd.f32 %v2056_v12, %v10594_v62  ;;  %v10037_v16 = vadd.f32 %v9952_v51, %v2065_v4 }
 0x1e5   : > { %v7222_v29 = vpop.f32.mrf.mxu1  ;;  %v7345_v11 = vpop.f32.mrf.mxu0 }
 0x1e6   : > { %v2068_v49 = vadd.f32 %v7222_v29, %v10595_v47  ;;  %v10041_v14 = vadd.f32 %v9961_v6, %v2057_v8 }
 0x1e7   : > { %v2059_v36 = vpop.f32.mrf.mxu1  ;;  %v3569_v57 = vpop.f32.mrf.mxu0 }
 0x1e8   : > { %v2060_v38 = vadd.f32 %v2059_v36, %v10596_v2  ;;  %v10045_v43 = vadd.f32 %v9971_v25, %v2068_v49 }
 0x1e9   : > { %v7225_v44 = vpop.f32.mrf.mxu1  ;;  %7512 = vmatmul.mubr.bf16.gmra.mxu1 %v6576_v58  ;;  %v7346_v48 = vpop.f32.mrf.mxu0 }
 0x1ea   : > { %v2081_v51 = vadd.f32 %v7225_v44, %v10597_v60  ;;  %v10049_v13 = vadd.f32 %v9977_v31, %v2060_v38 }
 0x1eb   : > { %v2072_v15 = vpop.f32.mrf.mxu1  ;;  %v3572_v6 = vpop.f32.mrf.mxu0 }
 0x1ec   : > { %v2073_v28 = vadd.f32 %v2072_v15, %v10598_v41  ;;  %v10053_v59 = vadd.f32 %v9987_v55, %v2081_v51 }
 0x1ed   : > { %v7226_v42 = vpop.f32.mrf.mxu1  ;;  %v7349_v25 = vpop.f32.mrf.mxu0 }
 0x1ee   : > { %v2084_v0 = vadd.f32 %v7226_v42, %v10599_v35  ;;  %v10057_v4 = vadd.f32 %v9996_v7, %v2073_v28 }
 0x1ef   : > { %v2075_v40 = vpop.f32.mrf.mxu1  ;;  %v3585_v62 = vpop.f32.mrf.mxu0 }
 0x1f0   : > { %v2076_v12 = vadd.f32 %v2075_v40, %v10600_v45  ;;  %v10060_v31 = vadd.f32 %v7274_v27, %v2084_v0 }
 0x1f1   : > { %v7293_v8 = vpop.f32.mrf.mxu1  ;;  %v7350_v58 = vpop.f32.mrf.mxu0 }
 0x1f2   : > { %v2928_v29 = vadd.f32 %v7293_v8, %v9846_v21  ;;  %v10063_v47 = vadd.f32 %v2528_v39, %v2076_v12 }
 0x1f3   : > { %v2799_v55 = vpop.f32.mrf.mxu1  ;;  %v3588_v36 = vpop.f32.mrf.mxu0 }
 0x1f4   : > { %v2926_v49 = vadd.f32 %v2799_v55, %v9849_v34  ;;  %v10066_v2 = vadd.f32 %v7341_v37, %v2928_v29 }
 0x1f5   : > { %v7294_v7 = vpop.f32.mrf.mxu1  ;;  %v7353_v44 = vpop.f32.mrf.mxu0 }
 0x1f6   : > { %v2929_v38 = vadd.f32 %v7294_v7, %v9852_v32  ;;  %v10069_v60 = vadd.f32 %v3553_v3, %v2926_v49  ;;  %v10601_v7 = vld [vmem:[#allocation9_spill] sm:$0xff] }
 0x1f7   : > { %v2802_v27 = vpop.f32.mrf.mxu1  ;;  %v3601_v15 = vpop.f32.mrf.mxu0 }
 0x1f8   : > { %v2927_v51 = vadd.f32 %v2802_v27, %v9859_v50  ;;  %v10072_v21 = vadd.f32 %v7342_v30, %v2929_v38 }
 0x1f9   : > { %v7297_v39 = vpop.f32.mrf.mxu1  ;;  %v7354_v28 = vpop.f32.mrf.mxu0 }
 0x1fa   : > { %v2932_v41 = vadd.f32 %v7297_v39, %v9862_v19  ;;  %v10075_v34 = vadd.f32 %v3556_v56, %v2927_v51 }
 0x1fb   : > { %v2815_v37 = vpop.f32.mrf.mxu1  ;;  %v3604_v35 = vpop.f32.mrf.mxu0 }
 0x1fc   : > { %v2930_v42 = vadd.f32 %v2815_v37, %v9867_v22  ;;  %v10078_v32 = vadd.f32 %v7345_v11, %v2932_v41 }
 0x1fd   : > { %v7298_v3 = vpop.f32.mrf.mxu1  ;;  %v7357_v40 = vpop.f32.mrf.mxu0 }
 0x1fe   : > { %v2933_v0 = vadd.f32 %v7298_v3, %v9870_v17  ;;  %v10081_v50 = vadd.f32 %v3569_v57, %v2930_v42 }
 0x1ff   : > { %v2818_v30 = vpop.f32.mrf.mxu1  ;;  %v3617_v12 = vpop.f32.mrf.mxu0 }
 0x200   : > { %v2931_v45 = vadd.f32 %v2818_v30, %v9873_v5  ;;  %v10084_v19 = vadd.f32 %v7346_v48, %v2933_v0 }
 0x201   : > { %v7301_v56 = vpop.f32.mrf.mxu1  ;;  %v7358_v29 = vpop.f32.mrf.mxu0 }
 0x202   : > { %v2936_v8 = vadd.f32 %v7301_v56, %v9883_v52  ;;  %v10087_v22 = vadd.f32 %v3572_v6, %v2931_v45 }
 0x203   : > { %v2831_v11 = vpop.f32.mrf.mxu1  ;;  %v3620_v49 = vpop.f32.mrf.mxu0 }
 0x204   : > { %v2934_v55 = vadd.f32 %v2831_v11, %v9903_v20  ;;  %v10090_v17 = vadd.f32 %v7349_v25, %v2936_v8 }
 0x205   : > { %v7302_v57 = vpop.f32.mrf.mxu1  ;;  %v7361_v27 = vpop.f32.mrf.mxu0 }
 0x206   : > { %v2937_v38 = vadd.f32 %v7302_v57, %v10601_v7  ;;  %v10093_v5 = vadd.f32 %v3585_v62, %v2934_v55 }
 0x207   : > { %v2834_v48 = vpop.f32.mrf.mxu1  ;;  %v3633_v39 = vpop.f32.mrf.mxu0 }
 0x208   : > { %v2935_v51 = vadd.f32 %v2834_v48, %v9926_v24  ;;  %v10096_v52 = vadd.f32 %v7350_v58, %v2937_v38 }
 0x209   : > { %v7305_v6 = vpop.f32.mrf.mxu1  ;;  %v7362_v37 = vpop.f32.mrf.mxu0 }
 0x20a   : > { %v2940_v41 = vadd.f32 %v7305_v6, %v9943_v23  ;;  %v10099_v20 = vadd.f32 %v3588_v36, %v2935_v51 }
 0x20b   : > { %v2847_v25 = vpop.f32.mrf.mxu1  ;;  %v3636_v3 = vpop.f32.mrf.mxu0 }
 0x20c   : > { %v2938_v42 = vadd.f32 %v2847_v25, %v9956_v63  ;;  %v10102_v0 = vadd.f32 %v7353_v44, %v2940_v41 }
 0x20d   : > { %v7306_v62 = vpop.f32.mrf.mxu1  ;;  %v7365_v45 = vpop.f32.mrf.mxu0 }
 0x20e   : > { %v2941_v30 = vadd.f32 %v7306_v62, %v9965_v53  ;;  %v10105_v24 = vadd.f32 %v3601_v15, %v2938_v42 }
 0x20f   : > { %v2850_v58 = vpop.f32.mrf.mxu1  ;;  %v3649_v8 = vpop.f32.mrf.mxu0 }
 0x210   : > { %v2939_v56 = vadd.f32 %v2850_v58, %v9974_v46  ;;  %v10108_v23 = vadd.f32 %v7354_v28, %v2941_v30 }
 0x211   : > { %v7309_v36 = vpop.f32.mrf.mxu1  ;;  %v7366_v57 = vpop.f32.mrf.mxu0 }
 0x212   : > { %v2944_v11 = vadd.f32 %v7309_v36, %v9982_v61  ;;  %v10111_v55 = vadd.f32 %v3604_v35, %v2939_v56 }
 0x213   : > { %v2863_v63 = vpop.f32.mrf.mxu1  ;;  %v3652_v48 = vpop.f32.mrf.mxu0 }
 0x214   : > { %v2942_v44 = vadd.f32 %v2863_v63, %v9990_v9  ;;  %v10114_v7 = vadd.f32 %v7357_v40, %v2944_v11 }
 0x215   : > { %v7310_v53 = vpop.f32.mrf.mxu1 }
 0x216   : > { %v2945_v15 = vadd.f32 %v7310_v53, %v9999_v10  ;;  %v10117_v38 = vadd.f32 %v3617_v12, %v2942_v44 }
 0x217   : > { %v2866_v46 = vpop.f32.mrf.mxu1 }
 0x218   : > { %v2943_v28 = vadd.f32 %v2866_v46, %v10013_v54  ;;  %v10120_v51 = vadd.f32 %v7358_v29, %v2945_v15 }
 0x219   : > { %v7313_v61 = vpop.f32.mrf.mxu1 }
 0x21a   : > { %v2948_v35 = vadd.f32 %v7313_v61, %v10017_v18  ;;  %v10123_v6 = vadd.f32 %v3620_v49, %v2943_v28 }
 0x21b   : > { %v2879_v9 = vpop.f32.mrf.mxu1  ;;  %v7369_v41 = vpop.f32.mrf.mxu0 }
 0x21c   : > { %v2946_v40 = vadd.f32 %v2879_v9, %v10021_v1  ;;  %v10126_v25 = vadd.f32 %v7361_v27, %v2948_v35 }
 0x21d   : > { %v7314_v10 = vpop.f32.mrf.mxu1  ;;  %v3665_v42 = vpop.f32.mrf.mxu0 }
 0x21e   : > { %v2949_v12 = vadd.f32 %v7314_v10, %v10025_v33  ;;  %v10129_v62 = vadd.f32 %v3633_v39, %v2946_v40 }
 0x21f   : > { %v2882_v54 = vpop.f32.mrf.mxu1  ;;  %v7370_v30 = vpop.f32.mrf.mxu0 }
 0x220   : > { %10602 = vst [vmem:[#allocation6_spill] sm:$0xff] %v10129_v62  ;;  %v2947_v29 = vadd.f32 %v2882_v54, %v10033_v26  ;;  %v10132_v58 = vadd.f32 %v7362_v37, %v2949_v12 }
 0x221   : > { %v7317_v18 = vpop.f32.mrf.mxu1  ;;  %v3668_v56 = vpop.f32.mrf.mxu0 }
 0x222   : > { %10603 = vst [vmem:[#allocation10_spill] sm:$0xff] %v10132_v58  ;;  %v2952_v49 = vadd.f32 %v7317_v18, %v10037_v16  ;;  %v10135_v1 = vadd.f32 %v3636_v3, %v2947_v29 }
 0x223   : > { %v2895_v27 = vpop.f32.mrf.mxu1  ;;  %v7437_v11 = vpop.f32.mrf.mxu0 }
 0x224   : > { %10604 = vst [vmem:[#allocation3_spill] sm:$0xff] %v10135_v1  ;;  %v2950_v36 = vadd.f32 %v2895_v27, %v10041_v14  ;;  %v10138_v33 = vadd.f32 %v7365_v45, %v2952_v49 }
 0x225   : > { %v7318_v39 = vpop.f32.mrf.mxu1  ;;  %v4438_v44 = vpop.f32.mrf.mxu0 }
 0x226   : > { %v2953_v63 = vadd.f32 %v7318_v39, %v10045_v43  ;;  %v10141_v26 = vadd.f32 %v3649_v8, %v2950_v36 }
 0x227   : > { %v2898_v37 = vpop.f32.mrf.mxu1  ;;  %v10144_v15 = vpop.f32.mrf.mxu0 }
 0x228   : > { %10605 = vst [vmem:[#allocation4_spill] sm:$0xff] %v10141_v26  ;;  %v2951_v53 = vadd.f32 %v2898_v37, %v10049_v13  ;;  %v10146_v16 = vadd.f32 %v7366_v57, %v2953_v63 }
 0x229   : > { %v7321_v3 = vpop.f32.mrf.mxu1  ;;  %v10149_v14 = vpop.f32.mrf.mxu0 }
 0x22a   : > { %10606 = vst [vmem:[#allocation11_spill] sm:$0xff] %v10146_v16  ;;  %v2956_v46 = vadd.f32 %v7321_v3, %v10053_v59  ;;  %v10151_v45 = vadd.f32 %v3652_v48, %v2951_v53 }
 0x22b   : > { %v2911_v28 = vpop.f32.mrf.mxu1  ;;  %v7441_v61 = vpop.f32.mrf.mxu0 }
 0x22c   : > { %10607 = vst [vmem:[#allocation13_spill] sm:$0xff] %v10151_v45  ;;  %v2954_v43 = vadd.f32 %v2911_v28, %v10057_v4  ;;  %v10154_v8 = vadd.f32 %v7369_v41, %v2956_v46 }
 0x22d   : > { %v7322_v35 = vpop.f32.mrf.mxu1  ;;  %v10157_v9 = vpop.f32.mrf.mxu0 }
 0x22e   : > { %v2957_v13 = vadd.f32 %v7322_v35, %v10060_v31  ;;  %v10159_v57 = vadd.f32 %v3665_v42, %v2954_v43 }
 0x22f   : > { %v2914_v40 = vpop.f32.mrf.mxu1  ;;  %v10162_v10 = vpop.f32.mrf.mxu0 }
 0x230   : > { %10608 = vst [vmem:[#allocation17_spill] sm:$0xff] %v10159_v57  ;;  %v2955_v59 = vadd.f32 %v2914_v40, %v10063_v47  ;;  %v10164_v48 = vadd.f32 %v7370_v30, %v2957_v13 }
 0x231   : > { %v7389_v12 = vpop.f32.mrf.mxu1  ;;  %v10167_v54 = vpop.f32.mrf.mxu0 }
 0x232   : > { %10609 = vst [vmem:[#allocation33_spill] sm:$0xff] %v10164_v48  ;;  %v4180_v4 = vadd.f32 %v7389_v12, %v10066_v2  ;;  %v10169_v41 = vadd.f32 %v3668_v56, %v2955_v59 }
 0x233   : > { %v4051_v29 = vpop.f32.mrf.mxu1  ;;  %v7445_v18 = vpop.f32.mrf.mxu0 }
 0x234   : > { %10610 = vst [vmem:[#allocation19_spill] sm:$0xff] %v10169_v41  ;;  %v4178_v31 = vadd.f32 %v4051_v29, %v10069_v60  ;;  %v10172_v42 = vadd.f32 %v7437_v11, %v4180_v4 }
 0x235   : > { %v10174_v49 = vpop.f32.mrf.mxu1  ;;  %v10176_v47 = vpop.f32.mrf.mxu0 }
 0x236   : > { %v10178_v27 = vadd.f32 %v4438_v44, %v4178_v31 }
 0x237   : > { %v10180_v30 = vpop.f32.mrf.mxu1  ;;  %v10182_v36 = vpop.f32.mrf.mxu0 }
 0x239   : > { %v7393_v2 = vpop.f32.mrf.mxu1  ;;  %v10185_v39 = vpop.f32.mrf.mxu0 }
 0x23a   : > { %v4184_v56 = vadd.f32 %v7393_v2, %v10078_v32 }
 0x23b   : > { %v10187_v63 = vpop.f32.mrf.mxu1  ;;  %v7449_v60 = vpop.f32.mrf.mxu0 }
 0x23c   : > { %v10189_v11 = vadd.f32 %v7441_v61, %v4184_v56 }
 0x23d   : > { %v10191_v37 = vpop.f32.mrf.mxu1  ;;  %v10193_v53 = vpop.f32.mrf.mxu0 }
 0x23f   : > { %v10195_v44 = vpop.f32.mrf.mxu1  ;;  %v10197_v3 = vpop.f32.mrf.mxu0 }
 0x241   : > { %v7397_v46 = vpop.f32.mrf.mxu1  ;;  %v10200_v43 = vpop.f32.mrf.mxu0 }
 0x242   : > { %v4188_v28 = vadd.f32 %v7397_v46, %v10090_v17 }
 0x243   : > { %v10202_v32 = vpop.f32.mrf.mxu1  ;;  %v7453_v35 = vpop.f32.mrf.mxu0 }
 0x244   : > { %v10204_v13 = vadd.f32 %v7445_v18, %v4188_v28 }
 0x245   : > { %v10206_v61 = vpop.f32.mrf.mxu1  ;;  %v10208_v40 = vpop.f32.mrf.mxu0 }
 0x247   : > { %v10210_v59 = vpop.f32.mrf.mxu1  ;;  %v10212_v12 = vpop.f32.mrf.mxu0 }
 0x248   : > { %10611 = vst [vmem:[#allocation35_spill] sm:$0xff] %v10212_v12 }
 0x249   : > { %v7401_v4 = vpop.f32.mrf.mxu1  ;;  %v10215_v31 = vpop.f32.mrf.mxu0 }
 0x24a   : > { %v4192_v29 = vadd.f32 %v7401_v4, %v10102_v0  ;;  %10612 = vst [vmem:[#allocation21_spill] sm:$0xff] %v10215_v31 }
 0x24b   : > { %v10217_v17 = vpop.f32.mrf.mxu1  ;;  %v7457_v2 = vpop.f32.mrf.mxu0 }
 0x24c   : > { %v10219_v56 = vadd.f32 %v7449_v60, %v4192_v29 }
 0x24d   : > { %v10221_v18 = vpop.f32.mrf.mxu1  ;;  %v10223_v46 = vpop.f32.mrf.mxu0 }
 0x24e   : > { %10613 = vst [vmem:[#allocation36_spill] sm:$0xff] %v10223_v46 }
 0x24f   : > { %v10225_v28 = vpop.f32.mrf.mxu1  ;;  %v10227_v41 = vpop.f32.mrf.mxu0 }
 0x250   : > { %10614 = vst [vmem:[#allocation31_spill] sm:$0xff] %v10227_v41 }
 0x251   : > { %v7405_v48 = vpop.f32.mrf.mxu1  ;;  %v10230_v45 = vpop.f32.mrf.mxu0 }
 0x252   : > { %v4196_v57 = vadd.f32 %v7405_v48, %v10114_v7  ;;  %10615 = vst [vmem:[#allocation23_spill] sm:$0xff] %v10230_v45 }
 0x253   : > { %v10232_v0 = vpop.f32.mrf.mxu1  ;;  %v7461_v4 = vpop.f32.mrf.mxu0 }
 0x254   : > { %v10234_v16 = vadd.f32 %v7453_v35, %v4196_v57 }
 0x255   : > { %v10236_v60 = vpop.f32.mrf.mxu1  ;;  %v10238_v29 = vpop.f32.mrf.mxu0 }
 0x256   : > { %10616 = vst [vmem:[#allocation24_spill] sm:$0xff] %v10234_v16  ;;  %10617 = vst [vmem:[#allocation26_spill] sm:$0xff] %v10238_v29 }
 0x257   : > { %v10240_v26 = vpop.f32.mrf.mxu1  ;;  %v10242_v46 = vpop.f32.mrf.mxu0 }
 0x258   : > { %10618 = vst [vmem:[#allocation27_spill] sm:$0xff] %v10242_v46 }
 0x259   : > { %v7409_v1 = vpop.f32.mrf.mxu1  ;;  %v10245_v31 = vpop.f32.mrf.mxu0 }
 0x25a   : > { %v4200_v41 = vadd.f32 %v7409_v1, %v10126_v25  ;;  %10619 = vst [vmem:[#allocation5_spill] sm:$0xff] %v10245_v31 }
 0x25b   : > { %v10247_v7 = vpop.f32.mrf.mxu1  ;;  %v7465_v48 = vpop.f32.mrf.mxu0 }
 0x25c   : > { %10620 = vst [vmem:[#allocation12_spill] sm:$0xff] %v10247_v7  ;;  %v10249_v45 = vadd.f32 %v7457_v2, %v4200_v41 }
 0x25d   : > { %v10251_v57 = vpop.f32.mrf.mxu1  ;;  %v10253_v35 = vpop.f32.mrf.mxu0 }
 0x25e   : > { %10621 = vst [vmem:[#allocation14_spill] sm:$0xff] %v10249_v45  ;;  %10622 = vst [vmem:[#allocation15_spill] sm:$0xff] %v10251_v57 }
 0x25f   : > { %10623 = vst [vmem:[#allocation16_spill] sm:$0xff] %v10253_v35  ;;  %v10255_v58 = vpop.f32.mrf.mxu1  ;;  %v10257_v29 = vpop.f32.mrf.mxu0 }
 0x260   : > { %10624 = vst [vmem:[#allocation18_spill] sm:$0xff] %v10255_v58  ;;  %10625 = vst [vmem:[#allocation20_spill] sm:$0xff] %v10257_v29 }
 0x261   : > { %v7413_v62 = vpop.f32.mrf.mxu1  ;;  %v10260_v16 = vpop.f32.mrf.mxu0 }
 0x262   : > { %v4204_v46 = vadd.f32 %v7413_v62, %v10138_v33  ;;  %10626 = vst [vmem:[#allocation22_spill] sm:$0xff] %v10260_v16 }
 0x263   : > { %v10262_v25 = vpop.f32.mrf.mxu1  ;;  %v7533_v1 = vpop.f32.mrf.mxu0 }
 0x264   : > { %10627 = vst [vmem:[#allocation25_spill] sm:$0xff] %v10262_v25  ;;  %v10264_v31 = vadd.f32 %v7461_v4, %v4204_v46  ;;  %v4181_v4 = vadd.f32 %v10174_v49, %v10072_v21  ;;  %v4182_v49 = vadd.f32 %v10187_v63, %v10081_v50 }
 0x265   : > { %v10266_v41 = vpop.f32.mrf.mxu1  ;;  %v5690_v2 = vpop.f32.mrf.mxu0 }
 0x266   : > { %10628 = vst [vmem:[#allocation28_spill] sm:$0xff] %v10264_v31  ;;  %10629 = vst [vmem:[#allocation29_spill] sm:$0xff] %v10266_v41  ;;  %v4179_v41 = vadd.f32 %v10180_v30, %v10075_v34  ;;  %v4185_v34 = vadd.f32 %v10191_v37, %v10084_v19  ;;  %v4569_v19 = vadd.f32 %v10157_v9, %v4182_v49 }
 0x267   : > { %v10268_v45 = vpop.f32.mrf.mxu1  ;;  %v7534_v35 = vpop.f32.mrf.mxu0 }
 0x268   : > { %10630 = vst [vmem:[#allocation30_spill] sm:$0xff] %v10268_v45  ;;  %v4566_v12 = vadd.f32 %v10149_v14, %v4179_v41  ;;  %v4572_v37 = vadd.f32 %v10162_v10, %v4185_v34  ;;  %v4189_v34 = vadd.f32 %v10206_v61, %v10096_v52 }
 0x269   : > { %v7417_v57 = vpop.f32.mrf.mxu1  ;;  %v5693_v29 = vpop.f32.mrf.mxu0 }
 0x26a   : > { %v4208_v58 = vadd.f32 %v7417_v57, %v10154_v8 }
 0x26b   : > { %v10271_v7 = vpop.f32.mrf.mxu1  ;;  %v7537_v62 = vpop.f32.mrf.mxu0 }
 0x26c   : > { %10631 = vst [vmem:[#allocation32_spill] sm:$0xff] %v10271_v7  ;;  %v10273_v33 = vadd.f32 %v7465_v48, %v4208_v58  ;;  %v4568_v48 = vadd.f32 %v10144_v15, %v4181_v4 }
 0x26d   : > { %v10275_v16 = vpop.f32.mrf.mxu1  ;;  %v5706_v25 = vpop.f32.mrf.mxu0 }
 0x26e   : > { %10632 = vst [vmem:[#allocation7_spill] sm:$0xff] %v10273_v33  ;;  %10633 = vst [vmem:[#allocation8_spill] sm:$0xff] %v10275_v16 }
 0x26f   : > { %v10277_v46 = vpop.f32.mrf.mxu1  ;;  %v7538_v31 = vpop.f32.mrf.mxu0 }
 0x270   : > { %10634 = vst [vmem:[#allocation34_spill] sm:$0xff] %v10277_v46 }
 0x271   : > { %v7485_v45 = vpop.f32.mrf.mxu1  ;;  %v5709_v8 = vpop.f32.mrf.mxu0 }
 0x272   : > { %v5321_v7 = vadd.f32 %v7485_v45, %v10172_v42 }
 0x273   : > { %v5192_v57 = vpop.f32.mrf.mxu1  ;;  %v10286_v33 = vpop.f32.mrf.mxu0 }
 0x274   : > { %v5319_v58 = vadd.f32 %v5192_v57, %v10178_v27  ;;  %v5819_v45 = vadd.f32 %v7533_v1, %v5321_v7 }
 0x275   : > { %v7486_v16 = vpop.f32.mrf.mxu1  ;;  %v10289_v21 = vpop.f32.mrf.mxu0 }
 0x276   : > { %v5322_v46 = vadd.f32 %v7486_v16, %v4568_v48  ;;  %v5817_v42 = vadd.f32 %v5690_v2, %v5319_v58  ;;  %v4183_v16 = vadd.f32 %v10195_v44, %v10087_v22  ;;  %v4186_v22 = vadd.f32 %v10202_v32, %v10093_v5 }
 0x277   : > { %v5195_v30 = vpop.f32.mrf.mxu1  ;;  %v10295_v4 = vpop.f32.mrf.mxu0 }
 0x278   : > { %v5820_v27 = vadd.f32 %v7534_v35, %v5322_v46  ;;  %v5320_v15 = vadd.f32 %v5195_v30, %v4566_v12  ;;  %v6046_v7 = vmul.f32 %v5817_v42, %v5817_v42  ;;  %v4570_v46 = vadd.f32 %v10167_v54, %v4183_v16 }
 0x279   : > { %v7489_v14 = vpop.f32.mrf.mxu1  ;;  %v10299_v48 = vpop.f32.mrf.mxu0 }
 0x27a   : > { %v6813_v41 = vpack.c.bf16 %v5820_v27, %v5819_v45  ;;  %v5818_v57 = vadd.f32 %v5693_v29, %v5320_v15  ;;  %v5325_v50 = vadd.f32 %v7489_v14, %v10189_v11  ;;  %v6048_v11 = vmul.f32 %v5819_v45, %v5819_v45 }
 0x27b   : > { %v5208_v63 = vpop.f32.mrf.mxu1  ;;  %v6049_v30 = vmul.f32 %v5820_v27, %v5820_v27 }
 0x27c   : > { %6900 = vst [vmem:[%s7786_s25 + $0x8] sm:$0xff] %v6813_v41   ;;  %v6808_v12 = vpack.c.bf16 %v5818_v57, %v5817_v42  ;;  %v6009_v35 = vadd.f32 %v5818_v57, %v5817_v42  ;;  %v6047_v1 = vmul.f32 %v5818_v57, %v5818_v57  ;;  %v10305_v2 = vpop.f32.mrf.mxu0  ;;  %v5323_v44 = vadd.f32 %v5208_v63, %v4569_v19 }
 0x27d   : > { %v7490_v29 = vpop.f32.mrf.mxu1  ;;  %v5823_v42 = vadd.f32 %v7537_v62, %v5325_v50  ;;  %v4573_v19 = vadd.f32 %v10176_v47, %v4186_v22  ;;  %v4190_v22 = vadd.f32 %v10217_v17, %v10105_v24 }
 0x27e   : > { %6809 = vst [vmem:[%s7786_s25] sm:$0xff] %v6808_v12   ;;  %v6010_v9 = vadd.f32 %v6009_v35, %v5819_v45  ;;  %v6078_v58 = vadd.f32 %v6047_v1, %v6046_v7  ;;  %v5326_v49 = vadd.f32 %v7490_v29, %v4572_v37  ;;  %v10311_v10 = vpop.f32.mrf.mxu0  ;;  %v5821_v15 = vadd.f32 %v5706_v25, %v5323_v44 }
 0x27f   : > { %v5211_v14 = vpop.f32.mrf.mxu1  ;;  %v4187_v45 = vadd.f32 %v10210_v59, %v10099_v20  ;;  %v4576_v12 = vadd.f32 %v10182_v36, %v4189_v34 }
 0x280   : > { %v6079_v41 = vadd.f32 %v6078_v58, %v6048_v11  ;;  %v6011_v5 = vadd.f32 %v6010_v9, %v5820_v27  ;;  %v5824_v32 = vadd.f32 %v7538_v31, %v5326_v49  ;;  %v5324_v57 = vadd.f32 %v5211_v14, %v4570_v46  ;;  %v10315_v54 = vpop.f32.mrf.mxu0 }
 0x281   : > { %v7493_v16 = vpop.f32.mrf.mxu1  ;;  %v6050_v37 = vmul.f32 %v5821_v15, %v5821_v15  ;;  %v4574_v29 = vadd.f32 %v10185_v39, %v4187_v45 }
 0x282   : > { %v6012_v63 = vadd.f32 %v6011_v5, %v5821_v15  ;;  %v6080_v52 = vadd.f32 %v6079_v41, %v6049_v30  ;;  %v6823_v61 = vpack.c.bf16 %v5824_v32, %v5823_v42  ;;  %v10320_v62 = vpop.f32.mrf.mxu0  ;;  %v5822_v25 = vadd.f32 %v5709_v8, %v5324_v57 }
 0x283   : > { %v5224_v50 = vpop.f32.mrf.mxu1  ;;  %v5329_v31 = vadd.f32 %v7493_v16, %v10204_v13  ;;  %v4193_v8 = vadd.f32 %v10221_v18, %v10108_v23  ;;  %v6052_v13 = vmul.f32 %v5823_v42, %v5823_v42  ;;  %v6053_v23 = vmul.f32 %v5824_v32, %v5824_v32 }
 0x284   : > { %v6081_v7 = vadd.f32 %v6080_v52, %v6050_v37  ;;  %6902 = vst [vmem:[%s7786_s25 + $0x18] sm:$0xff] %v6823_v61   ;;  %v5327_v27 = vadd.f32 %v5224_v50, %v4573_v19  ;;  %v10325_v20 = vpop.f32.mrf.mxu0  ;;  %v6818_v59 = vpack.c.bf16 %v5822_v25, %v5821_v15  ;;  %v6013_v47 = vadd.f32 %v6012_v63, %v5822_v25 }
 0x285   : > { %v6051_v35 = vmul.f32 %v5822_v25, %v5822_v25  ;;  %v7494_v1 = vpop.f32.mrf.mxu1  ;;  %v5827_v49 = vadd.f32 %v10286_v33, %v5329_v31  ;;  %v4191_v15 = vadd.f32 %v10225_v28, %v10111_v55  ;;  %v4580_v45 = vadd.f32 %v10197_v3, %v4193_v8 }
 0x286   : > { %v5330_v44 = vadd.f32 %v7494_v1, %v4576_v12  ;;  %v10332_v46 = vpop.f32.mrf.mxu0  ;;  %6901 = vst [vmem:[%s7786_s25 + $0x10] sm:$0xff] %v6818_v59   ;;  %v6014_v36 = vadd.f32 %v6013_v47, %v5823_v42  ;;  %v5825_v9 = vadd.f32 %v10289_v21, %v5327_v27  ;;  %v4577_v21 = vadd.f32 %v10193_v53, %v4190_v22 }
 0x287   : > { %v6082_v11 = vadd.f32 %v6081_v7, %v6051_v35  ;;  %v5227_v58 = vpop.f32.mrf.mxu1  ;;  %v4194_v37 = vadd.f32 %v10232_v0, %v10117_v38  ;;  %v4197_v52 = vadd.f32 %v10236_v60, %v10120_v51  ;;  %v4578_v3 = vadd.f32 %v10200_v43, %v4191_v15 }
 0x288   : > { %v5828_v34 = vadd.f32 %v10295_v4, %v5330_v44  ;;  %v5328_v24 = vadd.f32 %v5227_v58, %v4574_v29  ;;  %v10338_v17 = vpop.f32.mrf.mxu0  ;;  %v6015_v39 = vadd.f32 %v6014_v36, %v5824_v32  ;;  %v6054_v4 = vmul.f32 %v5825_v9, %v5825_v9  ;;  %v10636_v58 = vld [vmem:[#allocation24_spill] sm:$0xff] }
 0x289   : > { %v6083_v18 = vadd.f32 %v6082_v11, %v6052_v13  ;;  %v7497_v30 = vpop.f32.mrf.mxu1  ;;  %v6056_v50 = vmul.f32 %v5827_v49, %v5827_v49  ;;  %v4195_v35 = vadd.f32 %v10240_v26, %v10123_v6  ;;  %v10635_v13 = vld [vmem:[#allocation35_spill] sm:$0xff] }
 0x28a   : > { %v6833_v42 = vpack.c.bf16 %v5828_v34, %v5827_v49  ;;  %v5826_v14 = vadd.f32 %v10299_v48, %v5328_v24  ;;  %v10344_v41 = vpop.f32.mrf.mxu0  ;;  %v6016_v33 = vadd.f32 %v6015_v39, %v5825_v9  ;;  %v5333_v19 = vadd.f32 %v7497_v30, %v10219_v56  ;;  %v10639_v39 = vld [vmem:[#allocation10_spill] sm:$0xff]  ;;  %v10640_v30 = vld [vmem:[#allocation15_spill] sm:$0xff] }
 0x28b   : > { %v6084_v5 = vadd.f32 %v6083_v18, %v6053_v23  ;;  %v5240_v57 = vpop.f32.mrf.mxu1  ;;  %v6057_v51 = vmul.f32 %v5828_v34, %v5828_v34  ;;  %v4584_v36 = vadd.f32 %v10635_v13, %v4197_v52  ;;  %v10638_v23 = vld [vmem:[#allocation12_spill] sm:$0xff]  ;;  %v4201_v15 = vadd.f32 %v10640_v30, %v10639_v39  ;;  %v10642_v52 = vld [vmem:[#allocation3_spill] sm:$0xff] }
 0x28c   : > { %6904 = vst [vmem:[%s7786_s25 + $0x28] sm:$0xff] %v6833_v42   ;;  %v6828_v32 = vpack.c.bf16 %v5826_v14, %v5825_v9  ;;  %v6055_v16 = vmul.f32 %v5826_v14, %v5826_v14  ;;  %v5331_v55 = vadd.f32 %v5240_v57, %v4577_v21  ;;  %v10349_v28 = vpop.f32.mrf.mxu0  ;;  %v6017_v63 = vadd.f32 %v6016_v33, %v5826_v14  ;;  %v10641_v14 = vld [vmem:[#allocation21_spill] sm:$0xff] }
 0x28d   : > { %v6085_v48 = vadd.f32 %v6084_v5, %v6054_v4  ;;  %v7498_v53 = vpop.f32.mrf.mxu1  ;;  %v5831_v12 = vadd.f32 %v10305_v2, %v5333_v19  ;;  %v4582_v21 = vadd.f32 %v10641_v14, %v4195_v35  ;;  %v10652_v14 = vld [vmem:[#allocation13_spill] sm:$0xff] }
 0x28e   : > { %6903 = vst [vmem:[%s7786_s25 + $0x20] sm:$0xff] %v6828_v32   ;;  %v5334_v61 = vadd.f32 %v7498_v53, %v4580_v45  ;;  %v10357_v25 = vpop.f32.mrf.mxu0  ;;  %v6018_v56 = vadd.f32 %v6017_v63, %v5827_v49  ;;  %v5829_v31 = vadd.f32 %v10311_v10, %v5331_v55  ;;  %v4581_v10 = vadd.f32 %v10208_v40, %v4194_v37  ;;  %v10637_v40 = vld [vmem:[#allocation6_spill] sm:$0xff] }
 0x28f   : > { %v6086_v7 = vadd.f32 %v6085_v48, %v6055_v16  ;;  %v5243_v27 = vpop.f32.mrf.mxu1  ;;  %v4198_v18 = vadd.f32 %v10638_v23, %v10637_v40  ;;  %v6060_v33 = vmul.f32 %v5831_v12, %v5831_v12 }
 0x290   : > { %v5832_v59 = vadd.f32 %v10315_v54, %v5334_v61  ;;  %v5332_v38 = vadd.f32 %v5243_v27, %v4578_v3  ;;  %v10362_v0 = vpop.f32.mrf.mxu0  ;;  %v6019_v47 = vadd.f32 %v6018_v56, %v5828_v34  ;;  %v6058_v54 = vmul.f32 %v5829_v31, %v5829_v31  ;;  %v10643_v61 = vld [vmem:[#allocation18_spill] sm:$0xff] }
 0x291   : > { %v6087_v60 = vadd.f32 %v6086_v7, %v6056_v50  ;;  %v7501_v43 = vpop.f32.mrf.mxu1  ;;  %v4199_v3 = vadd.f32 %v10643_v61, %v10642_v52 }
 0x292   : > { %v6843_v1 = vpack.c.bf16 %v5832_v59, %v5831_v12  ;;  %v5830_v22 = vadd.f32 %v10320_v62, %v5332_v38  ;;  %v10368_v8 = vpop.f32.mrf.mxu0  ;;  %v6020_v2 = vadd.f32 %v6019_v47, %v5829_v31  ;;  %v5337_v49 = vadd.f32 %v7501_v43, %v10636_v58 }
 0x293   : > { %v6088_v44 = vadd.f32 %v6087_v60, %v6057_v51  ;;  %v5256_v29 = vpop.f32.mrf.mxu1  ;;  %v6061_v55 = vmul.f32 %v5832_v59, %v5832_v59  ;;  %v10646_v60 = vld [vmem:[#allocation14_spill] sm:$0xff] }
 0x294   : > { %6906 = vst [vmem:[%s7786_s25 + $0x38] sm:$0xff] %v6843_v1   ;;  %v6838_v11 = vpack.c.bf16 %v5830_v22, %v5829_v31  ;;  %v6059_v9 = vmul.f32 %v5830_v22, %v5830_v22  ;;  %v5335_v6 = vadd.f32 %v5256_v29, %v4581_v10  ;;  %v6021_v34 = vadd.f32 %v6020_v2, %v5830_v22  ;;  %v10373_v24 = vpop.f32.mrf.mxu0  ;;  %v10648_v2 = vld [vmem:[#allocation25_spill] sm:$0xff] }
 0x295   : > { %v6089_v26 = vadd.f32 %v6088_v44, %v6058_v54  ;;  %v7502_v62 = vpop.f32.mrf.mxu1  ;;  %v5835_v32 = vadd.f32 %v10325_v20, %v5337_v49  ;;  %v10649_v44 = vld [vmem:[#allocation11_spill] sm:$0xff]  ;;  %v10650_v29 = vld [vmem:[#allocation29_spill] sm:$0xff] }
 0x296   : > { %6905 = vst [vmem:[%s7786_s25 + $0x30] sm:$0xff] %v6838_v11   ;;  %v5338_v42 = vadd.f32 %v7502_v62, %v4584_v36  ;;  %v6022_v4 = vadd.f32 %v6021_v34, %v5831_v12  ;;  %v5833_v57 = vadd.f32 %v10332_v46, %v5335_v6  ;;  %v10384_v37 = vpop.f32.mrf.mxu0  ;;  %v10644_v46 = vld [vmem:[#allocation36_spill] sm:$0xff]  ;;  %v10645_v12 = vld [vmem:[#allocation31_spill] sm:$0xff]  ;;  %v4205_v13 = vadd.f32 %v10650_v29, %v10649_v44 }
 0x297   : > { %v6090_v5 = vadd.f32 %v6089_v26, %v6059_v9  ;;  %v5259_v45 = vpop.f32.mrf.mxu1  ;;  %v4585_v7 = vadd.f32 %v10644_v46, %v4198_v18  ;;  %v4588_v38 = vadd.f32 %v10645_v12, %v4201_v15  ;;  %v10651_v11 = vld [vmem:[#allocation23_spill] sm:$0xff]  ;;  %v6064_v58 = vmul.f32 %v5835_v32, %v5835_v32  ;;  %v10658_v46 = vld [vmem:[#allocation32_spill] sm:$0xff]  ;;  %v10661_v12 = vld [vmem:[#allocation5_spill] sm:$0xff] }
 0x298   : > { %v5836_v16 = vadd.f32 %v10338_v17, %v5338_v42  ;;  %v5336_v19 = vadd.f32 %v5259_v45, %v4582_v21  ;;  %v6023_v63 = vadd.f32 %v6022_v4, %v5832_v59  ;;  %v6062_v20 = vmul.f32 %v5833_v57, %v5833_v57  ;;  %v7558_v10 = vpop.f32.mrf.mxu0  ;;  %v10653_v21 = vld [vmem:[#allocation30_spill] sm:$0xff] }
 0x299   : > { %v6091_v48 = vadd.f32 %v6090_v5, %v6060_v33  ;;  %v7505_v53 = vpop.f32.mrf.mxu1  ;;  %v4586_v9 = vadd.f32 %v10651_v11, %v4199_v3  ;;  %v4203_v33 = vadd.f32 %v10653_v21, %v10652_v14 }
 0x29a   : > { %v6853_v50 = vpack.c.bf16 %v5836_v16, %v5835_v32  ;;  %v5834_v56 = vadd.f32 %v10344_v41, %v5336_v19  ;;  %v6024_v31 = vadd.f32 %v6023_v63, %v5833_v57  ;;  %v5341_v47 = vadd.f32 %v7505_v53, %v10646_v60  ;;  %v10647_v41 = vld [vmem:[#allocation4_spill] sm:$0xff]  ;;  %v5789_v42 = vpop.f32.mrf.mxu0  ;;  %v10655_v19 = vld [vmem:[#allocation27_spill] sm:$0xff] }
 0x29b   : > { %v6092_v17 = vadd.f32 %v6091_v48, %v6061_v55  ;;  %v5272_v27 = vpop.f32.mrf.mxu1  ;;  %v4202_v54 = vadd.f32 %v10648_v2, %v10647_v41  ;;  %v6065_v18 = vmul.f32 %v5836_v16, %v5836_v16  ;;  %v4592_v55 = vadd.f32 %v10655_v19, %v4205_v13  ;;  %v10656_v63 = vld [vmem:[#allocation28_spill] sm:$0xff]  ;;  %v10662_v13 = vld [vmem:[#allocation19_spill] sm:$0xff] }
 0x29c   : > { %6908 = vst [vmem:[%s7786_s25 + $0x48] sm:$0xff] %v6853_v50   ;;  %v6848_v59 = vpack.c.bf16 %v5834_v56, %v5833_v57  ;;  %v6063_v51 = vmul.f32 %v5834_v56, %v5834_v56  ;;  %v5339_v43 = vadd.f32 %v5272_v27, %v4585_v7  ;;  %v6025_v1 = vadd.f32 %v6024_v31, %v5834_v56  ;;  %v10654_v57 = vld [vmem:[#allocation26_spill] sm:$0xff]  ;;  %v7561_v56 = vpop.f32.mrf.mxu0  ;;  %v10659_v31 = vld [vmem:[#allocation33_spill] sm:$0xff] }
 0x29d   : > { %v6093_v35 = vadd.f32 %v6092_v17, %v6062_v20  ;;  %v7506_v22 = vpop.f32.mrf.mxu1  ;;  %v5839_v62 = vadd.f32 %v10349_v28, %v5341_v47  ;;  %v10660_v20 = vld [vmem:[#allocation8_spill] sm:$0xff] }
 0x29e   : > { %6907 = vst [vmem:[%s7786_s25 + $0x40] sm:$0xff] %v6848_v59   ;;  %v5342_v36 = vadd.f32 %v7506_v22, %v4588_v38  ;;  %v6026_v49 = vadd.f32 %v6025_v1, %v5835_v32  ;;  %v5837_v26 = vadd.f32 %v10357_v25, %v5339_v43  ;;  %v4589_v25 = vadd.f32 %v10654_v57, %v4202_v54  ;;  %v5802_v29 = vpop.f32.mrf.mxu0 }
 0x29f   : > { %v6094_v6 = vadd.f32 %v6093_v35, %v6063_v51  ;;  %v5275_v34 = vpop.f32.mrf.mxu1  ;;  %v4209_v17 = vadd.f32 %v10660_v20, %v10659_v31  ;;  %v4590_v38 = vadd.f32 %v10661_v12, %v4203_v33  ;;  %v6068_v59 = vmul.f32 %v5839_v62, %v5839_v62 }
 0x2a0   : > { %v5840_v40 = vadd.f32 %v10362_v0, %v5342_v36  ;;  %v5340_v23 = vadd.f32 %v5275_v34, %v4586_v9  ;;  %v6027_v30 = vadd.f32 %v6026_v49, %v5836_v16  ;;  %v6066_v28 = vmul.f32 %v5837_v26, %v5837_v26  ;;  %v10663_v36 = vld [vmem:[#allocation34_spill] sm:$0xff]  ;;  %v10664_v49 = vld [vmem:[#allocation16_spill] sm:$0xff]  ;;  %v7562_v21 = vpop.f32.mrf.mxu0 }
 0x2a1   : > { %v6095_v39 = vadd.f32 %v6094_v6, %v6064_v58  ;;  %v7509_v15 = vpop.f32.mrf.mxu1  ;;  %v4207_v11 = vadd.f32 %v10663_v36, %v10662_v13 }
 0x2a2   : > { %v6863_v4 = vpack.c.bf16 %v5840_v40, %v5839_v62  ;;  %v5838_v5 = vadd.f32 %v10368_v8, %v5340_v23  ;;  %v6028_v45 = vadd.f32 %v6027_v30, %v5837_v26  ;;  %v5345_v53 = vadd.f32 %v7509_v15, %v10656_v63  ;;  %v10657_v8 = vld [vmem:[#allocation17_spill] sm:$0xff] }
 0x2a3   : > { %v6096_v32 = vadd.f32 %v6095_v39, %v6065_v18  ;;  %v5288_v0 = vpop.f32.mrf.mxu1  ;;  %v4206_v7 = vadd.f32 %v10658_v46, %v10657_v8  ;;  %v6069_v41 = vmul.f32 %v5840_v40, %v5840_v40 }
 0x2a4   : > { %6910 = vst [vmem:[%s7786_s25 + $0x58] sm:$0xff] %v6863_v4   ;;  %v6858_v48 = vpack.c.bf16 %v5838_v5, %v5837_v26  ;;  %v6067_v16 = vmul.f32 %v5838_v5, %v5838_v5  ;;  %v5343_v52 = vadd.f32 %v5288_v0, %v4589_v25  ;;  %v6029_v3 = vadd.f32 %v6028_v45, %v5838_v5  ;;  %v10667_v4 = vld [vmem:[#allocation22_spill] sm:$0xff] }
 0x2a5   : > { %v6097_v61 = vadd.f32 %v6096_v32, %v6066_v28  ;;  %v7510_v50 = vpop.f32.mrf.mxu1  ;;  %v5843_v35 = vadd.f32 %v10373_v24, %v5345_v53  ;;  %v4593_v6 = vadd.f32 %v10664_v49, %v4206_v7  ;;  %v4594_v5 = vadd.f32 %v10667_v4, %v4207_v11  ;;  %v5805_v53 = vpop.f32.mrf.mxu0 }
 0x2a6   : > { %6909 = vst [vmem:[%s7786_s25 + $0x50] sm:$0xff] %v6858_v48   ;;  %v5346_v27 = vadd.f32 %v7510_v50, %v4592_v55  ;;  %v6030_v51 = vadd.f32 %v6029_v3, %v5839_v62  ;;  %v5841_v47 = vadd.f32 %v10384_v37, %v5343_v52 }
 0x2a7   : > { %v6098_v60 = vadd.f32 %v6097_v61, %v6067_v16  ;;  %v5291_v43 = vpop.f32.mrf.mxu1  ;;  %v6072_v57 = vmul.f32 %v5843_v35, %v5843_v35 }
 0x2a8   : > { %v5844_v1 = vadd.f32 %v7558_v10, %v5346_v27  ;;  %v5344_v22 = vadd.f32 %v5291_v43, %v4590_v38  ;;  %v6031_v54 = vadd.f32 %v6030_v51, %v5840_v40  ;;  %v6070_v26 = vmul.f32 %v5841_v47, %v5841_v47  ;;  %v10665_v10 = vld [vmem:[#allocation20_spill] sm:$0xff]  ;;  %v10666_v40 = vld [vmem:[#allocation7_spill] sm:$0xff] }
 0x2a9   : > { %v6099_v2 = vadd.f32 %v6098_v60, %v6068_v59  ;;  %v7513_v44 = vpop.f32.mrf.mxu1  ;;  %v4596_v62 = vadd.f32 %v10665_v10, %v4209_v17 }
 0x2aa   : > { %v6873_v9 = vpack.c.bf16 %v5844_v1, %v5843_v35  ;;  %v5842_v58 = vadd.f32 %v5789_v42, %v5344_v22  ;;  %v6032_v37 = vadd.f32 %v6031_v54, %v5841_v47  ;;  %v5349_v39 = vadd.f32 %v7513_v44, %v10666_v40 }
 0x2ab   : > { %v6100_v34 = vadd.f32 %v6099_v2, %v6069_v41  ;;  %v5304_v24 = vpop.f32.mrf.mxu1  ;;  %v6073_v48 = vmul.f32 %v5844_v1, %v5844_v1 }
 0x2ac   : > { %6912 = vst [vmem:[%s7786_s25 + $0x68] sm:$0xff] %v6873_v9   ;;  %v6868_v23 = vpack.c.bf16 %v5842_v58, %v5841_v47  ;;  %v6071_v18 = vmul.f32 %v5842_v58, %v5842_v58  ;;  %v5347_v30 = vadd.f32 %v5304_v24, %v4593_v6  ;;  %v6033_v14 = vadd.f32 %v6032_v37, %v5842_v58 }
 0x2ad   : > { %v6101_v15 = vadd.f32 %v6100_v34, %v6070_v26  ;;  %v7514_v33 = vpop.f32.mrf.mxu1  ;;  %v5847_v0 = vadd.f32 %v7561_v56, %v5349_v39 }
 0x2ae   : > { %6911 = vst [vmem:[%s7786_s25 + $0x60] sm:$0xff] %v6868_v23   ;;  %v5350_v42 = vadd.f32 %v7514_v33, %v4596_v62  ;;  %v6034_v25 = vadd.f32 %v6033_v14, %v5843_v35  ;;  %v5845_v28 = vadd.f32 %v5802_v29, %v5347_v30 }
 0x2af   : > { %v6102_v45 = vadd.f32 %v6101_v15, %v6071_v18  ;;  %v5307_v32 = vpop.f32.mrf.mxu1  ;;  %v6076_v17 = vmul.f32 %v5847_v0, %v5847_v0 }
 0x2b0   : > { %v5848_v19 = vadd.f32 %v7562_v21, %v5350_v42  ;;  %v5348_v55 = vadd.f32 %v5307_v32, %v4594_v5  ;;  %v6035_v63 = vadd.f32 %v6034_v25, %v5844_v1  ;;  %v6074_v50 = vmul.f32 %v5845_v28, %v5845_v28 }
 0x2b1   : > { %v6103_v16 = vadd.f32 %v6102_v45, %v6072_v57 }
 0x2b2   : > { %v6883_v52 = vpack.c.bf16 %v5848_v19, %v5847_v0  ;;  %v5846_v61 = vadd.f32 %v5805_v53, %v5348_v55  ;;  %v6036_v3 = vadd.f32 %v6035_v63, %v5845_v28  ;;  %v6077_v12 = vmul.f32 %v5848_v19, %v5848_v19 }
 0x2b3   : > { %v6104_v8 = vadd.f32 %v6103_v16, %v6073_v48 }
 0x2b4   : > { %6914 = vst [vmem:[%s7786_s25 + $0x78] sm:$0xff] %v6883_v52   ;;  %v6878_v46 = vpack.c.bf16 %v5846_v61, %v5845_v28  ;;  %v6075_v7 = vmul.f32 %v5846_v61, %v5846_v61  ;;  %v6037_v20 = vadd.f32 %v6036_v3, %v5846_v61 }
 0x2b5   : > { %v6105_v31 = vadd.f32 %v6104_v8, %v6074_v50 }
 0x2b6   : > { %6913 = vst [vmem:[%s7786_s25 + $0x70] sm:$0xff] %v6878_v46   ;;  %v6038_v56 = vadd.f32 %v6037_v20, %v5847_v0 }
 0x2b7   : > { %v6106_v27 = vadd.f32 %v6105_v31, %v6075_v7 }
 0x2b8   : > { %v6039_v38 = vadd.f32 %v6038_v56, %v5848_v19 }
 0x2b9   : > { %v6107_v59 = vadd.f32 %v6106_v27, %v6076_v17 }
 0x2ba   : > { %v6040_v51 = vrot.slane %v6039_v38, 4 }
 0x2bb   : > { %v6108_v60 = vadd.f32 %v6107_v59, %v6077_v12 }
 0x2bc   : > { %v6041_v47 = vadd.f32 %v6040_v51, %v6039_v38 }
 0x2bd   : > { %v6109_v43 = vrot.slane %v6108_v60, 4 }
 0x2be   : > { %v6042_v35 = vrot.slane %v6041_v47, 2 }
 0x2bf   : > { %v6110_v1 = vadd.f32 %v6109_v43, %v6108_v60 }
 0x2c0   : > { %v6043_v22 = vadd.f32 %v6042_v35, %v6041_v47 }
 0x2c1   : > { %v6111_v41 = vrot.slane %v6110_v1, 2 }
 0x2c2   : > { %v6044_v2 = vrot.slane %v6043_v22, 1 }
 0x2c3   : > { %v6112_v54 = vadd.f32 %v6111_v41, %v6110_v1 }
 0x2c4   : > { %v6045_v29 = vadd.f32 %v6044_v2, %v6043_v22 }
 0x2c5   : > { %v6113_v44 = vrot.slane %v6112_v54, 1 }
 0x2c7   : > { %v6114_v13 = vadd.f32 %v6113_v44, %v6112_v54 }
 0x2c9   : > { %v6116_v36 = vsel %vm931_vm10, %v6045_v29, %v6114_v13 }
 0x2ca   : > { %6117 = vst [vmem:[%s7791_s28] sm:$0x3] %v6116_v36 }
 0x2cb PF: > { %s15_s15 = sadd.s32 1, %s7742_s15  }
 0x2cc   : > { %p12_p5 = scmp.ge.s32.totalorder %s15_s15, 4  }
 0x2ce   :  { %14 = sbr.rel (!%p12_p5) target bundleno = 1 (0x1), region = 89 }

</bundles_post_ra>
